<compile_context>
chip_gen: v5e
topology: v5e:2x2
jax: 0.10.0
libtpu: 0.0.40
codegen_flags: <defaults>
</compile_context>

<pallas_src>
import jax
import jax.numpy as jnp
from jax.experimental import pallas as pl
from jax.experimental.pallas import tpu as pltpu

F = 128  # every padded dimension (rows: nodes/edges/graphs, and feature lanes)


def _pad2(a, rows, cols):
    r, c = a.shape
    return jnp.pad(a, ((0, rows - r), (0, cols - c)))


# ------------------------------------------------------------------ param prep

def prep_and_flatten_params(params, split_map):
    """Pad weights/biases once (W -> [F,F] bf16, b -> [1,F] f32) and flatten.

    Returns (flat_list, struct) where struct[name] is a list of
    ((w_slot_idx, ...), b_slot_idx) per layer, so the kernel can locate each
    padded tensor positionally in its ref list.  Layer-0 weights are split
    row-wise according to split_map[name] (matching the torch.cat order) so the
    kernel never has to concatenate activations.
    """
    flat = []
    struct = {}
    for name, layers in params.items():
        layer_infos = []
        for li, (W, b) in enumerate(layers):
            if li == 0 and split_map.get(name) is not None:
                parts, ofs = [], 0
                for s in split_map[name]:
                    parts.append(W[ofs:ofs + s])
                    ofs += s
            else:
                parts = [W]
            w_idxs = []
            for Wp in parts:
                w_idxs.append(len(flat))
                flat.append(_pad2(Wp, F, F).astype(jnp.bfloat16))
            b_idx = len(flat)
            flat.append(_pad2(b.reshape(1, -1).astype(jnp.float32), 1, F))
            layer_infos.append((tuple(w_idxs), b_idx))
        struct[name] = layer_infos
    return flat, struct


# ------------------------------------------------------------------ fused kernel

def _make_gnn_kernel(struct, num_mp):
    def kernel(*refs):
        out_ref = refs[-1]
        x_ref, ea_ref, row_g_ref, col_g_ref, col_s_ref, batch_s_ref = refs[:6]
        pref = refs[6:-1]  # parameter refs, in prep_and_flatten_params order

        def mlp(name, parts):
            """Fused Linear stack: sum_i parts[i] @ W0_i + b0, then @W+b chain."""
            layers = struct[name]
            w_idxs, b_idx = layers[0]
            acc = None
            for p, wi in zip(parts, w_idxs):
                t = jnp.dot(p.astype(jnp.bfloat16), pref[wi][...],
                            preferred_element_type=jnp.float32)
                acc = t if acc is None else acc + t
            h = acc + pref[b_idx][...]                      # fp32 bias add
            for w_idxs_l, b_idx_l in layers[1:]:
                h = jnp.dot(h.astype(jnp.bfloat16), pref[w_idxs_l[0]][...],
                            preferred_element_type=jnp.float32) + pref[b_idx_l][...]
            return h

        def gather(vals, idx_col):
            # vals[idx] == onehot(idx) @ vals ; one-hot built in-kernel (exact).
            iota = jax.lax.broadcasted_iota(jnp.int32, (F, F), 1)
            oh = (idx_col == iota).astype(jnp.float32).astype(jnp.bfloat16)
            return jnp.dot(oh, vals.astype(jnp.bfloat16),
                           preferred_element_type=jnp.float32)

        def scatter_add(vals, idx_row):
            # segment-sum: onehot^T @ vals ; padded index entries are -1 -> no match.
            iota = jax.lax.broadcasted_iota(jnp.int32, (F, F), 0)
            oh = (idx_row == iota).astype(jnp.float32).astype(jnp.bfloat16)
            return jnp.dot(oh, vals.astype(jnp.bfloat16),
                           preferred_element_type=jnp.float32)

        x = x_ref[...]
        ea = ea_ref[...]
        row_g = row_g_ref[...]
        col_g = col_g_ref[...]
        col_s = col_s_ref[...]
        batch_s = batch_s_ref[...]

        u = None
        for _ in range(num_mp):            # static unroll; weights are shared
            xr = gather(x, row_g)          # old x[row]
            xc = gather(x, col_g)          # old x[col]
            # EdgeModel: edge_attr = edge_mlp([x[row], x[col], edge_attr])
            ea = mlp("edge_mlp", [xr, xc, ea])
            # NodeModel
            h = mlp("node_mlp_1", [xr, ea])
            agg = scatter_add(h, col_s)                    # segment-sum over col
            x = mlp("node_mlp_2", [x, agg])                # updated node feats
            # GlobalModel (uses UPDATED x and edge_attr)
            xr2 = gather(x, row_g)
            g = mlp("global_mlp_1", [xr2, ea])
            g = scatter_add(g, col_s)                      # over col (dim=num_nodes)
            agg_x = scatter_add(x, batch_s)                # over batch
            agg_g = scatter_add(g, batch_s)
            u = mlp("global_mlp_2", [agg_x, agg_g])

        out_ref[...] = mlp("last_mlp", [u])
    return kernel


# ------------------------------------------------------------------ forward

def gnn_forward(params_flat, struct, x, edge_attr, row, col, batch,
                batch_size, num_outputs, num_mp):
    Nn, _ = x.shape
    Ne, _ = edge_attr.shape

    # One-time padding of activations to (F, F); stay padded inside the kernel.
    x_p = _pad2(x, F, F)
    ea_p = _pad2(edge_attr, F, F)

    # gather-layout indices [F, 1]: padded edges point at node 0 (harmless,
    # their rows never get scattered).
    row_g = _pad2(row.reshape(-1, 1), F, 1)
    col_g = _pad2(col.reshape(-1, 1), F, 1)
    # scatter-layout indices [1, F]: padded entries = -1 -> never match a segment.
    col_s = jnp.full((1, F), -1, jnp.int32).at[0, :Ne].set(col)
    batch_s = jnp.full((1, F), -1, jnp.int32).at[0, :Nn].set(batch)

    out = pl.pallas_call(
        _make_gnn_kernel(struct, num_mp),
        out_shape=jax.ShapeDtypeStruct((F, F), jnp.float32),
        compiler_params=pltpu.CompilerParams(vmem_limit_bytes=64 * 1024 * 1024),
    )(x_p, ea_p, row_g, col_g, col_s, batch_s, *params_flat)
    return out[:batch_size, :num_outputs]


# ------------------------------------------------------------------ main

if __name__ == "__main__":
    key = jax.random.PRNGKey(0)

    # Model hyper-parameters (num_hid_layers = 2, num_mlp_layers = 2)
    E, N, G = 4, 4, 3          # num_edge_feats, num_node_feats, num_global_feats
    H = 32                     # size_hid_layers
    M = 32                     # size_mlp_layers
    num_outputs = 2
    num_mp = 2

    # Graph batch
    B = 2                      # number of graphs (batch_size = grph.y.size(0))
    nodes_per_graph = 8
    edges_per_graph = 16
    Nn = B * nodes_per_graph
    Ne = B * edges_per_graph

    keys = jax.random.split(key, 12)

    def mlp_params(k, dims):
        ks = jax.random.split(k, len(dims) - 1)
        out = []
        for i in range(len(dims) - 1):
            din, dout = dims[i], dims[i + 1]
            std = (2.0 / (din + dout)) ** 0.5          # xavier_normal_
            W = std * jax.random.normal(ks[i], (din, dout), jnp.float32)
            b = jnp.full((dout,), 0.01, jnp.float32)   # bias fill 0.01
            out.append((W, b))
        return out

    params = {
        # EdgeModel:   Lin(E+2N,H) -> Lin(H,H) -> Lin(H,E)
        "edge_mlp":     mlp_params(keys[0], [E + 2 * N, H, H, E]),
        # NodeModel
        "node_mlp_1":   mlp_params(keys[1], [E + N, H, H, H]),
        "node_mlp_2":   mlp_params(keys[2], [H + N, H, H, N]),
        # GlobalModel
        "global_mlp_1": mlp_params(keys[3], [E + N, H, H, H]),
        "global_mlp_2": mlp_params(keys[4], [H + N, H, H, G]),
        # last_mlp:    Lin(G,M) -> Lin(M,M) -> Lin(M,num_outputs)
        "last_mlp":     mlp_params(keys[5], [G, M, M, num_outputs]),
    }

    # Row-splits of layer-0 weights, matching the torch.cat feature order.
    split_map = {
        "edge_mlp":     [N, N, E],   # [x[row], x[col], edge_attr]
        "node_mlp_1":   [N, E],      # [x[row], edge_attr]
        "node_mlp_2":   [N, H],      # [x, aggregated messages]
        "global_mlp_1": [N, E],      # [x[row], edge_attr]
        "global_mlp_2": [N, H],      # [agg(x, batch), agg(msgs, batch)]
        "last_mlp":     None,
    }

    params_flat, struct = prep_and_flatten_params(params, split_map)

    x = jax.random.normal(keys[6], (Nn, N), jnp.float32)
    edge_attr = jax.random.normal(keys[7], (Ne, E), jnp.float32)

    # Random edges, kept within each graph.
    src = jax.random.randint(keys[8], (B, edges_per_graph), 0, nodes_per_graph)
    dst = jax.random.randint(keys[9], (B, edges_per_graph), 0, nodes_per_graph)
    offs = (jnp.arange(B) * nodes_per_graph)[:, None]
    row = (src + offs).reshape(-1).astype(jnp.int32)
    col = (dst + offs).reshape(-1).astype(jnp.int32)
    batch = jnp.repeat(jnp.arange(B, dtype=jnp.int32), nodes_per_graph)

    # Note: the reference creates u = full((B, G), 0.1) but no sub-model reads
    # it, so it is intentionally not computed here (dead work in the reference).

    out = gnn_forward(params_flat, struct, x, edge_attr, row, col, batch,
                      B, num_outputs, num_mp)
    out = jax.block_until_ready(out)
    assert out.shape == (B, num_outputs) and out.dtype == jnp.float32
    print("KERNEL_OK")
</pallas_src>

<mosaic_0001>
module attributes {stable_mosaic.version = 11 : i64} {
  func.func @kernel(%arg0: memref<128x128xf32, #tpu.memory_space<vmem>>, %arg1: memref<128x128xf32, #tpu.memory_space<vmem>>, %arg2: memref<128x1xi32, #tpu.memory_space<vmem>>, %arg3: memref<128x1xi32, #tpu.memory_space<vmem>>, %arg4: memref<1x128xi32, #tpu.memory_space<vmem>>, %arg5: memref<1x128xi32, #tpu.memory_space<vmem>>, %arg6: memref<128x128xbf16, #tpu.memory_space<vmem>>, %arg7: memref<128x128xbf16, #tpu.memory_space<vmem>>, %arg8: memref<128x128xbf16, #tpu.memory_space<vmem>>, %arg9: memref<1x128xf32, #tpu.memory_space<vmem>>, %arg10: memref<128x128xbf16, #tpu.memory_space<vmem>>, %arg11: memref<1x128xf32, #tpu.memory_space<vmem>>, %arg12: memref<128x128xbf16, #tpu.memory_space<vmem>>, %arg13: memref<1x128xf32, #tpu.memory_space<vmem>>, %arg14: memref<128x128xbf16, #tpu.memory_space<vmem>>, %arg15: memref<128x128xbf16, #tpu.memory_space<vmem>>, %arg16: memref<1x128xf32, #tpu.memory_space<vmem>>, %arg17: memref<128x128xbf16, #tpu.memory_space<vmem>>, %arg18: memref<1x128xf32, #tpu.memory_space<vmem>>, %arg19: memref<128x128xbf16, #tpu.memory_space<vmem>>, %arg20: memref<1x128xf32, #tpu.memory_space<vmem>>, %arg21: memref<128x128xbf16, #tpu.memory_space<vmem>>, %arg22: memref<128x128xbf16, #tpu.memory_space<vmem>>, %arg23: memref<1x128xf32, #tpu.memory_space<vmem>>, %arg24: memref<128x128xbf16, #tpu.memory_space<vmem>>, %arg25: memref<1x128xf32, #tpu.memory_space<vmem>>, %arg26: memref<128x128xbf16, #tpu.memory_space<vmem>>, %arg27: memref<1x128xf32, #tpu.memory_space<vmem>>, %arg28: memref<128x128xbf16, #tpu.memory_space<vmem>>, %arg29: memref<128x128xbf16, #tpu.memory_space<vmem>>, %arg30: memref<1x128xf32, #tpu.memory_space<vmem>>, %arg31: memref<128x128xbf16, #tpu.memory_space<vmem>>, %arg32: memref<1x128xf32, #tpu.memory_space<vmem>>, %arg33: memref<128x128xbf16, #tpu.memory_space<vmem>>, %arg34: memref<1x128xf32, #tpu.memory_space<vmem>>, %arg35: memref<128x128xbf16, #tpu.memory_space<vmem>>, %arg36: memref<128x128xbf16, #tpu.memory_space<vmem>>, %arg37: memref<1x128xf32, #tpu.memory_space<vmem>>, %arg38: memref<128x128xbf16, #tpu.memory_space<vmem>>, %arg39: memref<1x128xf32, #tpu.memory_space<vmem>>, %arg40: memref<128x128xbf16, #tpu.memory_space<vmem>>, %arg41: memref<1x128xf32, #tpu.memory_space<vmem>>, %arg42: memref<128x128xbf16, #tpu.memory_space<vmem>>, %arg43: memref<1x128xf32, #tpu.memory_space<vmem>>, %arg44: memref<128x128xbf16, #tpu.memory_space<vmem>>, %arg45: memref<1x128xf32, #tpu.memory_space<vmem>>, %arg46: memref<128x128xbf16, #tpu.memory_space<vmem>>, %arg47: memref<1x128xf32, #tpu.memory_space<vmem>>, %arg48: memref<128x128xf32, #tpu.memory_space<vmem>>) attributes {dimension_semantics = [], scalar_prefetch = 0 : i64, scratch_operands = 0 : i64, tpu.core_type = #tpu.core_type<tc>} {
    %c0 = arith.constant 0 : index
    %c0_0 = arith.constant 0 : index
    %0 = vector.load %arg0[%c0, %c0_0] : memref<128x128xf32, #tpu.memory_space<vmem>>, vector<128x128xf32>
    %c0_1 = arith.constant 0 : index
    %c0_2 = arith.constant 0 : index
    %1 = vector.load %arg1[%c0_1, %c0_2] : memref<128x128xf32, #tpu.memory_space<vmem>>, vector<128x128xf32>
    %c0_3 = arith.constant 0 : index
    %c0_4 = arith.constant 0 : index
    %2 = vector.load %arg2[%c0_3, %c0_4] : memref<128x1xi32, #tpu.memory_space<vmem>>, vector<128x1xi32>
    %c0_5 = arith.constant 0 : index
    %c0_6 = arith.constant 0 : index
    %3 = vector.load %arg3[%c0_5, %c0_6] : memref<128x1xi32, #tpu.memory_space<vmem>>, vector<128x1xi32>
    %c0_7 = arith.constant 0 : index
    %c0_8 = arith.constant 0 : index
    %4 = vector.load %arg4[%c0_7, %c0_8] : memref<1x128xi32, #tpu.memory_space<vmem>>, vector<1x128xi32>
    %c0_9 = arith.constant 0 : index
    %c0_10 = arith.constant 0 : index
    %5 = vector.load %arg5[%c0_9, %c0_10] : memref<1x128xi32, #tpu.memory_space<vmem>>, vector<1x128xi32>
    %6 = tpu.iota {dimensions = array<i32: 1>} : vector<128x128xi32>
    %7 = vector.broadcast %2 : vector<128x1xi32> to vector<128x128xi32>
    %8 = arith.cmpi eq, %7, %6 : vector<128x128xi32>
    %9 = arith.extui %8 : vector<128x128xi1> to vector<128x128xi32>
    %10 = arith.sitofp %9 : vector<128x128xi32> to vector<128x128xf32>
    %11 = arith.truncf %10 : vector<128x128xf32> to vector<128x128xbf16>
    %12 = arith.truncf %0 : vector<128x128xf32> to vector<128x128xbf16>
    %cst = arith.constant dense<0.000000e+00> : vector<128x128xf32>
    %13 = tpu.matmul %11, %12, %cst {dimension_numbers = #tpu.dot_dimension_numbers<[1], [0], [0], [1], [0, 0, 1, 1], [], []>} : vector<128x128xbf16>, vector<128x128xbf16>, vector<128x128xf32> -> vector<128x128xf32>
    %14 = tpu.iota {dimensions = array<i32: 1>} : vector<128x128xi32>
    %15 = vector.broadcast %3 : vector<128x1xi32> to vector<128x128xi32>
    %16 = arith.cmpi eq, %15, %14 : vector<128x128xi32>
    %17 = arith.extui %16 : vector<128x128xi1> to vector<128x128xi32>
    %18 = arith.sitofp %17 : vector<128x128xi32> to vector<128x128xf32>
    %19 = arith.truncf %18 : vector<128x128xf32> to vector<128x128xbf16>
    %20 = arith.truncf %0 : vector<128x128xf32> to vector<128x128xbf16>
    %cst_11 = arith.constant dense<0.000000e+00> : vector<128x128xf32>
    %21 = tpu.matmul %19, %20, %cst_11 {dimension_numbers = #tpu.dot_dimension_numbers<[1], [0], [0], [1], [0, 0, 1, 1], [], []>} : vector<128x128xbf16>, vector<128x128xbf16>, vector<128x128xf32> -> vector<128x128xf32>
    %22 = arith.truncf %13 : vector<128x128xf32> to vector<128x128xbf16>
    %c0_12 = arith.constant 0 : index
    %c0_13 = arith.constant 0 : index
    %23 = vector.load %arg6[%c0_12, %c0_13] : memref<128x128xbf16, #tpu.memory_space<vmem>>, vector<128x128xbf16>
    %cst_14 = arith.constant dense<0.000000e+00> : vector<128x128xf32>
    %24 = tpu.matmul %22, %23, %cst_14 {dimension_numbers = #tpu.dot_dimension_numbers<[1], [0], [0], [1], [0, 0, 1, 1], [], []>} : vector<128x128xbf16>, vector<128x128xbf16>, vector<128x128xf32> -> vector<128x128xf32>
    %25 = arith.truncf %21 : vector<128x128xf32> to vector<128x128xbf16>
    %c0_15 = arith.constant 0 : index
    %c0_16 = arith.constant 0 : index
    %26 = vector.load %arg7[%c0_15, %c0_16] : memref<128x128xbf16, #tpu.memory_space<vmem>>, vector<128x128xbf16>
    %cst_17 = arith.constant dense<0.000000e+00> : vector<128x128xf32>
    %27 = tpu.matmul %25, %26, %cst_17 {dimension_numbers = #tpu.dot_dimension_numbers<[1], [0], [0], [1], [0, 0, 1, 1], [], []>} : vector<128x128xbf16>, vector<128x128xbf16>, vector<128x128xf32> -> vector<128x128xf32>
    %28 = arith.addf %24, %27 : vector<128x128xf32>
    %29 = arith.truncf %1 : vector<128x128xf32> to vector<128x128xbf16>
    %c0_18 = arith.constant 0 : index
    %c0_19 = arith.constant 0 : index
    %30 = vector.load %arg8[%c0_18, %c0_19] : memref<128x128xbf16, #tpu.memory_space<vmem>>, vector<128x128xbf16>
    %cst_20 = arith.constant dense<0.000000e+00> : vector<128x128xf32>
    %31 = tpu.matmul %29, %30, %cst_20 {dimension_numbers = #tpu.dot_dimension_numbers<[1], [0], [0], [1], [0, 0, 1, 1], [], []>} : vector<128x128xbf16>, vector<128x128xbf16>, vector<128x128xf32> -> vector<128x128xf32>
    %32 = arith.addf %28, %31 : vector<128x128xf32>
    %c0_21 = arith.constant 0 : index
    %c0_22 = arith.constant 0 : index
    %33 = vector.load %arg9[%c0_21, %c0_22] : memref<1x128xf32, #tpu.memory_space<vmem>>, vector<1x128xf32>
    %34 = vector.broadcast %33 : vector<1x128xf32> to vector<128x128xf32>
    %35 = arith.addf %32, %34 : vector<128x128xf32>
    %36 = arith.truncf %35 : vector<128x128xf32> to vector<128x128xbf16>
    %c0_23 = arith.constant 0 : index
    %c0_24 = arith.constant 0 : index
    %37 = vector.load %arg10[%c0_23, %c0_24] : memref<128x128xbf16, #tpu.memory_space<vmem>>, vector<128x128xbf16>
    %cst_25 = arith.constant dense<0.000000e+00> : vector<128x128xf32>
    %38 = tpu.matmul %36, %37, %cst_25 {dimension_numbers = #tpu.dot_dimension_numbers<[1], [0], [0], [1], [0, 0, 1, 1], [], []>} : vector<128x128xbf16>, vector<128x128xbf16>, vector<128x128xf32> -> vector<128x128xf32>
    %c0_26 = arith.constant 0 : index
    %c0_27 = arith.constant 0 : index
    %39 = vector.load %arg11[%c0_26, %c0_27] : memref<1x128xf32, #tpu.memory_space<vmem>>, vector<1x128xf32>
    %40 = vector.broadcast %39 : vector<1x128xf32> to vector<128x128xf32>
    %41 = arith.addf %38, %40 : vector<128x128xf32>
    %42 = arith.truncf %41 : vector<128x128xf32> to vector<128x128xbf16>
    %c0_28 = arith.constant 0 : index
    %c0_29 = arith.constant 0 : index
    %43 = vector.load %arg12[%c0_28, %c0_29] : memref<128x128xbf16, #tpu.memory_space<vmem>>, vector<128x128xbf16>
    %cst_30 = arith.constant dense<0.000000e+00> : vector<128x128xf32>
    %44 = tpu.matmul %42, %43, %cst_30 {dimension_numbers = #tpu.dot_dimension_numbers<[1], [0], [0], [1], [0, 0, 1, 1], [], []>} : vector<128x128xbf16>, vector<128x128xbf16>, vector<128x128xf32> -> vector<128x128xf32>
    %c0_31 = arith.constant 0 : index
    %c0_32 = arith.constant 0 : index
    %45 = vector.load %arg13[%c0_31, %c0_32] : memref<1x128xf32, #tpu.memory_space<vmem>>, vector<1x128xf32>
    %46 = vector.broadcast %45 : vector<1x128xf32> to vector<128x128xf32>
    %47 = arith.addf %44, %46 : vector<128x128xf32>
    %48 = arith.truncf %13 : vector<128x128xf32> to vector<128x128xbf16>
    %c0_33 = arith.constant 0 : index
    %c0_34 = arith.constant 0 : index
    %49 = vector.load %arg14[%c0_33, %c0_34] : memref<128x128xbf16, #tpu.memory_space<vmem>>, vector<128x128xbf16>
    %cst_35 = arith.constant dense<0.000000e+00> : vector<128x128xf32>
    %50 = tpu.matmul %48, %49, %cst_35 {dimension_numbers = #tpu.dot_dimension_numbers<[1], [0], [0], [1], [0, 0, 1, 1], [], []>} : vector<128x128xbf16>, vector<128x128xbf16>, vector<128x128xf32> -> vector<128x128xf32>
    %51 = arith.truncf %47 : vector<128x128xf32> to vector<128x128xbf16>
    %c0_36 = arith.constant 0 : index
    %c0_37 = arith.constant 0 : index
    %52 = vector.load %arg15[%c0_36, %c0_37] : memref<128x128xbf16, #tpu.memory_space<vmem>>, vector<128x128xbf16>
    %cst_38 = arith.constant dense<0.000000e+00> : vector<128x128xf32>
    %53 = tpu.matmul %51, %52, %cst_38 {dimension_numbers = #tpu.dot_dimension_numbers<[1], [0], [0], [1], [0, 0, 1, 1], [], []>} : vector<128x128xbf16>, vector<128x128xbf16>, vector<128x128xf32> -> vector<128x128xf32>
    %54 = arith.addf %50, %53 : vector<128x128xf32>
    %c0_39 = arith.constant 0 : index
    %c0_40 = arith.constant 0 : index
    %55 = vector.load %arg16[%c0_39, %c0_40] : memref<1x128xf32, #tpu.memory_space<vmem>>, vector<1x128xf32>
    %56 = vector.broadcast %55 : vector<1x128xf32> to vector<128x128xf32>
    %57 = arith.addf %54, %56 : vector<128x128xf32>
    %58 = arith.truncf %57 : vector<128x128xf32> to vector<128x128xbf16>
    %c0_41 = arith.constant 0 : index
    %c0_42 = arith.constant 0 : index
    %59 = vector.load %arg17[%c0_41, %c0_42] : memref<128x128xbf16, #tpu.memory_space<vmem>>, vector<128x128xbf16>
    %cst_43 = arith.constant dense<0.000000e+00> : vector<128x128xf32>
    %60 = tpu.matmul %58, %59, %cst_43 {dimension_numbers = #tpu.dot_dimension_numbers<[1], [0], [0], [1], [0, 0, 1, 1], [], []>} : vector<128x128xbf16>, vector<128x128xbf16>, vector<128x128xf32> -> vector<128x128xf32>
    %c0_44 = arith.constant 0 : index
    %c0_45 = arith.constant 0 : index
    %61 = vector.load %arg18[%c0_44, %c0_45] : memref<1x128xf32, #tpu.memory_space<vmem>>, vector<1x128xf32>
    %62 = vector.broadcast %61 : vector<1x128xf32> to vector<128x128xf32>
    %63 = arith.addf %60, %62 : vector<128x128xf32>
    %64 = arith.truncf %63 : vector<128x128xf32> to vector<128x128xbf16>
    %c0_46 = arith.constant 0 : index
    %c0_47 = arith.constant 0 : index
    %65 = vector.load %arg19[%c0_46, %c0_47] : memref<128x128xbf16, #tpu.memory_space<vmem>>, vector<128x128xbf16>
    %cst_48 = arith.constant dense<0.000000e+00> : vector<128x128xf32>
    %66 = tpu.matmul %64, %65, %cst_48 {dimension_numbers = #tpu.dot_dimension_numbers<[1], [0], [0], [1], [0, 0, 1, 1], [], []>} : vector<128x128xbf16>, vector<128x128xbf16>, vector<128x128xf32> -> vector<128x128xf32>
    %c0_49 = arith.constant 0 : index
    %c0_50 = arith.constant 0 : index
    %67 = vector.load %arg20[%c0_49, %c0_50] : memref<1x128xf32, #tpu.memory_space<vmem>>, vector<1x128xf32>
    %68 = vector.broadcast %67 : vector<1x128xf32> to vector<128x128xf32>
    %69 = arith.addf %66, %68 : vector<128x128xf32>
    %70 = tpu.iota {dimensions = array<i32: 0>} : vector<128x128xi32>
    %71 = vector.broadcast %4 : vector<1x128xi32> to vector<128x128xi32>
    %72 = arith.cmpi eq, %71, %70 : vector<128x128xi32>
    %73 = arith.extui %72 : vector<128x128xi1> to vector<128x128xi32>
    %74 = arith.sitofp %73 : vector<128x128xi32> to vector<128x128xf32>
    %75 = arith.truncf %74 : vector<128x128xf32> to vector<128x128xbf16>
    %76 = arith.truncf %69 : vector<128x128xf32> to vector<128x128xbf16>
    %cst_51 = arith.constant dense<0.000000e+00> : vector<128x128xf32>
    %77 = tpu.matmul %75, %76, %cst_51 {dimension_numbers = #tpu.dot_dimension_numbers<[1], [0], [0], [1], [0, 0, 1, 1], [], []>} : vector<128x128xbf16>, vector<128x128xbf16>, vector<128x128xf32> -> vector<128x128xf32>
    %78 = arith.truncf %0 : vector<128x128xf32> to vector<128x128xbf16>
    %c0_52 = arith.constant 0 : index
    %c0_53 = arith.constant 0 : index
    %79 = vector.load %arg21[%c0_52, %c0_53] : memref<128x128xbf16, #tpu.memory_space<vmem>>, vector<128x128xbf16>
    %cst_54 = arith.constant dense<0.000000e+00> : vector<128x128xf32>
    %80 = tpu.matmul %78, %79, %cst_54 {dimension_numbers = #tpu.dot_dimension_numbers<[1], [0], [0], [1], [0, 0, 1, 1], [], []>} : vector<128x128xbf16>, vector<128x128xbf16>, vector<128x128xf32> -> vector<128x128xf32>
    %81 = arith.truncf %77 : vector<128x128xf32> to vector<128x128xbf16>
    %c0_55 = arith.constant 0 : index
    %c0_56 = arith.constant 0 : index
    %82 = vector.load %arg22[%c0_55, %c0_56] : memref<128x128xbf16, #tpu.memory_space<vmem>>, vector<128x128xbf16>
    %cst_57 = arith.constant dense<0.000000e+00> : vector<128x128xf32>
    %83 = tpu.matmul %81, %82, %cst_57 {dimension_numbers = #tpu.dot_dimension_numbers<[1], [0], [0], [1], [0, 0, 1, 1], [], []>} : vector<128x128xbf16>, vector<128x128xbf16>, vector<128x128xf32> -> vector<128x128xf32>
    %84 = arith.addf %80, %83 : vector<128x128xf32>
    %c0_58 = arith.constant 0 : index
    %c0_59 = arith.constant 0 : index
    %85 = vector.load %arg23[%c0_58, %c0_59] : memref<1x128xf32, #tpu.memory_space<vmem>>, vector<1x128xf32>
    %86 = vector.broadcast %85 : vector<1x128xf32> to vector<128x128xf32>
    %87 = arith.addf %84, %86 : vector<128x128xf32>
    %88 = arith.truncf %87 : vector<128x128xf32> to vector<128x128xbf16>
    %c0_60 = arith.constant 0 : index
    %c0_61 = arith.constant 0 : index
    %89 = vector.load %arg24[%c0_60, %c0_61] : memref<128x128xbf16, #tpu.memory_space<vmem>>, vector<128x128xbf16>
    %cst_62 = arith.constant dense<0.000000e+00> : vector<128x128xf32>
    %90 = tpu.matmul %88, %89, %cst_62 {dimension_numbers = #tpu.dot_dimension_numbers<[1], [0], [0], [1], [0, 0, 1, 1], [], []>} : vector<128x128xbf16>, vector<128x128xbf16>, vector<128x128xf32> -> vector<128x128xf32>
    %c0_63 = arith.constant 0 : index
    %c0_64 = arith.constant 0 : index
    %91 = vector.load %arg25[%c0_63, %c0_64] : memref<1x128xf32, #tpu.memory_space<vmem>>, vector<1x128xf32>
    %92 = vector.broadcast %91 : vector<1x128xf32> to vector<128x128xf32>
    %93 = arith.addf %90, %92 : vector<128x128xf32>
    %94 = arith.truncf %93 : vector<128x128xf32> to vector<128x128xbf16>
    %c0_65 = arith.constant 0 : index
    %c0_66 = arith.constant 0 : index
    %95 = vector.load %arg26[%c0_65, %c0_66] : memref<128x128xbf16, #tpu.memory_space<vmem>>, vector<128x128xbf16>
    %cst_67 = arith.constant dense<0.000000e+00> : vector<128x128xf32>
    %96 = tpu.matmul %94, %95, %cst_67 {dimension_numbers = #tpu.dot_dimension_numbers<[1], [0], [0], [1], [0, 0, 1, 1], [], []>} : vector<128x128xbf16>, vector<128x128xbf16>, vector<128x128xf32> -> vector<128x128xf32>
    %c0_68 = arith.constant 0 : index
    %c0_69 = arith.constant 0 : index
    %97 = vector.load %arg27[%c0_68, %c0_69] : memref<1x128xf32, #tpu.memory_space<vmem>>, vector<1x128xf32>
    %98 = vector.broadcast %97 : vector<1x128xf32> to vector<128x128xf32>
    %99 = arith.addf %96, %98 : vector<128x128xf32>
    %100 = tpu.iota {dimensions = array<i32: 1>} : vector<128x128xi32>
    %101 = vector.broadcast %2 : vector<128x1xi32> to vector<128x128xi32>
    %102 = arith.cmpi eq, %101, %100 : vector<128x128xi32>
    %103 = arith.extui %102 : vector<128x128xi1> to vector<128x128xi32>
    %104 = arith.sitofp %103 : vector<128x128xi32> to vector<128x128xf32>
    %105 = arith.truncf %104 : vector<128x128xf32> to vector<128x128xbf16>
    %106 = arith.truncf %99 : vector<128x128xf32> to vector<128x128xbf16>
    %cst_70 = arith.constant dense<0.000000e+00> : vector<128x128xf32>
    %107 = tpu.matmul %105, %106, %cst_70 {dimension_numbers = #tpu.dot_dimension_numbers<[1], [0], [0], [1], [0, 0, 1, 1], [], []>} : vector<128x128xbf16>, vector<128x128xbf16>, vector<128x128xf32> -> vector<128x128xf32>
    %108 = tpu.iota {dimensions = array<i32: 1>} : vector<128x128xi32>
    %109 = vector.broadcast %3 : vector<128x1xi32> to vector<128x128xi32>
    %110 = arith.cmpi eq, %109, %108 : vector<128x128xi32>
    %111 = arith.extui %110 : vector<128x128xi1> to vector<128x128xi32>
    %112 = arith.sitofp %111 : vector<128x128xi32> to vector<128x128xf32>
    %113 = arith.truncf %112 : vector<128x128xf32> to vector<128x128xbf16>
    %114 = arith.truncf %99 : vector<128x128xf32> to vector<128x128xbf16>
    %cst_71 = arith.constant dense<0.000000e+00> : vector<128x128xf32>
    %115 = tpu.matmul %113, %114, %cst_71 {dimension_numbers = #tpu.dot_dimension_numbers<[1], [0], [0], [1], [0, 0, 1, 1], [], []>} : vector<128x128xbf16>, vector<128x128xbf16>, vector<128x128xf32> -> vector<128x128xf32>
    %116 = arith.truncf %107 : vector<128x128xf32> to vector<128x128xbf16>
    %c0_72 = arith.constant 0 : index
    %c0_73 = arith.constant 0 : index
    %117 = vector.load %arg6[%c0_72, %c0_73] : memref<128x128xbf16, #tpu.memory_space<vmem>>, vector<128x128xbf16>
    %cst_74 = arith.constant dense<0.000000e+00> : vector<128x128xf32>
    %118 = tpu.matmul %116, %117, %cst_74 {dimension_numbers = #tpu.dot_dimension_numbers<[1], [0], [0], [1], [0, 0, 1, 1], [], []>} : vector<128x128xbf16>, vector<128x128xbf16>, vector<128x128xf32> -> vector<128x128xf32>
    %119 = arith.truncf %115 : vector<128x128xf32> to vector<128x128xbf16>
    %c0_75 = arith.constant 0 : index
    %c0_76 = arith.constant 0 : index
    %120 = vector.load %arg7[%c0_75, %c0_76] : memref<128x128xbf16, #tpu.memory_space<vmem>>, vector<128x128xbf16>
    %cst_77 = arith.constant dense<0.000000e+00> : vector<128x128xf32>
    %121 = tpu.matmul %119, %120, %cst_77 {dimension_numbers = #tpu.dot_dimension_numbers<[1], [0], [0], [1], [0, 0, 1, 1], [], []>} : vector<128x128xbf16>, vector<128x128xbf16>, vector<128x128xf32> -> vector<128x128xf32>
    %122 = arith.addf %118, %121 : vector<128x128xf32>
    %123 = arith.truncf %47 : vector<128x128xf32> to vector<128x128xbf16>
    %c0_78 = arith.constant 0 : index
    %c0_79 = arith.constant 0 : index
    %124 = vector.load %arg8[%c0_78, %c0_79] : memref<128x128xbf16, #tpu.memory_space<vmem>>, vector<128x128xbf16>
    %cst_80 = arith.constant dense<0.000000e+00> : vector<128x128xf32>
    %125 = tpu.matmul %123, %124, %cst_80 {dimension_numbers = #tpu.dot_dimension_numbers<[1], [0], [0], [1], [0, 0, 1, 1], [], []>} : vector<128x128xbf16>, vector<128x128xbf16>, vector<128x128xf32> -> vector<128x128xf32>
    %126 = arith.addf %122, %125 : vector<128x128xf32>
    %c0_81 = arith.constant 0 : index
    %c0_82 = arith.constant 0 : index
    %127 = vector.load %arg9[%c0_81, %c0_82] : memref<1x128xf32, #tpu.memory_space<vmem>>, vector<1x128xf32>
    %128 = vector.broadcast %127 : vector<1x128xf32> to vector<128x128xf32>
    %129 = arith.addf %126, %128 : vector<128x128xf32>
    %130 = arith.truncf %129 : vector<128x128xf32> to vector<128x128xbf16>
    %c0_83 = arith.constant 0 : index
    %c0_84 = arith.constant 0 : index
    %131 = vector.load %arg10[%c0_83, %c0_84] : memref<128x128xbf16, #tpu.memory_space<vmem>>, vector<128x128xbf16>
    %cst_85 = arith.constant dense<0.000000e+00> : vector<128x128xf32>
    %132 = tpu.matmul %130, %131, %cst_85 {dimension_numbers = #tpu.dot_dimension_numbers<[1], [0], [0], [1], [0, 0, 1, 1], [], []>} : vector<128x128xbf16>, vector<128x128xbf16>, vector<128x128xf32> -> vector<128x128xf32>
    %c0_86 = arith.constant 0 : index
    %c0_87 = arith.constant 0 : index
    %133 = vector.load %arg11[%c0_86, %c0_87] : memref<1x128xf32, #tpu.memory_space<vmem>>, vector<1x128xf32>
    %134 = vector.broadcast %133 : vector<1x128xf32> to vector<128x128xf32>
    %135 = arith.addf %132, %134 : vector<128x128xf32>
    %136 = arith.truncf %135 : vector<128x128xf32> to vector<128x128xbf16>
    %c0_88 = arith.constant 0 : index
    %c0_89 = arith.constant 0 : index
    %137 = vector.load %arg12[%c0_88, %c0_89] : memref<128x128xbf16, #tpu.memory_space<vmem>>, vector<128x128xbf16>
    %cst_90 = arith.constant dense<0.000000e+00> : vector<128x128xf32>
    %138 = tpu.matmul %136, %137, %cst_90 {dimension_numbers = #tpu.dot_dimension_numbers<[1], [0], [0], [1], [0, 0, 1, 1], [], []>} : vector<128x128xbf16>, vector<128x128xbf16>, vector<128x128xf32> -> vector<128x128xf32>
    %c0_91 = arith.constant 0 : index
    %c0_92 = arith.constant 0 : index
    %139 = vector.load %arg13[%c0_91, %c0_92] : memref<1x128xf32, #tpu.memory_space<vmem>>, vector<1x128xf32>
    %140 = vector.broadcast %139 : vector<1x128xf32> to vector<128x128xf32>
    %141 = arith.addf %138, %140 : vector<128x128xf32>
    %142 = arith.truncf %107 : vector<128x128xf32> to vector<128x128xbf16>
    %c0_93 = arith.constant 0 : index
    %c0_94 = arith.constant 0 : index
    %143 = vector.load %arg14[%c0_93, %c0_94] : memref<128x128xbf16, #tpu.memory_space<vmem>>, vector<128x128xbf16>
    %cst_95 = arith.constant dense<0.000000e+00> : vector<128x128xf32>
    %144 = tpu.matmul %142, %143, %cst_95 {dimension_numbers = #tpu.dot_dimension_numbers<[1], [0], [0], [1], [0, 0, 1, 1], [], []>} : vector<128x128xbf16>, vector<128x128xbf16>, vector<128x128xf32> -> vector<128x128xf32>
    %145 = arith.truncf %141 : vector<128x128xf32> to vector<128x128xbf16>
    %c0_96 = arith.constant 0 : index
    %c0_97 = arith.constant 0 : index
    %146 = vector.load %arg15[%c0_96, %c0_97] : memref<128x128xbf16, #tpu.memory_space<vmem>>, vector<128x128xbf16>
    %cst_98 = arith.constant dense<0.000000e+00> : vector<128x128xf32>
    %147 = tpu.matmul %145, %146, %cst_98 {dimension_numbers = #tpu.dot_dimension_numbers<[1], [0], [0], [1], [0, 0, 1, 1], [], []>} : vector<128x128xbf16>, vector<128x128xbf16>, vector<128x128xf32> -> vector<128x128xf32>
    %148 = arith.addf %144, %147 : vector<128x128xf32>
    %c0_99 = arith.constant 0 : index
    %c0_100 = arith.constant 0 : index
    %149 = vector.load %arg16[%c0_99, %c0_100] : memref<1x128xf32, #tpu.memory_space<vmem>>, vector<1x128xf32>
    %150 = vector.broadcast %149 : vector<1x128xf32> to vector<128x128xf32>
    %151 = arith.addf %148, %150 : vector<128x128xf32>
    %152 = arith.truncf %151 : vector<128x128xf32> to vector<128x128xbf16>
    %c0_101 = arith.constant 0 : index
    %c0_102 = arith.constant 0 : index
    %153 = vector.load %arg17[%c0_101, %c0_102] : memref<128x128xbf16, #tpu.memory_space<vmem>>, vector<128x128xbf16>
    %cst_103 = arith.constant dense<0.000000e+00> : vector<128x128xf32>
    %154 = tpu.matmul %152, %153, %cst_103 {dimension_numbers = #tpu.dot_dimension_numbers<[1], [0], [0], [1], [0, 0, 1, 1], [], []>} : vector<128x128xbf16>, vector<128x128xbf16>, vector<128x128xf32> -> vector<128x128xf32>
    %c0_104 = arith.constant 0 : index
    %c0_105 = arith.constant 0 : index
    %155 = vector.load %arg18[%c0_104, %c0_105] : memref<1x128xf32, #tpu.memory_space<vmem>>, vector<1x128xf32>
    %156 = vector.broadcast %155 : vector<1x128xf32> to vector<128x128xf32>
    %157 = arith.addf %154, %156 : vector<128x128xf32>
    %158 = arith.truncf %157 : vector<128x128xf32> to vector<128x128xbf16>
    %c0_106 = arith.constant 0 : index
    %c0_107 = arith.constant 0 : index
    %159 = vector.load %arg19[%c0_106, %c0_107] : memref<128x128xbf16, #tpu.memory_space<vmem>>, vector<128x128xbf16>
    %cst_108 = arith.constant dense<0.000000e+00> : vector<128x128xf32>
    %160 = tpu.matmul %158, %159, %cst_108 {dimension_numbers = #tpu.dot_dimension_numbers<[1], [0], [0], [1], [0, 0, 1, 1], [], []>} : vector<128x128xbf16>, vector<128x128xbf16>, vector<128x128xf32> -> vector<128x128xf32>
    %c0_109 = arith.constant 0 : index
    %c0_110 = arith.constant 0 : index
    %161 = vector.load %arg20[%c0_109, %c0_110] : memref<1x128xf32, #tpu.memory_space<vmem>>, vector<1x128xf32>
    %162 = vector.broadcast %161 : vector<1x128xf32> to vector<128x128xf32>
    %163 = arith.addf %160, %162 : vector<128x128xf32>
    %164 = tpu.iota {dimensions = array<i32: 0>} : vector<128x128xi32>
    %165 = vector.broadcast %4 : vector<1x128xi32> to vector<128x128xi32>
    %166 = arith.cmpi eq, %165, %164 : vector<128x128xi32>
    %167 = arith.extui %166 : vector<128x128xi1> to vector<128x128xi32>
    %168 = arith.sitofp %167 : vector<128x128xi32> to vector<128x128xf32>
    %169 = arith.truncf %168 : vector<128x128xf32> to vector<128x128xbf16>
    %170 = arith.truncf %163 : vector<128x128xf32> to vector<128x128xbf16>
    %cst_111 = arith.constant dense<0.000000e+00> : vector<128x128xf32>
    %171 = tpu.matmul %169, %170, %cst_111 {dimension_numbers = #tpu.dot_dimension_numbers<[1], [0], [0], [1], [0, 0, 1, 1], [], []>} : vector<128x128xbf16>, vector<128x128xbf16>, vector<128x128xf32> -> vector<128x128xf32>
    %172 = arith.truncf %99 : vector<128x128xf32> to vector<128x128xbf16>
    %c0_112 = arith.constant 0 : index
    %c0_113 = arith.constant 0 : index
    %173 = vector.load %arg21[%c0_112, %c0_113] : memref<128x128xbf16, #tpu.memory_space<vmem>>, vector<128x128xbf16>
    %cst_114 = arith.constant dense<0.000000e+00> : vector<128x128xf32>
    %174 = tpu.matmul %172, %173, %cst_114 {dimension_numbers = #tpu.dot_dimension_numbers<[1], [0], [0], [1], [0, 0, 1, 1], [], []>} : vector<128x128xbf16>, vector<128x128xbf16>, vector<128x128xf32> -> vector<128x128xf32>
    %175 = arith.truncf %171 : vector<128x128xf32> to vector<128x128xbf16>
    %c0_115 = arith.constant 0 : index
    %c0_116 = arith.constant 0 : index
    %176 = vector.load %arg22[%c0_115, %c0_116] : memref<128x128xbf16, #tpu.memory_space<vmem>>, vector<128x128xbf16>
    %cst_117 = arith.constant dense<0.000000e+00> : vector<128x128xf32>
    %177 = tpu.matmul %175, %176, %cst_117 {dimension_numbers = #tpu.dot_dimension_numbers<[1], [0], [0], [1], [0, 0, 1, 1], [], []>} : vector<128x128xbf16>, vector<128x128xbf16>, vector<128x128xf32> -> vector<128x128xf32>
    %178 = arith.addf %174, %177 : vector<128x128xf32>
    %c0_118 = arith.constant 0 : index
    %c0_119 = arith.constant 0 : index
    %179 = vector.load %arg23[%c0_118, %c0_119] : memref<1x128xf32, #tpu.memory_space<vmem>>, vector<1x128xf32>
    %180 = vector.broadcast %179 : vector<1x128xf32> to vector<128x128xf32>
    %181 = arith.addf %178, %180 : vector<128x128xf32>
    %182 = arith.truncf %181 : vector<128x128xf32> to vector<128x128xbf16>
    %c0_120 = arith.constant 0 : index
    %c0_121 = arith.constant 0 : index
    %183 = vector.load %arg24[%c0_120, %c0_121] : memref<128x128xbf16, #tpu.memory_space<vmem>>, vector<128x128xbf16>
    %cst_122 = arith.constant dense<0.000000e+00> : vector<128x128xf32>
    %184 = tpu.matmul %182, %183, %cst_122 {dimension_numbers = #tpu.dot_dimension_numbers<[1], [0], [0], [1], [0, 0, 1, 1], [], []>} : vector<128x128xbf16>, vector<128x128xbf16>, vector<128x128xf32> -> vector<128x128xf32>
    %c0_123 = arith.constant 0 : index
    %c0_124 = arith.constant 0 : index
    %185 = vector.load %arg25[%c0_123, %c0_124] : memref<1x128xf32, #tpu.memory_space<vmem>>, vector<1x128xf32>
    %186 = vector.broadcast %185 : vector<1x128xf32> to vector<128x128xf32>
    %187 = arith.addf %184, %186 : vector<128x128xf32>
    %188 = arith.truncf %187 : vector<128x128xf32> to vector<128x128xbf16>
    %c0_125 = arith.constant 0 : index
    %c0_126 = arith.constant 0 : index
    %189 = vector.load %arg26[%c0_125, %c0_126] : memref<128x128xbf16, #tpu.memory_space<vmem>>, vector<128x128xbf16>
    %cst_127 = arith.constant dense<0.000000e+00> : vector<128x128xf32>
    %190 = tpu.matmul %188, %189, %cst_127 {dimension_numbers = #tpu.dot_dimension_numbers<[1], [0], [0], [1], [0, 0, 1, 1], [], []>} : vector<128x128xbf16>, vector<128x128xbf16>, vector<128x128xf32> -> vector<128x128xf32>
    %c0_128 = arith.constant 0 : index
    %c0_129 = arith.constant 0 : index
    %191 = vector.load %arg27[%c0_128, %c0_129] : memref<1x128xf32, #tpu.memory_space<vmem>>, vector<1x128xf32>
    %192 = vector.broadcast %191 : vector<1x128xf32> to vector<128x128xf32>
    %193 = arith.addf %190, %192 : vector<128x128xf32>
    %194 = tpu.iota {dimensions = array<i32: 1>} : vector<128x128xi32>
    %195 = vector.broadcast %2 : vector<128x1xi32> to vector<128x128xi32>
    %196 = arith.cmpi eq, %195, %194 : vector<128x128xi32>
    %197 = arith.extui %196 : vector<128x128xi1> to vector<128x128xi32>
    %198 = arith.sitofp %197 : vector<128x128xi32> to vector<128x128xf32>
    %199 = arith.truncf %198 : vector<128x128xf32> to vector<128x128xbf16>
    %200 = arith.truncf %193 : vector<128x128xf32> to vector<128x128xbf16>
    %cst_130 = arith.constant dense<0.000000e+00> : vector<128x128xf32>
    %201 = tpu.matmul %199, %200, %cst_130 {dimension_numbers = #tpu.dot_dimension_numbers<[1], [0], [0], [1], [0, 0, 1, 1], [], []>} : vector<128x128xbf16>, vector<128x128xbf16>, vector<128x128xf32> -> vector<128x128xf32>
    %202 = arith.truncf %201 : vector<128x128xf32> to vector<128x128xbf16>
    %c0_131 = arith.constant 0 : index
    %c0_132 = arith.constant 0 : index
    %203 = vector.load %arg28[%c0_131, %c0_132] : memref<128x128xbf16, #tpu.memory_space<vmem>>, vector<128x128xbf16>
    %cst_133 = arith.constant dense<0.000000e+00> : vector<128x128xf32>
    %204 = tpu.matmul %202, %203, %cst_133 {dimension_numbers = #tpu.dot_dimension_numbers<[1], [0], [0], [1], [0, 0, 1, 1], [], []>} : vector<128x128xbf16>, vector<128x128xbf16>, vector<128x128xf32> -> vector<128x128xf32>
    %205 = arith.truncf %141 : vector<128x128xf32> to vector<128x128xbf16>
    %c0_134 = arith.constant 0 : index
    %c0_135 = arith.constant 0 : index
    %206 = vector.load %arg29[%c0_134, %c0_135] : memref<128x128xbf16, #tpu.memory_space<vmem>>, vector<128x128xbf16>
    %cst_136 = arith.constant dense<0.000000e+00> : vector<128x128xf32>
    %207 = tpu.matmul %205, %206, %cst_136 {dimension_numbers = #tpu.dot_dimension_numbers<[1], [0], [0], [1], [0, 0, 1, 1], [], []>} : vector<128x128xbf16>, vector<128x128xbf16>, vector<128x128xf32> -> vector<128x128xf32>
    %208 = arith.addf %204, %207 : vector<128x128xf32>
    %c0_137 = arith.constant 0 : index
    %c0_138 = arith.constant 0 : index
    %209 = vector.load %arg30[%c0_137, %c0_138] : memref<1x128xf32, #tpu.memory_space<vmem>>, vector<1x128xf32>
    %210 = vector.broadcast %209 : vector<1x128xf32> to vector<128x128xf32>
    %211 = arith.addf %208, %210 : vector<128x128xf32>
    %212 = arith.truncf %211 : vector<128x128xf32> to vector<128x128xbf16>
    %c0_139 = arith.constant 0 : index
    %c0_140 = arith.constant 0 : index
    %213 = vector.load %arg31[%c0_139, %c0_140] : memref<128x128xbf16, #tpu.memory_space<vmem>>, vector<128x128xbf16>
    %cst_141 = arith.constant dense<0.000000e+00> : vector<128x128xf32>
    %214 = tpu.matmul %212, %213, %cst_141 {dimension_numbers = #tpu.dot_dimension_numbers<[1], [0], [0], [1], [0, 0, 1, 1], [], []>} : vector<128x128xbf16>, vector<128x128xbf16>, vector<128x128xf32> -> vector<128x128xf32>
    %c0_142 = arith.constant 0 : index
    %c0_143 = arith.constant 0 : index
    %215 = vector.load %arg32[%c0_142, %c0_143] : memref<1x128xf32, #tpu.memory_space<vmem>>, vector<1x128xf32>
    %216 = vector.broadcast %215 : vector<1x128xf32> to vector<128x128xf32>
    %217 = arith.addf %214, %216 : vector<128x128xf32>
    %218 = arith.truncf %217 : vector<128x128xf32> to vector<128x128xbf16>
    %c0_144 = arith.constant 0 : index
    %c0_145 = arith.constant 0 : index
    %219 = vector.load %arg33[%c0_144, %c0_145] : memref<128x128xbf16, #tpu.memory_space<vmem>>, vector<128x128xbf16>
    %cst_146 = arith.constant dense<0.000000e+00> : vector<128x128xf32>
    %220 = tpu.matmul %218, %219, %cst_146 {dimension_numbers = #tpu.dot_dimension_numbers<[1], [0], [0], [1], [0, 0, 1, 1], [], []>} : vector<128x128xbf16>, vector<128x128xbf16>, vector<128x128xf32> -> vector<128x128xf32>
    %c0_147 = arith.constant 0 : index
    %c0_148 = arith.constant 0 : index
    %221 = vector.load %arg34[%c0_147, %c0_148] : memref<1x128xf32, #tpu.memory_space<vmem>>, vector<1x128xf32>
    %222 = vector.broadcast %221 : vector<1x128xf32> to vector<128x128xf32>
    %223 = arith.addf %220, %222 : vector<128x128xf32>
    %224 = tpu.iota {dimensions = array<i32: 0>} : vector<128x128xi32>
    %225 = vector.broadcast %4 : vector<1x128xi32> to vector<128x128xi32>
    %226 = arith.cmpi eq, %225, %224 : vector<128x128xi32>
    %227 = arith.extui %226 : vector<128x128xi1> to vector<128x128xi32>
    %228 = arith.sitofp %227 : vector<128x128xi32> to vector<128x128xf32>
    %229 = arith.truncf %228 : vector<128x128xf32> to vector<128x128xbf16>
    %230 = arith.truncf %223 : vector<128x128xf32> to vector<128x128xbf16>
    %cst_149 = arith.constant dense<0.000000e+00> : vector<128x128xf32>
    %231 = tpu.matmul %229, %230, %cst_149 {dimension_numbers = #tpu.dot_dimension_numbers<[1], [0], [0], [1], [0, 0, 1, 1], [], []>} : vector<128x128xbf16>, vector<128x128xbf16>, vector<128x128xf32> -> vector<128x128xf32>
    %232 = tpu.iota {dimensions = array<i32: 0>} : vector<128x128xi32>
    %233 = vector.broadcast %5 : vector<1x128xi32> to vector<128x128xi32>
    %234 = arith.cmpi eq, %233, %232 : vector<128x128xi32>
    %235 = arith.extui %234 : vector<128x128xi1> to vector<128x128xi32>
    %236 = arith.sitofp %235 : vector<128x128xi32> to vector<128x128xf32>
    %237 = arith.truncf %236 : vector<128x128xf32> to vector<128x128xbf16>
    %238 = arith.truncf %193 : vector<128x128xf32> to vector<128x128xbf16>
    %cst_150 = arith.constant dense<0.000000e+00> : vector<128x128xf32>
    %239 = tpu.matmul %237, %238, %cst_150 {dimension_numbers = #tpu.dot_dimension_numbers<[1], [0], [0], [1], [0, 0, 1, 1], [], []>} : vector<128x128xbf16>, vector<128x128xbf16>, vector<128x128xf32> -> vector<128x128xf32>
    %240 = tpu.iota {dimensions = array<i32: 0>} : vector<128x128xi32>
    %241 = vector.broadcast %5 : vector<1x128xi32> to vector<128x128xi32>
    %242 = arith.cmpi eq, %241, %240 : vector<128x128xi32>
    %243 = arith.extui %242 : vector<128x128xi1> to vector<128x128xi32>
    %244 = arith.sitofp %243 : vector<128x128xi32> to vector<128x128xf32>
    %245 = arith.truncf %244 : vector<128x128xf32> to vector<128x128xbf16>
    %246 = arith.truncf %231 : vector<128x128xf32> to vector<128x128xbf16>
    %cst_151 = arith.constant dense<0.000000e+00> : vector<128x128xf32>
    %247 = tpu.matmul %245, %246, %cst_151 {dimension_numbers = #tpu.dot_dimension_numbers<[1], [0], [0], [1], [0, 0, 1, 1], [], []>} : vector<128x128xbf16>, vector<128x128xbf16>, vector<128x128xf32> -> vector<128x128xf32>
    %248 = arith.truncf %239 : vector<128x128xf32> to vector<128x128xbf16>
    %c0_152 = arith.constant 0 : index
    %c0_153 = arith.constant 0 : index
    %249 = vector.load %arg35[%c0_152, %c0_153] : memref<128x128xbf16, #tpu.memory_space<vmem>>, vector<128x128xbf16>
    %cst_154 = arith.constant dense<0.000000e+00> : vector<128x128xf32>
    %250 = tpu.matmul %248, %249, %cst_154 {dimension_numbers = #tpu.dot_dimension_numbers<[1], [0], [0], [1], [0, 0, 1, 1], [], []>} : vector<128x128xbf16>, vector<128x128xbf16>, vector<128x128xf32> -> vector<128x128xf32>
    %251 = arith.truncf %247 : vector<128x128xf32> to vector<128x128xbf16>
    %c0_155 = arith.constant 0 : index
    %c0_156 = arith.constant 0 : index
    %252 = vector.load %arg36[%c0_155, %c0_156] : memref<128x128xbf16, #tpu.memory_space<vmem>>, vector<128x128xbf16>
    %cst_157 = arith.constant dense<0.000000e+00> : vector<128x128xf32>
    %253 = tpu.matmul %251, %252, %cst_157 {dimension_numbers = #tpu.dot_dimension_numbers<[1], [0], [0], [1], [0, 0, 1, 1], [], []>} : vector<128x128xbf16>, vector<128x128xbf16>, vector<128x128xf32> -> vector<128x128xf32>
    %254 = arith.addf %250, %253 : vector<128x128xf32>
    %c0_158 = arith.constant 0 : index
    %c0_159 = arith.constant 0 : index
    %255 = vector.load %arg37[%c0_158, %c0_159] : memref<1x128xf32, #tpu.memory_space<vmem>>, vector<1x128xf32>
    %256 = vector.broadcast %255 : vector<1x128xf32> to vector<128x128xf32>
    %257 = arith.addf %254, %256 : vector<128x128xf32>
    %258 = arith.truncf %257 : vector<128x128xf32> to vector<128x128xbf16>
    %c0_160 = arith.constant 0 : index
    %c0_161 = arith.constant 0 : index
    %259 = vector.load %arg38[%c0_160, %c0_161] : memref<128x128xbf16, #tpu.memory_space<vmem>>, vector<128x128xbf16>
    %cst_162 = arith.constant dense<0.000000e+00> : vector<128x128xf32>
    %260 = tpu.matmul %258, %259, %cst_162 {dimension_numbers = #tpu.dot_dimension_numbers<[1], [0], [0], [1], [0, 0, 1, 1], [], []>} : vector<128x128xbf16>, vector<128x128xbf16>, vector<128x128xf32> -> vector<128x128xf32>
    %c0_163 = arith.constant 0 : index
    %c0_164 = arith.constant 0 : index
    %261 = vector.load %arg39[%c0_163, %c0_164] : memref<1x128xf32, #tpu.memory_space<vmem>>, vector<1x128xf32>
    %262 = vector.broadcast %261 : vector<1x128xf32> to vector<128x128xf32>
    %263 = arith.addf %260, %262 : vector<128x128xf32>
    %264 = arith.truncf %263 : vector<128x128xf32> to vector<128x128xbf16>
    %c0_165 = arith.constant 0 : index
    %c0_166 = arith.constant 0 : index
    %265 = vector.load %arg40[%c0_165, %c0_166] : memref<128x128xbf16, #tpu.memory_space<vmem>>, vector<128x128xbf16>
    %cst_167 = arith.constant dense<0.000000e+00> : vector<128x128xf32>
    %266 = tpu.matmul %264, %265, %cst_167 {dimension_numbers = #tpu.dot_dimension_numbers<[1], [0], [0], [1], [0, 0, 1, 1], [], []>} : vector<128x128xbf16>, vector<128x128xbf16>, vector<128x128xf32> -> vector<128x128xf32>
    %c0_168 = arith.constant 0 : index
    %c0_169 = arith.constant 0 : index
    %267 = vector.load %arg41[%c0_168, %c0_169] : memref<1x128xf32, #tpu.memory_space<vmem>>, vector<1x128xf32>
    %268 = vector.broadcast %267 : vector<1x128xf32> to vector<128x128xf32>
    %269 = arith.addf %266, %268 : vector<128x128xf32>
    %270 = arith.truncf %269 : vector<128x128xf32> to vector<128x128xbf16>
    %c0_170 = arith.constant 0 : index
    %c0_171 = arith.constant 0 : index
    %271 = vector.load %arg42[%c0_170, %c0_171] : memref<128x128xbf16, #tpu.memory_space<vmem>>, vector<128x128xbf16>
    %cst_172 = arith.constant dense<0.000000e+00> : vector<128x128xf32>
    %272 = tpu.matmul %270, %271, %cst_172 {dimension_numbers = #tpu.dot_dimension_numbers<[1], [0], [0], [1], [0, 0, 1, 1], [], []>} : vector<128x128xbf16>, vector<128x128xbf16>, vector<128x128xf32> -> vector<128x128xf32>
    %c0_173 = arith.constant 0 : index
    %c0_174 = arith.constant 0 : index
    %273 = vector.load %arg43[%c0_173, %c0_174] : memref<1x128xf32, #tpu.memory_space<vmem>>, vector<1x128xf32>
    %274 = vector.broadcast %273 : vector<1x128xf32> to vector<128x128xf32>
    %275 = arith.addf %272, %274 : vector<128x128xf32>
    %276 = arith.truncf %275 : vector<128x128xf32> to vector<128x128xbf16>
    %c0_175 = arith.constant 0 : index
    %c0_176 = arith.constant 0 : index
    %277 = vector.load %arg44[%c0_175, %c0_176] : memref<128x128xbf16, #tpu.memory_space<vmem>>, vector<128x128xbf16>
    %cst_177 = arith.constant dense<0.000000e+00> : vector<128x128xf32>
    %278 = tpu.matmul %276, %277, %cst_177 {dimension_numbers = #tpu.dot_dimension_numbers<[1], [0], [0], [1], [0, 0, 1, 1], [], []>} : vector<128x128xbf16>, vector<128x128xbf16>, vector<128x128xf32> -> vector<128x128xf32>
    %c0_178 = arith.constant 0 : index
    %c0_179 = arith.constant 0 : index
    %279 = vector.load %arg45[%c0_178, %c0_179] : memref<1x128xf32, #tpu.memory_space<vmem>>, vector<1x128xf32>
    %280 = vector.broadcast %279 : vector<1x128xf32> to vector<128x128xf32>
    %281 = arith.addf %278, %280 : vector<128x128xf32>
    %282 = arith.truncf %281 : vector<128x128xf32> to vector<128x128xbf16>
    %c0_180 = arith.constant 0 : index
    %c0_181 = arith.constant 0 : index
    %283 = vector.load %arg46[%c0_180, %c0_181] : memref<128x128xbf16, #tpu.memory_space<vmem>>, vector<128x128xbf16>
    %cst_182 = arith.constant dense<0.000000e+00> : vector<128x128xf32>
    %284 = tpu.matmul %282, %283, %cst_182 {dimension_numbers = #tpu.dot_dimension_numbers<[1], [0], [0], [1], [0, 0, 1, 1], [], []>} : vector<128x128xbf16>, vector<128x128xbf16>, vector<128x128xf32> -> vector<128x128xf32>
    %c0_183 = arith.constant 0 : index
    %c0_184 = arith.constant 0 : index
    %285 = vector.load %arg47[%c0_183, %c0_184] : memref<1x128xf32, #tpu.memory_space<vmem>>, vector<1x128xf32>
    %286 = vector.broadcast %285 : vector<1x128xf32> to vector<128x128xf32>
    %287 = arith.addf %284, %286 : vector<128x128xf32>
    %c0_185 = arith.constant 0 : index
    %c0_186 = arith.constant 0 : index
    %288 = vector.load %arg48[%c0_185, %c0_186] : memref<128x128xf32, #tpu.memory_space<vmem>>, vector<128x128xf32>
    tpu.vector_store %arg48[%c0_185, %c0_186], %287 {strides = array<i32>} : memref<128x128xf32, #tpu.memory_space<vmem>>, vector<128x128xf32>,
    return
  }
}

</mosaic_0001>

<bundles_post_ra>
// kernel: tpu_custom_call.1
= control target key start
LH: loop header
LB: loop body
LE: loop exit
PB: predicated region body
PF: predicated region fallthrough
CT: control target
= control target key end

     0   :  { %s7484_s6 = smov 1   ;;  %s7485_s10 = smov 2   ;;  %s9158_s0 = inlined_call_operand.smem [shape: u32[49], index: -1, kind: input, shape index: {}] }
   0x1   :  { %s7571_s5 = sld [smem:[%s9158_s0]]   ;;  %s7486_s14 = smov 3  }
   0x2   :  { %s7576_s9 = sld [smem:[%s9158_s0 + %s7484_s6]]   ;;  %s7487_s18 = smov 4  }
   0x3   :  { %s7581_s13 = sld [smem:[%s9158_s0 + %s7485_s10]]   ;;  %s7488_s22 = smov 5  }
   0x4   :  { %s7586_s17 = sld [smem:[%s9158_s0 + %s7486_s14]]   ;;  %s7489_s26 = smov 6  }
   0x5   :  { %s7591_s21 = sld [smem:[%s9158_s0 + %s7487_s18]]   ;;  %s7490_s30 = smov 7  }
   0x6   :  { %s7596_s25 = sld [smem:[%s9158_s0 + %s7488_s22]]   ;;  %s7491_s4 = smov 8  }
   0x7   :  { %9237 = sst [smem:[#allocation55_spill]] %s7571_s5  ;;  %s7492_s10 = smov 9  }
   0x8   :  { %9238 = sst [smem:[#allocation56_spill]] %s7576_s9  ;;  %s7493_s15 = smov 10  }
   0x9   :  { %9239 = sst [smem:[#allocation57_spill]] %s7581_s13  ;;  %s7494_s20 = smov 11  }
   0xa   :  { %9240 = sst [smem:[#allocation58_spill]] %s7586_s17  ;;  %s7496_s1 = smov 13  }
   0xb   :  { %9241 = sst [smem:[#allocation59_spill]] %s7591_s21  ;;  %s7497_s7 = smov 14  }
   0xc   :  { %9242 = sst [smem:[#allocation60_spill]] %s7596_s25  ;;  %s7499_s22 = smov 16  }
   0xd   :  { %s7601_s29 = sld [smem:[%s9158_s0 + %s7489_s26]]   ;;  %s7495_s26 = smov 12  }
   0xe   :  { %s7606_s3 = sld [smem:[%s9158_s0 + %s7490_s30]]   ;;  %s7500_s28 = smov 17  }
   0xf   :  { %s7611_s8 = sld [smem:[%s9158_s0 + %s7491_s4]]  }
  0x10   :  { %s7616_s14 = sld [smem:[%s9158_s0 + %s7492_s10]]  }
  0x11   :  { %s7621_s19 = sld [smem:[%s9158_s0 + %s7493_s15]]   ;;  %s7498_s15 = smov 15  }
  0x12   :  { %s7626_s24 = sld [smem:[%s9158_s0 + %s7494_s20]]  }
  0x13   :  { %s7631_s30 = sld [smem:[%s9158_s0 + %s7495_s26]]  }
  0x14   :  { %s7636_s6 = sld [smem:[%s9158_s0 + %s7496_s1]]  }
  0x15   :  { %s7641_s12 = sld [smem:[%s9158_s0 + %s7497_s7]]   ;;  %s7501_s7 = smov 18  }
  0x16   :  { %9243 = sst [smem:[#allocation61_spill]] %s7616_s14 }
  0x17   :  { %s7646_s20 = sld [smem:[%s9158_s0 + %s7498_s15]]   ;;  %s7502_s15 = smov 19  }
  0x18   :  { %9244 = sst [smem:[#allocation62_spill]] %s7626_s24 }
  0x19   :  { %s7651_s27 = sld [smem:[%s9158_s0 + %s7499_s22]]   ;;  %s7503_s22 = smov 20  }
  0x1a   :  { %9245 = sst [smem:[#allocation63_spill]] %s7636_s6 }
  0x1b   :  { %s7656_s4 = sld [smem:[%s9158_s0 + %s7500_s28]]   ;;  %s7504_s28 = smov 21  }
  0x1c   :  { %s7661_s25 = sld [smem:[%s9158_s0 + %s7501_s7]]   ;;  %s7505_s7 = smov 22  }
  0x1d   :  { %9246 = sst [smem:[#allocation64_spill]] %s7646_s20 }
  0x1e   :  { %s7666_s21 = sld [smem:[%s9158_s0 + %s7502_s15]]   ;;  %s7506_s15 = smov 23  }
  0x1f   :  { %9247 = sst [smem:[#allocation65_spill]] %s7651_s27 }
  0x20   :  { %s7671_s27 = sld [smem:[%s9158_s0 + %s7503_s22]]   ;;  %s7507_s22 = smov 24  }
  0x21   :  { %s7676_s6 = sld [smem:[%s9158_s0 + %s7504_s28]]   ;;  %s7508_s28 = smov 25  }
  0x22   :  { %9248 = sst [smem:[#allocation66_spill]] %s7661_s25 }
  0x23   :  { %s7681_s25 = sld [smem:[%s9158_s0 + %s7505_s7]]   ;;  %s7509_s7 = smov 26  }
  0x24   :  { %9249 = sst [smem:[#allocation67_spill]] %s7666_s21 }
  0x25   :  { %s7686_s24 = sld [smem:[%s9158_s0 + %s7506_s15]]   ;;  %s7510_s15 = smov 27  }
  0x26   :  { %9250 = sst [smem:[#allocation68_spill]] %s7671_s27 }
  0x27   :  { %s7691_s27 = sld [smem:[%s9158_s0 + %s7507_s22]]   ;;  %s7511_s22 = smov 28  }
  0x28   :  { %s7696_s14 = sld [smem:[%s9158_s0 + %s7508_s28]]   ;;  %s7512_s28 = smov 29  }
  0x29   :  { %9251 = sst [smem:[#allocation69_spill]] %s7681_s25 }
  0x2a   :  { %s7701_s9 = sld [smem:[%s9158_s0 + %s7509_s7]]   ;;  %s7513_s7 = smov 30  }
  0x2b   :  { %9252 = sst [smem:[#allocation70_spill]] %s7686_s24 }
  0x2c   :  { %s7706_s24 = sld [smem:[%s9158_s0 + %s7510_s15]]   ;;  %s7514_s15 = smov 31  }
  0x2d   :  { %s7711_s5 = sld [smem:[%s9158_s0 + %s7511_s22]]   ;;  %s7515_s22 = smov 32  }
  0x2e   :  { %9253 = sst [smem:[#allocation71_spill]] %s7696_s14 }
  0x2f   :  { %s7716_s14 = sld [smem:[%s9158_s0 + %s7512_s28]]   ;;  %s7516_s28 = smov 33  }
  0x30   :  { %9254 = sst [smem:[#allocation72_spill]] %s7701_s9 }
  0x31   :  { %s7721_s13 = sld [smem:[%s9158_s0 + %s7513_s7]]   ;;  %s7517_s7 = smov 34  }
  0x32   :  { %9255 = sst [smem:[#allocation73_spill]] %s7706_s24 }
  0x33   :  { %s7726_s24 = sld [smem:[%s9158_s0 + %s7514_s15]]   ;;  %s7518_s15 = smov 35  }
  0x34   :  { %s7731_s17 = sld [smem:[%s9158_s0 + %s7515_s22]]   ;;  %s7519_s22 = smov 36  }
  0x35   :  { %9256 = sst [smem:[#allocation74_spill]] %s7716_s14 }
  0x36   :  { %s7736_s14 = sld [smem:[%s9158_s0 + %s7516_s28]]   ;;  %s7520_s28 = smov 37  }
  0x37   :  { %9257 = sst [smem:[#allocation75_spill]] %s7721_s13 }
  0x38   :  { %s7741_s13 = sld [smem:[%s9158_s0 + %s7517_s7]]   ;;  %s7521_s7 = smov 38  }
  0x39   :  { %s7746_s9 = sld [smem:[%s9158_s0 + %s7518_s15]]   ;;  %s7522_s15 = smov 39  }
  0x3a   :  { %9258 = sst [smem:[#allocation76_spill]] %s7731_s17 }
  0x3b   :  { %s7751_s17 = sld [smem:[%s9158_s0 + %s7519_s22]]   ;;  %s7523_s22 = smov 40  }
  0x3c   :  { %9259 = sst [smem:[#allocation77_spill]] %s7736_s14 }
  0x3d   :  { %s7756_s14 = sld [smem:[%s9158_s0 + %s7520_s28]]   ;;  %s7524_s28 = smov 41  }
  0x3e   :  { %9260 = sst [smem:[#allocation78_spill]] %s7741_s13 }
  0x3f   :  { %s7761_s13 = sld [smem:[%s9158_s0 + %s7521_s7]]   ;;  %s7525_s7 = smov 42  }
  0x40   :  { %s7766_s25 = sld [smem:[%s9158_s0 + %s7522_s15]]   ;;  %s7526_s15 = smov 43  }
  0x41   :  { %9261 = sst [smem:[#allocation79_spill]] %s7751_s17 }
  0x42   :  { %s7771_s17 = sld [smem:[%s9158_s0 + %s7523_s22]]   ;;  %s7527_s22 = smov 44  }
  0x43   :  { %9262 = sst [smem:[#allocation80_spill]] %s7756_s14 }
  0x44   :  { %s7776_s14 = sld [smem:[%s9158_s0 + %s7524_s28]]   ;;  %s7528_s28 = smov 45  }
  0x45   :  { %s7781_s21 = sld [smem:[%s9158_s0 + %s7525_s7]]   ;;  %s7529_s7 = smov 46  }
  0x46   :  { %9263 = sst [smem:[#allocation81_spill]] %s7766_s25 }
  0x47   :  { %s7786_s25 = sld [smem:[%s9158_s0 + %s7526_s15]]   ;;  %s7530_s15 = smov 47  }
  0x48   :  { %9264 = sst [smem:[#allocation82_spill]] %s7771_s17 }
  0x49   :  { %s7791_s17 = sld [smem:[%s9158_s0 + %s7527_s22]]   ;;  %s7531_s22 = smov 48  }
  0x4a   :  { %9265 = sst [smem:[#allocation83_spill]] %s7776_s14 }
  0x4b   :  { %s7796_s14 = sld [smem:[%s9158_s0 + %s7528_s28]]  }
  0x4c   :  { %s7801_s20 = sld [smem:[%s9158_s0 + %s7529_s7]]  }
  0x4d   :  { %9266 = sst [smem:[#allocation84_spill]] %s7786_s25 }
  0x4e   :  { %s7806_s25 = sld [smem:[%s9158_s0 + %s7530_s15]]  }
  0x4f   :  { %9267 = sst [smem:[#allocation85_spill]] %s7791_s17 }
  0x50   :  { %s7811_s17 = sld [smem:[%s9158_s0 + %s7531_s22]]  }
  0x51   :  { %102 = vsyncpa [#allocation3], 0 }
  0x52   :  { %103 = vsyncpa [#allocation6], 0 }
  0x53   :  { %104 = vsyncpa [#allocation9], 0 }
  0x54   :  { %105 = vsyncpa [#allocation12], 0 }
  0x55   :  { %106 = vsyncpa [#allocation15], 0 }
  0x56   :  { %107 = vsyncpa [#allocation18], 0 }
  0x57   :  { %108 = vsyncpa [#allocation21], 0 }
  0x58   :  { %109 = vsyncpa [#allocation24], 0 }
  0x59   :  { %110 = vsyncpa [#allocation27], 0 }
  0x5a   :  { %111 = vsyncpa [#allocation30], 0 }
  0x5b   :  { %112 = vsyncpa [#allocation33], 0 }
  0x5c   :  { %113 = vsyncpa [#allocation36], 0 }
  0x5d   :  { %114 = vsyncpa [#allocation39], 0 }
  0x5e   :  { %115 = vsyncpa [#allocation4], 0  ;;  %s145_s0 = sshll.u32 %s7606_s3, 4  ;;  %s7532_s28 = smov [#allocation5]   ;;  %s146_s0 = int_to_ptr.hbm [resolvable:$true] %s145_s0 }
  0x5f   :  { %s147_s1 = sshll.u32 %s7532_s28, 4  ;;  %s173_s2 = sshll.u32 %s7621_s19, 4  ;;  %s148_s1 = int_to_ptr.vmem [resolvable:$true] %s147_s1  ;;  %s174_s2 = int_to_ptr.hbm [resolvable:$true] %s173_s2 }
  0x60   :  { %s6856_s7 = sshra.s32 %s146_s0, 4  ;;  %s6860_s11 = scalar_lea.hbm %s7606_s3, 64  ;;  %s6857_s7 = int_to_ptr.hbm [resolvable:$true] %s6856_s7 }
  0x61   :  { %s6858_s10 = scalar_lea.hbm %s6857_s7, 64  ;;  %p6861_p1 = scmp.lt.s32.totalorder %s6857_s7, %s7606_s3 }
  0x62   :  { %p6859_p0 = scmp.ne.s32.totalorder %s6857_s7, %s6858_s10  ;;  %p6862_p2 = scmp.lt.s32.totalorder %s6860_s11, %s6858_s10 }
  0x64   :  { %p6863_p3 = por %p6862_p2, %p6861_p1 }
  0x66   :  { %p6864_p4 = pnand %p6863_p3, %p6859_p0 }
  0x68   :  { %6867 = shalt.err (!%p6864_p4)
}
  0x69   :  { %s7533_s15 = smov 64   ;;  %s7534_s16 = smov 4  }
  0x6a   :  { %153 = dma.hbm_to_vmem [thread:$0]  %s146_s0, 1024, %s148_s1, [#allocation6], %s7533_s15, %s7533_s15, %s7534_s16  }
  0x6b   :  { %s7535_s18 = smov [#allocation8]   ;;  %s203_s23 = sshll.u32 %s7641_s12, 4  ;;  %s7821_s23 = int_to_ptr.hbm [resolvable:$true] %s203_s23 }
  0x6c   :  { %s175_s22 = sshll.u32 %s7535_s18, 4  ;;  %s6880_s3 = sshra.s32 %s174_s2, 4  ;;  %s176_s22 = int_to_ptr.vmem [resolvable:$true] %s175_s22  ;;  %s6881_s3 = int_to_ptr.hbm [resolvable:$true] %s6880_s3 }
  0x6d   :  { %s6882_s26 = scalar_lea.hbm %s6881_s3, 64  ;;  %s6884_s28 = scalar_lea.hbm %s7621_s19, 64 }
  0x6e   :  { %p6883_p5 = scmp.ne.s32.totalorder %s6881_s3, %s6882_s26  ;;  %p6885_p6 = scmp.lt.s32.totalorder %s6881_s3, %s7621_s19 }
  0x6f   :  { %p6886_p7 = scmp.lt.s32.totalorder %s6884_s28, %s6882_s26 }
  0x71   :  { %p6887_p8 = por %p6886_p7, %p6885_p6 }
  0x73   :  { %p6888_p9 = pnand %p6887_p8, %p6883_p5 }
  0x75   :  { %6891 = shalt.err (!%p6888_p9)
}
  0x76   :  { %181 = dma.hbm_to_vmem [thread:$0]  %s174_s2, 1024, %s176_s22, [#allocation9], %s7533_s15, %s7533_s15, %s7534_s16  }
  0x77   :  { %s231_s0 = sshll.u32 %s7656_s4, 4  ;;  %s7536_s1 = smov [#allocation11]   ;;  %s7829_s0 = int_to_ptr.hbm [resolvable:$true] %s231_s0 }
  0x78   :  { %s205_s7 = sshll.u32 %s7536_s1, 4  ;;  %s6904_s10 = sshra.s32 %s7821_s23, 4  ;;  %s206_s7 = int_to_ptr.vmem [resolvable:$true] %s205_s7  ;;  %s6905_s10 = int_to_ptr.hbm [resolvable:$true] %s6904_s10 }
  0x79   :  { %s6906_s19 = scalar_lea.hbm %s6905_s10, 64  ;;  %s6908_s11 = scalar_lea.hbm %s7641_s12, 64 }
  0x7a   :  { %p6907_p10 = scmp.ne.s32.totalorder %s6905_s10, %s6906_s19  ;;  %p6909_p11 = scmp.lt.s32.totalorder %s6905_s10, %s7641_s12 }
  0x7b   :  { %p6910_p12 = scmp.lt.s32.totalorder %s6908_s11, %s6906_s19 }
  0x7d   :  { %p6911_p13 = por %p6910_p12, %p6909_p11 }
  0x7f   :  { %p6912_p0 = pnand %p6911_p13, %p6907_p10 }
  0x81   :  { %6915 = shalt.err (!%p6912_p0)
}
  0x82   :  { %211 = dma.hbm_to_vmem [thread:$0]  %s7821_s23, 1024, %s206_s7, [#allocation12], %s7533_s15, %s7533_s15, %s7534_s16  }
  0x83   :  { %s7537_s2 = smov [#allocation14]   ;;  %s261_s22 = sshll.u32 %s7676_s6, 4  ;;  %s7839_s22 = int_to_ptr.hbm [resolvable:$true] %s261_s22 }
  0x84   :  { %s233_s18 = sshll.u32 %s7537_s2, 4  ;;  %s6928_s12 = sshra.s32 %s7829_s0, 4  ;;  %s234_s18 = int_to_ptr.vmem [resolvable:$true] %s233_s18  ;;  %s6929_s12 = int_to_ptr.hbm [resolvable:$true] %s6928_s12 }
  0x85   :  { %s6930_s3 = scalar_lea.hbm %s6929_s12, 64  ;;  %s6932_s26 = scalar_lea.hbm %s7656_s4, 64 }
  0x86   :  { %p6931_p1 = scmp.ne.s32.totalorder %s6929_s12, %s6930_s3  ;;  %p6933_p2 = scmp.lt.s32.totalorder %s6929_s12, %s7656_s4 }
  0x87   :  { %p6934_p3 = scmp.lt.s32.totalorder %s6932_s26, %s6930_s3 }
  0x89   :  { %p6935_p4 = por %p6934_p3, %p6933_p2 }
  0x8b   :  { %p6936_p5 = pnand %p6935_p4, %p6931_p1 }
  0x8d   :  { %6939 = shalt.err (!%p6936_p5)
}
  0x8e   :  { %239 = dma.hbm_to_vmem [thread:$0]  %s7829_s0, 1024, %s234_s18, [#allocation15], %s7533_s15, %s7533_s15, %s7534_s16  }
  0x8f   :  { %s289_s23 = sshll.u32 %s7691_s27, 4  ;;  %s7538_s28 = smov [#allocation17]   ;;  %s7849_s23 = int_to_ptr.hbm [resolvable:$true] %s289_s23 }
  0x90   :  { %s263_s1 = sshll.u32 %s7538_s28, 4  ;;  %s6952_s4 = sshra.s32 %s7839_s22, 4  ;;  %s264_s1 = int_to_ptr.vmem [resolvable:$true] %s263_s1  ;;  %s6953_s4 = int_to_ptr.hbm [resolvable:$true] %s6952_s4 }
  0x91   :  { %s6954_s7 = scalar_lea.hbm %s6953_s4, 64  ;;  %s6956_s10 = scalar_lea.hbm %s7676_s6, 64 }
  0x92   :  { %p6955_p6 = scmp.ne.s32.totalorder %s6953_s4, %s6954_s7  ;;  %p6957_p7 = scmp.lt.s32.totalorder %s6953_s4, %s7676_s6 }
  0x93   :  { %p6958_p8 = scmp.lt.s32.totalorder %s6956_s10, %s6954_s7 }
  0x95   :  { %p6959_p9 = por %p6958_p8, %p6957_p7 }
  0x97   :  { %p6960_p10 = pnand %p6959_p9, %p6955_p6 }
  0x99   :  { %6963 = shalt.err (!%p6960_p10)
}
  0x9a   :  { %269 = dma.hbm_to_vmem [thread:$0]  %s7839_s22, 1024, %s264_s1, [#allocation18], %s7533_s15, %s7533_s15, %s7534_s16  }
  0x9b   :  { %s7539_s0 = smov [#allocation20]   ;;  %s319_s11 = sshll.u32 %s7711_s5, 4  ;;  %s7859_s11 = int_to_ptr.hbm [resolvable:$true] %s319_s11 }
  0x9c   :  { %s291_s19 = sshll.u32 %s7539_s0, 4  ;;  %s6976_s6 = sshra.s32 %s7849_s23, 4  ;;  %s292_s19 = int_to_ptr.vmem [resolvable:$true] %s291_s19  ;;  %s6977_s6 = int_to_ptr.hbm [resolvable:$true] %s6976_s6 }
  0x9d   :  { %s6978_s2 = scalar_lea.hbm %s6977_s6, 64  ;;  %s6980_s18 = scalar_lea.hbm %s7691_s27, 64 }
  0x9e   :  { %p6979_p11 = scmp.ne.s32.totalorder %s6977_s6, %s6978_s2  ;;  %p6981_p12 = scmp.lt.s32.totalorder %s6977_s6, %s7691_s27 }
  0x9f   :  { %p6982_p13 = scmp.lt.s32.totalorder %s6980_s18, %s6978_s2 }
  0xa1   :  { %p6983_p0 = por %p6982_p13, %p6981_p12 }
  0xa3   :  { %p6984_p1 = pnand %p6983_p0, %p6979_p11 }
  0xa5   :  { %6987 = shalt.err (!%p6984_p1)
}
  0xa6   :  { %297 = dma.hbm_to_vmem [thread:$0]  %s7849_s23, 1024, %s292_s19, [#allocation21], %s7533_s15, %s7533_s15, %s7534_s16  }
  0xa7   :  { %s347_s22 = sshll.u32 %s7726_s24, 4  ;;  %s7540_s12 = smov [#allocation23]   ;;  %s7869_s22 = int_to_ptr.hbm [resolvable:$true] %s347_s22 }
  0xa8   :  { %s321_s3 = sshll.u32 %s7540_s12, 4  ;;  %s7000_s27 = sshra.s32 %s7859_s11, 4  ;;  %s322_s3 = int_to_ptr.vmem [resolvable:$true] %s321_s3  ;;  %s7001_s27 = int_to_ptr.hbm [resolvable:$true] %s7000_s27 }
  0xa9   :  { %s7002_s26 = scalar_lea.hbm %s7001_s27, 64  ;;  %s7004_s28 = scalar_lea.hbm %s7711_s5, 64 }
  0xaa   :  { %p7003_p2 = scmp.ne.s32.totalorder %s7001_s27, %s7002_s26  ;;  %p7005_p3 = scmp.lt.s32.totalorder %s7001_s27, %s7711_s5 }
  0xab   :  { %p7006_p4 = scmp.lt.s32.totalorder %s7004_s28, %s7002_s26 }
  0xad   :  { %p7007_p5 = por %p7006_p4, %p7005_p3 }
  0xaf   :  { %p7008_p6 = pnand %p7007_p5, %p7003_p2 }
  0xb1   :  { %7011 = shalt.err (!%p7008_p6)
}
  0xb2   :  { %327 = dma.hbm_to_vmem [thread:$0]  %s7859_s11, 1024, %s322_s3, [#allocation24], %s7533_s15, %s7533_s15, %s7534_s16  }
  0xb3   :  { %s7541_s23 = smov [#allocation26]   ;;  %s377_s4 = sshll.u32 %s7746_s9, 4  ;;  %s7879_s4 = int_to_ptr.hbm [resolvable:$true] %s377_s4 }
  0xb4   :  { %s349_s1 = sshll.u32 %s7541_s23, 4  ;;  %s7024_s5 = sshra.s32 %s7869_s22, 4  ;;  %s350_s1 = int_to_ptr.vmem [resolvable:$true] %s349_s1  ;;  %s7025_s5 = int_to_ptr.hbm [resolvable:$true] %s7024_s5 }
  0xb5   :  { %s7026_s7 = scalar_lea.hbm %s7025_s5, 64  ;;  %s7028_s10 = scalar_lea.hbm %s7726_s24, 64 }
  0xb6   :  { %p7027_p7 = scmp.ne.s32.totalorder %s7025_s5, %s7026_s7  ;;  %p7029_p8 = scmp.lt.s32.totalorder %s7025_s5, %s7726_s24 }
  0xb7   :  { %p7030_p9 = scmp.lt.s32.totalorder %s7028_s10, %s7026_s7 }
  0xb9   :  { %p7031_p10 = por %p7030_p9, %p7029_p8 }
  0xbb   :  { %p7032_p11 = pnand %p7031_p10, %p7027_p7 }
  0xbd   :  { %7035 = shalt.err (!%p7032_p11)
}
  0xbe   :  { %355 = dma.hbm_to_vmem [thread:$0]  %s7869_s22, 1024, %s350_s1, [#allocation27], %s7533_s15, %s7533_s15, %s7534_s16  }
  0xbf   :  { %s405_s0 = sshll.u32 %s7761_s13, 4  ;;  %s7542_s19 = smov [#allocation29]   ;;  %s7889_s0 = int_to_ptr.hbm [resolvable:$true] %s405_s0 }
  0xc0   :  { %s379_s11 = sshll.u32 %s7542_s19, 4  ;;  %s7048_s24 = sshra.s32 %s7879_s4, 4  ;;  %s380_s11 = int_to_ptr.vmem [resolvable:$true] %s379_s11  ;;  %s7049_s24 = int_to_ptr.hbm [resolvable:$true] %s7048_s24 }
  0xc1   :  { %s7050_s6 = scalar_lea.hbm %s7049_s24, 64  ;;  %s7052_s2 = scalar_lea.hbm %s7746_s9, 64 }
  0xc2   :  { %p7051_p12 = scmp.ne.s32.totalorder %s7049_s24, %s7050_s6  ;;  %p7053_p13 = scmp.lt.s32.totalorder %s7049_s24, %s7746_s9 }
  0xc3   :  { %p7054_p0 = scmp.lt.s32.totalorder %s7052_s2, %s7050_s6 }
  0xc5   :  { %p7055_p1 = por %p7054_p0, %p7053_p13 }
  0xc7   :  { %p7056_p2 = pnand %p7055_p1, %p7051_p12 }
  0xc9   :  { %7059 = shalt.err (!%p7056_p2)
}
  0xca   :  { %385 = dma.hbm_to_vmem [thread:$0]  %s7879_s4, 1024, %s380_s11, [#allocation30], %s7533_s15, %s7533_s15, %s7534_s16  }
  0xcb   :  { %s7543_s18 = smov [#allocation32]   ;;  %s435_s12 = sshll.u32 %s7781_s21, 4  ;;  %s7899_s12 = int_to_ptr.hbm [resolvable:$true] %s435_s12 }
  0xcc   :  { %s407_s22 = sshll.u32 %s7543_s18, 4  ;;  %s7072_s9 = sshra.s32 %s7889_s0, 4  ;;  %s408_s22 = int_to_ptr.vmem [resolvable:$true] %s407_s22  ;;  %s7073_s9 = int_to_ptr.hbm [resolvable:$true] %s7072_s9 }
  0xcd   :  { %s7074_s3 = scalar_lea.hbm %s7073_s9, 64  ;;  %s7076_s27 = scalar_lea.hbm %s7761_s13, 64 }
  0xce   :  { %p7075_p3 = scmp.ne.s32.totalorder %s7073_s9, %s7074_s3  ;;  %p7077_p4 = scmp.lt.s32.totalorder %s7073_s9, %s7761_s13 }
  0xcf   :  { %p7078_p5 = scmp.lt.s32.totalorder %s7076_s27, %s7074_s3 }
  0xd1   :  { %p7079_p6 = por %p7078_p5, %p7077_p4 }
  0xd3   :  { %p7080_p7 = pnand %p7079_p6, %p7075_p3 }
  0xd5   :  { %7083 = shalt.err (!%p7080_p7)
}
  0xd6   :  { %413 = dma.hbm_to_vmem [thread:$0]  %s7889_s0, 1024, %s408_s22, [#allocation33], %s7533_s15, %s7533_s15, %s7534_s16  }
  0xd7   :  { %s132_s26 = sshll.u32 %s7601_s29, 4  ;;  %s7544_s28 = smov [#allocation35]   ;;  %s7909_s26 = int_to_ptr.hbm [resolvable:$true] %s132_s26 }
  0xd8   :  { %s437_s23 = sshll.u32 %s7544_s28, 4  ;;  %s7096_s13 = sshra.s32 %s7899_s12, 4  ;;  %s438_s23 = int_to_ptr.vmem [resolvable:$true] %s437_s23  ;;  %s7097_s13 = int_to_ptr.hbm [resolvable:$true] %s7096_s13 }
  0xd9   :  { %s7098_s1 = scalar_lea.hbm %s7097_s13, 64  ;;  %s7100_s4 = scalar_lea.hbm %s7781_s21, 64 }
  0xda   :  { %p7099_p8 = scmp.ne.s32.totalorder %s7097_s13, %s7098_s1  ;;  %p7101_p9 = scmp.lt.s32.totalorder %s7097_s13, %s7781_s21 }
  0xdb   :  { %p7102_p10 = scmp.lt.s32.totalorder %s7100_s4, %s7098_s1 }
  0xdd   :  { %p7103_p11 = por %p7102_p10, %p7101_p9 }
  0xdf   :  { %p7104_p12 = pnand %p7103_p11, %p7099_p8 }
  0xe1   :  { %7107 = shalt.err (!%p7104_p12)
}
  0xe2   :  { %443 = dma.hbm_to_vmem [thread:$0]  %s7899_s12, 1024, %s438_s23, [#allocation36], %s7533_s15, %s7533_s15, %s7534_s16  }
  0xe3   :  { %s7545_s5 = smov [#allocation2]   ;;  %s158_s10 = sshll.u32 %s7611_s8, 4  ;;  %s7919_s10 = int_to_ptr.hbm [resolvable:$true] %s158_s10 }
  0xe4   :  { %s134_s7 = sshll.u32 %s7545_s5, 4  ;;  %s7120_s21 = sshra.s32 %s7909_s26, 4  ;;  %s135_s7 = int_to_ptr.vmem [resolvable:$true] %s134_s7  ;;  %s7121_s21 = int_to_ptr.hbm [resolvable:$true] %s7120_s21 }
  0xe5   :  { %s7122_s0 = scalar_lea.hbm %s7121_s21, 64  ;;  %s7124_s19 = scalar_lea.hbm %s7601_s29, 64 }
  0xe6   :  { %p7123_p13 = scmp.ne.s32.totalorder %s7121_s21, %s7122_s0  ;;  %p7125_p0 = scmp.lt.s32.totalorder %s7121_s21, %s7601_s29 }
  0xe7   :  { %p7126_p1 = scmp.lt.s32.totalorder %s7124_s19, %s7122_s0 }
  0xe9   :  { %p7127_p2 = por %p7126_p1, %p7125_p0 }
  0xeb   :  { %p7128_p3 = pnand %p7127_p2, %p7123_p13 }
  0xed   :  { %7131 = shalt.err (!%p7128_p3)
}
  0xee   :  { %140 = dma.hbm_to_vmem [thread:$0]  %s7909_s26, 1024, %s135_s7, [#allocation3], %s7533_s15, %s7533_s15, %s7534_s16  }
  0xef   :  { %s188_s11 = sshll.u32 %s7631_s30, 4  ;;  %s7546_s24 = smov [#allocation7]   ;;  %s7929_s11 = int_to_ptr.hbm [resolvable:$true] %s188_s11 }
  0xf0   :  { %s160_s6 = sshll.u32 %s7546_s24, 4  ;;  %s7144_s29 = sshra.s32 %s7919_s10, 4  ;;  %s161_s6 = int_to_ptr.vmem [resolvable:$true] %s160_s6  ;;  %s7145_s29 = int_to_ptr.hbm [resolvable:$true] %s7144_s29 }
  0xf1   :  { %s7146_s2 = scalar_lea.hbm %s7145_s29, 64  ;;  %s7148_s18 = scalar_lea.hbm %s7611_s8, 64 }
  0xf2   :  { %p7147_p4 = scmp.ne.s32.totalorder %s7145_s29, %s7146_s2  ;;  %p7149_p5 = scmp.lt.s32.totalorder %s7145_s29, %s7611_s8 }
  0xf3   :  { %p7150_p6 = scmp.lt.s32.totalorder %s7148_s18, %s7146_s2 }
  0xf5   :  { %p7151_p7 = por %p7150_p6, %p7149_p5 }
  0xf7   :  { %p7152_p8 = pnand %p7151_p7, %p7147_p4 }
  0xf9   :  { %7155 = shalt.err (!%p7152_p8)
}
  0xfa   :  { %s9268_s22 = sld [smem:[#allocation64_spill]]  ;;  %s7547_s12 = smov [#allocation10]  }
  0xfb   :  { %166 = dma.hbm_to_vmem [thread:$0]  %s7919_s10, 1024, %s161_s6, [#allocation6], %s7533_s15, %s7533_s15, %s7534_s16  }
  0xfc   :  { %s190_s9 = sshll.u32 %s7547_s12, 4  ;;  %s7168_s8 = sshra.s32 %s7929_s11, 4  ;;  %s191_s9 = int_to_ptr.vmem [resolvable:$true] %s190_s9  ;;  %s7169_s8 = int_to_ptr.hbm [resolvable:$true] %s7168_s8 }
  0xfd   :  { %s7170_s27 = scalar_lea.hbm %s7169_s8, 64  ;;  %s7172_s26 = scalar_lea.hbm %s7631_s30, 64 }
  0xfe   :  { %p7171_p9 = scmp.ne.s32.totalorder %s7169_s8, %s7170_s27  ;;  %p7173_p10 = scmp.lt.s32.totalorder %s7169_s8, %s7631_s30 }
  0xff   :  { %p7174_p11 = scmp.lt.s32.totalorder %s7172_s26, %s7170_s27 }
 0x100   :  { %s216_s3 = sshll.u32 %s9268_s22, 4  ;;  %s7939_s3 = int_to_ptr.hbm [resolvable:$true] %s216_s3 }
 0x101   :  { %p7175_p12 = por %p7174_p11, %p7173_p10 }
 0x103   :  { %p7176_p13 = pnand %p7175_p12, %p7171_p9 }
 0x105   :  { %7179 = shalt.err (!%p7176_p13)
}
 0x106   :  { %s9269_s28 = sld [smem:[#allocation67_spill]]  ;;  %s7548_s13 = smov [#allocation13]  }
 0x107   :  { %196 = dma.hbm_to_vmem [thread:$0]  %s7929_s11, 1024, %s191_s9, [#allocation9], %s7533_s15, %s7533_s15, %s7534_s16  }
 0x108   :  { %s218_s1 = sshll.u32 %s7548_s13, 4  ;;  %s7192_s30 = sshra.s32 %s7939_s3, 4  ;;  %s219_s1 = int_to_ptr.vmem [resolvable:$true] %s218_s1  ;;  %s7193_s30 = int_to_ptr.hbm [resolvable:$true] %s7192_s30 }
 0x109   :  { %s7194_s4 = scalar_lea.hbm %s7193_s30, 64  ;;  %s7196_s5 = scalar_lea.hbm %s9268_s22, 64 }
 0x10a   :  { %p7195_p0 = scmp.ne.s32.totalorder %s7193_s30, %s7194_s4  ;;  %p7197_p1 = scmp.lt.s32.totalorder %s7193_s30, %s9268_s22 }
 0x10b   :  { %p7198_p2 = scmp.lt.s32.totalorder %s7196_s5, %s7194_s4 }
 0x10c   :  { %s246_s23 = sshll.u32 %s9269_s28, 4  ;;  %s7949_s23 = int_to_ptr.hbm [resolvable:$true] %s246_s23 }
 0x10d   :  { %p7199_p3 = por %p7198_p2, %p7197_p1 }
 0x10f   :  { %p7200_p4 = pnand %p7199_p3, %p7195_p0 }
 0x111   :  { %7203 = shalt.err (!%p7200_p4)
}
 0x112   :  { %s9270_s7 = sld [smem:[#allocation69_spill]]  ;;  %s7549_s10 = smov [#allocation16]  }
 0x113   :  { %224 = dma.hbm_to_vmem [thread:$0]  %s7939_s3, 1024, %s219_s1, [#allocation12], %s7533_s15, %s7533_s15, %s7534_s16  }
 0x114   :  { %s248_s21 = sshll.u32 %s7549_s10, 4  ;;  %s7216_s19 = sshra.s32 %s7949_s23, 4  ;;  %s249_s21 = int_to_ptr.vmem [resolvable:$true] %s248_s21  ;;  %s7217_s19 = int_to_ptr.hbm [resolvable:$true] %s7216_s19 }
 0x115   :  { %s7218_s11 = scalar_lea.hbm %s7217_s19, 64  ;;  %s7220_s24 = scalar_lea.hbm %s9269_s28, 64 }
 0x116   :  { %p7219_p5 = scmp.ne.s32.totalorder %s7217_s19, %s7218_s11  ;;  %p7221_p6 = scmp.lt.s32.totalorder %s7217_s19, %s9269_s28 }
 0x117   :  { %p7222_p7 = scmp.lt.s32.totalorder %s7220_s24, %s7218_s11 }
 0x118   :  { %s274_s0 = sshll.u32 %s9270_s7, 4  ;;  %s7959_s0 = int_to_ptr.hbm [resolvable:$true] %s274_s0 }
 0x119   :  { %p7223_p8 = por %p7222_p7, %p7221_p6 }
 0x11b   :  { %p7224_p9 = pnand %p7223_p8, %p7219_p5 }
 0x11d   :  { %7227 = shalt.err (!%p7224_p9)
}
 0x11e   :  { %s9271_s6 = sld [smem:[#allocation72_spill]]  ;;  %s7550_s2 = smov [#allocation19]  }
 0x11f   :  { %254 = dma.hbm_to_vmem [thread:$0]  %s7949_s23, 1024, %s249_s21, [#allocation15], %s7533_s15, %s7533_s15, %s7534_s16  }
 0x120   :  { %s276_s18 = sshll.u32 %s7550_s2, 4  ;;  %s7240_s22 = sshra.s32 %s7959_s0, 4  ;;  %s277_s18 = int_to_ptr.vmem [resolvable:$true] %s276_s18  ;;  %s7241_s22 = int_to_ptr.hbm [resolvable:$true] %s7240_s22 }
 0x121   :  { %s7242_s12 = scalar_lea.hbm %s7241_s22, 64  ;;  %s7244_s9 = scalar_lea.hbm %s9270_s7, 64 }
 0x122   :  { %p7243_p10 = scmp.ne.s32.totalorder %s7241_s22, %s7242_s12  ;;  %p7245_p11 = scmp.lt.s32.totalorder %s7241_s22, %s9270_s7 }
 0x123   :  { %p7246_p12 = scmp.lt.s32.totalorder %s7244_s9, %s7242_s12 }
 0x124   :  { %s304_s29 = sshll.u32 %s9271_s6, 4  ;;  %s7969_s29 = int_to_ptr.hbm [resolvable:$true] %s304_s29 }
 0x125   :  { %p7247_p13 = por %p7246_p12, %p7245_p11 }
 0x127   :  { %p7248_p0 = pnand %p7247_p13, %p7243_p10 }
 0x129   :  { %7251 = shalt.err (!%p7248_p0)
}
 0x12a   :  { %s9272_s3 = sld [smem:[#allocation74_spill]]  ;;  %s7551_s8 = smov [#allocation22]  }
 0x12b   :  { %282 = dma.hbm_to_vmem [thread:$0]  %s7959_s0, 1024, %s277_s18, [#allocation18], %s7533_s15, %s7533_s15, %s7534_s16  }
 0x12c   :  { %s306_s27 = sshll.u32 %s7551_s8, 4  ;;  %s7264_s28 = sshra.s32 %s7969_s29, 4  ;;  %s307_s27 = int_to_ptr.vmem [resolvable:$true] %s306_s27  ;;  %s7265_s28 = int_to_ptr.hbm [resolvable:$true] %s7264_s28 }
 0x12d   :  { %s7266_s23 = scalar_lea.hbm %s7265_s28, 64  ;;  %s7268_s13 = scalar_lea.hbm %s9271_s6, 64 }
 0x12e   :  { %p7267_p1 = scmp.ne.s32.totalorder %s7265_s28, %s7266_s23  ;;  %p7269_p2 = scmp.lt.s32.totalorder %s7265_s28, %s9271_s6 }
 0x12f   :  { %p7270_p3 = scmp.lt.s32.totalorder %s7268_s13, %s7266_s23 }
 0x130   :  { %s332_s26 = sshll.u32 %s9272_s3, 4  ;;  %s7979_s26 = int_to_ptr.hbm [resolvable:$true] %s332_s26 }
 0x131   :  { %p7271_p4 = por %p7270_p3, %p7269_p2 }
 0x133   :  { %p7272_p5 = pnand %p7271_p4, %p7267_p1 }
 0x135   :  { %7275 = shalt.err (!%p7272_p5)
}
 0x136   :  { %s9273_s1 = sld [smem:[#allocation77_spill]]  ;;  %s7552_s4 = smov [#allocation25]  }
 0x137   :  { %312 = dma.hbm_to_vmem [thread:$0]  %s7969_s29, 1024, %s307_s27, [#allocation21], %s7533_s15, %s7533_s15, %s7534_s16  }
 0x138   :  { %s334_s5 = sshll.u32 %s7552_s4, 4  ;;  %s7288_s7 = sshra.s32 %s7979_s26, 4  ;;  %s335_s5 = int_to_ptr.vmem [resolvable:$true] %s334_s5  ;;  %s7289_s7 = int_to_ptr.hbm [resolvable:$true] %s7288_s7 }
 0x139   :  { %s7290_s10 = scalar_lea.hbm %s7289_s7, 64  ;;  %s7292_s21 = scalar_lea.hbm %s9272_s3, 64 }
 0x13a   :  { %p7291_p6 = scmp.ne.s32.totalorder %s7289_s7, %s7290_s10  ;;  %p7293_p7 = scmp.lt.s32.totalorder %s7289_s7, %s9272_s3 }
 0x13b   :  { %p7294_p8 = scmp.lt.s32.totalorder %s7292_s21, %s7290_s10 }
 0x13c   :  { %s362_s30 = sshll.u32 %s9273_s1, 4  ;;  %s7989_s30 = int_to_ptr.hbm [resolvable:$true] %s362_s30 }
 0x13d   :  { %p7295_p9 = por %p7294_p8, %p7293_p7 }
 0x13f   :  { %p7296_p10 = pnand %p7295_p9, %p7291_p6 }
 0x141   :  { %7299 = shalt.err (!%p7296_p10)
}
 0x142   :  { %s9274_s0 = sld [smem:[#allocation79_spill]]  ;;  %s7553_s19 = smov [#allocation28]  }
 0x143   :  { %340 = dma.hbm_to_vmem [thread:$0]  %s7979_s26, 1024, %s335_s5, [#allocation24], %s7533_s15, %s7533_s15, %s7534_s16  }
 0x144   :  { %s364_s11 = sshll.u32 %s7553_s19, 4  ;;  %s7312_s6 = sshra.s32 %s7989_s30, 4  ;;  %s365_s11 = int_to_ptr.vmem [resolvable:$true] %s364_s11  ;;  %s7313_s6 = int_to_ptr.hbm [resolvable:$true] %s7312_s6 }
 0x145   :  { %s7314_s29 = scalar_lea.hbm %s7313_s6, 64  ;;  %s7316_s2 = scalar_lea.hbm %s9273_s1, 64 }
 0x146   :  { %p7315_p11 = scmp.ne.s32.totalorder %s7313_s6, %s7314_s29  ;;  %p7317_p12 = scmp.lt.s32.totalorder %s7313_s6, %s9273_s1 }
 0x147   :  { %p7318_p13 = scmp.lt.s32.totalorder %s7316_s2, %s7314_s29 }
 0x148   :  { %s390_s24 = sshll.u32 %s9274_s0, 4  ;;  %s7999_s24 = int_to_ptr.hbm [resolvable:$true] %s390_s24 }
 0x149   :  { %p7319_p0 = por %p7318_p13, %p7317_p12 }
 0x14b   :  { %p7320_p1 = pnand %p7319_p0, %p7315_p11 }
 0x14d   :  { %7323 = shalt.err (!%p7320_p1)
}
 0x14e   :  { %s9275_s18 = sld [smem:[#allocation82_spill]]  ;;  %s7554_s12 = smov [#allocation31]  }
 0x14f   :  { %370 = dma.hbm_to_vmem [thread:$0]  %s7989_s30, 1024, %s365_s11, [#allocation27], %s7533_s15, %s7533_s15, %s7534_s16  }
 0x150   :  { %s392_s9 = sshll.u32 %s7554_s12, 4  ;;  %s7336_s3 = sshra.s32 %s7999_s24, 4  ;;  %s393_s9 = int_to_ptr.vmem [resolvable:$true] %s392_s9  ;;  %s7337_s3 = int_to_ptr.hbm [resolvable:$true] %s7336_s3 }
 0x151   :  { %s7338_s8 = scalar_lea.hbm %s7337_s3, 64  ;;  %s7340_s27 = scalar_lea.hbm %s9274_s0, 64 }
 0x152   :  { %p7339_p2 = scmp.ne.s32.totalorder %s7337_s3, %s7338_s8  ;;  %p7341_p3 = scmp.lt.s32.totalorder %s7337_s3, %s9274_s0 }
 0x153   :  { %p7342_p4 = scmp.lt.s32.totalorder %s7340_s27, %s7338_s8 }
 0x154   :  { %s420_s22 = sshll.u32 %s9275_s18, 4  ;;  %s8009_s22 = int_to_ptr.hbm [resolvable:$true] %s420_s22 }
 0x155   :  { %p7343_p5 = por %p7342_p4, %p7341_p3 }
 0x157   :  { %p7344_p6 = pnand %p7343_p5, %p7339_p2 }
 0x159   :  { %7347 = shalt.err (!%p7344_p6)
}
 0x15a   :  { %s9276_s26 = sld [smem:[#allocation85_spill]]  ;;  %s7555_s28 = smov [#allocation34]  }
 0x15b   :  { %398 = dma.hbm_to_vmem [thread:$0]  %s7999_s24, 1024, %s393_s9, [#allocation30], %s7533_s15, %s7533_s15, %s7534_s16  }
 0x15c   :  { %s422_s23 = sshll.u32 %s7555_s28, 4  ;;  %s7360_s1 = sshra.s32 %s8009_s22, 4  ;;  %s423_s23 = int_to_ptr.vmem [resolvable:$true] %s422_s23  ;;  %s7361_s1 = int_to_ptr.hbm [resolvable:$true] %s7360_s1 }
 0x15d   :  { %s7362_s30 = scalar_lea.hbm %s7361_s1, 64  ;;  %s7364_s4 = scalar_lea.hbm %s9275_s18, 64 }
 0x15e   :  { %p7363_p7 = scmp.ne.s32.totalorder %s7361_s1, %s7362_s30  ;;  %p7365_p8 = scmp.lt.s32.totalorder %s7361_s1, %s9275_s18 }
 0x15f   :  { %p7366_p9 = scmp.lt.s32.totalorder %s7364_s4, %s7362_s30 }
 0x160   :  { %s450_s13 = sshll.u32 %s9276_s26, 4  ;;  %s8019_s13 = int_to_ptr.hbm [resolvable:$true] %s450_s13 }
 0x161   :  { %p7367_p10 = por %p7366_p9, %p7365_p8 }
 0x163   :  { %p7368_p11 = pnand %p7367_p10, %p7363_p7 }
 0x165   :  { %7371 = shalt.err (!%p7368_p11)
}
 0x166   :  { %428 = dma.hbm_to_vmem [thread:$0]  %s8009_s22, 1024, %s423_s23, [#allocation33], %s7533_s15, %s7533_s15, %s7534_s16  }
 0x167   :  { %s465_s5 = sshll.u32 %s7801_s20, 4  ;;  %s7556_s7 = smov [#allocation37]   ;;  %s8029_s5 = int_to_ptr.hbm [resolvable:$true] %s465_s5 }
 0x168   :  { %s452_s10 = sshll.u32 %s7556_s7, 4  ;;  %s7384_s21 = sshra.s32 %s8019_s13, 4  ;;  %s453_s10 = int_to_ptr.vmem [resolvable:$true] %s452_s10  ;;  %s7385_s21 = int_to_ptr.hbm [resolvable:$true] %s7384_s21 }
 0x169   :  { %s7386_s0 = scalar_lea.hbm %s7385_s21, 64  ;;  %s7388_s19 = scalar_lea.hbm %s9276_s26, 64 }
 0x16a   :  { %p7387_p12 = scmp.ne.s32.totalorder %s7385_s21, %s7386_s0  ;;  %p7389_p13 = scmp.lt.s32.totalorder %s7385_s21, %s9276_s26 }
 0x16b   :  { %p7390_p0 = scmp.lt.s32.totalorder %s7388_s19, %s7386_s0 }
 0x16d   :  { %p7391_p1 = por %p7390_p0, %p7389_p13 }
 0x16f   :  { %p7392_p2 = pnand %p7391_p1, %p7387_p12 }
 0x171   :  { %7395 = shalt.err (!%p7392_p2)
}
 0x172   :  { %458 = dma.hbm_to_vmem [thread:$0]  %s8019_s13, 1024, %s453_s10, [#allocation36], %s7533_s15, %s7533_s15, %s7534_s16  }
 0x173   :  { %s7557_s11 = smov [#allocation38]   ;;  %s7408_s6 = sshra.s32 %s8029_s5, 4  ;;  %s7409_s6 = int_to_ptr.hbm [resolvable:$true] %s7408_s6 }
 0x174   :  { %s467_s24 = sshll.u32 %s7557_s11, 4  ;;  %s7410_s29 = scalar_lea.hbm %s7409_s6, 64  ;;  %s468_s24 = int_to_ptr.vmem [resolvable:$true] %s467_s24 }
 0x175   :  { %p7411_p3 = scmp.ne.s32.totalorder %s7409_s6, %s7410_s29  ;;  %s7412_s2 = scalar_lea.hbm %s7801_s20, 64 }
 0x176   :  { %p7413_p4 = scmp.lt.s32.totalorder %s7409_s6, %s7801_s20  ;;  %p7414_p5 = scmp.lt.s32.totalorder %s7412_s2, %s7410_s29 }
 0x178   :  { %p7415_p6 = por %p7414_p5, %p7413_p4 }
 0x17a   :  { %p7416_p7 = pnand %p7415_p6, %p7411_p3 }
 0x17c   :  { %7419 = shalt.err (!%p7416_p7)
}
 0x17d   :  { %473 = dma.hbm_to_vmem [thread:$0]  %s8029_s5, 1024, %s468_s24, [#allocation39], %s7533_s15, %s7533_s15, %s7534_s16  }
 0x17e   :  { %7456 = dma.done.wait [#allocation3], 1024  }
 0x17f   :  { %7457 = vsyncadd [#allocation3], 4294966272 }
 0x180   :  { %7458 = dma.done.wait [#allocation6], 2048  }
 0x181   :  { %7459 = vsyncadd [#allocation6], 4294965248 }
 0x182   :  { %7460 = dma.done.wait [#allocation9], 2048  }
 0x183   :  { %7461 = vsyncadd [#allocation9], 4294965248 }
 0x184   :  { %7462 = dma.done.wait [#allocation12], 2048  }
 0x185   :  { %7463 = vsyncadd [#allocation12], 4294965248 }
 0x186   :  { %7464 = dma.done.wait [#allocation15], 2048  }
 0x187   :  { %7465 = vsyncadd [#allocation15], 4294965248 }
 0x188   :  { %7466 = dma.done.wait [#allocation18], 2048  }
 0x189   :  { %7467 = vsyncadd [#allocation18], 4294965248 }
 0x18a   :  { %7468 = dma.done.wait [#allocation21], 2048  }
 0x18b   :  { %7469 = vsyncadd [#allocation21], 4294965248 }
 0x18c   :  { %7470 = dma.done.wait [#allocation24], 2048  }
 0x18d   :  { %7471 = vsyncadd [#allocation24], 4294965248 }
 0x18e   :  { %7472 = dma.done.wait [#allocation27], 2048  }
 0x18f   :  { %7473 = vsyncadd [#allocation27], 4294965248 }
 0x190   :  { %7474 = dma.done.wait [#allocation30], 2048  }
 0x191   :  { %7475 = vsyncadd [#allocation30], 4294965248 }
 0x192   :  { %7476 = dma.done.wait [#allocation33], 2048  }
 0x193   :  { %7477 = vsyncadd [#allocation33], 4294965248 }
 0x194   :  { %7478 = dma.done.wait [#allocation36], 2048  }
 0x195   :  { %7479 = vsyncadd [#allocation36], 4294965248 }
 0x196   :  { %7480 = dma.done.wait [#allocation39], 1024  }
 0x197   :  { %7481 = vsyncadd [#allocation39], 4294966272  ;;  %s9277_s20 = sld [smem:[#allocation58_spill]]  ;;  %v7558_v0 = vmov 0   ;;  %v9189_v60 = vlaneseq  ;;  %s5376_s19 = sshll.u32 %s7811_s17, 4  ;;  %s5377_s19 = int_to_ptr.hbm [resolvable:$true] %s5376_s19 }
 0x198   :  { %s9278_s15 = sld [smem:[#allocation57_spill]]  ;;  %6738 = vset.pattern.permute.xlu2 %v7558_v0  ;;  %6737 = vset.pattern.permute.xlu1 %v7558_v0  ;;  %s7444_s11 = sshra.s32 %s5377_s19, 4  ;;  %s7445_s11 = int_to_ptr.hbm [resolvable:$true] %s7444_s11 }
 0x199   :  { %6736 = vset.pattern.permute.xlu0 %v7558_v0  ;;  %s9279_s16 = sld [smem:[#allocation55_spill]]  ;;  %v8141_v62 = vand.u32 127, %v9189_v60  ;;  %s7446_s24 = scalar_lea.hbm %s7445_s11, 128 }
 0x19a   :  { %s9312_s18 = sld [smem:[#allocation56_spill]]  ;;  %p7447_p8 = scmp.ne.s32.totalorder %s7445_s11, %s7446_s24 }
 0x19b   :  { %s9313_s22 = sld [smem:[#allocation61_spill]]  ;;  %s7448_s6 = scalar_lea.hbm %s7811_s17, 128 }
 0x19c   :  { %s9314_s12 = sld [smem:[#allocation62_spill]]  ;;  %p7449_p9 = scmp.lt.s32.totalorder %s7445_s11, %s7811_s17 }
 0x19d   :  { %v620_v1 = vld [vmem:[%s9277_s20] sm:$0xff]  ;;  %v621_v4 = vld [vmem:[%s9277_s20 + $0x8] sm:$0xff]  ;;  %v623_v8 = vld [vmem:[%s9277_s20 + $0x18] sm:$0xff]  ;;  %s9315_s9 = sld [smem:[#allocation63_spill]]  ;;  %p7450_p10 = scmp.lt.s32.totalorder %s7448_s6, %s7446_s24 }
 0x19e   :  { %v606_v2 = vld [vmem:[%s9278_s15 + $0x10] sm:$0xff]  ;;  %v604_v3 = vld [vmem:[%s9278_s15] sm:$0xff]  ;;  %802 = vperm.xlu2 %6738, %v620_v1   ;;  %v607_v5 = vld [vmem:[%s9278_s15 + $0x18] sm:$0xff]  ;;  %s9316_s3 = sld [smem:[#allocation65_spill]] }
 0x19f   :  { %647 = vperm.xlu1 %6737, %v606_v2   ;;  %641 = vperm.xlu0 %6736, %v604_v3   ;;  %v605_v6 = vld [vmem:[%s9278_s15 + $0x8] sm:$0xff]  ;;  %v608_v7 = vld [vmem:[%s9278_s15 + $0x20] sm:$0xff]  ;;  %v622_v9 = vld [vmem:[%s9277_s20 + $0x10] sm:$0xff]  ;;  %v9187_v3 = vmov 1.0|1.0   ;;  %s9317_s8 = sld [smem:[#allocation66_spill]]  ;;  %p7451_p11 = por %p7450_p10, %p7449_p9 }
 0x1a0   :  { %v625_v10 = vld [vmem:[%s9277_s20 + $0x28] sm:$0xff]  ;;  %v624_v11 = vld [vmem:[%s9277_s20 + $0x20] sm:$0xff]  ;;  %v626_v13 = vld [vmem:[%s9277_s20 + $0x30] sm:$0xff]  ;;  %s9318_s27 = sld [smem:[#allocation68_spill]] }
 0x1a1   :  { %v609_v12 = vld [vmem:[%s9278_s15 + $0x28] sm:$0xff]  ;;  %v611_v14 = vld [vmem:[%s9278_s15 + $0x38] sm:$0xff]  ;;  %v610_v15 = vld [vmem:[%s9278_s15 + $0x30] sm:$0xff]  ;;  %s9319_s26 = sld [smem:[#allocation59_spill]]  ;;  %p7452_p12 = pnand %p7451_p11, %p7447_p8 }
 0x1a2   :  { %v613_v16 = vld [vmem:[%s9278_s15 + $0x48] sm:$0xff]  ;;  %v612_v17 = vld [vmem:[%s9278_s15 + $0x40] sm:$0xff]  ;;  %v627_v18 = vld [vmem:[%s9277_s20 + $0x38] sm:$0xff]  ;;  %s9366_s28 = sld [smem:[#allocation70_spill]] }
 0x1a3   :  { %v614_v19 = vld [vmem:[%s9278_s15 + $0x50] sm:$0xff]  ;;  %v629_v20 = vld [vmem:[%s9277_s20 + $0x48] sm:$0xff]  ;;  %v628_v21 = vld [vmem:[%s9277_s20 + $0x40] sm:$0xff]  ;;  %s9367_s23 = sld [smem:[#allocation71_spill]] }
 0x1a4   :  { %v631_v22 = vld [vmem:[%s9277_s20 + $0x58] sm:$0xff]  ;;  %v630_v23 = vld [vmem:[%s9277_s20 + $0x50] sm:$0xff]  ;;  %v632_v28 = vld [vmem:[%s9277_s20 + $0x60] sm:$0xff]  ;;  %s9368_s13 = sld [smem:[#allocation73_spill]] }
 0x1a5   :  { %v615_v24 = vld [vmem:[%s9278_s15 + $0x58] sm:$0xff]  ;;  %v586_v25 = vld [vmem:[%s9279_s16 + $0x70] sm:$0xff]  ;;  %v617_v29 = vld [vmem:[%s9278_s15 + $0x68] sm:$0xff]  ;;  %s9391_s1 = sld [smem:[#allocation75_spill]] }
 0x1a6   :  { %805 = vperm.xlu2 %6738, %v621_v4   ;;  %v587_v26 = vld [vmem:[%s9279_s16 + $0x78] sm:$0xff]  ;;  %v616_v30 = vld [vmem:[%s9278_s15 + $0x60] sm:$0xff]  ;;  %v585_v32 = vld [vmem:[%s9279_s16 + $0x68] sm:$0xff]  ;;  %s9392_s30 = sld [smem:[#allocation76_spill]] }
 0x1a7   :  { %650 = vperm.xlu1 %6737, %v607_v5   ;;  %644 = vperm.xlu0 %6736, %v605_v6   ;;  %v8071_v27 = vpack.c.bf16 %v587_v26, %v586_v25  ;;  %v584_v31 = vld [vmem:[%s9279_s16 + $0x60] sm:$0xff]  ;;  %v582_v34 = vld [vmem:[%s9279_s16 + $0x50] sm:$0xff]  ;;  %v583_v35 = vld [vmem:[%s9279_s16 + $0x58] sm:$0xff]  ;;  %s9393_s4 = sld [smem:[#allocation78_spill]] }
 0x1a8   :  { %v8081_v33 = vpack.c.bf16 %v585_v32, %v584_v31  ;;  %v619_v36 = vld [vmem:[%s9278_s15 + $0x78] sm:$0xff]  ;;  %v618_v37 = vld [vmem:[%s9278_s15 + $0x70] sm:$0xff]  ;;  %v8090_v38 = vpack.c.bf16 %v583_v35, %v582_v34  ;;  %v633_v39 = vld [vmem:[%s9277_s20 + $0x68] sm:$0xff]  ;;  %v9300_v31 = vmov 0  ;;  %v9302_v32 = vmov 0  ;;  %s9394_s5 = sld [smem:[#allocation60_spill]] }
 0x1a9   :  { %752 = vmatpush.bf16.msra.mxu0 %v8071_v27  ;;  %6633 = vmatpush.bf16.msra.mxu3 %v8071_v27  ;;  %v580_v40 = vld [vmem:[%s9279_s16 + $0x40] sm:$0xff]  ;;  %v581_v41 = vld [vmem:[%s9279_s16 + $0x48] sm:$0xff]  ;;  %v578_v43 = vld [vmem:[%s9279_s16 + $0x30] sm:$0xff]  ;;  %s9427_s7 = sld [smem:[#allocation80_spill]] }
 0x1aa   :  { %6641 = vmatpush.bf16.msra.mxu1 %v8071_v27  ;;  %v8097_v42 = vpack.c.bf16 %v581_v41, %v580_v40  ;;  %v579_v44 = vld [vmem:[%s9279_s16 + $0x38] sm:$0xff]  ;;  %v634_v47 = vld [vmem:[%s9277_s20 + $0x70] sm:$0xff]  ;;  %v576_v48 = vld [vmem:[%s9279_s16 + $0x20] sm:$0xff]  ;;  %s9428_s10 = sld [smem:[#allocation81_spill]] }
 0x1ab   :  { %v8104_v45 = vpack.c.bf16 %v579_v44, %v578_v43  ;;  %v635_v46 = vld [vmem:[%s9277_s20 + $0x78] sm:$0xff]  ;;  %v577_v49 = vld [vmem:[%s9279_s16 + $0x28] sm:$0xff]  ;;  %v574_v51 = vld [vmem:[%s9279_s16 + $0x10] sm:$0xff]  ;;  %s9429_s21 = sld [smem:[#allocation83_spill]] }
 0x1ac   :  { %v8113_v50 = vpack.c.bf16 %v577_v49, %v576_v48  ;;  %v575_v52 = vld [vmem:[%s9279_s16 + $0x18] sm:$0xff]  ;;  %v572_v54 = vld [vmem:[%s9279_s16] sm:$0xff]  ;;  %v573_v55 = vld [vmem:[%s9279_s16 + $0x8] sm:$0xff]  ;;  %v9306_v49 = vmov 0  ;;  %s9430_s0 = sld [smem:[#allocation84_spill]] }
 0x1ad   :  { %753 = vmatpush.bf16.msra.mxu0 %v8081_v33  ;;  %6634 = vmatpush.bf16.msra.mxu3 %v8081_v33  ;;  %v8120_v53 = vpack.c.bf16 %v575_v52, %v574_v51  ;;  %v8127_v56 = vpack.c.bf16 %v573_v55, %v572_v54  ;;  %v6448_v35 = vld [vmem:[#allocation2 + $0x38] sm:$0xff]  ;;  %v6446_v40 = vld [vmem:[#allocation2 + $0x28] sm:$0xff]  ;;  %v6445_v43 = vld [vmem:[#allocation2 + $0x20] sm:$0xff] }
 0x1ae   :  { %653 = vperm.xlu2 %6738, %v608_v7   ;;  %6642 = vmatpush.bf16.msra.mxu1 %v8081_v33  ;;  %v6455_v55 = vld [vmem:[#allocation5 + $0x30] sm:$0xff] }
 0x1af   :  { %811 = vperm.xlu1 %6737, %v623_v8   ;;  %808 = vperm.xlu0 %6736, %v622_v9  }
 0x1b1   :  { %754 = vmatpush.bf16.msra.mxu0 %v8090_v38  ;;  %6635 = vmatpush.bf16.msra.mxu3 %v8090_v38 }
 0x1b2   :  { %6643 = vmatpush.bf16.msra.mxu1 %v8090_v38 }
 0x1b5   :  { %755 = vmatpush.bf16.msra.mxu0 %v8097_v42  ;;  %6636 = vmatpush.bf16.msra.mxu3 %v8097_v42 }
 0x1b6   :  { %817 = vperm.xlu2 %6738, %v625_v10   ;;  %6644 = vmatpush.bf16.msra.mxu1 %v8097_v42  ;;  %v6819_v10 = vld [vmem:[#allocation11 + $0x8] sm:$0xff] }
 0x1b7   :  { %814 = vperm.xlu1 %6737, %v624_v11   ;;  %656 = vperm.xlu0 %6736, %v609_v12  }
 0x1b9   :  { %756 = vmatpush.bf16.msra.mxu0 %v8104_v45  ;;  %6637 = vmatpush.bf16.msra.mxu3 %v8104_v45 }
 0x1ba   :  { %6645 = vmatpush.bf16.msra.mxu1 %v8104_v45 }
 0x1bd   :  { %757 = vmatpush.bf16.msra.mxu0 %v8113_v50  ;;  %6638 = vmatpush.bf16.msra.mxu3 %v8113_v50 }
 0x1be   :  { %820 = vperm.xlu2 %6738, %v626_v13   ;;  %6646 = vmatpush.bf16.msra.mxu1 %v8113_v50 }
 0x1bf   :  { %662 = vperm.xlu1 %6737, %v611_v14   ;;  %659 = vperm.xlu0 %6736, %v610_v15   ;;  %v6801_v14 = vld [vmem:[#allocation7 + $0x10] sm:$0xff] }
 0x1c1   :  { %758 = vmatpush.bf16.msra.mxu0 %v8120_v53  ;;  %6639 = vmatpush.bf16.msra.mxu3 %v8120_v53 }
 0x1c2   :  { %6647 = vmatpush.bf16.msra.mxu1 %v8120_v53 }
 0x1c5   :  { %759 = vmatpush.bf16.msra.mxu0 %v8127_v56  ;;  %6640 = vmatpush.bf16.msra.mxu3 %v8127_v56 }
 0x1c6   :  { %668 = vperm.xlu2 %6738, %v613_v16   ;;  %6648 = vmatpush.bf16.msra.mxu1 %v8127_v56 }
 0x1c7   :  { %665 = vperm.xlu1 %6737, %v612_v17   ;;  %823 = vperm.xlu0 %6736, %v627_v18  }
 0x1c9   :  { %905 = vmatpush.bf16.msrb.mxu0 %v8071_v27  ;;  %1147 = vmatpush.bf16.msrb.mxu3 %v6448_v35 }
 0x1cd   :  { %906 = vmatpush.bf16.msrb.mxu0 %v8081_v33 }
 0x1ce   :  { %671 = vperm.xlu2 %6738, %v614_v19  }
 0x1cf   :  { %829 = vperm.xlu1 %6737, %v629_v20   ;;  %826 = vperm.xlu0 %6736, %v628_v21  }
 0x1d1   :  { %907 = vmatpush.bf16.msrb.mxu0 %v8090_v38 }
 0x1d5   :  { %908 = vmatpush.bf16.msrb.mxu0 %v8097_v42 }
 0x1d6   :  { %835 = vperm.xlu2 %6738, %v631_v22  }
 0x1d7   :  { %832 = vperm.xlu1 %6737, %v630_v23   ;;  %674 = vperm.xlu0 %6736, %v615_v24   ;;  %v6810_v23 = vld [vmem:[#allocation14 + $0x30] sm:$0xff] }
 0x1d9   :  { %909 = vmatpush.bf16.msrb.mxu0 %v8104_v45 }
 0x1dd   :  { %910 = vmatpush.bf16.msrb.mxu0 %v8113_v50 }
 0x1de   :  { %838 = vperm.xlu2 %6738, %v632_v28  }
 0x1df   :  { %680 = vperm.xlu1 %6737, %v617_v29   ;;  %677 = vperm.xlu0 %6736, %v616_v30  }
 0x1e1   :  { %911 = vmatpush.bf16.msrb.mxu0 %v8120_v53 }
 0x1e5   :  { %912 = vmatpush.bf16.msrb.mxu0 %v8127_v56 }
 0x1e6   :  { %686 = vperm.xlu2 %6738, %v619_v36   ;;  %v6456_v36 = vld [vmem:[#allocation5 + $0x38] sm:$0xff] }
 0x1e7   :  { %683 = vperm.xlu1 %6737, %v618_v37   ;;  %841 = vperm.xlu0 %6736, %v633_v39   ;;  %v6447_v37 = vld [vmem:[#allocation2 + $0x30] sm:$0xff] }
 0x1e8   :  { %6649 = vmatpush.bf16.msra.mxu2 %v6456_v36  ;;  %1148 = vmatpush.bf16.msrb.mxu3 %v6447_v37 }
 0x1ec   :  { %1149 = vmatpush.bf16.msrb.mxu3 %v6446_v40  ;;  %6650 = vmatpush.bf16.msra.mxu2 %v6455_v55  ;;  %v6458_v40 = vld [vmem:[#allocation7 + $0x8] sm:$0xff] }
 0x1ef   :  { %847 = vperm.xlu1 %6737, %v635_v46   ;;  %844 = vperm.xlu0 %6736, %v634_v47   ;;  %v9304_v46 = vmov 0  ;;  %v6444_v47 = vld [vmem:[#allocation2 + $0x18] sm:$0xff] }
 0x1f0   :  { %1150 = vmatpush.bf16.msrb.mxu3 %v6445_v43  ;;  %v6457_v43 = vld [vmem:[#allocation7] sm:$0xff] }
 0x1f4   :  { %1151 = vmatpush.bf16.msrb.mxu3 %v6444_v47 }
 0x1f8   :  { %v803_v57 = vpop.permute.xlu2 %802 }
 0x1f9   :  { %vm849_vm12 = vcmp.eq.s32.totalorder %v803_v57, %v8141_v62  ;;  %v6443_v57 = vld [vmem:[#allocation2 + $0x10] sm:$0xff] }
 0x1fa   :  { %1152 = vmatpush.bf16.msrb.mxu3 %v6443_v57 }
 0x200   :  { %v806_v61 = vpop.permute.xlu2 %805 }
 0x201   :  { %vm850_vm13 = vcmp.eq.s32.totalorder %v806_v61, %v8141_v62 }
 0x208   :  { %v654_v2 = vpop.permute.xlu2 %653 }
 0x209   :  { %vm692_vm6 = vcmp.eq.s32.totalorder %v654_v2, %v8141_v62  ;;  %v6452_v2 = vld [vmem:[#allocation5 + $0x18] sm:$0xff] }
 0x210   :  { %v818_v6 = vpop.permute.xlu2 %817 }
 0x211   :  { %v648_v58 = vpop.permute.xlu1 %647  ;;  %v642_v59 = vpop.permute.xlu0 %641  ;;  %vm854_vm5 = vcmp.eq.s32.totalorder %v818_v6, %v8141_v62  ;;  %v6449_v6 = vld [vmem:[#allocation5] sm:$0xff] }
 0x212   :  { %vm688_vm0 = vcmp.eq.s32.totalorder %v642_v59, %v8141_v62  ;;  %vm690_vm3 = vcmp.eq.s32.totalorder %v648_v58, %v8141_v62  ;;  %v6454_v58 = vld [vmem:[#allocation5 + $0x28] sm:$0xff] }
 0x213   :  { %v6442_v59 = vld [vmem:[#allocation2 + $0x8] sm:$0xff]  ;;  %6651 = vmatpush.bf16.msra.mxu2 %v6454_v58 }
 0x214   :  { %1153 = vmatpush.bf16.msrb.mxu3 %v6442_v59 }
 0x218   :  { %v821_v15 = vpop.permute.xlu2 %820 }
 0x219   :  { %v651_v63 = vpop.permute.xlu1 %650  ;;  %v645_v0 = vpop.permute.xlu0 %644 }
 0x21a   :  { %vm689_vm1 = vcmp.eq.s32.totalorder %v645_v0, %v8141_v62  ;;  %vm691_vm4 = vcmp.eq.s32.totalorder %v651_v63, %v8141_v62  ;;  %v9310_v63 = vmov 0  ;;  %v6441_v0 = vld [vmem:[#allocation2] sm:$0xff] }
 0x21b   :  { %vm8146_vm2 = vmpackc.low %vm689_vm1, %vm688_vm0  ;;  %vm855_vm1 = vcmp.eq.s32.totalorder %v821_v15, %v8141_v62  ;;  %1154 = vmatpush.bf16.msrb.mxu3 %v6441_v0 }
 0x21c   :  { %5466 = vmatmul.msk.bf16.vlgmr.msra.gmra.mxu0 %vm8146_vm2, %v9187_v3  ;;  %vm8157_vm7 = vmpackc.low %vm691_vm4, %vm690_vm3 }
 0x21d   :  { %vm8184_vm0 = vmpackc.low %vm850_vm13, %vm849_vm12  ;;  %1050 = vmatpush.bf16.msra.mxu0 %v6456_v36  ;;  %v6459_v36 = vld [vmem:[#allocation7 + $0x10] sm:$0xff] }
 0x220   :  { %v669_v20 = vpop.permute.xlu2 %668 }
 0x221   :  { %v812_v4 = vpop.permute.xlu1 %811  ;;  %v809_v5 = vpop.permute.xlu0 %808  ;;  %1051 = vmatpush.bf16.msra.mxu0 %v6455_v55 }
 0x225   :  { %1052 = vmatpush.bf16.msra.mxu0 %v6454_v58 }
 0x228   :  { %v672_v26 = vpop.permute.xlu2 %671 }
 0x229   :  { %v815_v7 = vpop.permute.xlu1 %814  ;;  %v657_v9 = vpop.permute.xlu0 %656 }
 0x22a   :  { %vm853_vm8 = vcmp.eq.s32.totalorder %v815_v7, %v8141_v62  ;;  %vm693_vm10 = vcmp.eq.s32.totalorder %v657_v9, %v8141_v62 }
 0x22b   :  { %vm8162_vm9 = vmpackc.low %vm854_vm5, %vm853_vm8  ;;  %vm851_vm8 = vcmp.eq.s32.totalorder %v809_v5, %v8141_v62  ;;  %v6450_v5 = vld [vmem:[#allocation5 + $0x8] sm:$0xff] }
 0x22c   :  { %vm8167_vm11 = vmpackc.low %vm693_vm10, %vm692_vm6  ;;  %5502 = vmatmul.msk.bf16.vlgmr.msra.gmra.mxu1 %vm8162_vm9, %v9187_v3  ;;  %5468 = vmatmul.msk.bf16.gmra.mxu0 %vm8157_vm7, %v9187_v3  ;;  %vm852_vm6 = vcmp.eq.s32.totalorder %v812_v4, %v8141_v62  ;;  %v6451_v4 = vld [vmem:[#allocation5 + $0x10] sm:$0xff] }
 0x22d   :  { %5470 = vmatmul.msk.bf16.vlgmr.msra.gmra.mxu3 %vm8167_vm11, %v9187_v3 }
 0x230   :  { %v836_v30 = vpop.permute.xlu2 %835 }
 0x231   :  { %v660_v12 = vpop.permute.xlu0 %659  ;;  %v663_v13 = vpop.permute.xlu1 %662 }
 0x232   :  { %vm695_vm14 = vcmp.eq.s32.totalorder %v663_v13, %v8141_v62  ;;  %vm694_vm15 = vcmp.eq.s32.totalorder %v660_v12, %v8141_v62  ;;  %v6464_v13 = vld [vmem:[#allocation7 + $0x38] sm:$0xff] }
 0x233   :  { %vm8189_vm3 = vmpackc.low %vm695_vm14, %vm694_vm15  ;;  %vm697_vm14 = vcmp.eq.s32.totalorder %v669_v20, %v8141_v62  ;;  %v6462_v20 = vld [vmem:[#allocation7 + $0x28] sm:$0xff] }
 0x234   :  { %vm8213_vm15 = vmpackc.low %vm852_vm6, %vm851_vm8 }
 0x238   :  { %v839_v44 = vpop.permute.xlu2 %838 }
 0x239   :  { %v824_v16 = vpop.permute.xlu0 %823  ;;  %v666_v19 = vpop.permute.xlu1 %665 }
 0x23a   :  { %vm856_vm4 = vcmp.eq.s32.totalorder %v824_v16, %v8141_v62  ;;  %vm696_vm10 = vcmp.eq.s32.totalorder %v666_v19, %v8141_v62  ;;  %v6463_v16 = vld [vmem:[#allocation7 + $0x30] sm:$0xff] }
 0x23b   :  { %vm8194_vm5 = vmpackc.low %vm856_vm4, %vm855_vm1 }
 0x23c   :  { %5498 = vmatmul.msk.bf16.vlgmr.msrb.gmra.mxu0 %vm8184_vm0, %v9187_v3  ;;  %5504 = vmatmul.msk.bf16.gmra.mxu1 %vm8194_vm5, %v9187_v3  ;;  %vm8217_vm1 = vmpackc.low %vm697_vm14, %vm696_vm10  ;;  %vm698_vm10 = vcmp.eq.s32.totalorder %v672_v26, %v8141_v62  ;;  %v6461_v26 = vld [vmem:[#allocation7 + $0x20] sm:$0xff] }
 0x23d   :  { %5472 = vmatmul.msk.bf16.gmra.mxu3 %vm8189_vm3, %v9187_v3 }
 0x240   :  { %v687_v54 = vpop.permute.xlu2 %686 }
 0x241   :  { %v830_v21 = vpop.permute.xlu1 %829  ;;  %v827_v22 = vpop.permute.xlu0 %826 }
 0x242   :  { %vm858_vm12 = vcmp.eq.s32.totalorder %v830_v21, %v8141_v62  ;;  %vm857_vm13 = vcmp.eq.s32.totalorder %v827_v22, %v8141_v62 }
 0x243   :  { %vm8221_vm4 = vmpackc.low %vm858_vm12, %vm857_vm13  ;;  %vm860_vm12 = vcmp.eq.s32.totalorder %v836_v30, %v8141_v62 }
 0x249   :  { %v675_v28 = vpop.permute.xlu0 %674  ;;  %v833_v29 = vpop.permute.xlu1 %832 }
 0x24a   :  { %vm699_vm6 = vcmp.eq.s32.totalorder %v675_v28, %v8141_v62  ;;  %vm859_vm8 = vcmp.eq.s32.totalorder %v833_v29, %v8141_v62 }
 0x24b   :  { %vm8238_vm13 = vmpackc.low %vm699_vm6, %vm698_vm10 }
 0x24c   :  { %5500 = vmatmul.msk.bf16.gmra.mxu0 %vm8213_vm15, %v9187_v3  ;;  %5506 = vmatmul.msk.bf16.gmra.mxu1 %vm8221_vm4, %v9187_v3  ;;  %v9301_v31 = vsel %vm8238_vm13, 4294967295, %v9300_v31  ;;  %vm8242_vm14 = vmpackc.low %vm860_vm12, %vm859_vm8  ;;  %vm861_vm12 = vcmp.eq.s32.totalorder %v839_v44, %v8141_v62 }
 0x24d   :  { %5474 = vmatmul.msk.bf16.gmra.mxu3 %vm8217_vm1, %v9187_v3  ;;  %v9303_v32 = vsel %vm8242_vm14, 4294967295, %v9302_v32 }
 0x251   :  { %v678_v34 = vpop.permute.xlu0 %677  ;;  %v681_v39 = vpop.permute.xlu1 %680 }
 0x252   :  { %vm701_vm6 = vcmp.eq.s32.totalorder %v681_v39, %v8141_v62  ;;  %vm700_vm8 = vcmp.eq.s32.totalorder %v678_v34, %v8141_v62  ;;  %v6460_v34 = vld [vmem:[#allocation7 + $0x18] sm:$0xff] }
 0x259   :  { %v842_v41 = vpop.permute.xlu0 %841  ;;  %v684_v48 = vpop.permute.xlu1 %683 }
 0x25a   :  { %vm862_vm10 = vcmp.eq.s32.totalorder %v842_v41, %v8141_v62 }
 0x25c   :  { %5508 = vmatmul.msk.bf16.gmra.mxu1 %vm8242_vm14, %v9187_v3  ;;  %vm8256_vm14 = vmpackc.low %vm701_vm6, %vm700_vm8  ;;  %vm702_vm6 = vcmp.eq.s32.totalorder %v684_v48, %v8141_v62 }
 0x25d   :  { %5476 = vmatmul.msk.bf16.gmra.mxu3 %vm8238_vm13, %v9187_v3  ;;  %v9305_v46 = vsel %vm8256_vm14, 4294967295, %v9304_v46  ;;  %vm8260_vm13 = vmpackc.low %vm862_vm10, %vm861_vm12  ;;  %vm703_vm12 = vcmp.eq.s32.totalorder %v687_v54, %v8141_v62 }
 0x25e   :  { %v9307_v49 = vsel %vm8260_vm13, 4294967295, %v9306_v49 }
 0x261   :  { %v848_v51 = vpop.permute.xlu1 %847  ;;  %v845_v52 = vpop.permute.xlu0 %844 }
 0x262   :  { %vm864_vm8 = vcmp.eq.s32.totalorder %v848_v51, %v8141_v62  ;;  %vm863_vm10 = vcmp.eq.s32.totalorder %v845_v52, %v8141_v62  ;;  %v6453_v62 = vld [vmem:[#allocation5 + $0x20] sm:$0xff] }
 0x263   :  { %6652 = vmatpush.bf16.msra.mxu2 %v6453_v62  ;;  %1053 = vmatpush.bf16.msra.mxu0 %v6453_v62 }
 0x267   :  { %6653 = vmatpush.bf16.msra.mxu2 %v6452_v2  ;;  %1054 = vmatpush.bf16.msra.mxu0 %v6452_v2 }
 0x26b   :  { %6654 = vmatpush.bf16.msra.mxu2 %v6451_v4  ;;  %1055 = vmatpush.bf16.msra.mxu0 %v6451_v4 }
 0x26c   :  { %5510 = vmatmul.msk.bf16.gmra.mxu1 %vm8260_vm13, %v9187_v3  ;;  %vm8278_vm13 = vmpackc.low %vm864_vm8, %vm863_vm10 }
 0x26d   :  { %5478 = vmatmul.msk.bf16.gmra.mxu3 %vm8256_vm14, %v9187_v3  ;;  %vm8274_vm14 = vmpackc.low %vm703_vm12, %vm702_vm6  ;;  %v9311_v63 = vsel %vm8278_vm13, 4294967295, %v9310_v63 }
 0x26f   :  { %6655 = vmatpush.bf16.msra.mxu2 %v6450_v5  ;;  %1056 = vmatpush.bf16.msra.mxu0 %v6450_v5 }
 0x273   :  { %6656 = vmatpush.bf16.msra.mxu2 %v6449_v6  ;;  %1057 = vmatpush.bf16.msra.mxu0 %v6449_v6 }
 0x277   :  { %1268 = vmatpush.bf16.msrb.mxu0 %v6464_v13 }
 0x27b   :  { %1269 = vmatpush.bf16.msrb.mxu0 %v6463_v16 }
 0x27c   :  { %5512 = vmatmul.msk.bf16.gmra.mxu1 %vm8278_vm13, %v9187_v3 }
 0x27d   :  { %5480 = vmatmul.msk.bf16.gmra.mxu3 %vm8274_vm14, %v9187_v3 }
 0x27f   :  { %1270 = vmatpush.bf16.msrb.mxu0 %v6462_v20 }
 0x283   :  { %1271 = vmatpush.bf16.msrb.mxu0 %v6461_v26  ;;  %v590_v26 = vld [vmem:[%s9312_s18 + $0x10] sm:$0xff] }
 0x287   :  { %1272 = vmatpush.bf16.msrb.mxu0 %v6460_v34 }
 0x28b   :  { %1273 = vmatpush.bf16.msrb.mxu0 %v6459_v36 }
 0x28f   :  { %1274 = vmatpush.bf16.msrb.mxu0 %v6458_v40 }
 0x293   :  { %1275 = vmatpush.bf16.msrb.mxu0 %v6457_v43  ;;  %v593_v43 = vld [vmem:[%s9312_s18 + $0x28] sm:$0xff] }
 0x299   :  { %v761_v7 = vpop.f32.mrf.mxu0 }
 0x2a1   :  { %v763_v9 = vpop.f32.mrf.mxu0 }
 0x2a2   :  { %v8288_v12 = vpack.c.bf16 %v763_v9, %v761_v7  ;;  %v588_v7 = vld [vmem:[%s9312_s18] sm:$0xff]  ;;  %v589_v9 = vld [vmem:[%s9312_s18 + $0x8] sm:$0xff] }
 0x2a4   :  { %1155 = vmatmul.bf16.vlgmr.msrb.gmra.mxu3 %v8288_v12 }
 0x2a9   :  { %v924_v15 = vpop.f32.mrf.mxu1  ;;  %v766_v19 = vpop.f32.mrf.mxu0 }
 0x2b0   :  { %v771_v21 = vpop.f32.mrf.mxu3 }
 0x2b1   :  { %v926_v22 = vpop.f32.mrf.mxu1  ;;  %v768_v28 = vpop.f32.mrf.mxu0 }
 0x2b2   :  { %v980_v29 = vpack.c.bf16 %v926_v22, %v924_v15  ;;  %v8291_v30 = vpack.c.bf16 %v768_v28, %v766_v19  ;;  %v1196_v15 = vpack.c.bf16 %v589_v9, %v588_v7  ;;  %v591_v28 = vld [vmem:[%s9312_s18 + $0x18] sm:$0xff]  ;;  %v6487_v7 = vld [vmem:[#allocation11 + $0x30] sm:$0xff]  ;;  %v6486_v9 = vld [vmem:[#allocation11 + $0x28] sm:$0xff] }
 0x2b4   :  { %1068 = vmatmul.bf16.vlgmr.msra.gmra.mxu2 %v980_v29  ;;  %1160 = vmatmul.bf16.gmra.mxu3 %v8291_v30  ;;  %v1197_v29 = vpack.c.bf16 %v591_v28, %v590_v26  ;;  %v6484_v26 = vld [vmem:[#allocation11 + $0x18] sm:$0xff]  ;;  %v6470_v28 = vld [vmem:[#allocation8 + $0x28] sm:$0xff] }
 0x2b8   :  { %v773_v35 = vpop.f32.mrf.mxu3 }
 0x2b9   :  { %v914_v37 = vpop.f32.mrf.mxu0  ;;  %v929_v39 = vpop.f32.mrf.mxu1  ;;  %v8294_v51 = vpack.c.bf16 %v773_v35, %v771_v21 }
 0x2c0   :  { %v776_v41 = vpop.f32.mrf.mxu3 }
 0x2c1   :  { %v916_v44 = vpop.f32.mrf.mxu0  ;;  %v931_v48 = vpop.f32.mrf.mxu1 }
 0x2c2   :  { %v978_v47 = vpack.c.bf16 %v916_v44, %v914_v37  ;;  %v981_v52 = vpack.c.bf16 %v931_v48, %v929_v39 }
 0x2c4   :  { %1058 = vmatmul.bf16.vlgmr.msra.gmra.mxu0 %v978_v47  ;;  %1165 = vmatmul.bf16.gmra.mxu3 %v8294_v51 }
 0x2c5   :  { %1073 = vmatmul.bf16.gmra.mxu2 %v981_v52 }
 0x2c8   :  { %v778_v54 = vpop.f32.mrf.mxu3 }
 0x2c9   :  { %v919_v55 = vpop.f32.mrf.mxu0  ;;  %v934_v57 = vpop.f32.mrf.mxu1  ;;  %v8297_v2 = vpack.c.bf16 %v778_v54, %v776_v41  ;;  %v592_v41 = vld [vmem:[%s9312_s18 + $0x20] sm:$0xff] }
 0x2ca   :  { %v1198_v44 = vpack.c.bf16 %v593_v43, %v592_v41  ;;  %v6468_v43 = vld [vmem:[#allocation8 + $0x18] sm:$0xff] }
 0x2d0   :  { %v781_v58 = vpop.f32.mrf.mxu3 }
 0x2d1   :  { %v921_v59 = vpop.f32.mrf.mxu0  ;;  %v936_v62 = vpop.f32.mrf.mxu1 }
 0x2d2   :  { %v979_v0 = vpack.c.bf16 %v921_v59, %v919_v55  ;;  %v982_v4 = vpack.c.bf16 %v936_v62, %v934_v57  ;;  %v594_v55 = vld [vmem:[%s9312_s18 + $0x30] sm:$0xff]  ;;  %v595_v57 = vld [vmem:[%s9312_s18 + $0x38] sm:$0xff] }
 0x2d3   :  { %v1199_v59 = vpack.c.bf16 %v595_v57, %v594_v55 }
 0x2d4   :  { %1063 = vmatmul.bf16.gmra.mxu0 %v979_v0  ;;  %1170 = vmatmul.bf16.gmra.mxu3 %v8297_v2  ;;  %v596_v0 = vld [vmem:[%s9312_s18 + $0x40] sm:$0xff] }
 0x2d5   :  { %1078 = vmatmul.bf16.gmra.mxu2 %v982_v4  ;;  %v597_v4 = vld [vmem:[%s9312_s18 + $0x48] sm:$0xff] }
 0x2d8   :  { %v783_v5 = vpop.f32.mrf.mxu3 }
 0x2d9   :  { %v939_v6 = vpop.f32.mrf.mxu1  ;;  %v8302_v19 = vpack.c.bf16 %v783_v5, %v781_v58  ;;  %v1200_v5 = vpack.c.bf16 %v597_v4, %v596_v0  ;;  %v603_v0 = vld [vmem:[%s9312_s18 + $0x78] sm:$0xff] }
 0x2e0   :  { %v786_v13 = vpop.f32.mrf.mxu3 }
 0x2e1   :  { %v941_v16 = vpop.f32.mrf.mxu1 }
 0x2e2   :  { %v983_v20 = vpack.c.bf16 %v941_v16, %v939_v6  ;;  %v6488_v6 = vld [vmem:[#allocation11 + $0x38] sm:$0xff] }
 0x2e3   :  { %1788 = vmatpush.bf16.msra.mxu0 %v6488_v6 }
 0x2e4   :  { %1175 = vmatmul.bf16.gmra.mxu3 %v8302_v19  ;;  %1276 = vmatmul.bf16.vlgmr.msrb.gmra.mxu0 %v1196_v15  ;;  %v599_v15 = vld [vmem:[%s9312_s18 + $0x58] sm:$0xff] }
 0x2e5   :  { %1083 = vmatmul.bf16.gmra.mxu2 %v983_v20  ;;  %v6472_v20 = vld [vmem:[#allocation8 + $0x38] sm:$0xff] }
 0x2e6   :  { %1429 = vmatpush.bf16.msrb.mxu1 %v6472_v20 }
 0x2e7   :  { %1789 = vmatpush.bf16.msra.mxu0 %v6487_v7 }
 0x2e8   :  { %v788_v21 = vpop.f32.mrf.mxu3 }
 0x2e9   :  { %v944_v22 = vpop.f32.mrf.mxu1  ;;  %v8307_v36 = vpack.c.bf16 %v788_v21, %v786_v13  ;;  %v598_v13 = vld [vmem:[%s9312_s18 + $0x50] sm:$0xff]  ;;  %v6485_v21 = vld [vmem:[#allocation11 + $0x20] sm:$0xff] }
 0x2ea   :  { %v1201_v16 = vpack.c.bf16 %v599_v15, %v598_v13 }
 0x2eb   :  { %1790 = vmatpush.bf16.msra.mxu0 %v6486_v9 }
 0x2ef   :  { %1791 = vmatpush.bf16.msra.mxu0 %v6485_v21 }
 0x2f0   :  { %v791_v34 = vpop.f32.mrf.mxu3 }
 0x2f1   :  { %v946_v35 = vpop.f32.mrf.mxu1 }
 0x2f2   :  { %v984_v37 = vpack.c.bf16 %v946_v35, %v944_v22  ;;  %v6471_v22 = vld [vmem:[#allocation8 + $0x30] sm:$0xff]  ;;  %v6482_v35 = vld [vmem:[#allocation11 + $0x8] sm:$0xff] }
 0x2f3   :  { %1430 = vmatpush.bf16.msrb.mxu1 %v6471_v22  ;;  %1792 = vmatpush.bf16.msra.mxu0 %v6484_v26  ;;  %v8330_v22 = vld [vmem:[%s9313_s22] ss:$0 sm:$0xff] }
 0x2f4   :  { %1180 = vmatmul.bf16.gmra.mxu3 %v8307_v36  ;;  %1281 = vmatmul.bf16.gmra.mxu0 %v1197_v29  ;;  %v6483_v29 = vld [vmem:[#allocation11 + $0x10] sm:$0xff] }
 0x2f5   :  { %1088 = vmatmul.bf16.gmra.mxu2 %v984_v37  ;;  %v600_v37 = vld [vmem:[%s9312_s18 + $0x60] sm:$0xff] }
 0x2f7   :  { %1431 = vmatpush.bf16.msrb.mxu1 %v6470_v28  ;;  %1793 = vmatpush.bf16.msra.mxu0 %v6483_v29 }
 0x2f8   :  { %v793_v40 = vpop.f32.mrf.mxu3 }
 0x2f9   :  { %v949_v39 = vpop.f32.mrf.mxu1  ;;  %v8312_v47 = vpack.c.bf16 %v793_v40, %v791_v34  ;;  %v6469_v34 = vld [vmem:[#allocation8 + $0x20] sm:$0xff] }
 0x2fb   :  { %1432 = vmatpush.bf16.msrb.mxu1 %v6469_v34  ;;  %1794 = vmatpush.bf16.msra.mxu0 %v6482_v35 }
 0x2ff   :  { %1433 = vmatpush.bf16.msrb.mxu1 %v6468_v43 }
 0x300   :  { %v796_v54 = vpop.f32.mrf.mxu3 }
 0x301   :  { %v951_v48 = vpop.f32.mrf.mxu1 }
 0x302   :  { %v985_v52 = vpack.c.bf16 %v951_v48, %v949_v39  ;;  %v601_v39 = vld [vmem:[%s9312_s18 + $0x68] sm:$0xff] }
 0x303   :  { %v1202_v41 = vpack.c.bf16 %v601_v39, %v600_v37 }
 0x304   :  { %1185 = vmatmul.bf16.gmra.mxu3 %v8312_v47  ;;  %1286 = vmatmul.bf16.gmra.mxu0 %v1198_v44  ;;  %v6481_v44 = vld [vmem:[#allocation11] sm:$0xff] }
 0x305   :  { %1093 = vmatmul.bf16.gmra.mxu2 %v985_v52  ;;  %1795 = vmatpush.bf16.msra.mxu0 %v6481_v44  ;;  %v6467_v52 = vld [vmem:[#allocation8 + $0x10] sm:$0xff] }
 0x306   :  { %1434 = vmatpush.bf16.msrb.mxu1 %v6467_v52 }
 0x308   :  { %v798_v58 = vpop.f32.mrf.mxu3 }
 0x309   :  { %v8317_v62 = vpack.c.bf16 %v798_v58, %v796_v54  ;;  %v6466_v54 = vld [vmem:[#allocation8 + $0x8] sm:$0xff]  ;;  %v6465_v58 = vld [vmem:[#allocation8] sm:$0xff] }
 0x30a   :  { %1435 = vmatpush.bf16.msrb.mxu1 %v6466_v54 }
 0x30e   :  { %1436 = vmatpush.bf16.msrb.mxu1 %v6465_v58 }
 0x314   :  { %1190 = vmatmul.bf16.gmra.mxu3 %v8317_v62  ;;  %1291 = vmatmul.bf16.gmra.mxu0 %v1199_v59  ;;  %v602_v59 = vld [vmem:[%s9312_s18 + $0x70] sm:$0xff] }
 0x315   :  { %v1203_v4 = vpack.c.bf16 %v603_v0, %v602_v59 }
 0x324   :  { %1296 = vmatmul.bf16.gmra.mxu0 %v1200_v5 }
 0x327   :  { %v1156_v40 = vpop.f32.mrf.mxu3 }
 0x32f   :  { %v1158_v55 = vpop.f32.mrf.mxu3 }
 0x334   :  { %1301 = vmatmul.bf16.gmra.mxu0 %v1201_v16 }
 0x337   :  { %v1161_v6 = vpop.f32.mrf.mxu3  ;;  %v1069_v26 = vpop.f32.mrf.mxu2 }
 0x33f   :  { %v1163_v9 = vpop.f32.mrf.mxu3  ;;  %v1071_v43 = vpop.f32.mrf.mxu2 }
 0x341   :  { %v1059_v48 = vpop.f32.mrf.mxu0 }
 0x342   :  { %v1157_v15 = vadd.f32 %v1156_v40, %v1059_v48 }
 0x344   :  { %1306 = vmatmul.bf16.gmra.mxu0 %v1202_v41 }
 0x347   :  { %v1166_v16 = vpop.f32.mrf.mxu3 }
 0x348   :  { %v1074_v58 = vpop.f32.mrf.mxu2 }
 0x349   :  { %v1061_v57 = vpop.f32.mrf.mxu0 }
 0x34a   :  { %v1159_v20 = vadd.f32 %v1158_v55, %v1061_v57 }
 0x34f   :  { %v1168_v39 = vpop.f32.mrf.mxu3 }
 0x351   :  { %v1064_v5 = vpop.f32.mrf.mxu0 }
 0x354   :  { %1311 = vmatmul.bf16.gmra.mxu0 %v1203_v4 }
 0x357   :  { %v1171_v54 = vpop.f32.mrf.mxu3 }
 0x359   :  { %v1066_v7 = vpop.f32.mrf.mxu0 }
 0x35a   :  { %v1164_v40 = vadd.f32 %v1163_v9, %v1066_v7 }
 0x35f   :  { %v1173_v4 = vpop.f32.mrf.mxu3 }
 0x361   :  { %v1277_v13 = vpop.f32.mrf.mxu0 }
 0x362   :  { %v1317_v21 = vadd.f32 %v1277_v13, %v1157_v15  ;;  %v1167_v13 = vadd.f32 %v1166_v16, %v1069_v26  ;;  %v1076_v15 = vpop.f32.mrf.mxu2 }
 0x364   :  { %1796 = vmatmul.bf16.vlgmr.msra.gmra.mxu0 %v8288_v12  ;;  %v1337_v34 = vadd.f32 %v8330_v22, %v1317_v21  ;;  %v1162_v12 = vadd.f32 %v1161_v6, %v1064_v5 }
 0x369   :  { %v1279_v28 = vpop.f32.mrf.mxu0 }
 0x36a   :  { %v1318_v29 = vadd.f32 %v1279_v28, %v1159_v20  ;;  %v1176_v28 = vpop.f32.mrf.mxu3 }
 0x36c   :  { %v1338_v35 = vadd.f32 %v8330_v22, %v1318_v29  ;;  %v1079_v29 = vpop.f32.mrf.mxu2 }
 0x36e   :  { %v1353_v37 = vpack.c.bf16 %v1338_v35, %v1337_v34  ;;  %v1172_v35 = vadd.f32 %v1171_v54, %v1074_v58 }
 0x370   :  { %1437 = vmatmul.bf16.vlgmr.msrb.gmra.mxu1 %v1353_v37 }
 0x371   :  { %v1282_v41 = vpop.f32.mrf.mxu0 }
 0x372   :  { %v1319_v44 = vadd.f32 %v1282_v41, %v1162_v12  ;;  %v1178_v16 = vpop.f32.mrf.mxu3 }
 0x374   :  { %1801 = vmatmul.bf16.gmra.mxu0 %v8291_v30  ;;  %v1339_v55 = vadd.f32 %v8330_v22, %v1319_v44  ;;  %v1169_v30 = vadd.f32 %v1168_v39, %v1071_v43  ;;  %v1081_v41 = vpop.f32.mrf.mxu2 }
 0x379   :  { %v1284_v48 = vpop.f32.mrf.mxu0 }
 0x37a   :  { %v1320_v52 = vadd.f32 %v1284_v48, %v1164_v40  ;;  %v1181_v48 = vpop.f32.mrf.mxu3 }
 0x37c   :  { %v1340_v57 = vadd.f32 %v8330_v22, %v1320_v52  ;;  %v1084_v52 = vpop.f32.mrf.mxu2 }
 0x37e   :  { %v1354_v59 = vpack.c.bf16 %v1340_v57, %v1339_v55  ;;  %v1177_v55 = vadd.f32 %v1176_v28, %v1079_v29  ;;  %v6480_v28 = vld [vmem:[#allocation10 + $0x38] sm:$0xff] }
 0x37f   :  { %1554 = vmatpush.bf16.msrb.mxu2 %v6480_v28  ;;  %v6740_v28 = vld [vmem:[%s9314_s12] ss:$0 sm:$0xff] }
 0x380   :  { %1442 = vmatmul.bf16.gmra.mxu1 %v1354_v59 }
 0x381   :  { %v1287_v0 = vpop.f32.mrf.mxu0 }
 0x382   :  { %v1321_v5 = vadd.f32 %v1287_v0, %v1167_v13 }
 0x384   :  { %1806 = vmatmul.bf16.gmra.mxu0 %v8294_v51  ;;  %v1341_v9 = vadd.f32 %v8330_v22, %v1321_v5  ;;  %v1174_v51 = vadd.f32 %v1173_v4, %v1076_v15  ;;  %v1183_v4 = vpop.f32.mrf.mxu3  ;;  %v1086_v15 = vpop.f32.mrf.mxu2  ;;  %v1182_v5 = vadd.f32 %v1181_v48, %v1084_v52 }
 0x389   :  { %v1289_v6 = vpop.f32.mrf.mxu0 }
 0x38a   :  { %v1322_v7 = vadd.f32 %v1289_v6, %v1169_v30 }
 0x38c   :  { %v1342_v20 = vadd.f32 %v8330_v22, %v1322_v7  ;;  %v1186_v6 = vpop.f32.mrf.mxu3 }
 0x38e   :  { %v1355_v21 = vpack.c.bf16 %v1342_v20, %v1341_v9  ;;  %v1089_v9 = vpop.f32.mrf.mxu2 }
 0x390   :  { %1447 = vmatmul.bf16.gmra.mxu1 %v1355_v21 }
 0x391   :  { %v1292_v34 = vpop.f32.mrf.mxu0 }
 0x392   :  { %v1323_v37 = vadd.f32 %v1292_v34, %v1172_v35  ;;  %v6479_v35 = vld [vmem:[#allocation10 + $0x30] sm:$0xff] }
 0x393   :  { %1555 = vmatpush.bf16.msrb.mxu2 %v6479_v35 }
 0x394   :  { %1811 = vmatmul.bf16.gmra.mxu0 %v8297_v2  ;;  %v1343_v43 = vadd.f32 %v8330_v22, %v1323_v37  ;;  %v1179_v2 = vadd.f32 %v1178_v16, %v1081_v41  ;;  %v1188_v37 = vpop.f32.mrf.mxu3  ;;  %v1187_v41 = vadd.f32 %v1186_v6, %v1089_v9 }
 0x399   :  { %v1294_v26 = vpop.f32.mrf.mxu0 }
 0x39a   :  { %v1324_v39 = vadd.f32 %v1294_v26, %v1174_v51  ;;  %v1091_v26 = vpop.f32.mrf.mxu2 }
 0x39c   :  { %v1344_v12 = vadd.f32 %v8330_v22, %v1324_v39  ;;  %v6477_v39 = vld [vmem:[#allocation10 + $0x20] sm:$0xff]  ;;  %v1191_v52 = vpop.f32.mrf.mxu3 }
 0x39e   :  { %v1356_v40 = vpack.c.bf16 %v1344_v12, %v1343_v43  ;;  %v1189_v43 = vadd.f32 %v1188_v37, %v1091_v26 }
 0x3a0   :  { %1452 = vmatmul.bf16.gmra.mxu1 %v1356_v40 }
 0x3a1   :  { %v1297_v44 = vpop.f32.mrf.mxu0 }
 0x3a2   :  { %v1325_v54 = vadd.f32 %v1297_v44, %v1177_v55  ;;  %v6476_v44 = vld [vmem:[#allocation10 + $0x18] sm:$0xff] }
 0x3a4   :  { %1816 = vmatmul.bf16.gmra.mxu0 %v8302_v19  ;;  %v1345_v59 = vadd.f32 %v8330_v22, %v1325_v54  ;;  %v1184_v19 = vadd.f32 %v1183_v4, %v1086_v15  ;;  %v1094_v54 = vpop.f32.mrf.mxu2 }
 0x3a5   :  { %v1192_v4 = vadd.f32 %v1191_v52, %v1094_v54 }
 0x3a9   :  { %v1299_v57 = vpop.f32.mrf.mxu0 }
 0x3aa   :  { %v1326_v58 = vadd.f32 %v1299_v57, %v1179_v2 }
 0x3ac   :  { %v1346_v0 = vadd.f32 %v8330_v22, %v1326_v58  ;;  %v6475_v58 = vld [vmem:[#allocation10 + $0x10] sm:$0xff]  ;;  %v1096_v15 = vpop.f32.mrf.mxu2 }
 0x3ae   :  { %v1357_v13 = vpack.c.bf16 %v1346_v0, %v1345_v59  ;;  %v6474_v59 = vld [vmem:[#allocation10 + $0x8] sm:$0xff]  ;;  %v1193_v0 = vpop.f32.mrf.mxu3 }
 0x3b0   :  { %1457 = vmatmul.bf16.gmra.mxu1 %v1357_v13  ;;  %v6473_v13 = vld [vmem:[#allocation10] sm:$0xff] }
 0x3b1   :  { %v1302_v30 = vpop.f32.mrf.mxu0 }
 0x3b2   :  { %v1327_v7 = vadd.f32 %v1302_v30, %v1182_v5  ;;  %v1194_v30 = vadd.f32 %v1193_v0, %v1096_v15 }
 0x3b4   :  { %1821 = vmatmul.bf16.gmra.mxu0 %v8307_v36  ;;  %v1347_v29 = vadd.f32 %v8330_v22, %v1327_v7  ;;  %v6478_v36 = vld [vmem:[#allocation10 + $0x28] sm:$0xff] }
 0x3b5   :  { %1556 = vmatpush.bf16.msrb.mxu2 %v6478_v36 }
 0x3b9   :  { %v1304_v20 = vpop.f32.mrf.mxu0  ;;  %1557 = vmatpush.bf16.msrb.mxu2 %v6477_v39 }
 0x3ba   :  { %v1328_v21 = vadd.f32 %v1304_v20, %v1184_v19 }
 0x3bc   :  { %v1348_v34 = vadd.f32 %v8330_v22, %v1328_v21 }
 0x3bd   :  { %1558 = vmatpush.bf16.msrb.mxu2 %v6476_v44 }
 0x3be   :  { %v1358_v51 = vpack.c.bf16 %v1348_v34, %v1347_v29 }
 0x3c0   :  { %1462 = vmatmul.bf16.gmra.mxu1 %v1358_v51 }
 0x3c1   :  { %v1307_v16 = vpop.f32.mrf.mxu0  ;;  %1559 = vmatpush.bf16.msrb.mxu2 %v6475_v58 }
 0x3c2   :  { %v1329_v12 = vadd.f32 %v1307_v16, %v1187_v41 }
 0x3c4   :  { %1826 = vmatmul.bf16.gmra.mxu0 %v8312_v47  ;;  %v1349_v55 = vadd.f32 %v8330_v22, %v1329_v12 }
 0x3c5   :  { %1560 = vmatpush.bf16.msrb.mxu2 %v6474_v59 }
 0x3c9   :  { %v1309_v40 = vpop.f32.mrf.mxu0  ;;  %1561 = vmatpush.bf16.msrb.mxu2 %v6473_v13 }
 0x3ca   :  { %v1330_v48 = vadd.f32 %v1309_v40, %v1189_v43 }
 0x3cc   :  { %v1350_v2 = vadd.f32 %v8330_v22, %v1330_v48 }
 0x3ce   :  { %v1359_v57 = vpack.c.bf16 %v1350_v2, %v1349_v55 }
 0x3d0   :  { %1467 = vmatmul.bf16.gmra.mxu1 %v1359_v57 }
 0x3d1   :  { %v1312_v47 = vpop.f32.mrf.mxu0 }
 0x3d2   :  { %v1331_v5 = vadd.f32 %v1312_v47, %v1192_v4 }
 0x3d4   :  { %1831 = vmatmul.bf16.gmra.mxu0 %v8317_v62  ;;  %v1351_v7 = vadd.f32 %v8330_v22, %v1331_v5  ;;  %v6495_v5 = vld [vmem:[#allocation13 + $0x30] sm:$0xff] }
 0x3d9   :  { %v1314_v6 = vpop.f32.mrf.mxu0 }
 0x3da   :  { %v1332_v19 = vadd.f32 %v1314_v6, %v1194_v30  ;;  %v6496_v30 = vld [vmem:[#allocation13 + $0x38] sm:$0xff] }
 0x3db   :  { %1691 = vmatpush.bf16.msra.mxu3 %v6496_v30 }
 0x3dc   :  { %v1352_v9 = vadd.f32 %v8330_v22, %v1332_v19  ;;  %v6494_v19 = vld [vmem:[#allocation13 + $0x28] sm:$0xff] }
 0x3de   :  { %v1360_v20 = vpack.c.bf16 %v1352_v9, %v1351_v7  ;;  %v6493_v7 = vld [vmem:[#allocation13 + $0x20] sm:$0xff] }
 0x3df   :  { %1692 = vmatpush.bf16.msra.mxu3 %v6495_v5 }
 0x3e0   :  { %1472 = vmatmul.bf16.gmra.mxu1 %v1360_v20 }
 0x3e3   :  { %1693 = vmatpush.bf16.msra.mxu3 %v6494_v19 }
 0x3e7   :  { %1694 = vmatpush.bf16.msra.mxu3 %v6493_v7 }
 0x3ed   :  { %v1438_v21 = vpop.f32.mrf.mxu1 }
 0x3ee   :  { %v1439_v29 = vadd.f32 %v6740_v28, %v1438_v21 }
 0x3f5   :  { %v1440_v62 = vpop.f32.mrf.mxu1 }
 0x3f6   :  { %v1441_v34 = vadd.f32 %v6740_v28, %v1440_v62 }
 0x3f8   :  { %v1478_v35 = vpack.c.bf16 %v1441_v34, %v1439_v29  ;;  %v6492_v29 = vld [vmem:[#allocation13 + $0x18] sm:$0xff] }
 0x3f9   :  { %1695 = vmatpush.bf16.msra.mxu3 %v6492_v29 }
 0x3fa   :  { %1562 = vmatmul.bf16.vlgmr.msrb.gmra.mxu2 %v1478_v35  ;;  %v6491_v35 = vld [vmem:[#allocation13 + $0x10] sm:$0xff] }
 0x3fd   :  { %v1443_v51 = vpop.f32.mrf.mxu1  ;;  %1696 = vmatpush.bf16.msra.mxu3 %v6491_v35  ;;  %v6504_v35 = vld [vmem:[#allocation14 + $0x38] sm:$0xff] }
 0x3fe   :  { %v1444_v16 = vadd.f32 %v6740_v28, %v1443_v51  ;;  %v6490_v51 = vld [vmem:[#allocation13 + $0x8] sm:$0xff]  ;;  %1933 = vmatpush.bf16.msra.mxu1 %v6504_v35 }
 0x401   :  { %1697 = vmatpush.bf16.msra.mxu3 %v6490_v51  ;;  %v6503_v51 = vld [vmem:[#allocation14 + $0x30] sm:$0xff] }
 0x402   :  { %1934 = vmatpush.bf16.msra.mxu1 %v6503_v51 }
 0x405   :  { %v1445_v37 = vpop.f32.mrf.mxu1 }
 0x406   :  { %v1446_v36 = vadd.f32 %v6740_v28, %v1445_v37 }
 0x408   :  { %v1479_v26 = vpack.c.bf16 %v1446_v36, %v1444_v16 }
 0x40a   :  { %1567 = vmatmul.bf16.gmra.mxu2 %v1479_v26  ;;  %v6489_v26 = vld [vmem:[#allocation13] sm:$0xff] }
 0x40b   :  { %1698 = vmatpush.bf16.msra.mxu3 %v6489_v26 }
 0x40d   :  { %v1448_v39 = vpop.f32.mrf.mxu1 }
 0x40e   :  { %v1449_v43 = vadd.f32 %v6740_v28, %v1448_v39 }
 0x415   :  { %v1450_v41 = vpop.f32.mrf.mxu1 }
 0x416   :  { %v1451_v12 = vadd.f32 %v6740_v28, %v1450_v41 }
 0x418   :  { %v1480_v22 = vpack.c.bf16 %v1451_v12, %v1449_v43  ;;  %v6741_v43 = vld [vmem:[%s9315_s9] ss:$0 sm:$0xff] }
 0x41a   :  { %1572 = vmatmul.bf16.gmra.mxu2 %v1480_v22 }
 0x41d   :  { %v1453_v40 = vpop.f32.mrf.mxu1 }
 0x41e   :  { %v1454_v48 = vadd.f32 %v6740_v28, %v1453_v40 }
 0x425   :  { %v1455_v44 = vpop.f32.mrf.mxu1 }
 0x426   :  { %v1456_v52 = vadd.f32 %v6740_v28, %v1455_v44 }
 0x428   :  { %v1481_v55 = vpack.c.bf16 %v1456_v52, %v1454_v48 }
 0x42a   :  { %1577 = vmatmul.bf16.gmra.mxu2 %v1481_v55 }
 0x42d   :  { %v1458_v2 = vpop.f32.mrf.mxu1 }
 0x42e   :  { %v1459_v57 = vadd.f32 %v6740_v28, %v1458_v2 }
 0x435   :  { %v1460_v54 = vpop.f32.mrf.mxu1 }
 0x436   :  { %v1461_v58 = vadd.f32 %v6740_v28, %v1460_v54 }
 0x438   :  { %v1482_v47 = vpack.c.bf16 %v1461_v58, %v1459_v57 }
 0x43a   :  { %1582 = vmatmul.bf16.gmra.mxu2 %v1482_v47 }
 0x43d   :  { %v1463_v59 = vpop.f32.mrf.mxu1 }
 0x43e   :  { %v1464_v4 = vadd.f32 %v6740_v28, %v1463_v59 }
 0x445   :  { %v1465_v0 = vpop.f32.mrf.mxu1 }
 0x446   :  { %v1466_v13 = vadd.f32 %v6740_v28, %v1465_v0 }
 0x448   :  { %v1483_v15 = vpack.c.bf16 %v1466_v13, %v1464_v4 }
 0x44a   :  { %1587 = vmatmul.bf16.gmra.mxu2 %v1483_v15 }
 0x44d   :  { %v1468_v6 = vpop.f32.mrf.mxu1 }
 0x44e   :  { %v1469_v20 = vadd.f32 %v6740_v28, %v1468_v6 }
 0x455   :  { %v1470_v9 = vpop.f32.mrf.mxu1 }
 0x456   :  { %v1471_v21 = vadd.f32 %v6740_v28, %v1470_v9 }
 0x458   :  { %v1484_v62 = vpack.c.bf16 %v1471_v21, %v1469_v20 }
 0x45a   :  { %1592 = vmatmul.bf16.gmra.mxu2 %v1484_v62 }
 0x45d   :  { %v1473_v34 = vpop.f32.mrf.mxu1 }
 0x45e   :  { %v1474_v16 = vadd.f32 %v6740_v28, %v1473_v34 }
 0x465   :  { %v1475_v37 = vpop.f32.mrf.mxu1 }
 0x466   :  { %v1476_v36 = vadd.f32 %v6740_v28, %v1475_v37 }
 0x468   :  { %v1485_v39 = vpack.c.bf16 %v1476_v36, %v1474_v16  ;;  %v6502_v16 = vld [vmem:[#allocation14 + $0x28] sm:$0xff]  ;;  %v6501_v36 = vld [vmem:[#allocation14 + $0x20] sm:$0xff] }
 0x469   :  { %1935 = vmatpush.bf16.msra.mxu1 %v6502_v16 }
 0x46a   :  { %1597 = vmatmul.bf16.gmra.mxu2 %v1485_v39 }
 0x46d   :  { %1936 = vmatpush.bf16.msra.mxu1 %v6501_v36 }
 0x47d   :  { %v1563_v41 = vpop.f32.mrf.mxu2 }
 0x47e   :  { %v1564_v22 = vadd.f32 %v6741_v43, %v1563_v41 }
 0x485   :  { %v1565_v12 = vpop.f32.mrf.mxu2 }
 0x486   :  { %v1566_v40 = vadd.f32 %v6741_v43, %v1565_v12 }
 0x488   :  { %v8357_v44 = vpack.c.bf16 %v1566_v40, %v1564_v22  ;;  %v6500_v22 = vld [vmem:[#allocation14 + $0x18] sm:$0xff] }
 0x489   :  { %1937 = vmatpush.bf16.msra.mxu1 %v6500_v22 }
 0x48a   :  { %1699 = vmatmul.bf16.vlgmr.msra.gmra.mxu3 %v8357_v44 }
 0x48d   :  { %v1568_v48 = vpop.f32.mrf.mxu2 }
 0x48e   :  { %v1569_v55 = vadd.f32 %v6741_v43, %v1568_v48  ;;  %v1797_v48 = vpop.f32.mrf.mxu0 }
 0x495   :  { %v1570_v52 = vpop.f32.mrf.mxu2 }
 0x496   :  { %v1571_v2 = vadd.f32 %v6741_v43, %v1570_v52  ;;  %v6499_v52 = vld [vmem:[#allocation14 + $0x10] sm:$0xff] }
 0x497   :  { %1938 = vmatpush.bf16.msra.mxu1 %v6499_v52 }
 0x498   :  { %v8360_v54 = vpack.c.bf16 %v1571_v2, %v1569_v55  ;;  %v6498_v55 = vld [vmem:[#allocation14 + $0x8] sm:$0xff] }
 0x49a   :  { %1704 = vmatmul.bf16.gmra.mxu3 %v8360_v54 }
 0x49b   :  { %1939 = vmatpush.bf16.msra.mxu1 %v6498_v55 }
 0x49d   :  { %v1573_v28 = vpop.f32.mrf.mxu2 }
 0x49e   :  { %v1574_v58 = vadd.f32 %v6741_v43, %v1573_v28 }
 0x4a5   :  { %v1575_v57 = vpop.f32.mrf.mxu2 }
 0x4a6   :  { %v1576_v47 = vadd.f32 %v6741_v43, %v1575_v57 }
 0x4a8   :  { %v8363_v59 = vpack.c.bf16 %v1576_v47, %v1574_v58  ;;  %v6497_v47 = vld [vmem:[#allocation14] sm:$0xff] }
 0x4a9   :  { %1940 = vmatpush.bf16.msra.mxu1 %v6497_v47 }
 0x4aa   :  { %1709 = vmatmul.bf16.gmra.mxu3 %v8363_v59 }
 0x4ad   :  { %v1578_v0 = vpop.f32.mrf.mxu2 }
 0x4ae   :  { %v1579_v13 = vadd.f32 %v6741_v43, %v1578_v0  ;;  %v1799_v0 = vpop.f32.mrf.mxu0 }
 0x4b5   :  { %v1580_v4 = vpop.f32.mrf.mxu2 }
 0x4b6   :  { %v1581_v15 = vadd.f32 %v6741_v43, %v1580_v4  ;;  %v1802_v4 = vpop.f32.mrf.mxu0 }
 0x4b8   :  { %v8366_v30 = vpack.c.bf16 %v1581_v15, %v1579_v13 }
 0x4ba   :  { %1714 = vmatmul.bf16.gmra.mxu3 %v8366_v30 }
 0x4bd   :  { %v1583_v5 = vpop.f32.mrf.mxu2 }
 0x4be   :  { %v1584_v19 = vadd.f32 %v6741_v43, %v1583_v5  ;;  %v1804_v13 = vpop.f32.mrf.mxu0 }
 0x4c5   :  { %v1585_v6 = vpop.f32.mrf.mxu2 }
 0x4c6   :  { %v1586_v7 = vadd.f32 %v6741_v43, %v1585_v6  ;;  %v8382_v6 = vld [vmem:[%s9316_s3] ss:$0 sm:$0xff] }
 0x4c8   :  { %v8369_v9 = vpack.c.bf16 %v1586_v7, %v1584_v19 }
 0x4ca   :  { %1719 = vmatmul.bf16.gmra.mxu3 %v8369_v9 }
 0x4cd   :  { %v1588_v20 = vpop.f32.mrf.mxu2 }
 0x4ce   :  { %v1589_v62 = vadd.f32 %v6741_v43, %v1588_v20  ;;  %v1807_v20 = vpop.f32.mrf.mxu0 }
 0x4d5   :  { %v1590_v21 = vpop.f32.mrf.mxu2 }
 0x4d6   :  { %v1591_v29 = vadd.f32 %v6741_v43, %v1590_v21  ;;  %v1809_v35 = vpop.f32.mrf.mxu0 }
 0x4d8   :  { %v8372_v34 = vpack.c.bf16 %v1591_v29, %v1589_v62 }
 0x4da   :  { %1724 = vmatmul.bf16.gmra.mxu3 %v8372_v34 }
 0x4dd   :  { %v1593_v37 = vpop.f32.mrf.mxu2 }
 0x4de   :  { %v1594_v39 = vadd.f32 %v6741_v43, %v1593_v37 }
 0x4e5   :  { %v1595_v26 = vpop.f32.mrf.mxu2 }
 0x4e6   :  { %v1596_v41 = vadd.f32 %v6741_v43, %v1595_v26 }
 0x4e8   :  { %v8375_v12 = vpack.c.bf16 %v1596_v41, %v1594_v39  ;;  %v1812_v41 = vpop.f32.mrf.mxu0 }
 0x4ea   :  { %1729 = vmatmul.bf16.gmra.mxu3 %v8375_v12 }
 0x4ed   :  { %v1598_v40 = vpop.f32.mrf.mxu2 }
 0x4ee   :  { %v1599_v28 = vadd.f32 %v6741_v43, %v1598_v40 }
 0x4f5   :  { %v1600_v2 = vpop.f32.mrf.mxu2 }
 0x4f6   :  { %v1601_v57 = vadd.f32 %v6741_v43, %v1600_v2 }
 0x4f8   :  { %v8378_v58 = vpack.c.bf16 %v1601_v57, %v1599_v28 }
 0x4fa   :  { %1734 = vmatmul.bf16.gmra.mxu3 %v8378_v58 }
 0x50d   :  { %v1700_v15 = vpop.f32.mrf.mxu3 }
 0x50e   :  { %v1798_v5 = vadd.f32 %v1797_v48, %v1700_v15  ;;  %v1814_v48 = vpop.f32.mrf.mxu0 }
 0x510   :  { %v1841_v21 = vadd.f32 %v8382_v6, %v1798_v5 }
 0x515   :  { %v1702_v19 = vpop.f32.mrf.mxu3 }
 0x516   :  { %v1800_v7 = vadd.f32 %v1799_v0, %v1702_v19  ;;  %v1817_v0 = vpop.f32.mrf.mxu0 }
 0x518   :  { %v1842_v43 = vadd.f32 %v8382_v6, %v1800_v7 }
 0x51a   :  { %v1857_v62 = vpack.c.bf16 %v1842_v43, %v1841_v21 }
 0x51c   :  { %1941 = vmatmul.bf16.vlgmr.msra.gmra.mxu1 %v1857_v62 }
 0x51d   :  { %v1705_v29 = vpop.f32.mrf.mxu3 }
 0x51e   :  { %v1803_v51 = vadd.f32 %v1802_v4, %v1705_v29  ;;  %v1819_v7 = vpop.f32.mrf.mxu0 }
 0x520   :  { %v1843_v36 = vadd.f32 %v8382_v6, %v1803_v51 }
 0x525   :  { %v1707_v37 = vpop.f32.mrf.mxu3 }
 0x526   :  { %v1805_v16 = vadd.f32 %v1804_v13, %v1707_v37  ;;  %v1822_v43 = vpop.f32.mrf.mxu0 }
 0x528   :  { %v1844_v26 = vadd.f32 %v8382_v6, %v1805_v16 }
 0x52a   :  { %v1858_v39 = vpack.c.bf16 %v1844_v26, %v1843_v36 }
 0x52c   :  { %1946 = vmatmul.bf16.gmra.mxu1 %v1858_v39 }
 0x52d   :  { %v1710_v22 = vpop.f32.mrf.mxu3 }
 0x52e   :  { %v1808_v40 = vadd.f32 %v1807_v20, %v1710_v22  ;;  %v1824_v36 = vpop.f32.mrf.mxu0 }
 0x530   :  { %v1845_v2 = vadd.f32 %v8382_v6, %v1808_v40  ;;  %v6512_v40 = vld [vmem:[#allocation16 + $0x38] sm:$0xff] }
 0x531   :  { %2058 = vmatpush.bf16.msra.mxu2 %v6512_v40 }
 0x535   :  { %v1712_v52 = vpop.f32.mrf.mxu3 }
 0x536   :  { %v1810_v55 = vadd.f32 %v1809_v35, %v1712_v52 }
 0x538   :  { %v1846_v28 = vadd.f32 %v8382_v6, %v1810_v55 }
 0x53a   :  { %v1859_v57 = vpack.c.bf16 %v1846_v28, %v1845_v2  ;;  %v6511_v2 = vld [vmem:[#allocation16 + $0x30] sm:$0xff] }
 0x53b   :  { %2059 = vmatpush.bf16.msra.mxu2 %v6511_v2 }
 0x53c   :  { %1951 = vmatmul.bf16.gmra.mxu1 %v1859_v57  ;;  %v6510_v57 = vld [vmem:[#allocation16 + $0x28] sm:$0xff] }
 0x53d   :  { %v1715_v47 = vpop.f32.mrf.mxu3 }
 0x53e   :  { %v1813_v4 = vadd.f32 %v1812_v41, %v1715_v47 }
 0x53f   :  { %2060 = vmatpush.bf16.msra.mxu2 %v6510_v57 }
 0x540   :  { %v1847_v5 = vadd.f32 %v8382_v6, %v1813_v4 }
 0x545   :  { %v1717_v13 = vpop.f32.mrf.mxu3 }
 0x546   :  { %v1815_v15 = vadd.f32 %v1814_v48, %v1717_v13  ;;  %v1827_v48 = vpop.f32.mrf.mxu0 }
 0x548   :  { %v1848_v19 = vadd.f32 %v8382_v6, %v1815_v15  ;;  %v6508_v15 = vld [vmem:[#allocation16 + $0x18] sm:$0xff] }
 0x54a   :  { %v1860_v20 = vpack.c.bf16 %v1848_v19, %v1847_v5 }
 0x54c   :  { %1956 = vmatmul.bf16.gmra.mxu1 %v1860_v20 }
 0x54d   :  { %v1720_v21 = vpop.f32.mrf.mxu3 }
 0x54e   :  { %v1818_v62 = vadd.f32 %v1817_v0, %v1720_v21  ;;  %v6509_v0 = vld [vmem:[#allocation16 + $0x20] sm:$0xff]  ;;  %v1829_v4 = vpop.f32.mrf.mxu0 }
 0x54f   :  { %2061 = vmatpush.bf16.msra.mxu2 %v6509_v0 }
 0x550   :  { %v1849_v51 = vadd.f32 %v8382_v6, %v1818_v62 }
 0x553   :  { %2062 = vmatpush.bf16.msra.mxu2 %v6508_v15 }
 0x555   :  { %v1722_v29 = vpop.f32.mrf.mxu3 }
 0x556   :  { %v1820_v35 = vadd.f32 %v1819_v7, %v1722_v29  ;;  %v1832_v62 = vpop.f32.mrf.mxu0  ;;  %v6506_v29 = vld [vmem:[#allocation16 + $0x8] sm:$0xff] }
 0x558   :  { %v1850_v37 = vadd.f32 %v8382_v6, %v1820_v35 }
 0x55a   :  { %v1861_v16 = vpack.c.bf16 %v1850_v37, %v1849_v51  ;;  %v6505_v51 = vld [vmem:[#allocation16] sm:$0xff] }
 0x55c   :  { %1961 = vmatmul.bf16.gmra.mxu1 %v1861_v16 }
 0x55d   :  { %v1725_v26 = vpop.f32.mrf.mxu3 }
 0x55e   :  { %v1823_v39 = vadd.f32 %v1822_v43, %v1725_v26  ;;  %v6507_v43 = vld [vmem:[#allocation16 + $0x10] sm:$0xff]  ;;  %v1834_v16 = vpop.f32.mrf.mxu0 }
 0x55f   :  { %2063 = vmatpush.bf16.msra.mxu2 %v6507_v43 }
 0x560   :  { %v1851_v52 = vadd.f32 %v8382_v6, %v1823_v39 }
 0x563   :  { %2064 = vmatpush.bf16.msra.mxu2 %v6506_v29 }
 0x565   :  { %v1727_v41 = vpop.f32.mrf.mxu3 }
 0x566   :  { %v1825_v22 = vadd.f32 %v1824_v36, %v1727_v41 }
 0x567   :  { %2065 = vmatpush.bf16.msra.mxu2 %v6505_v51 }
 0x568   :  { %v1852_v55 = vadd.f32 %v8382_v6, %v1825_v22 }
 0x56a   :  { %v1862_v28 = vpack.c.bf16 %v1852_v55, %v1851_v52 }
 0x56c   :  { %1966 = vmatmul.bf16.gmra.mxu1 %v1862_v28 }
 0x56d   :  { %v1730_v47 = vpop.f32.mrf.mxu3 }
 0x56e   :  { %v1828_v13 = vadd.f32 %v1827_v48, %v1730_v47  ;;  %v6743_v48 = vld [vmem:[%s9317_s8] ss:$0 sm:$0xff] }
 0x570   :  { %v1853_v7 = vadd.f32 %v8382_v6, %v1828_v13 }
 0x575   :  { %v1732_v5 = vpop.f32.mrf.mxu3 }
 0x576   :  { %v1830_v19 = vadd.f32 %v1829_v4, %v1732_v5 }
 0x578   :  { %v1854_v20 = vadd.f32 %v8382_v6, %v1830_v19 }
 0x57a   :  { %v1863_v21 = vpack.c.bf16 %v1854_v20, %v1853_v7 }
 0x57c   :  { %1971 = vmatmul.bf16.gmra.mxu1 %v1863_v21 }
 0x57d   :  { %v1735_v35 = vpop.f32.mrf.mxu3 }
 0x57e   :  { %v1833_v37 = vadd.f32 %v1832_v62, %v1735_v35 }
 0x580   :  { %v1855_v39 = vadd.f32 %v8382_v6, %v1833_v37 }
 0x585   :  { %v1737_v36 = vpop.f32.mrf.mxu3 }
 0x586   :  { %v1835_v26 = vadd.f32 %v1834_v16, %v1737_v36 }
 0x588   :  { %v1856_v41 = vadd.f32 %v8382_v6, %v1835_v26 }
 0x58a   :  { %v1864_v22 = vpack.c.bf16 %v1856_v41, %v1855_v39 }
 0x58c   :  { %1976 = vmatmul.bf16.gmra.mxu1 %v1864_v22 }
 0x599   :  { %v1942_v40 = vpop.f32.mrf.mxu1 }
 0x59a   :  { %v1943_v55 = vadd.f32 %v6743_v48, %v1942_v40 }
 0x5a1   :  { %v1944_v52 = vpop.f32.mrf.mxu1 }
 0x5a2   :  { %v1945_v2 = vadd.f32 %v6743_v48, %v1944_v52 }
 0x5a4   :  { %v1982_v28 = vpack.c.bf16 %v1945_v2, %v1943_v55 }
 0x5a6   :  { %2066 = vmatmul.bf16.vlgmr.msra.gmra.mxu2 %v1982_v28 }
 0x5a9   :  { %v1947_v57 = vpop.f32.mrf.mxu1 }
 0x5aa   :  { %v1948_v0 = vadd.f32 %v6743_v48, %v1947_v57 }
 0x5b1   :  { %v1949_v47 = vpop.f32.mrf.mxu1 }
 0x5b2   :  { %v1950_v4 = vadd.f32 %v6743_v48, %v1949_v47 }
 0x5b4   :  { %v1983_v13 = vpack.c.bf16 %v1950_v4, %v1948_v0 }
 0x5b6   :  { %2071 = vmatmul.bf16.gmra.mxu2 %v1983_v13 }
 0x5b9   :  { %v1952_v15 = vpop.f32.mrf.mxu1 }
 0x5ba   :  { %v1953_v19 = vadd.f32 %v6743_v48, %v1952_v15 }
 0x5c1   :  { %v1954_v5 = vpop.f32.mrf.mxu1 }
 0x5c2   :  { %v1955_v7 = vadd.f32 %v6743_v48, %v1954_v5 }
 0x5c4   :  { %v1984_v6 = vpack.c.bf16 %v1955_v7, %v1953_v19 }
 0x5c6   :  { %2076 = vmatmul.bf16.gmra.mxu2 %v1984_v6 }
 0x5c9   :  { %v1957_v20 = vpop.f32.mrf.mxu1 }
 0x5ca   :  { %v1958_v43 = vadd.f32 %v6743_v48, %v1957_v20 }
 0x5d1   :  { %v1959_v21 = vpop.f32.mrf.mxu1 }
 0x5d2   :  { %v1960_v62 = vadd.f32 %v6743_v48, %v1959_v21 }
 0x5d4   :  { %v1985_v29 = vpack.c.bf16 %v1960_v62, %v1958_v43 }
 0x5d6   :  { %2081 = vmatmul.bf16.gmra.mxu2 %v1985_v29 }
 0x5d9   :  { %v1962_v35 = vpop.f32.mrf.mxu1 }
 0x5da   :  { %v1963_v37 = vadd.f32 %v6743_v48, %v1962_v35 }
 0x5e1   :  { %v1964_v51 = vpop.f32.mrf.mxu1 }
 0x5e2   :  { %v1965_v16 = vadd.f32 %v6743_v48, %v1964_v51 }
 0x5e4   :  { %v1986_v36 = vpack.c.bf16 %v1965_v16, %v1963_v37 }
 0x5e6   :  { %2086 = vmatmul.bf16.gmra.mxu2 %v1986_v36 }
 0x5e9   :  { %v1967_v26 = vpop.f32.mrf.mxu1 }
 0x5ea   :  { %v1968_v41 = vadd.f32 %v6743_v48, %v1967_v26 }
 0x5f1   :  { %v1969_v39 = vpop.f32.mrf.mxu1 }
 0x5f2   :  { %v1970_v22 = vadd.f32 %v6743_v48, %v1969_v39  ;;  %v6744_v39 = vld [vmem:[%s9318_s27] ss:$0 sm:$0xff] }
 0x5f4   :  { %v1987_v40 = vpack.c.bf16 %v1970_v22, %v1968_v41 }
 0x5f6   :  { %2091 = vmatmul.bf16.gmra.mxu2 %v1987_v40 }
 0x5f9   :  { %v1972_v52 = vpop.f32.mrf.mxu1 }
 0x5fa   :  { %v1973_v2 = vadd.f32 %v6743_v48, %v1972_v52 }
 0x601   :  { %v1974_v55 = vpop.f32.mrf.mxu1 }
 0x602   :  { %v1975_v28 = vadd.f32 %v6743_v48, %v1974_v55 }
 0x604   :  { %v1988_v57 = vpack.c.bf16 %v1975_v28, %v1973_v2 }
 0x606   :  { %2096 = vmatmul.bf16.gmra.mxu2 %v1988_v57 }
 0x609   :  { %v1977_v47 = vpop.f32.mrf.mxu1 }
 0x60a   :  { %v1978_v4 = vadd.f32 %v6743_v48, %v1977_v47 }
 0x611   :  { %v1979_v0 = vpop.f32.mrf.mxu1 }
 0x612   :  { %v1980_v13 = vadd.f32 %v6743_v48, %v1979_v0 }
 0x614   :  { %v1989_v15 = vpack.c.bf16 %v1980_v13, %v1978_v4 }
 0x616   :  { %2101 = vmatmul.bf16.gmra.mxu2 %v1989_v15 }
 0x629   :  { %v2067_v5 = vpop.f32.mrf.mxu2 }
 0x631   :  { %v2069_v19 = vpop.f32.mrf.mxu2 }
 0x639   :  { %v2072_v7 = vpop.f32.mrf.mxu2 }
 0x641   :  { %v2074_v6 = vpop.f32.mrf.mxu2 }
 0x649   :  { %v2077_v20 = vpop.f32.mrf.mxu2 }
 0x651   :  { %v2079_v21 = vpop.f32.mrf.mxu2 }
 0x652   :  { %v2080_v60 = vadd.f32 %v6744_v39, %v2079_v21 }
 0x659   :  { %v2082_v43 = vpop.f32.mrf.mxu2 }
 0x65a   :  { %v2083_v3 = vadd.f32 %v6744_v39, %v2082_v43  ;;  %v2068_v43 = vadd.f32 %v6744_v39, %v2067_v5 }
 0x661   :  { %v2084_v62 = vpop.f32.mrf.mxu2 }
 0x662   :  { %v2085_v13 = vadd.f32 %v6744_v39, %v2084_v62  ;;  %v2070_v62 = vadd.f32 %v6744_v39, %v2069_v19 }
 0x669   :  { %v2087_v29 = vpop.f32.mrf.mxu2 }
 0x66a   :  { %v2088_v4 = vadd.f32 %v6744_v39, %v2087_v29  ;;  %v8409_v29 = vld [vmem:[%s9319_s26] ss:$0 sm:$0xff] }
 0x671   :  { %v2089_v35 = vpop.f32.mrf.mxu2 }
 0x672   :  { %v2090_v47 = vadd.f32 %v6744_v39, %v2089_v35 }
 0x674   :  { %v2185_v15 = vpack.c.bf16 %v2090_v47, %v2088_v4  ;;  %v8490_v47 = vld [vmem:[#allocation17 + $0x38] sm:$0xff]  ;;  %v8495_v4 = vld [vmem:[#allocation17 + $0x30] sm:$0xff] }
 0x675   :  { %2423 = vmatpush.bf16.msrb.mxu1 %v8490_v47 }
 0x679   :  { %v2092_v51 = vpop.f32.mrf.mxu2  ;;  %2424 = vmatpush.bf16.msrb.mxu1 %v8495_v4 }
 0x67a   :  { %v2093_v57 = vadd.f32 %v6744_v39, %v2092_v51  ;;  %v2073_v51 = vadd.f32 %v6744_v39, %v2072_v7  ;;  %v9326_v7 = vmov 1.0|1.0  }
 0x681   :  { %v2094_v37 = vpop.f32.mrf.mxu2 }
 0x682   :  { %v2095_v2 = vadd.f32 %v6744_v39, %v2094_v37  ;;  %v2075_v37 = vadd.f32 %v6744_v39, %v2074_v6  ;;  %v9329_v6 = vmov 0 }
 0x684   :  { %v2186_v0 = vpack.c.bf16 %v2095_v2, %v2093_v57  ;;  %v9344_v57 = vmov 0 }
 0x689   :  { %v2097_v16 = vpop.f32.mrf.mxu2 }
 0x68a   :  { %v2098_v55 = vadd.f32 %v6744_v39, %v2097_v16 }
 0x691   :  { %v2099_v36 = vpop.f32.mrf.mxu2 }
 0x692   :  { %v2100_v40 = vadd.f32 %v6744_v39, %v2099_v36  ;;  %v9320_v36 = vlaneseq }
 0x694   :  { %v2187_v28 = vpack.c.bf16 %v2100_v40, %v2098_v55  ;;  %v8403_v16 = vshrl.u32 %v9320_v36, 7  ;;  %v9339_v55 = vmov 0  ;;  %v8519_v36 = vld [vmem:[#allocation19 + $0x30] sm:$0xff] }
 0x696   :  { %9321 = vst [vmem:[#allocation86_spill] sm:$0xff] %v8403_v16  ;;  %v8406_v35 = vadd.s32 8, %v8403_v16  ;;  %vm2125_vm6 = vcmp.eq.s32.totalorder %v8409_v29, %v8403_v16  ;;  %v8423_v19 = vadd.s32 16, %v8403_v16  ;;  %v8426_v5 = vadd.s32 24, %v8403_v16 }
 0x697   :  { %v8443_v21 = vadd.s32 40, %v8403_v16  ;;  %v8457_v40 = vadd.s32 48, %v8403_v16  ;;  %v8474_v2 = vadd.s32 64, %v8403_v16 }
 0x698   :  { %9322 = vst [vmem:[#allocation87_spill] sm:$0xff] %v8406_v35  ;;  %vm2126_vm8 = vcmp.eq.s32.totalorder %v8409_v29, %v8406_v35  ;;  %vm2127_vm12 = vcmp.eq.s32.totalorder %v8409_v29, %v8423_v19  ;;  %vm2128_vm13 = vcmp.eq.s32.totalorder %v8409_v29, %v8426_v5 }
 0x699   :  { %v2102_v26 = vpop.f32.mrf.mxu2  ;;  %vm8415_vm10 = vmpackc.low %vm2126_vm8, %vm2125_vm6  ;;  %9327 = vst [vmem:[#allocation89_spill] sm:$0xff] %v8423_v19 }
 0x69a   :  { %v2103_v41 = vadd.f32 %v6744_v39, %v2102_v26  ;;  %v2184_v26 = vpack.c.bf16 %v2085_v13, %v2083_v3  ;;  %v2181_v3 = vpack.c.bf16 %v2070_v62, %v2068_v43  ;;  %9328 = vst [vmem:[#allocation90_spill] sm:$0xff] %v8426_v5  ;;  %vm8432_vm6 = vmpackc.low %vm2128_vm13, %vm2127_vm12  ;;  %vm2131_vm12 = vcmp.eq.s32.totalorder %v8409_v29, %v8457_v40  ;;  %v8537_v43 = vld [vmem:[#allocation19 + $0x20] sm:$0xff] }
 0x69b   :  { %v9330_v6 = vsel %vm8432_vm6, 4294967295, %v9329_v6  ;;  %9333 = vst [vmem:[#allocation93_spill] sm:$0xff] %v8443_v21  ;;  %v8499_v13 = vadd.s32 80, %v8403_v16  ;;  %v8530_v62 = vadd.s32 96, %v8403_v16 }
 0x69c   :  { %9331 = vst [vmem:[#allocation91_spill] sm:$0xff] %v9330_v6 }
 0x69d   :  { %9337 = vst [vmem:[#allocation95_spill] sm:$0xff] %v8457_v40  ;;  %v8572_v40 = vadd.s32 120, %v8403_v16 }
 0x69e   :  { %9342 = vst [vmem:[#allocation98_spill] sm:$0xff] %v8474_v2 }
 0x69f   :  { %9347 = vst [vmem:[#allocation101_spill] sm:$0xff] %v8499_v13 }
 0x6a0   :  { %9353 = vst [vmem:[#allocation105_spill] sm:$0xff] %v8530_v62 }
 0x6a1   :  { %v2104_v48 = vpop.f32.mrf.mxu2  ;;  %9362 = vst [vmem:[#allocation112_spill] sm:$0xff] %v8572_v40 }
 0x6a2   :  { %v2105_v22 = vadd.f32 %v6744_v39, %v2104_v48  ;;  %v2078_v48 = vadd.f32 %v6744_v39, %v2077_v20  ;;  %v8440_v20 = vadd.s32 32, %v8403_v16  ;;  %v9334_v39 = vmov 0 }
 0x6a4   :  { %v2188_v52 = vpack.c.bf16 %v2105_v22, %v2103_v41  ;;  %v2183_v41 = vpack.c.bf16 %v2080_v60, %v2078_v48  ;;  %v2182_v22 = vpack.c.bf16 %v2075_v37, %v2073_v51  ;;  %v9323_v60 = vmov 0  ;;  %9332 = vst [vmem:[#allocation92_spill] sm:$0xff] %v8440_v20  ;;  %v8521_v37 = vld [vmem:[#allocation17 + $0x20] sm:$0xff]  ;;  %v8527_v51 = vld [vmem:[#allocation17 + $0x18] sm:$0xff] }
 0x6a5   :  { %v9324_v60 = vsel %vm8415_vm10, 4294967295, %v9323_v60  ;;  %vm2129_vm8 = vcmp.eq.s32.totalorder %v8409_v29, %v8440_v20  ;;  %v9349_v48 = vmov 0  ;;  %9352 = vst [vmem:[#allocation104_spill] sm:$0xff] %v8527_v51  ;;  %v9363_v20 = vmov 0 }
 0x6a6   :  { %2189 = vmatpush.bf16.msrb.mxu3 %v2188_v52  ;;  %9325 = vst [vmem:[#allocation88_spill] sm:$0xff] %v9324_v60  ;;  %v8460_v52 = vadd.s32 56, %v8403_v16 }
 0x6a8   :  { %9338 = vst [vmem:[#allocation96_spill] sm:$0xff] %v8460_v52 }
 0x6aa   :  { %2190 = vmatpush.bf16.msrb.mxu3 %v2187_v28  ;;  %v8477_v28 = vadd.s32 72, %v8403_v16 }
 0x6ac   :  { %9343 = vst [vmem:[#allocation99_spill] sm:$0xff] %v8477_v28 }
 0x6ae   :  { %2191 = vmatpush.bf16.msrb.mxu3 %v2186_v0  ;;  %v8492_v0 = vld [vmem:[#allocation19 + $0x38] sm:$0xff] }
 0x6af   :  { %2326 = vmatpush.bf16.msrb.mxu0 %v8492_v0 }
 0x6b2   :  { %2192 = vmatpush.bf16.msrb.mxu3 %v2185_v15  ;;  %v8502_v15 = vadd.s32 88, %v8403_v16 }
 0x6b3   :  { %2327 = vmatpush.bf16.msrb.mxu0 %v8519_v36 }
 0x6b4   :  { %9348 = vst [vmem:[#allocation102_spill] sm:$0xff] %v8502_v15 }
 0x6b6   :  { %2193 = vmatpush.bf16.msrb.mxu3 %v2184_v26  ;;  %v8505_v26 = vld [vmem:[#allocation17 + $0x28] sm:$0xff] }
 0x6b7   :  { %2425 = vmatpush.bf16.msrb.mxu1 %v8505_v26 }
 0x6ba   :  { %2194 = vmatpush.bf16.msrb.mxu3 %v2183_v41  ;;  %v8525_v41 = vld [vmem:[#allocation19 + $0x28] sm:$0xff] }
 0x6bb   :  { %2426 = vmatpush.bf16.msrb.mxu1 %v8521_v37  ;;  %2328 = vmatpush.bf16.msrb.mxu0 %v8525_v41 }
 0x6be   :  { %2195 = vmatpush.bf16.msrb.mxu3 %v2182_v22  ;;  %v8533_v22 = vadd.s32 104, %v8403_v16 }
 0x6bf   :  { %2427 = vmatpush.bf16.msrb.mxu1 %v8527_v51  ;;  %2329 = vmatpush.bf16.msrb.mxu0 %v8537_v43 }
 0x6c0   :  { %9354 = vst [vmem:[#allocation106_spill] sm:$0xff] %v8533_v22 }
 0x6c2   :  { %2196 = vmatpush.bf16.msrb.mxu3 %v2181_v3  ;;  %v8539_v3 = vld [vmem:[#allocation17 + $0x10] sm:$0xff] }
 0x6c3   :  { %9355 = vst [vmem:[#allocation107_spill] sm:$0xff] %v8539_v3  ;;  %2428 = vmatpush.bf16.msrb.mxu1 %v8539_v3 }
 0x6c5   :  { %5818 = vmatmul.msk.bf16.vlgmr.msrb.gmra.mxu3 %vm8415_vm10, %v9326_v7  ;;  %vm2130_vm10 = vcmp.eq.s32.totalorder %v8409_v29, %v8443_v21  ;;  %v8580_v21 = vld [vmem:[#allocation19] sm:$0xff] }
 0x6c6   :  { %vm8449_vm13 = vmpackc.low %vm2130_vm10, %vm2129_vm8  ;;  %vm2133_vm8 = vcmp.eq.s32.totalorder %v8409_v29, %v8474_v2  ;;  %v8566_v2 = vld [vmem:[#allocation19 + $0x8] sm:$0xff] }
 0x6c7   :  { %v9335_v39 = vsel %vm8449_vm13, 4294967295, %v9334_v39 }
 0x6c8   :  { %9336 = vst [vmem:[#allocation94_spill] sm:$0xff] %v9335_v39 }
 0x6d5   :  { %5820 = vmatmul.msk.bf16.gmra.mxu3 %vm8432_vm6, %v9326_v7  ;;  %vm2132_vm6 = vcmp.eq.s32.totalorder %v8409_v29, %v8460_v52  ;;  %v8569_v52 = vadd.s32 112, %v8403_v16 }
 0x6d6   :  { %vm8466_vm10 = vmpackc.low %vm2132_vm6, %vm2131_vm12  ;;  %vm2136_vm12 = vcmp.eq.s32.totalorder %v8409_v29, %v8502_v15  ;;  %v8547_v15 = vld [vmem:[#allocation19 + $0x18] sm:$0xff] }
 0x6d7   :  { %v9340_v55 = vsel %vm8466_vm10, 4294967295, %v9339_v55  ;;  %2330 = vmatpush.bf16.msrb.mxu0 %v8547_v15  ;;  %9361 = vst [vmem:[#allocation111_spill] sm:$0xff] %v8569_v52 }
 0x6d8   :  { %9341 = vst [vmem:[#allocation97_spill] sm:$0xff] %v9340_v55  ;;  %v6773_v55 = vld [vmem:[#allocation10 + $0x8] sm:$0xff] }
 0x6e5   :  { %5822 = vmatmul.msk.bf16.gmra.mxu3 %vm8449_vm13, %v9326_v7  ;;  %vm2134_vm13 = vcmp.eq.s32.totalorder %v8409_v29, %v8477_v28  ;;  %v9357_v28 = vmov 0 }
 0x6e6   :  { %vm8483_vm6 = vmpackc.low %vm2134_vm13, %vm2133_vm8  ;;  %vm2135_vm13 = vcmp.eq.s32.totalorder %v8409_v29, %v8499_v13  ;;  %v8549_v13 = vld [vmem:[#allocation17 + $0x8] sm:$0xff] }
 0x6e7   :  { %v9345_v57 = vsel %vm8483_vm6, 4294967295, %v9344_v57  ;;  %vm8512_vm8 = vmpackc.low %vm2136_vm12, %vm2135_vm13  ;;  %vm2137_vm13 = vcmp.eq.s32.totalorder %v8409_v29, %v8530_v62  ;;  %vm2138_vm12 = vcmp.eq.s32.totalorder %v8409_v29, %v8533_v22  ;;  %9356 = vst [vmem:[#allocation108_spill] sm:$0xff] %v8549_v13  ;;  %2429 = vmatpush.bf16.msrb.mxu1 %v8549_v13  ;;  %v8560_v22 = vld [vmem:[#allocation19 + $0x10] sm:$0xff]  ;;  %v8562_v62 = vld [vmem:[#allocation17] sm:$0xff] }
 0x6e8   :  { %9346 = vst [vmem:[#allocation100_spill] sm:$0xff] %v9345_v57  ;;  %v9350_v48 = vsel %vm8512_vm8, 4294967295, %v9349_v48  ;;  %2331 = vmatpush.bf16.msrb.mxu0 %v8560_v22  ;;  %v6768_v57 = vld [vmem:[#allocation10 + $0x30] sm:$0xff] }
 0x6e9   :  { %9351 = vst [vmem:[#allocation103_spill] sm:$0xff] %v9350_v48  ;;  %v6767_v48 = vld [vmem:[#allocation10 + $0x38] sm:$0xff] }
 0x6ea   :  { %9360 = vst [vmem:[#allocation110_spill] sm:$0xff] %v8562_v62 }
 0x6eb   :  { %2430 = vmatpush.bf16.msrb.mxu1 %v8562_v62 }
 0x6ec   :  { %2332 = vmatpush.bf16.msrb.mxu0 %v8566_v2 }
 0x6ee   :  { %2431 = vmatmul.bf16.vlgmr.msrb.gmra.mxu1 %v8127_v56 }
 0x6f0   :  { %2333 = vmatpush.bf16.msrb.mxu0 %v8580_v21 }
 0x6f5   :  { %5824 = vmatmul.msk.bf16.gmra.mxu3 %vm8466_vm10, %v9326_v7 }
 0x6fe   :  { %2436 = vmatmul.bf16.gmra.mxu1 %v8120_v53 }
 0x705   :  { %5826 = vmatmul.msk.bf16.gmra.mxu3 %vm8483_vm6, %v9326_v7 }
 0x70e   :  { %2441 = vmatmul.bf16.gmra.mxu1 %v8113_v50 }
 0x715   :  { %5828 = vmatmul.msk.bf16.gmra.mxu3 %vm8512_vm8, %v9326_v7  ;;  %vm8551_vm8 = vmpackc.low %vm2138_vm12, %vm2137_vm13  ;;  %vm2139_vm13 = vcmp.eq.s32.totalorder %v8409_v29, %v8569_v52  ;;  %vm2140_vm12 = vcmp.eq.s32.totalorder %v8409_v29, %v8572_v40 }
 0x716   :  { %v9358_v28 = vsel %vm8551_vm8, 4294967295, %v9357_v28 }
 0x717   :  { %9359 = vst [vmem:[#allocation109_spill] sm:$0xff] %v9358_v28 }
 0x71e   :  { %2446 = vmatmul.bf16.gmra.mxu1 %v8104_v45 }
 0x725   :  { %5830 = vmatmul.msk.bf16.gmra.mxu3 %vm8551_vm8, %v9326_v7  ;;  %vm8583_vm8 = vmpackc.low %vm2140_vm12, %vm2139_vm13 }
 0x726   :  { %v9364_v20 = vsel %vm8583_vm8, 4294967295, %v9363_v20 }
 0x727   :  { %9365 = vst [vmem:[#allocation113_spill] sm:$0xff] %v9364_v20 }
 0x72e   :  { %2451 = vmatmul.bf16.gmra.mxu1 %v8097_v42 }
 0x735   :  { %5832 = vmatmul.msk.bf16.gmra.mxu3 %vm8583_vm8, %v9326_v7 }
 0x73e   :  { %2456 = vmatmul.bf16.gmra.mxu1 %v8090_v38  ;;  %v6534_v38 = vld [vmem:[#allocation20 + $0x28] sm:$0xff] }
 0x748   :  { %v2198_v56 = vpop.f32.mrf.mxu3 }
 0x74e   :  { %2461 = vmatmul.bf16.gmra.mxu1 %v8081_v33 }
 0x750   :  { %v2200_v52 = vpop.f32.mrf.mxu3 }
 0x751   :  { %v2254_v5 = vpack.c.bf16 %v2200_v52, %v2198_v56 }
 0x753   :  { %2334 = vmatmul.bf16.vlgmr.msrb.gmra.mxu0 %v2254_v5 }
 0x758   :  { %v2203_v29 = vpop.f32.mrf.mxu3 }
 0x75e   :  { %2466 = vmatmul.bf16.gmra.mxu1 %v8071_v27  ;;  %v6530_v27 = vld [vmem:[#allocation20 + $0x8] sm:$0xff] }
 0x760   :  { %v2205_v40 = vpop.f32.mrf.mxu3 }
 0x761   :  { %v2255_v19 = vpack.c.bf16 %v2205_v40, %v2203_v29 }
 0x763   :  { %2339 = vmatmul.bf16.gmra.mxu0 %v2255_v19  ;;  %v6536_v19 = vld [vmem:[#allocation20 + $0x38] sm:$0xff] }
 0x764   :  { %2568 = vmatpush.bf16.msrb.mxu2 %v6536_v19 }
 0x768   :  { %v2208_v35 = vpop.f32.mrf.mxu3 }
 0x770   :  { %v2210_v16 = vpop.f32.mrf.mxu3 }
 0x771   :  { %v2256_v20 = vpack.c.bf16 %v2210_v16, %v2208_v35  ;;  %v6535_v16 = vld [vmem:[#allocation20 + $0x30] sm:$0xff] }
 0x772   :  { %2569 = vmatpush.bf16.msrb.mxu2 %v6535_v16 }
 0x773   :  { %2344 = vmatmul.bf16.gmra.mxu0 %v2256_v20  ;;  %v6533_v20 = vld [vmem:[#allocation20 + $0x20] sm:$0xff] }
 0x776   :  { %2570 = vmatpush.bf16.msrb.mxu2 %v6534_v38  ;;  %v6761_v38 = vld [vmem:[#allocation5 + $0x28] sm:$0xff] }
 0x778   :  { %v2213_v28 = vpop.f32.mrf.mxu3 }
 0x77a   :  { %2571 = vmatpush.bf16.msrb.mxu2 %v6533_v20  ;;  %v6763_v20 = vld [vmem:[#allocation5 + $0x18] sm:$0xff] }
 0x780   :  { %v2215_v53 = vpop.f32.mrf.mxu3 }
 0x781   :  { %v2257_v50 = vpack.c.bf16 %v2215_v53, %v2213_v28  ;;  %v6532_v28 = vld [vmem:[#allocation20 + $0x18] sm:$0xff]  ;;  %v2432_v53 = vpop.f32.mrf.mxu1 }
 0x782   :  { %2572 = vmatpush.bf16.msrb.mxu2 %v6532_v28 }
 0x783   :  { %2349 = vmatmul.bf16.gmra.mxu0 %v2257_v50  ;;  %v6531_v50 = vld [vmem:[#allocation20 + $0x10] sm:$0xff] }
 0x786   :  { %2573 = vmatpush.bf16.msrb.mxu2 %v6531_v50  ;;  %v6765_v50 = vld [vmem:[#allocation5 + $0x8] sm:$0xff] }
 0x788   :  { %v2218_v52 = vpop.f32.mrf.mxu3 }
 0x78a   :  { %2574 = vmatpush.bf16.msrb.mxu2 %v6530_v27 }
 0x790   :  { %v2220_v5 = vpop.f32.mrf.mxu3 }
 0x791   :  { %v2258_v45 = vpack.c.bf16 %v2220_v5, %v2218_v52  ;;  %v6529_v5 = vld [vmem:[#allocation20] sm:$0xff] }
 0x792   :  { %2575 = vmatpush.bf16.msrb.mxu2 %v6529_v5  ;;  %v8598_v5 = vld [vmem:[%s9366_s28] ss:$0 sm:$0xff] }
 0x793   :  { %2354 = vmatmul.bf16.gmra.mxu0 %v2258_v45  ;;  %v2434_v45 = vpop.f32.mrf.mxu1 }
 0x798   :  { %v2223_v40 = vpop.f32.mrf.mxu3 }
 0x79b   :  { %v2437_v16 = vpop.f32.mrf.mxu1 }
 0x7a0   :  { %v2225_v42 = vpop.f32.mrf.mxu3 }
 0x7a1   :  { %v2259_v56 = vpack.c.bf16 %v2225_v42, %v2223_v40  ;;  %v6759_v40 = vld [vmem:[#allocation5 + $0x38] sm:$0xff] }
 0x7a2   :  { %2864 = vmatpush.bf16.msra.mxu2 %v6759_v40 }
 0x7a3   :  { %2359 = vmatmul.bf16.gmra.mxu0 %v2259_v56  ;;  %v6760_v56 = vld [vmem:[#allocation5 + $0x30] sm:$0xff] }
 0x7a6   :  { %2865 = vmatpush.bf16.msra.mxu2 %v6760_v56 }
 0x7a8   :  { %v2228_v35 = vpop.f32.mrf.mxu3 }
 0x7aa   :  { %2866 = vmatpush.bf16.msra.mxu2 %v6761_v38 }
 0x7b0   :  { %v2230_v33 = vpop.f32.mrf.mxu3 }
 0x7b1   :  { %v2260_v29 = vpack.c.bf16 %v2230_v33, %v2228_v35  ;;  %v6762_v35 = vld [vmem:[#allocation5 + $0x20] sm:$0xff]  ;;  %v2439_v33 = vpop.f32.mrf.mxu1 }
 0x7b2   :  { %2867 = vmatpush.bf16.msra.mxu2 %v6762_v35 }
 0x7b3   :  { %2364 = vmatmul.bf16.gmra.mxu0 %v2260_v29  ;;  %v6764_v29 = vld [vmem:[#allocation5 + $0x10] sm:$0xff] }
 0x7b6   :  { %2868 = vmatpush.bf16.msra.mxu2 %v6763_v20 }
 0x7b8   :  { %v2233_v52 = vpop.f32.mrf.mxu3 }
 0x7ba   :  { %2869 = vmatpush.bf16.msra.mxu2 %v6764_v29 }
 0x7be   :  { %2870 = vmatpush.bf16.msra.mxu2 %v6765_v50  ;;  %v6769_v50 = vld [vmem:[#allocation10 + $0x28] sm:$0xff] }
 0x7c0   :  { %v2235_v19 = vpop.f32.mrf.mxu3 }
 0x7c1   :  { %v2261_v42 = vpack.c.bf16 %v2235_v19, %v2233_v52  ;;  %v2442_v19 = vpop.f32.mrf.mxu1 }
 0x7c3   :  { %2369 = vmatmul.bf16.gmra.mxu0 %v2261_v42  ;;  %v6766_v42 = vld [vmem:[#allocation5] sm:$0xff] }
 0x7c4   :  { %2871 = vmatpush.bf16.msra.mxu2 %v6766_v42 }
 0x7c9   :  { %v2444_v29 = vpop.f32.mrf.mxu1 }
 0x7d0   :  { %v2335_v28 = vpop.f32.mrf.mxu0 }
 0x7d1   :  { %v2433_v27 = vadd.f32 %v2432_v53, %v2335_v28 }
 0x7d3   :  { %v2476_v56 = vadd.f32 %v8598_v5, %v2433_v27  ;;  %v6770_v27 = vld [vmem:[#allocation10 + $0x20] sm:$0xff] }
 0x7d8   :  { %v2337_v52 = vpop.f32.mrf.mxu0 }
 0x7d9   :  { %v2435_v40 = vadd.f32 %v2434_v45, %v2337_v52 }
 0x7db   :  { %v2477_v38 = vadd.f32 %v8598_v5, %v2435_v40 }
 0x7dd   :  { %v2492_v35 = vpack.c.bf16 %v2477_v38, %v2476_v56  ;;  %v2447_v56 = vpop.f32.mrf.mxu1 }
 0x7df   :  { %2576 = vmatmul.bf16.vlgmr.msrb.gmra.mxu2 %v2492_v35  ;;  %v6771_v35 = vld [vmem:[#allocation10 + $0x18] sm:$0xff] }
 0x7e0   :  { %v2340_v20 = vpop.f32.mrf.mxu0  ;;  %3108 = vmatpush.bf16.msrb.mxu2 %v6767_v48  ;;  %v6772_v48 = vld [vmem:[#allocation10 + $0x10] sm:$0xff] }
 0x7e1   :  { %v2438_v53 = vadd.f32 %v2437_v16, %v2340_v20 }
 0x7e3   :  { %v2478_v52 = vadd.f32 %v8598_v5, %v2438_v53 }
 0x7e4   :  { %3109 = vmatpush.bf16.msrb.mxu2 %v6768_v57 }
 0x7e5   :  { %v2449_v20 = vpop.f32.mrf.mxu1 }
 0x7e8   :  { %v2342_v28 = vpop.f32.mrf.mxu0  ;;  %3110 = vmatpush.bf16.msrb.mxu2 %v6769_v50  ;;  %v6774_v50 = vld [vmem:[#allocation10] sm:$0xff] }
 0x7e9   :  { %v2440_v45 = vadd.f32 %v2439_v33, %v2342_v28 }
 0x7eb   :  { %v2479_v42 = vadd.f32 %v8598_v5, %v2440_v45 }
 0x7ec   :  { %3111 = vmatpush.bf16.msrb.mxu2 %v6770_v27 }
 0x7ed   :  { %v2493_v40 = vpack.c.bf16 %v2479_v42, %v2478_v52  ;;  %v2452_v42 = vpop.f32.mrf.mxu1 }
 0x7ef   :  { %2581 = vmatmul.bf16.gmra.mxu2 %v2493_v40 }
 0x7f0   :  { %v2345_v38 = vpop.f32.mrf.mxu0  ;;  %3112 = vmatpush.bf16.msrb.mxu2 %v6771_v35 }
 0x7f1   :  { %v2443_v57 = vadd.f32 %v2442_v19, %v2345_v38 }
 0x7f3   :  { %v2480_v53 = vadd.f32 %v8598_v5, %v2443_v57 }
 0x7f4   :  { %3113 = vmatpush.bf16.msrb.mxu2 %v6772_v48 }
 0x7f5   :  { %v2454_v48 = vpop.f32.mrf.mxu1 }
 0x7f8   :  { %v2347_v16 = vpop.f32.mrf.mxu0  ;;  %3114 = vmatpush.bf16.msrb.mxu2 %v6773_v55 }
 0x7f9   :  { %v2445_v33 = vadd.f32 %v2444_v29, %v2347_v16 }
 0x7fb   :  { %v2481_v28 = vadd.f32 %v8598_v5, %v2445_v33 }
 0x7fc   :  { %3115 = vmatpush.bf16.msrb.mxu2 %v6774_v50 }
 0x7fd   :  { %v2494_v45 = vpack.c.bf16 %v2481_v28, %v2480_v53  ;;  %v2457_v57 = vpop.f32.mrf.mxu1 }
 0x7ff   :  { %2586 = vmatmul.bf16.gmra.mxu2 %v2494_v45 }
 0x800   :  { %v2350_v52 = vpop.f32.mrf.mxu0 }
 0x801   :  { %v2448_v27 = vadd.f32 %v2447_v56, %v2350_v52 }
 0x803   :  { %v2482_v19 = vadd.f32 %v8598_v5, %v2448_v27 }
 0x808   :  { %v2352_v40 = vpop.f32.mrf.mxu0 }
 0x809   :  { %v2450_v35 = vadd.f32 %v2449_v20, %v2352_v40  ;;  %v2459_v20 = vpop.f32.mrf.mxu1 }
 0x80b   :  { %v2483_v38 = vadd.f32 %v8598_v5, %v2450_v35 }
 0x80d   :  { %v2495_v55 = vpack.c.bf16 %v2483_v38, %v2482_v19 }
 0x80f   :  { %2591 = vmatmul.bf16.gmra.mxu2 %v2495_v55  ;;  %v6543_v55 = vld [vmem:[#allocation22 + $0x30] sm:$0xff] }
 0x810   :  { %v2355_v29 = vpop.f32.mrf.mxu0 }
 0x811   :  { %v2453_v16 = vadd.f32 %v2452_v42, %v2355_v29  ;;  %v2462_v40 = vpop.f32.mrf.mxu1  ;;  %v6544_v42 = vld [vmem:[#allocation22 + $0x38] sm:$0xff] }
 0x812   :  { %2693 = vmatpush.bf16.msra.mxu3 %v6544_v42 }
 0x813   :  { %v2484_v53 = vadd.f32 %v8598_v5, %v2453_v16 }
 0x816   :  { %2694 = vmatpush.bf16.msra.mxu3 %v6543_v55 }
 0x818   :  { %v2357_v33 = vpop.f32.mrf.mxu0 }
 0x819   :  { %v2455_v39 = vadd.f32 %v2454_v48, %v2357_v33  ;;  %v2464_v29 = vpop.f32.mrf.mxu1 }
 0x81b   :  { %v2485_v28 = vadd.f32 %v8598_v5, %v2455_v39  ;;  %v6542_v39 = vld [vmem:[#allocation22 + $0x28] sm:$0xff] }
 0x81c   :  { %2695 = vmatpush.bf16.msra.mxu3 %v6542_v39 }
 0x81d   :  { %v2496_v50 = vpack.c.bf16 %v2485_v28, %v2484_v53 }
 0x81f   :  { %2596 = vmatmul.bf16.gmra.mxu2 %v2496_v50 }
 0x820   :  { %v2360_v56 = vpop.f32.mrf.mxu0 }
 0x821   :  { %v2458_v45 = vadd.f32 %v2457_v57, %v2360_v56  ;;  %v6541_v57 = vld [vmem:[#allocation22 + $0x20] sm:$0xff] }
 0x822   :  { %2696 = vmatpush.bf16.msra.mxu3 %v6541_v57  ;;  %v6778_v57 = vld [vmem:[#allocation2 + $0x20] sm:$0xff] }
 0x823   :  { %v2486_v35 = vadd.f32 %v8598_v5, %v2458_v45  ;;  %v2467_v45 = vpop.f32.mrf.mxu1 }
 0x828   :  { %v2362_v52 = vpop.f32.mrf.mxu0 }
 0x829   :  { %v2460_v27 = vadd.f32 %v2459_v20, %v2362_v52  ;;  %v6540_v20 = vld [vmem:[#allocation22 + $0x18] sm:$0xff] }
 0x82a   :  { %2697 = vmatpush.bf16.msra.mxu3 %v6540_v20  ;;  %v6781_v20 = vld [vmem:[#allocation2 + $0x8] sm:$0xff] }
 0x82b   :  { %v2487_v19 = vadd.f32 %v8598_v5, %v2460_v27  ;;  %v6539_v27 = vld [vmem:[#allocation22 + $0x10] sm:$0xff] }
 0x82d   :  { %v2497_v38 = vpack.c.bf16 %v2487_v19, %v2486_v35  ;;  %v6538_v35 = vld [vmem:[#allocation22 + $0x8] sm:$0xff] }
 0x82e   :  { %2698 = vmatpush.bf16.msra.mxu3 %v6539_v27 }
 0x82f   :  { %2601 = vmatmul.bf16.gmra.mxu2 %v2497_v38 }
 0x830   :  { %v2365_v48 = vpop.f32.mrf.mxu0 }
 0x831   :  { %v2463_v16 = vadd.f32 %v2462_v40, %v2365_v48  ;;  %v2469_v40 = vpop.f32.mrf.mxu1 }
 0x832   :  { %2699 = vmatpush.bf16.msra.mxu3 %v6538_v35 }
 0x833   :  { %v2488_v28 = vadd.f32 %v8598_v5, %v2463_v16  ;;  %v6775_v16 = vld [vmem:[#allocation2 + $0x38] sm:$0xff] }
 0x838   :  { %v2367_v33 = vpop.f32.mrf.mxu0 }
 0x839   :  { %v2465_v53 = vadd.f32 %v2464_v29, %v2367_v33  ;;  %v6537_v29 = vld [vmem:[#allocation22] sm:$0xff]  ;;  %v6776_v33 = vld [vmem:[#allocation2 + $0x30] sm:$0xff] }
 0x83a   :  { %2700 = vmatpush.bf16.msra.mxu3 %v6537_v29 }
 0x83b   :  { %v2489_v50 = vadd.f32 %v8598_v5, %v2465_v53  ;;  %v6777_v53 = vld [vmem:[#allocation2 + $0x28] sm:$0xff] }
 0x83d   :  { %v2498_v56 = vpack.c.bf16 %v2489_v50, %v2488_v28  ;;  %v6779_v28 = vld [vmem:[#allocation2 + $0x18] sm:$0xff] }
 0x83e   :  { %2913 = vmatpush.bf16.msrb.mxu3 %v6775_v16  ;;  %v6786_v16 = vld [vmem:[#allocation13 + $0x20] sm:$0xff] }
 0x83f   :  { %2606 = vmatmul.bf16.gmra.mxu2 %v2498_v56  ;;  %v6780_v56 = vld [vmem:[#allocation2 + $0x10] sm:$0xff] }
 0x840   :  { %v2370_v52 = vpop.f32.mrf.mxu0 }
 0x841   :  { %v2468_v19 = vadd.f32 %v2467_v45, %v2370_v52  ;;  %v6782_v52 = vld [vmem:[#allocation2] sm:$0xff] }
 0x842   :  { %2914 = vmatpush.bf16.msrb.mxu3 %v6776_v33 }
 0x843   :  { %v2490_v48 = vadd.f32 %v8598_v5, %v2468_v19 }
 0x846   :  { %2915 = vmatpush.bf16.msrb.mxu3 %v6777_v53  ;;  %v6787_v53 = vld [vmem:[#allocation13 + $0x18] sm:$0xff] }
 0x848   :  { %v2372_v38 = vpop.f32.mrf.mxu0 }
 0x849   :  { %v2470_v42 = vadd.f32 %v2469_v40, %v2372_v38  ;;  %v6783_v40 = vld [vmem:[#allocation13 + $0x38] sm:$0xff] }
 0x84a   :  { %2916 = vmatpush.bf16.msrb.mxu3 %v6778_v57 }
 0x84b   :  { %v2491_v55 = vadd.f32 %v8598_v5, %v2470_v42  ;;  %v8617_v5 = vld [vmem:[%s9367_s23] ss:$0 sm:$0xff]  ;;  %v6784_v42 = vld [vmem:[#allocation13 + $0x30] sm:$0xff] }
 0x84d   :  { %v2499_v39 = vpack.c.bf16 %v2491_v55, %v2490_v48  ;;  %v6785_v48 = vld [vmem:[#allocation13 + $0x28] sm:$0xff] }
 0x84e   :  { %2917 = vmatpush.bf16.msrb.mxu3 %v6779_v28  ;;  %v6788_v28 = vld [vmem:[#allocation13 + $0x10] sm:$0xff] }
 0x84f   :  { %2611 = vmatmul.bf16.gmra.mxu2 %v2499_v39 }
 0x852   :  { %2918 = vmatpush.bf16.msrb.mxu3 %v6780_v56 }
 0x856   :  { %2919 = vmatpush.bf16.msrb.mxu3 %v6781_v20 }
 0x85a   :  { %2920 = vmatpush.bf16.msrb.mxu3 %v6782_v52  ;;  %v6790_v52 = vld [vmem:[#allocation13] sm:$0xff] }
 0x862   :  { %v2577_v50 = vpop.f32.mrf.mxu2 }
 0x863   :  { %v2578_v27 = vadd.f32 %v8617_v5, %v2577_v50  ;;  %v6789_v50 = vld [vmem:[#allocation13 + $0x8] sm:$0xff] }
 0x86a   :  { %v2579_v45 = vpop.f32.mrf.mxu2 }
 0x86b   :  { %v2580_v35 = vadd.f32 %v8617_v5, %v2579_v45 }
 0x86d   :  { %v2617_v19 = vpack.c.bf16 %v2580_v35, %v2578_v27 }
 0x86f   :  { %2701 = vmatmul.bf16.vlgmr.msra.gmra.mxu3 %v2617_v19 }
 0x870   :  { %3165 = vmatpush.bf16.msra.mxu3 %v6783_v40 }
 0x872   :  { %v2582_v38 = vpop.f32.mrf.mxu2 }
 0x873   :  { %v2583_v29 = vadd.f32 %v8617_v5, %v2582_v38 }
 0x874   :  { %3166 = vmatpush.bf16.msra.mxu3 %v6784_v42 }
 0x878   :  { %3167 = vmatpush.bf16.msra.mxu3 %v6785_v48 }
 0x87a   :  { %v2584_v55 = vpop.f32.mrf.mxu2 }
 0x87b   :  { %v2585_v39 = vadd.f32 %v8617_v5, %v2584_v55 }
 0x87c   :  { %3168 = vmatpush.bf16.msra.mxu3 %v6786_v16 }
 0x87d   :  { %v2618_v33 = vpack.c.bf16 %v2585_v39, %v2583_v29 }
 0x87f   :  { %2706 = vmatmul.bf16.gmra.mxu3 %v2618_v33 }
 0x880   :  { %3169 = vmatpush.bf16.msra.mxu3 %v6787_v53 }
 0x882   :  { %v2587_v57 = vpop.f32.mrf.mxu2 }
 0x883   :  { %v2588_v20 = vadd.f32 %v8617_v5, %v2587_v57 }
 0x884   :  { %3170 = vmatpush.bf16.msra.mxu3 %v6788_v28 }
 0x888   :  { %3171 = vmatpush.bf16.msra.mxu3 %v6789_v50 }
 0x88a   :  { %v2589_v56 = vpop.f32.mrf.mxu2 }
 0x88b   :  { %v2590_v45 = vadd.f32 %v8617_v5, %v2589_v56 }
 0x88c   :  { %3172 = vmatpush.bf16.msra.mxu3 %v6790_v52 }
 0x88d   :  { %v2619_v27 = vpack.c.bf16 %v2590_v45, %v2588_v20 }
 0x88f   :  { %2711 = vmatmul.bf16.gmra.mxu3 %v2619_v27 }
 0x892   :  { %v2592_v35 = vpop.f32.mrf.mxu2 }
 0x893   :  { %v2593_v40 = vadd.f32 %v8617_v5, %v2592_v35 }
 0x89a   :  { %v2594_v19 = vpop.f32.mrf.mxu2 }
 0x89b   :  { %v2595_v38 = vadd.f32 %v8617_v5, %v2594_v19 }
 0x89d   :  { %v2620_v42 = vpack.c.bf16 %v2595_v38, %v2593_v40 }
 0x89f   :  { %2716 = vmatmul.bf16.gmra.mxu3 %v2620_v42 }
 0x8a2   :  { %v2597_v48 = vpop.f32.mrf.mxu2 }
 0x8a3   :  { %v2598_v29 = vadd.f32 %v8617_v5, %v2597_v48 }
 0x8aa   :  { %v2599_v55 = vpop.f32.mrf.mxu2 }
 0x8ab   :  { %v2600_v39 = vadd.f32 %v8617_v5, %v2599_v55 }
 0x8ad   :  { %v2621_v16 = vpack.c.bf16 %v2600_v39, %v2598_v29 }
 0x8af   :  { %2721 = vmatmul.bf16.gmra.mxu3 %v2621_v16 }
 0x8b2   :  { %v2602_v33 = vpop.f32.mrf.mxu2 }
 0x8b3   :  { %v2603_v57 = vadd.f32 %v8617_v5, %v2602_v33 }
 0x8ba   :  { %v2604_v53 = vpop.f32.mrf.mxu2 }
 0x8bb   :  { %v2605_v28 = vadd.f32 %v8617_v5, %v2604_v53 }
 0x8bd   :  { %v2622_v50 = vpack.c.bf16 %v2605_v28, %v2603_v57 }
 0x8bf   :  { %2726 = vmatmul.bf16.gmra.mxu3 %v2622_v50 }
 0x8c2   :  { %v2607_v56 = vpop.f32.mrf.mxu2 }
 0x8c3   :  { %v2608_v45 = vadd.f32 %v8617_v5, %v2607_v56 }
 0x8ca   :  { %v2609_v20 = vpop.f32.mrf.mxu2 }
 0x8cb   :  { %v2610_v52 = vadd.f32 %v8617_v5, %v2609_v20 }
 0x8cd   :  { %v2623_v27 = vpack.c.bf16 %v2610_v52, %v2608_v45 }
 0x8cf   :  { %2731 = vmatmul.bf16.gmra.mxu3 %v2623_v27 }
 0x8d2   :  { %v2612_v35 = vpop.f32.mrf.mxu2 }
 0x8d3   :  { %v2613_v40 = vadd.f32 %v8617_v5, %v2612_v35  ;;  %v6748_v35 = vld [vmem:[%s9368_s13] ss:$0 sm:$0xff] }
 0x8da   :  { %v2614_v19 = vpop.f32.mrf.mxu2 }
 0x8db   :  { %v2615_v38 = vadd.f32 %v8617_v5, %v2614_v19 }
 0x8dd   :  { %v2624_v42 = vpack.c.bf16 %v2615_v38, %v2613_v40 }
 0x8df   :  { %2736 = vmatmul.bf16.gmra.mxu3 %v2624_v42 }
 0x8f2   :  { %v2702_v48 = vpop.f32.mrf.mxu3 }
 0x8fa   :  { %v2704_v55 = vpop.f32.mrf.mxu3 }
 0x902   :  { %v2707_v29 = vpop.f32.mrf.mxu3 }
 0x90a   :  { %v2709_v39 = vpop.f32.mrf.mxu3 }
 0x912   :  { %v2712_v16 = vpop.f32.mrf.mxu3 }
 0x91a   :  { %v2714_v33 = vpop.f32.mrf.mxu3 }
 0x922   :  { %v2717_v53 = vpop.f32.mrf.mxu3 }
 0x92a   :  { %v2719_v57 = vpop.f32.mrf.mxu3 }
 0x932   :  { %v2722_v28 = vpop.f32.mrf.mxu3 }
 0x93a   :  { %v2724_v50 = vpop.f32.mrf.mxu3 }
 0x93b   :  { %v2725_v3 = vadd.f32 %v6748_v35, %v2724_v50  ;;  %v6796_v50 = vld [vmem:[#allocation8 + $0x28] sm:$0xff] }
 0x942   :  { %v2727_v56 = vpop.f32.mrf.mxu3 }
 0x943   :  { %v2728_v13 = vadd.f32 %v6748_v35, %v2727_v56 }
 0x94a   :  { %v2729_v20 = vpop.f32.mrf.mxu3 }
 0x94b   :  { %v2730_v60 = vadd.f32 %v6748_v35, %v2729_v20  ;;  %v2713_v20 = vadd.f32 %v6748_v35, %v2712_v16 }
 0x94d   :  { %v8644_v51 = vpack.c.bf16 %v2730_v60, %v2728_v13  ;;  %v2710_v60 = vadd.f32 %v6748_v35, %v2709_v39  ;;  %v6791_v39 = vld [vmem:[#allocation7 + $0x38] sm:$0xff] }
 0x952   :  { %v2732_v45 = vpop.f32.mrf.mxu3 }
 0x953   :  { %v2733_v6 = vadd.f32 %v6748_v35, %v2732_v45  ;;  %v2720_v45 = vadd.f32 %v6748_v35, %v2719_v57  ;;  %v2703_v57 = vadd.f32 %v6748_v35, %v2702_v48  ;;  %v6793_v48 = vld [vmem:[#allocation7 + $0x30] sm:$0xff] }
 0x95a   :  { %v2734_v52 = vpop.f32.mrf.mxu3 }
 0x95b   :  { %v2735_v38 = vadd.f32 %v6748_v35, %v2734_v52 }
 0x95d   :  { %v8640_v62 = vpack.c.bf16 %v2735_v38, %v2733_v6  ;;  %v2715_v6 = vadd.f32 %v6748_v35, %v2714_v33  ;;  %v6795_v33 = vld [vmem:[#allocation7 + $0x28] sm:$0xff]  ;;  %v6800_v38 = vld [vmem:[#allocation8 + $0x18] sm:$0xff] }
 0x95f   :  { %v8656_v13 = vpack.c.bf16 %v2715_v6, %v2713_v20  ;;  %v6805_v6 = vld [vmem:[#allocation7] sm:$0xff] }
 0x960   :  { %v6806_v20 = vld [vmem:[#allocation8] sm:$0xff] }
 0x962   :  { %v2737_v27 = vpop.f32.mrf.mxu3 }
 0x963   :  { %v2738_v19 = vadd.f32 %v6748_v35, %v2737_v27  ;;  %v2723_v27 = vadd.f32 %v6748_v35, %v2722_v28  ;;  %v2708_v28 = vadd.f32 %v6748_v35, %v2707_v29  ;;  %v6792_v29 = vld [vmem:[#allocation8 + $0x38] sm:$0xff] }
 0x965   :  { %v8648_v52 = vpack.c.bf16 %v2725_v3, %v2723_v27  ;;  %v2705_v3 = vadd.f32 %v6748_v35, %v2704_v55  ;;  %v6794_v55 = vld [vmem:[#allocation8 + $0x30] sm:$0xff] }
 0x966   :  { %v6802_v27 = vld [vmem:[#allocation8 + $0x10] sm:$0xff] }
 0x967   :  { %v8664_v16 = vpack.c.bf16 %v2705_v3, %v2703_v57  ;;  %v6809_v3 = vld [vmem:[#allocation11 + $0x30] sm:$0xff]  ;;  %v6811_v57 = vld [vmem:[#allocation11 + $0x28] sm:$0xff] }
 0x96a   :  { %v2739_v5 = vpop.f32.mrf.mxu3 }
 0x96b   :  { %v2740_v40 = vadd.f32 %v6748_v35, %v2739_v5  ;;  %v2718_v5 = vadd.f32 %v6748_v35, %v2717_v53  ;;  %v8660_v53 = vpack.c.bf16 %v2710_v60, %v2708_v28  ;;  %v6797_v35 = vld [vmem:[#allocation7 + $0x20] sm:$0xff]  ;;  %v6807_v60 = vld [vmem:[#allocation11 + $0x38] sm:$0xff] }
 0x96c   :  { %v6808_v28 = vld [vmem:[#allocation14 + $0x38] sm:$0xff] }
 0x96d   :  { %v8636_v42 = vpack.c.bf16 %v2740_v40, %v2738_v19  ;;  %v8652_v56 = vpack.c.bf16 %v2720_v45, %v2718_v5  ;;  %v6798_v19 = vld [vmem:[#allocation8 + $0x20] sm:$0xff]  ;;  %v6799_v40 = vld [vmem:[#allocation7 + $0x18] sm:$0xff]  ;;  %v6803_v45 = vld [vmem:[#allocation7 + $0x8] sm:$0xff] }
 0x96e   :  { %v6804_v5 = vld [vmem:[#allocation8 + $0x8] sm:$0xff] }
 0x96f   :  { %2750 = vmatpush.bf16.msra.mxu0 %v8636_v42  ;;  %2799 = vmatpush.bf16.msra.mxu1 %v8636_v42 }
 0x973   :  { %2751 = vmatpush.bf16.msra.mxu0 %v8640_v62  ;;  %2800 = vmatpush.bf16.msra.mxu1 %v8640_v62 }
 0x977   :  { %2752 = vmatpush.bf16.msra.mxu0 %v8644_v51  ;;  %2801 = vmatpush.bf16.msra.mxu1 %v8644_v51 }
 0x97b   :  { %2753 = vmatpush.bf16.msra.mxu0 %v8648_v52  ;;  %2802 = vmatpush.bf16.msra.mxu1 %v8648_v52 }
 0x97f   :  { %2754 = vmatpush.bf16.msra.mxu0 %v8652_v56  ;;  %2803 = vmatpush.bf16.msra.mxu1 %v8652_v56 }
 0x983   :  { %2755 = vmatpush.bf16.msra.mxu0 %v8656_v13  ;;  %2804 = vmatpush.bf16.msra.mxu1 %v8656_v13 }
 0x987   :  { %2756 = vmatpush.bf16.msra.mxu0 %v8660_v53  ;;  %2805 = vmatpush.bf16.msra.mxu1 %v8660_v53 }
 0x98b   :  { %2757 = vmatpush.bf16.msra.mxu0 %v8664_v16  ;;  %2806 = vmatpush.bf16.msra.mxu1 %v8664_v16 }
 0x98e   :  { %5962 = vmatmul.msk.bf16.vlgmr.msra.gmra.mxu0 %vm8146_vm2, %v9326_v7  ;;  %5978 = vmatmul.msk.bf16.vlgmr.msra.gmra.mxu1 %vm8184_vm0, %v9326_v7  ;;  %vm9370_vm0 = vnez %v9303_v32 }
 0x98f   :  { %2962 = vmatpush.bf16.msrb.mxu0 %v6791_v39  ;;  %3051 = vmatpush.bf16.msrb.mxu1 %v6792_v29  ;;  %v6812_v39 = vld [vmem:[#allocation14 + $0x28] sm:$0xff]  ;;  %v6813_v29 = vld [vmem:[#allocation11 + $0x20] sm:$0xff] }
 0x993   :  { %2963 = vmatpush.bf16.msrb.mxu0 %v6793_v48  ;;  %3052 = vmatpush.bf16.msrb.mxu1 %v6794_v55  ;;  %v6814_v48 = vld [vmem:[#allocation14 + $0x20] sm:$0xff]  ;;  %v6815_v55 = vld [vmem:[#allocation11 + $0x18] sm:$0xff] }
 0x997   :  { %2964 = vmatpush.bf16.msrb.mxu0 %v6795_v33  ;;  %3053 = vmatpush.bf16.msrb.mxu1 %v6796_v50  ;;  %v6816_v33 = vld [vmem:[#allocation14 + $0x18] sm:$0xff]  ;;  %v6817_v50 = vld [vmem:[#allocation11 + $0x10] sm:$0xff] }
 0x99b   :  { %2965 = vmatpush.bf16.msrb.mxu0 %v6797_v35  ;;  %3054 = vmatpush.bf16.msrb.mxu1 %v6798_v19  ;;  %v6818_v35 = vld [vmem:[#allocation14 + $0x10] sm:$0xff]  ;;  %v6820_v19 = vld [vmem:[#allocation14 + $0x8] sm:$0xff] }
 0x99e   :  { %5964 = vmatmul.msk.bf16.gmra.mxu0 %vm8157_vm7, %v9326_v7  ;;  %5980 = vmatmul.msk.bf16.gmra.mxu1 %vm8213_vm15, %v9326_v7  ;;  %vm9372_vm15 = vnez %v9307_v49 }
 0x99f   :  { %2966 = vmatpush.bf16.msrb.mxu0 %v6799_v40  ;;  %3055 = vmatpush.bf16.msrb.mxu1 %v6800_v38  ;;  %v6821_v40 = vld [vmem:[#allocation11] sm:$0xff] }
 0x9a0   :  { %v6822_v38 = vld [vmem:[#allocation14] sm:$0xff] }
 0x9a3   :  { %2967 = vmatpush.bf16.msrb.mxu0 %v6801_v14  ;;  %3056 = vmatpush.bf16.msrb.mxu1 %v6802_v27 }
 0x9a7   :  { %2968 = vmatpush.bf16.msrb.mxu0 %v6803_v45  ;;  %3057 = vmatpush.bf16.msrb.mxu1 %v6804_v5  ;;  %v6823_v45 = vld [vmem:[#allocation16 + $0x38] sm:$0xff] }
 0x9ab   :  { %2969 = vmatpush.bf16.msrb.mxu0 %v6805_v6  ;;  %3058 = vmatpush.bf16.msrb.mxu1 %v6806_v20  ;;  %v6824_v6 = vld [vmem:[#allocation16 + $0x30] sm:$0xff]  ;;  %v6826_v20 = vld [vmem:[#allocation16 + $0x20] sm:$0xff] }
 0x9ae   :  { %5966 = vmatmul.msk.bf16.gmra.mxu0 %vm8167_vm11, %v9326_v7  ;;  %5982 = vmatmul.msk.bf16.gmra.mxu1 %vm8162_vm9, %v9326_v7  ;;  %vm9369_vm9 = vnez %v9301_v31 }
 0x9af   :  { %3214 = vmatpush.bf16.msra.mxu0 %v6807_v60  ;;  %3287 = vmatpush.bf16.msra.mxu1 %v6808_v28  ;;  %v6827_v28 = vld [vmem:[#allocation16 + $0x18] sm:$0xff] }
 0x9b3   :  { %3215 = vmatpush.bf16.msra.mxu0 %v6809_v3  ;;  %3288 = vmatpush.bf16.msra.mxu1 %v6810_v23  ;;  %v6828_v3 = vld [vmem:[#allocation16 + $0x10] sm:$0xff] }
 0x9b7   :  { %3216 = vmatpush.bf16.msra.mxu0 %v6811_v57  ;;  %3289 = vmatpush.bf16.msra.mxu1 %v6812_v39  ;;  %v6830_v57 = vld [vmem:[#allocation16] sm:$0xff] }
 0x9bb   :  { %3217 = vmatpush.bf16.msra.mxu0 %v6813_v29  ;;  %3290 = vmatpush.bf16.msra.mxu1 %v6814_v48 }
 0x9be   :  { %5968 = vmatmul.msk.bf16.gmra.mxu0 %vm8189_vm3, %v9326_v7  ;;  %5984 = vmatmul.msk.bf16.gmra.mxu1 %vm8194_vm5, %v9326_v7  ;;  %vm9371_vm5 = vnez %v9305_v46 }
 0x9bf   :  { %3218 = vmatpush.bf16.msra.mxu0 %v6815_v55  ;;  %3291 = vmatpush.bf16.msra.mxu1 %v6816_v33 }
 0x9c3   :  { %3219 = vmatpush.bf16.msra.mxu0 %v6817_v50  ;;  %3292 = vmatpush.bf16.msra.mxu1 %v6818_v35 }
 0x9c7   :  { %3220 = vmatpush.bf16.msra.mxu0 %v6819_v10  ;;  %3293 = vmatpush.bf16.msra.mxu1 %v6820_v19 }
 0x9cb   :  { %3221 = vmatpush.bf16.msra.mxu0 %v6821_v40  ;;  %3294 = vmatpush.bf16.msra.mxu1 %v6822_v38 }
 0x9ce   :  { %5970 = vmatmul.msk.bf16.gmra.mxu0 %vm8217_vm1, %v9326_v7  ;;  %5986 = vmatmul.msk.bf16.gmra.mxu1 %vm8221_vm4, %v9326_v7  ;;  %vm9373_vm4 = vnez %v9311_v63 }
 0x9de   :  { %5972 = vmatmul.msk.bf16.gmra.mxu0 %vm9369_vm9, %v9326_v7  ;;  %5988 = vmatmul.msk.bf16.gmra.mxu1 %vm9370_vm0, %v9326_v7 }
 0x9ee   :  { %5974 = vmatmul.msk.bf16.gmra.mxu0 %vm9371_vm5, %v9326_v7  ;;  %5990 = vmatmul.msk.bf16.gmra.mxu1 %vm9372_vm15, %v9326_v7 }
 0x9fe   :  { %5976 = vmatmul.msk.bf16.gmra.mxu0 %vm8274_vm14, %v9326_v7  ;;  %5992 = vmatmul.msk.bf16.gmra.mxu1 %vm9373_vm4, %v9326_v7 }
 0xa0b   :  { %v2759_v18 = vpop.f32.mrf.mxu0  ;;  %v2808_v25 = vpop.f32.mrf.mxu1 }
 0xa0e   :  { %2970 = vmatmul.bf16.vlgmr.msrb.gmra.mxu0 %v8357_v44  ;;  %v6825_v44 = vld [vmem:[#allocation16 + $0x28] sm:$0xff] }
 0xa0f   :  { %3458 = vmatpush.bf16.msrb.mxu0 %v8492_v0 }
 0xa13   :  { %v2761_v32 = vpop.f32.mrf.mxu0  ;;  %v2810_v14 = vpop.f32.mrf.mxu1  ;;  %3459 = vmatpush.bf16.msrb.mxu0 %v8519_v36 }
 0xa14   :  { %v8719_v49 = vpack.c.bf16 %v2761_v32, %v2759_v18  ;;  %v2856_v27 = vpack.c.bf16 %v2810_v14, %v2808_v25 }
 0xa16   :  { %2872 = vmatmul.bf16.vlgmr.msra.gmra.mxu2 %v2856_v27  ;;  %2921 = vmatmul.bf16.vlgmr.msrb.gmra.mxu3 %v8719_v49 }
 0xa17   :  { %3344 = vmatpush.bf16.msra.mxu2 %v6823_v45  ;;  %3460 = vmatpush.bf16.msrb.mxu0 %v8525_v41 }
 0xa1b   :  { %v2764_v63 = vpop.f32.mrf.mxu0  ;;  %v2813_v5 = vpop.f32.mrf.mxu1  ;;  %3345 = vmatpush.bf16.msra.mxu2 %v6824_v6  ;;  %3461 = vmatpush.bf16.msrb.mxu0 %v8537_v43 }
 0xa1e   :  { %2975 = vmatmul.bf16.gmra.mxu0 %v8360_v54 }
 0xa1f   :  { %3346 = vmatpush.bf16.msra.mxu2 %v6825_v44  ;;  %3462 = vmatpush.bf16.msrb.mxu0 %v8547_v15  ;;  %v6829_v15 = vld [vmem:[#allocation16 + $0x8] sm:$0xff] }
 0xa23   :  { %v2766_v0 = vpop.f32.mrf.mxu0  ;;  %v2815_v36 = vpop.f32.mrf.mxu1  ;;  %3347 = vmatpush.bf16.msra.mxu2 %v6826_v20  ;;  %3463 = vmatpush.bf16.msrb.mxu0 %v8560_v22 }
 0xa24   :  { %v8727_v60 = vpack.c.bf16 %v2766_v0, %v2764_v63  ;;  %v2857_v41 = vpack.c.bf16 %v2815_v36, %v2813_v5 }
 0xa26   :  { %2877 = vmatmul.bf16.gmra.mxu2 %v2857_v41  ;;  %2926 = vmatmul.bf16.gmra.mxu3 %v8727_v60 }
 0xa27   :  { %3348 = vmatpush.bf16.msra.mxu2 %v6827_v28  ;;  %3464 = vmatpush.bf16.msrb.mxu0 %v8566_v2 }
 0xa2b   :  { %v2769_v54 = vpop.f32.mrf.mxu0  ;;  %v2818_v43 = vpop.f32.mrf.mxu1  ;;  %3349 = vmatpush.bf16.msra.mxu2 %v6828_v3  ;;  %3465 = vmatpush.bf16.msrb.mxu0 %v8580_v21 }
 0xa2e   :  { %2980 = vmatmul.bf16.gmra.mxu0 %v8363_v59 }
 0xa2f   :  { %3350 = vmatpush.bf16.msra.mxu2 %v6829_v15 }
 0xa33   :  { %v2771_v22 = vpop.f32.mrf.mxu0  ;;  %v2820_v23 = vpop.f32.mrf.mxu1  ;;  %3351 = vmatpush.bf16.msra.mxu2 %v6830_v57 }
 0xa34   :  { %v8733_v39 = vpack.c.bf16 %v2771_v22, %v2769_v54  ;;  %v2858_v29 = vpack.c.bf16 %v2820_v23, %v2818_v43 }
 0xa36   :  { %2882 = vmatmul.bf16.gmra.mxu2 %v2858_v29  ;;  %2931 = vmatmul.bf16.gmra.mxu3 %v8733_v39 }
 0xa3b   :  { %v2774_v2 = vpop.f32.mrf.mxu0  ;;  %v2823_v48 = vpop.f32.mrf.mxu1 }
 0xa3e   :  { %2985 = vmatmul.bf16.gmra.mxu0 %v8366_v30 }
 0xa43   :  { %v2776_v55 = vpop.f32.mrf.mxu0  ;;  %v2825_v21 = vpop.f32.mrf.mxu1 }
 0xa44   :  { %v8737_v33 = vpack.c.bf16 %v2776_v55, %v2774_v2  ;;  %v2859_v59 = vpack.c.bf16 %v2825_v21, %v2823_v48  ;;  %v8759_v55 = vld [vmem:[%s9313_s22] ss:$0 sm:$0xff] }
 0xa46   :  { %2887 = vmatmul.bf16.gmra.mxu2 %v2859_v59  ;;  %2936 = vmatmul.bf16.gmra.mxu3 %v8737_v33 }
 0xa4b   :  { %v2779_v50 = vpop.f32.mrf.mxu0  ;;  %v2828_v35 = vpop.f32.mrf.mxu1 }
 0xa4e   :  { %2990 = vmatmul.bf16.gmra.mxu0 %v8369_v9 }
 0xa53   :  { %v2781_v10 = vpop.f32.mrf.mxu0  ;;  %v2830_v19 = vpop.f32.mrf.mxu1 }
 0xa54   :  { %v8741_v40 = vpack.c.bf16 %v2781_v10, %v2779_v50  ;;  %v2860_v38 = vpack.c.bf16 %v2830_v19, %v2828_v35 }
 0xa56   :  { %2892 = vmatmul.bf16.gmra.mxu2 %v2860_v38  ;;  %2941 = vmatmul.bf16.gmra.mxu3 %v8741_v40 }
 0xa5b   :  { %v2784_v30 = vpop.f32.mrf.mxu0  ;;  %v2833_v18 = vpop.f32.mrf.mxu1 }
 0xa5e   :  { %2995 = vmatmul.bf16.gmra.mxu0 %v8372_v34 }
 0xa63   :  { %v2786_v25 = vpop.f32.mrf.mxu0  ;;  %v2835_v32 = vpop.f32.mrf.mxu1 }
 0xa64   :  { %v8745_v14 = vpack.c.bf16 %v2786_v25, %v2784_v30  ;;  %v2861_v27 = vpack.c.bf16 %v2835_v32, %v2833_v18 }
 0xa66   :  { %2897 = vmatmul.bf16.gmra.mxu2 %v2861_v27  ;;  %2946 = vmatmul.bf16.gmra.mxu3 %v8745_v14 }
 0xa6b   :  { %v2789_v9 = vpop.f32.mrf.mxu0  ;;  %v2838_v45 = vpop.f32.mrf.mxu1 }
 0xa6e   :  { %3000 = vmatmul.bf16.gmra.mxu0 %v8375_v12 }
 0xa73   :  { %v2791_v63 = vpop.f32.mrf.mxu0  ;;  %v2840_v5 = vpop.f32.mrf.mxu1 }
 0xa74   :  { %v8749_v6 = vpack.c.bf16 %v2791_v63, %v2789_v9  ;;  %v2862_v44 = vpack.c.bf16 %v2840_v5, %v2838_v45 }
 0xa76   :  { %2902 = vmatmul.bf16.gmra.mxu2 %v2862_v44  ;;  %2951 = vmatmul.bf16.gmra.mxu3 %v8749_v6  ;;  %v9375_v44 = vld [vmem:[#allocation107_spill] sm:$0xff] }
 0xa7b   :  { %v2794_v34 = vpop.f32.mrf.mxu0  ;;  %v2843_v0 = vpop.f32.mrf.mxu1 }
 0xa7e   :  { %3005 = vmatmul.bf16.gmra.mxu0 %v8378_v58 }
 0xa83   :  { %v2796_v36 = vpop.f32.mrf.mxu0  ;;  %v2845_v20 = vpop.f32.mrf.mxu1 }
 0xa84   :  { %v8753_v41 = vpack.c.bf16 %v2796_v36, %v2794_v34  ;;  %v2863_v28 = vpack.c.bf16 %v2845_v20, %v2843_v0 }
 0xa86   :  { %2907 = vmatmul.bf16.gmra.mxu2 %v2863_v28  ;;  %2956 = vmatmul.bf16.gmra.mxu3 %v8753_v41  ;;  %v9376_v28 = vld [vmem:[#allocation108_spill] sm:$0xff] }
 0xa8b   :  { %v2971_v12 = vpop.f32.mrf.mxu0 }
 0xa8e   :  { %3222 = vmatmul.bf16.vlgmr.msra.gmra.mxu0 %v8719_v49 }
 0xa93   :  { %v2973_v54 = vpop.f32.mrf.mxu0 }
 0xa99   :  { %v2873_v43 = vpop.f32.mrf.mxu2  ;;  %v2922_v3 = vpop.f32.mrf.mxu3 }
 0xa9a   :  { %v2923_v22 = vadd.f32 %v2922_v3, %v2873_v43  ;;  %v9377_v43 = vld [vmem:[#allocation110_spill] sm:$0xff] }
 0xa9b   :  { %v2976_v15 = vpop.f32.mrf.mxu0 }
 0xa9c   :  { %v3011_v57 = vadd.f32 %v2971_v12, %v2923_v22 }
 0xa9e   :  { %3227 = vmatmul.bf16.gmra.mxu0 %v8727_v60  ;;  %v3027_v21 = vadd.f32 %v8759_v55, %v3011_v57 }
 0xaa1   :  { %v2875_v58 = vpop.f32.mrf.mxu2  ;;  %v2924_v23 = vpop.f32.mrf.mxu3 }
 0xaa2   :  { %v2925_v29 = vadd.f32 %v2924_v23, %v2875_v58 }
 0xaa3   :  { %v2978_v2 = vpop.f32.mrf.mxu0 }
 0xaa4   :  { %v3012_v48 = vadd.f32 %v2973_v54, %v2925_v29 }
 0xaa6   :  { %v3028_v59 = vadd.f32 %v8759_v55, %v3012_v48 }
 0xaa8   :  { %v3043_v49 = vpack.c.bf16 %v3028_v59, %v3027_v21 }
 0xaa9   :  { %v2878_v50 = vpop.f32.mrf.mxu2  ;;  %v2927_v35 = vpop.f32.mrf.mxu3 }
 0xaaa   :  { %3059 = vmatmul.bf16.vlgmr.msrb.gmra.mxu1 %v3043_v49  ;;  %v2928_v60 = vadd.f32 %v2927_v35, %v2878_v50 }
 0xaab   :  { %v2981_v10 = vpop.f32.mrf.mxu0  ;;  %3507 = vmatpush.bf16.msrb.mxu1 %v8490_v47 }
 0xaac   :  { %v3013_v30 = vadd.f32 %v2976_v15, %v2928_v60 }
 0xaae   :  { %3232 = vmatmul.bf16.gmra.mxu0 %v8733_v39  ;;  %v3029_v27 = vadd.f32 %v8759_v55, %v3013_v30 }
 0xaaf   :  { %3508 = vmatpush.bf16.msrb.mxu1 %v8495_v4  ;;  %v9374_v4 = vld [vmem:[#allocation104_spill] sm:$0xff] }
 0xab1   :  { %v2880_v19 = vpop.f32.mrf.mxu2  ;;  %v2929_v38 = vpop.f32.mrf.mxu3 }
 0xab2   :  { %v2930_v18 = vadd.f32 %v2929_v38, %v2880_v19 }
 0xab3   :  { %v2983_v25 = vpop.f32.mrf.mxu0  ;;  %3509 = vmatpush.bf16.msrb.mxu1 %v8505_v26 }
 0xab4   :  { %v3014_v32 = vadd.f32 %v2978_v2, %v2930_v18 }
 0xab6   :  { %v3030_v9 = vadd.f32 %v8759_v55, %v3014_v32 }
 0xab7   :  { %3510 = vmatpush.bf16.msrb.mxu1 %v8521_v37 }
 0xab8   :  { %v3044_v47 = vpack.c.bf16 %v3030_v9, %v3029_v27 }
 0xab9   :  { %v2883_v45 = vpop.f32.mrf.mxu2  ;;  %v2932_v63 = vpop.f32.mrf.mxu3 }
 0xaba   :  { %3064 = vmatmul.bf16.gmra.mxu1 %v3044_v47  ;;  %v2933_v5 = vadd.f32 %v2932_v63, %v2883_v45 }
 0xabb   :  { %v2986_v39 = vpop.f32.mrf.mxu0  ;;  %3511 = vmatpush.bf16.msrb.mxu1 %v9374_v4 }
 0xabc   :  { %v3015_v0 = vadd.f32 %v2981_v10, %v2933_v5 }
 0xabe   :  { %3237 = vmatmul.bf16.gmra.mxu0 %v8737_v33  ;;  %v3031_v12 = vadd.f32 %v8759_v55, %v3015_v0 }
 0xabf   :  { %3512 = vmatpush.bf16.msrb.mxu1 %v9375_v44 }
 0xac1   :  { %v2885_v26 = vpop.f32.mrf.mxu2  ;;  %v2934_v34 = vpop.f32.mrf.mxu3 }
 0xac2   :  { %v2935_v36 = vadd.f32 %v2934_v34, %v2885_v26 }
 0xac3   :  { %v2988_v20 = vpop.f32.mrf.mxu0  ;;  %3513 = vmatpush.bf16.msrb.mxu1 %v9376_v28 }
 0xac4   :  { %v3016_v37 = vadd.f32 %v2983_v25, %v2935_v36 }
 0xac6   :  { %v3032_v54 = vadd.f32 %v8759_v55, %v3016_v37 }
 0xac7   :  { %3514 = vmatpush.bf16.msrb.mxu1 %v9377_v43 }
 0xac8   :  { %v3045_v3 = vpack.c.bf16 %v3032_v54, %v3031_v12 }
 0xac9   :  { %v2888_v15 = vpop.f32.mrf.mxu2  ;;  %v2937_v22 = vpop.f32.mrf.mxu3 }
 0xaca   :  { %3069 = vmatmul.bf16.gmra.mxu1 %v3045_v3  ;;  %v2938_v58 = vadd.f32 %v2937_v22, %v2888_v15 }
 0xacb   :  { %v2991_v33 = vpop.f32.mrf.mxu0 }
 0xacc   :  { %v3017_v29 = vadd.f32 %v2986_v39, %v2938_v58 }
 0xace   :  { %3242 = vmatmul.bf16.gmra.mxu0 %v8741_v40  ;;  %v3033_v21 = vadd.f32 %v8759_v55, %v3017_v29 }
 0xad1   :  { %v2890_v23 = vpop.f32.mrf.mxu2  ;;  %v2939_v57 = vpop.f32.mrf.mxu3 }
 0xad2   :  { %v2940_v2 = vadd.f32 %v2939_v57, %v2890_v23 }
 0xad3   :  { %v2993_v49 = vpop.f32.mrf.mxu0 }
 0xad4   :  { %v3018_v48 = vadd.f32 %v2988_v20, %v2940_v2 }
 0xad6   :  { %v3034_v59 = vadd.f32 %v8759_v55, %v3018_v48 }
 0xad8   :  { %v3046_v50 = vpack.c.bf16 %v3034_v59, %v3033_v21 }
 0xad9   :  { %v2893_v35 = vpop.f32.mrf.mxu2  ;;  %v2942_v10 = vpop.f32.mrf.mxu3 }
 0xada   :  { %3074 = vmatmul.bf16.gmra.mxu1 %v3046_v50  ;;  %v2943_v60 = vadd.f32 %v2942_v10, %v2893_v35 }
 0xadb   :  { %v2996_v19 = vpop.f32.mrf.mxu0 }
 0xadc   :  { %v3019_v30 = vadd.f32 %v2991_v33, %v2943_v60 }
 0xade   :  { %3247 = vmatmul.bf16.gmra.mxu0 %v8745_v14  ;;  %v3035_v32 = vadd.f32 %v8759_v55, %v3019_v30  ;;  %v6832_v30 = vld [vmem:[%s9314_s12] ss:$0 sm:$0xff] }
 0xae1   :  { %v2895_v38 = vpop.f32.mrf.mxu2  ;;  %v2944_v40 = vpop.f32.mrf.mxu3 }
 0xae2   :  { %v2945_v18 = vadd.f32 %v2944_v40, %v2895_v38 }
 0xae3   :  { %v2998_v63 = vpop.f32.mrf.mxu0 }
 0xae4   :  { %v3020_v25 = vadd.f32 %v2993_v49, %v2945_v18 }
 0xae6   :  { %v3036_v27 = vadd.f32 %v8759_v55, %v3020_v25 }
 0xae8   :  { %v3047_v9 = vpack.c.bf16 %v3036_v27, %v3035_v32  ;;  %v6833_v27 = vld [vmem:[#allocation20 + $0x38] sm:$0xff] }
 0xae9   :  { %v2898_v47 = vpop.f32.mrf.mxu2  ;;  %v2947_v45 = vpop.f32.mrf.mxu3 }
 0xaea   :  { %3079 = vmatmul.bf16.gmra.mxu1 %v3047_v9  ;;  %v2948_v39 = vadd.f32 %v2947_v45, %v2898_v47  ;;  %v6834_v47 = vld [vmem:[#allocation20 + $0x30] sm:$0xff]  ;;  %v6835_v45 = vld [vmem:[#allocation20 + $0x28] sm:$0xff] }
 0xaeb   :  { %v3001_v26 = vpop.f32.mrf.mxu0 }
 0xaec   :  { %v3021_v5 = vadd.f32 %v2996_v19, %v2948_v39 }
 0xaee   :  { %3252 = vmatmul.bf16.gmra.mxu0 %v8749_v6  ;;  %v3037_v0 = vadd.f32 %v8759_v55, %v3021_v5  ;;  %v6837_v5 = vld [vmem:[#allocation20 + $0x18] sm:$0xff] }
 0xaf1   :  { %v2900_v4 = vpop.f32.mrf.mxu2  ;;  %v2949_v14 = vpop.f32.mrf.mxu3 }
 0xaf2   :  { %v2950_v44 = vadd.f32 %v2949_v14, %v2900_v4 }
 0xaf3   :  { %v3003_v12 = vpop.f32.mrf.mxu0 }
 0xaf4   :  { %v3022_v34 = vadd.f32 %v2998_v63, %v2950_v44 }
 0xaf6   :  { %v3038_v36 = vadd.f32 %v8759_v55, %v3022_v34  ;;  %v6839_v34 = vld [vmem:[#allocation20 + $0x8] sm:$0xff] }
 0xaf8   :  { %v3048_v20 = vpack.c.bf16 %v3038_v36, %v3037_v0 }
 0xaf9   :  { %v2903_v28 = vpop.f32.mrf.mxu2  ;;  %v2952_v37 = vpop.f32.mrf.mxu3 }
 0xafa   :  { %3084 = vmatmul.bf16.gmra.mxu1 %v3048_v20  ;;  %v2953_v54 = vadd.f32 %v2952_v37, %v2903_v28  ;;  %v6840_v28 = vld [vmem:[#allocation20] sm:$0xff] }
 0xafb   :  { %v3006_v23 = vpop.f32.mrf.mxu0 }
 0xafc   :  { %v3023_v3 = vadd.f32 %v3001_v26, %v2953_v54  ;;  %v6838_v26 = vld [vmem:[#allocation20 + $0x10] sm:$0xff] }
 0xafe   :  { %3257 = vmatmul.bf16.gmra.mxu0 %v8753_v41  ;;  %v3039_v33 = vadd.f32 %v8759_v55, %v3023_v3 }
 0xb01   :  { %v2905_v43 = vpop.f32.mrf.mxu2  ;;  %v2954_v6 = vpop.f32.mrf.mxu3 }
 0xb02   :  { %v2955_v15 = vadd.f32 %v2954_v6, %v2905_v43 }
 0xb03   :  { %v3008_v50 = vpop.f32.mrf.mxu0 }
 0xb04   :  { %v3024_v22 = vadd.f32 %v3003_v12, %v2955_v15 }
 0xb06   :  { %v3040_v58 = vadd.f32 %v8759_v55, %v3024_v22 }
 0xb08   :  { %v3049_v57 = vpack.c.bf16 %v3040_v58, %v3039_v33 }
 0xb09   :  { %v2908_v29 = vpop.f32.mrf.mxu2  ;;  %v2957_v2 = vpop.f32.mrf.mxu3 }
 0xb0a   :  { %3089 = vmatmul.bf16.gmra.mxu1 %v3049_v57  ;;  %v2958_v48 = vadd.f32 %v2957_v2, %v2908_v29 }
 0xb0c   :  { %v3025_v49 = vadd.f32 %v3006_v23, %v2958_v48 }
 0xb0e   :  { %v3041_v10 = vadd.f32 %v8759_v55, %v3025_v49 }
 0xb11   :  { %v2910_v21 = vpop.f32.mrf.mxu2  ;;  %v2959_v59 = vpop.f32.mrf.mxu3 }
 0xb12   :  { %v2960_v41 = vadd.f32 %v2959_v59, %v2910_v21 }
 0xb14   :  { %v3026_v35 = vadd.f32 %v3008_v50, %v2960_v41 }
 0xb16   :  { %v3042_v60 = vadd.f32 %v8759_v55, %v3026_v35  ;;  %v6836_v55 = vld [vmem:[#allocation20 + $0x20] sm:$0xff] }
 0xb18   :  { %v3050_v19 = vpack.c.bf16 %v3042_v60, %v3041_v10 }
 0xb1a   :  { %3094 = vmatmul.bf16.gmra.mxu1 %v3050_v19 }
 0xb27   :  { %v3060_v38 = vpop.f32.mrf.mxu1 }
 0xb28   :  { %v3061_v18 = vadd.f32 %v6832_v30, %v3060_v38 }
 0xb2f   :  { %v3062_v40 = vpop.f32.mrf.mxu1 }
 0xb30   :  { %v3063_v25 = vadd.f32 %v6832_v30, %v3062_v40 }
 0xb32   :  { %v3100_v32 = vpack.c.bf16 %v3063_v25, %v3061_v18 }
 0xb34   :  { %3116 = vmatmul.bf16.vlgmr.msrb.gmra.mxu2 %v3100_v32  ;;  %v6841_v32 = vld [vmem:[%s9315_s9] ss:$0 sm:$0xff] }
 0xb35   :  { %3580 = vmatpush.bf16.msrb.mxu2 %v6833_v27 }
 0xb37   :  { %v3065_v9 = vpop.f32.mrf.mxu1 }
 0xb38   :  { %v3066_v39 = vadd.f32 %v6832_v30, %v3065_v9 }
 0xb39   :  { %3581 = vmatpush.bf16.msrb.mxu2 %v6834_v47 }
 0xb3d   :  { %3582 = vmatpush.bf16.msrb.mxu2 %v6835_v45 }
 0xb3f   :  { %v3067_v63 = vpop.f32.mrf.mxu1 }
 0xb40   :  { %v3068_v4 = vadd.f32 %v6832_v30, %v3067_v63 }
 0xb41   :  { %3583 = vmatpush.bf16.msrb.mxu2 %v6836_v55 }
 0xb42   :  { %v3101_v14 = vpack.c.bf16 %v3068_v4, %v3066_v39 }
 0xb44   :  { %3121 = vmatmul.bf16.gmra.mxu2 %v3101_v14 }
 0xb45   :  { %3584 = vmatpush.bf16.msrb.mxu2 %v6837_v5 }
 0xb47   :  { %v3070_v44 = vpop.f32.mrf.mxu1 }
 0xb48   :  { %v3071_v36 = vadd.f32 %v6832_v30, %v3070_v44 }
 0xb49   :  { %3585 = vmatpush.bf16.msrb.mxu2 %v6838_v26 }
 0xb4d   :  { %3586 = vmatpush.bf16.msrb.mxu2 %v6839_v34 }
 0xb4f   :  { %v3072_v0 = vpop.f32.mrf.mxu1 }
 0xb50   :  { %v3073_v20 = vadd.f32 %v6832_v30, %v3072_v0 }
 0xb51   :  { %3587 = vmatpush.bf16.msrb.mxu2 %v6840_v28 }
 0xb52   :  { %v3102_v37 = vpack.c.bf16 %v3073_v20, %v3071_v36 }
 0xb54   :  { %3126 = vmatmul.bf16.gmra.mxu2 %v3102_v37 }
 0xb57   :  { %v3075_v12 = vpop.f32.mrf.mxu1 }
 0xb58   :  { %v3076_v43 = vadd.f32 %v6832_v30, %v3075_v12 }
 0xb5f   :  { %v3077_v54 = vpop.f32.mrf.mxu1 }
 0xb60   :  { %v3078_v6 = vadd.f32 %v6832_v30, %v3077_v54 }
 0xb62   :  { %v3103_v3 = vpack.c.bf16 %v3078_v6, %v3076_v43 }
 0xb64   :  { %3131 = vmatmul.bf16.gmra.mxu2 %v3103_v3 }
 0xb67   :  { %v3080_v15 = vpop.f32.mrf.mxu1 }
 0xb68   :  { %v3081_v33 = vadd.f32 %v6832_v30, %v3080_v15 }
 0xb6f   :  { %v3082_v22 = vpop.f32.mrf.mxu1 }
 0xb70   :  { %v3083_v58 = vadd.f32 %v6832_v30, %v3082_v22 }
 0xb72   :  { %v3104_v23 = vpack.c.bf16 %v3083_v58, %v3081_v33 }
 0xb74   :  { %3136 = vmatmul.bf16.gmra.mxu2 %v3104_v23 }
 0xb77   :  { %v3085_v57 = vpop.f32.mrf.mxu1 }
 0xb78   :  { %v3086_v2 = vadd.f32 %v6832_v30, %v3085_v57 }
 0xb7f   :  { %v3087_v29 = vpop.f32.mrf.mxu1 }
 0xb80   :  { %v3088_v48 = vadd.f32 %v6832_v30, %v3087_v29 }
 0xb82   :  { %v3105_v21 = vpack.c.bf16 %v3088_v48, %v3086_v2 }
 0xb84   :  { %3141 = vmatmul.bf16.gmra.mxu2 %v3105_v21 }
 0xb87   :  { %v3090_v59 = vpop.f32.mrf.mxu1 }
 0xb88   :  { %v3091_v41 = vadd.f32 %v6832_v30, %v3090_v59  ;;  %v3223_v59 = vpop.f32.mrf.mxu0 }
 0xb8f   :  { %v3092_v49 = vpop.f32.mrf.mxu1 }
 0xb90   :  { %v3093_v50 = vadd.f32 %v6832_v30, %v3092_v49 }
 0xb92   :  { %v3106_v35 = vpack.c.bf16 %v3093_v50, %v3091_v41 }
 0xb94   :  { %3146 = vmatmul.bf16.gmra.mxu2 %v3106_v35 }
 0xb97   :  { %v3095_v10 = vpop.f32.mrf.mxu1 }
 0xb98   :  { %v3096_v19 = vadd.f32 %v6832_v30, %v3095_v10  ;;  %v3225_v10 = vpop.f32.mrf.mxu0 }
 0xb9f   :  { %v3097_v60 = vpop.f32.mrf.mxu1 }
 0xba0   :  { %v3098_v38 = vadd.f32 %v6832_v30, %v3097_v60  ;;  %v3228_v60 = vpop.f32.mrf.mxu0 }
 0xba2   :  { %v3107_v40 = vpack.c.bf16 %v3098_v38, %v3096_v19 }
 0xba4   :  { %3151 = vmatmul.bf16.gmra.mxu2 %v3107_v40 }
 0xba8   :  { %v3230_v19 = vpop.f32.mrf.mxu0 }
 0xbb7   :  { %v3117_v18 = vpop.f32.mrf.mxu2 }
 0xbb8   :  { %v3118_v27 = vadd.f32 %v6841_v32, %v3117_v18 }
 0xbbf   :  { %v3119_v25 = vpop.f32.mrf.mxu2 }
 0xbc0   :  { %v3120_v9 = vadd.f32 %v6841_v32, %v3119_v25 }
 0xbc2   :  { %v8793_v47 = vpack.c.bf16 %v3120_v9, %v3118_v27  ;;  %v3233_v27 = vpop.f32.mrf.mxu0  ;;  %v8818_v9 = vld [vmem:[%s9316_s3] ss:$0 sm:$0xff] }
 0xbc4   :  { %3173 = vmatmul.bf16.vlgmr.msra.gmra.mxu3 %v8793_v47 }
 0xbc7   :  { %v3122_v45 = vpop.f32.mrf.mxu2 }
 0xbc8   :  { %v3123_v39 = vadd.f32 %v6841_v32, %v3122_v45 }
 0xbcf   :  { %v3124_v63 = vpop.f32.mrf.mxu2 }
 0xbd0   :  { %v3125_v4 = vadd.f32 %v6841_v32, %v3124_v63 }
 0xbd2   :  { %v8796_v55 = vpack.c.bf16 %v3125_v4, %v3123_v39  ;;  %v3235_v4 = vpop.f32.mrf.mxu0 }
 0xbd4   :  { %3178 = vmatmul.bf16.gmra.mxu3 %v8796_v55 }
 0xbd7   :  { %v3127_v30 = vpop.f32.mrf.mxu2 }
 0xbd8   :  { %v3128_v5 = vadd.f32 %v6841_v32, %v3127_v30 }
 0xbdf   :  { %v3129_v14 = vpop.f32.mrf.mxu2 }
 0xbe0   :  { %v3130_v44 = vadd.f32 %v6841_v32, %v3129_v14 }
 0xbe2   :  { %v8799_v26 = vpack.c.bf16 %v3130_v44, %v3128_v5 }
 0xbe4   :  { %3183 = vmatmul.bf16.gmra.mxu3 %v8799_v26 }
 0xbe7   :  { %v3132_v34 = vpop.f32.mrf.mxu2 }
 0xbe8   :  { %v3133_v36 = vadd.f32 %v6841_v32, %v3132_v34 }
 0xbef   :  { %v3134_v0 = vpop.f32.mrf.mxu2 }
 0xbf0   :  { %v3135_v20 = vadd.f32 %v6841_v32, %v3134_v0 }
 0xbf2   :  { %v8802_v28 = vpack.c.bf16 %v3135_v20, %v3133_v36  ;;  %v3238_v36 = vpop.f32.mrf.mxu0 }
 0xbf4   :  { %3188 = vmatmul.bf16.gmra.mxu3 %v8802_v28 }
 0xbf7   :  { %v3137_v37 = vpop.f32.mrf.mxu2 }
 0xbf8   :  { %v3138_v54 = vadd.f32 %v6841_v32, %v3137_v37 }
 0xbff   :  { %v3139_v12 = vpop.f32.mrf.mxu2 }
 0xc00   :  { %v3140_v43 = vadd.f32 %v6841_v32, %v3139_v12  ;;  %v3240_v12 = vpop.f32.mrf.mxu0 }
 0xc02   :  { %v8805_v6 = vpack.c.bf16 %v3140_v43, %v3138_v54 }
 0xc04   :  { %3193 = vmatmul.bf16.gmra.mxu3 %v8805_v6 }
 0xc07   :  { %v3142_v3 = vpop.f32.mrf.mxu2 }
 0xc08   :  { %v3143_v22 = vadd.f32 %v6841_v32, %v3142_v3 }
 0xc0f   :  { %v3144_v15 = vpop.f32.mrf.mxu2 }
 0xc10   :  { %v3145_v33 = vadd.f32 %v6841_v32, %v3144_v15 }
 0xc12   :  { %v8808_v58 = vpack.c.bf16 %v3145_v33, %v3143_v22 }
 0xc14   :  { %3198 = vmatmul.bf16.gmra.mxu3 %v8808_v58 }
 0xc17   :  { %v3147_v23 = vpop.f32.mrf.mxu2 }
 0xc18   :  { %v3148_v29 = vadd.f32 %v6841_v32, %v3147_v23  ;;  %v3243_v23 = vpop.f32.mrf.mxu0 }
 0xc1f   :  { %v3149_v57 = vpop.f32.mrf.mxu2 }
 0xc20   :  { %v3150_v2 = vadd.f32 %v6841_v32, %v3149_v57 }
 0xc22   :  { %v8811_v48 = vpack.c.bf16 %v3150_v2, %v3148_v29 }
 0xc24   :  { %3203 = vmatmul.bf16.gmra.mxu3 %v8811_v48 }
 0xc27   :  { %v3152_v21 = vpop.f32.mrf.mxu2 }
 0xc28   :  { %v3153_v41 = vadd.f32 %v6841_v32, %v3152_v21 }
 0xc2f   :  { %v3154_v49 = vpop.f32.mrf.mxu2 }
 0xc30   :  { %v3155_v50 = vadd.f32 %v6841_v32, %v3154_v49  ;;  %v3245_v49 = vpop.f32.mrf.mxu0 }
 0xc32   :  { %v8814_v35 = vpack.c.bf16 %v3155_v50, %v3153_v41 }
 0xc34   :  { %3208 = vmatmul.bf16.gmra.mxu3 %v8814_v35 }
 0xc47   :  { %v3174_v38 = vpop.f32.mrf.mxu3 }
 0xc48   :  { %v3224_v40 = vadd.f32 %v3223_v59, %v3174_v38 }
 0xc4a   :  { %v3263_v45 = vadd.f32 %v8818_v9, %v3224_v40 }
 0xc4f   :  { %v3176_v18 = vpop.f32.mrf.mxu3 }
 0xc50   :  { %v3226_v25 = vadd.f32 %v3225_v10, %v3176_v18  ;;  %v3248_v10 = vpop.f32.mrf.mxu0 }
 0xc52   :  { %v3264_v63 = vadd.f32 %v8818_v9, %v3226_v25 }
 0xc54   :  { %v3279_v39 = vpack.c.bf16 %v3264_v63, %v3263_v45 }
 0xc56   :  { %3295 = vmatmul.bf16.vlgmr.msra.gmra.mxu1 %v3279_v39 }
 0xc57   :  { %v3179_v32 = vpop.f32.mrf.mxu3 }
 0xc58   :  { %v3229_v30 = vadd.f32 %v3228_v60, %v3179_v32 }
 0xc5a   :  { %v3265_v44 = vadd.f32 %v8818_v9, %v3229_v30 }
 0xc5f   :  { %v3181_v14 = vpop.f32.mrf.mxu3 }
 0xc60   :  { %v3231_v5 = vadd.f32 %v3230_v19, %v3181_v14 }
 0xc62   :  { %v3266_v34 = vadd.f32 %v8818_v9, %v3231_v5 }
 0xc64   :  { %v3280_v0 = vpack.c.bf16 %v3266_v34, %v3265_v44 }
 0xc66   :  { %3300 = vmatmul.bf16.gmra.mxu1 %v3280_v0 }
 0xc67   :  { %v3184_v20 = vpop.f32.mrf.mxu3 }
 0xc68   :  { %v3234_v37 = vadd.f32 %v3233_v27, %v3184_v20  ;;  %v3250_v27 = vpop.f32.mrf.mxu0 }
 0xc6a   :  { %v3267_v3 = vadd.f32 %v8818_v9, %v3234_v37 }
 0xc6f   :  { %v3186_v54 = vpop.f32.mrf.mxu3 }
 0xc70   :  { %v3236_v43 = vadd.f32 %v3235_v4, %v3186_v54  ;;  %v3253_v4 = vpop.f32.mrf.mxu0 }
 0xc72   :  { %v3268_v15 = vadd.f32 %v8818_v9, %v3236_v43 }
 0xc74   :  { %v3281_v22 = vpack.c.bf16 %v3268_v15, %v3267_v3 }
 0xc76   :  { %3305 = vmatmul.bf16.gmra.mxu1 %v3281_v22 }
 0xc77   :  { %v3189_v33 = vpop.f32.mrf.mxu3 }
 0xc78   :  { %v3239_v57 = vadd.f32 %v3238_v36, %v3189_v33  ;;  %v3255_v34 = vpop.f32.mrf.mxu0 }
 0xc7a   :  { %v3269_v21 = vadd.f32 %v8818_v9, %v3239_v57 }
 0xc7f   :  { %v3191_v29 = vpop.f32.mrf.mxu3 }
 0xc80   :  { %v3241_v2 = vadd.f32 %v3240_v12, %v3191_v29  ;;  %v3258_v43 = vpop.f32.mrf.mxu0 }
 0xc82   :  { %v3270_v59 = vadd.f32 %v8818_v9, %v3241_v2 }
 0xc84   :  { %v3282_v41 = vpack.c.bf16 %v3270_v59, %v3269_v21 }
 0xc86   :  { %3310 = vmatmul.bf16.gmra.mxu1 %v3282_v41 }
 0xc87   :  { %v3194_v50 = vpop.f32.mrf.mxu3 }
 0xc88   :  { %v3244_v60 = vadd.f32 %v3243_v23, %v3194_v50  ;;  %v3260_v22 = vpop.f32.mrf.mxu0 }
 0xc8a   :  { %v3271_v40 = vadd.f32 %v8818_v9, %v3244_v60 }
 0xc8f   :  { %v3196_v19 = vpop.f32.mrf.mxu3 }
 0xc90   :  { %v3246_v38 = vadd.f32 %v3245_v49, %v3196_v19  ;;  %v8838_v49 = vld [vmem:[%s9317_s8] ss:$0 sm:$0xff] }
 0xc92   :  { %v3272_v18 = vadd.f32 %v8818_v9, %v3246_v38 }
 0xc94   :  { %v3283_v25 = vpack.c.bf16 %v3272_v18, %v3271_v40 }
 0xc96   :  { %3315 = vmatmul.bf16.gmra.mxu1 %v3283_v25 }
 0xc97   :  { %v3199_v45 = vpop.f32.mrf.mxu3 }
 0xc98   :  { %v3249_v63 = vadd.f32 %v3248_v10, %v3199_v45 }
 0xc9a   :  { %v3273_v30 = vadd.f32 %v8818_v9, %v3249_v63 }
 0xc9f   :  { %v3201_v39 = vpop.f32.mrf.mxu3 }
 0xca0   :  { %v3251_v32 = vadd.f32 %v3250_v27, %v3201_v39 }
 0xca2   :  { %v3274_v14 = vadd.f32 %v8818_v9, %v3251_v32 }
 0xca4   :  { %v3284_v5 = vpack.c.bf16 %v3274_v14, %v3273_v30  ;;  %v6559_v14 = vld [vmem:[#allocation25 + $0x30] sm:$0xff] }
 0xca6   :  { %3320 = vmatmul.bf16.gmra.mxu1 %v3284_v5 }
 0xca7   :  { %v3204_v44 = vpop.f32.mrf.mxu3 }
 0xca8   :  { %v3254_v0 = vadd.f32 %v3253_v4, %v3204_v44 }
 0xcaa   :  { %v3275_v37 = vadd.f32 %v8818_v9, %v3254_v0  ;;  %v6558_v0 = vld [vmem:[#allocation25 + $0x28] sm:$0xff] }
 0xcaf   :  { %v3206_v36 = vpop.f32.mrf.mxu3 }
 0xcb0   :  { %v3256_v20 = vadd.f32 %v3255_v34, %v3206_v36  ;;  %v6557_v36 = vld [vmem:[#allocation25 + $0x20] sm:$0xff] }
 0xcb2   :  { %v3276_v12 = vadd.f32 %v8818_v9, %v3256_v20 }
 0xcb4   :  { %v3285_v54 = vpack.c.bf16 %v3276_v12, %v3275_v37  ;;  %v6556_v37 = vld [vmem:[#allocation25 + $0x18] sm:$0xff] }
 0xcb6   :  { %3325 = vmatmul.bf16.gmra.mxu1 %v3285_v54 }
 0xcb7   :  { %v3209_v3 = vpop.f32.mrf.mxu3 }
 0xcb8   :  { %v3259_v15 = vadd.f32 %v3258_v43, %v3209_v3 }
 0xcba   :  { %v3277_v57 = vadd.f32 %v8818_v9, %v3259_v15  ;;  %v6554_v15 = vld [vmem:[#allocation25 + $0x8] sm:$0xff] }
 0xcbf   :  { %v3211_v33 = vpop.f32.mrf.mxu3 }
 0xcc0   :  { %v3261_v23 = vadd.f32 %v3260_v22, %v3211_v33  ;;  %v6553_v22 = vld [vmem:[#allocation25] sm:$0xff] }
 0xcc2   :  { %v3278_v29 = vadd.f32 %v8818_v9, %v3261_v23 }
 0xcc4   :  { %v3286_v2 = vpack.c.bf16 %v3278_v29, %v3277_v57 }
 0xcc6   :  { %3330 = vmatmul.bf16.gmra.mxu1 %v3286_v2 }
 0xcd3   :  { %v3296_v21 = vpop.f32.mrf.mxu1 }
 0xcd4   :  { %v3297_v41 = vadd.f32 %v8838_v49, %v3296_v21 }
 0xcd6   :  { %3515 = vmatmul.bf16.vlgmr.msrb.gmra.mxu1 %v8664_v16 }
 0xcdb   :  { %v3298_v59 = vpop.f32.mrf.mxu1 }
 0xcdc   :  { %v3299_v50 = vadd.f32 %v8838_v49, %v3298_v59 }
 0xcde   :  { %v3336_v10 = vpack.c.bf16 %v3299_v50, %v3297_v41 }
 0xce0   :  { %3352 = vmatmul.bf16.vlgmr.msra.gmra.mxu2 %v3336_v10 }
 0xce3   :  { %v3301_v60 = vpop.f32.mrf.mxu1 }
 0xce4   :  { %v3302_v9 = vadd.f32 %v8838_v49, %v3301_v60 }
 0xce6   :  { %3520 = vmatmul.bf16.gmra.mxu1 %v8660_v53 }
 0xceb   :  { %v3303_v19 = vpop.f32.mrf.mxu1 }
 0xcec   :  { %v3304_v38 = vadd.f32 %v8838_v49, %v3303_v19 }
 0xcee   :  { %v3337_v40 = vpack.c.bf16 %v3304_v38, %v3302_v9 }
 0xcf0   :  { %3357 = vmatmul.bf16.gmra.mxu2 %v3337_v40 }
 0xcf3   :  { %v3306_v16 = vpop.f32.mrf.mxu1 }
 0xcf4   :  { %v3307_v25 = vadd.f32 %v8838_v49, %v3306_v16 }
 0xcf6   :  { %3525 = vmatmul.bf16.gmra.mxu1 %v8656_v13  ;;  %v6560_v13 = vld [vmem:[#allocation25 + $0x38] sm:$0xff] }
 0xcf7   :  { %3831 = vmatpush.bf16.msra.mxu1 %v6560_v13 }
 0xcfb   :  { %v3308_v18 = vpop.f32.mrf.mxu1  ;;  %3832 = vmatpush.bf16.msra.mxu1 %v6559_v14 }
 0xcfc   :  { %v3309_v27 = vadd.f32 %v8838_v49, %v3308_v18 }
 0xcfe   :  { %v3338_v45 = vpack.c.bf16 %v3309_v27, %v3307_v25 }
 0xcff   :  { %3833 = vmatpush.bf16.msra.mxu1 %v6558_v0 }
 0xd00   :  { %3362 = vmatmul.bf16.gmra.mxu2 %v3338_v45 }
 0xd03   :  { %v3311_v63 = vpop.f32.mrf.mxu1  ;;  %3834 = vmatpush.bf16.msra.mxu1 %v6557_v36 }
 0xd04   :  { %v3312_v39 = vadd.f32 %v8838_v49, %v3311_v63 }
 0xd06   :  { %3530 = vmatmul.bf16.gmra.mxu1 %v8652_v56 }
 0xd07   :  { %3835 = vmatpush.bf16.msra.mxu1 %v6556_v37 }
 0xd0b   :  { %v3313_v53 = vpop.f32.mrf.mxu1 }
 0xd0c   :  { %v3314_v32 = vadd.f32 %v8838_v49, %v3313_v53 }
 0xd0e   :  { %v3339_v4 = vpack.c.bf16 %v3314_v32, %v3312_v39 }
 0xd10   :  { %3367 = vmatmul.bf16.gmra.mxu2 %v3339_v4 }
 0xd13   :  { %v3316_v30 = vpop.f32.mrf.mxu1 }
 0xd14   :  { %v3317_v44 = vadd.f32 %v8838_v49, %v3316_v30 }
 0xd16   :  { %3535 = vmatmul.bf16.gmra.mxu1 %v8648_v52  ;;  %v6555_v52 = vld [vmem:[#allocation25 + $0x10] sm:$0xff] }
 0xd17   :  { %3836 = vmatpush.bf16.msra.mxu1 %v6555_v52 }
 0xd1b   :  { %v3318_v5 = vpop.f32.mrf.mxu1  ;;  %3837 = vmatpush.bf16.msra.mxu1 %v6554_v15 }
 0xd1c   :  { %v3319_v34 = vadd.f32 %v8838_v49, %v3318_v5 }
 0xd1e   :  { %v3340_v56 = vpack.c.bf16 %v3319_v34, %v3317_v44 }
 0xd1f   :  { %3838 = vmatpush.bf16.msra.mxu1 %v6553_v22 }
 0xd20   :  { %3372 = vmatmul.bf16.gmra.mxu2 %v3340_v56 }
 0xd23   :  { %v3321_v20 = vpop.f32.mrf.mxu1 }
 0xd24   :  { %v3322_v54 = vadd.f32 %v8838_v49, %v3321_v20 }
 0xd26   :  { %3540 = vmatmul.bf16.gmra.mxu1 %v8644_v51 }
 0xd2b   :  { %v3323_v12 = vpop.f32.mrf.mxu1 }
 0xd2c   :  { %v3324_v43 = vadd.f32 %v8838_v49, %v3323_v12 }
 0xd2e   :  { %v3341_v3 = vpack.c.bf16 %v3324_v43, %v3322_v54 }
 0xd30   :  { %3377 = vmatmul.bf16.gmra.mxu2 %v3341_v3 }
 0xd33   :  { %v3326_v33 = vpop.f32.mrf.mxu1 }
 0xd34   :  { %v3327_v51 = vadd.f32 %v8838_v49, %v3326_v33 }
 0xd36   :  { %3545 = vmatmul.bf16.gmra.mxu1 %v8640_v62 }
 0xd3b   :  { %v3328_v23 = vpop.f32.mrf.mxu1 }
 0xd3c   :  { %v3329_v57 = vadd.f32 %v8838_v49, %v3328_v23 }
 0xd3e   :  { %v3342_v29 = vpack.c.bf16 %v3329_v57, %v3327_v51 }
 0xd40   :  { %3382 = vmatmul.bf16.gmra.mxu2 %v3342_v29  ;;  %v6845_v29 = vld [vmem:[#allocation22 + $0x38] sm:$0xff] }
 0xd43   :  { %v3331_v2 = vpop.f32.mrf.mxu1 }
 0xd44   :  { %v3332_v59 = vadd.f32 %v8838_v49, %v3331_v2  ;;  %v9378_v2 = vld [vmem:[#allocation88_spill] sm:$0xff] }
 0xd45   :  { %vm9379_vm13 = vnez %v9378_v2 }
 0xd46   :  { %3550 = vmatmul.bf16.gmra.mxu1 %v8636_v42 }
 0xd4b   :  { %v3333_v21 = vpop.f32.mrf.mxu1 }
 0xd4c   :  { %v3334_v41 = vadd.f32 %v8838_v49, %v3333_v21  ;;  %v6846_v21 = vld [vmem:[#allocation22 + $0x30] sm:$0xff] }
 0xd4e   :  { %v3343_v50 = vpack.c.bf16 %v3334_v41, %v3332_v59  ;;  %v6847_v59 = vld [vmem:[#allocation22 + $0x28] sm:$0xff]  ;;  %v6848_v41 = vld [vmem:[#allocation22 + $0x20] sm:$0xff] }
 0xd50   :  { %3387 = vmatmul.bf16.gmra.mxu2 %v3343_v50  ;;  %v6849_v50 = vld [vmem:[#allocation22 + $0x18] sm:$0xff] }
 0xd53   :  { %v8866_v9 = vpop.f32.mrf.mxu1 }
 0xd56   :  { %3839 = vmatmul.bf16.vlgmr.msra.gmra.mxu1 %v8793_v47 }
 0xd5b   :  { %v8869_v38 = vpop.f32.mrf.mxu1 }
 0xd63   :  { %v3353_v62 = vpop.f32.mrf.mxu2  ;;  %v8871_v16 = vpop.f32.mrf.mxu1 }
 0xd66   :  { %3844 = vmatmul.bf16.gmra.mxu1 %v8796_v55 }
 0xd6b   :  { %v3355_v10 = vpop.f32.mrf.mxu2  ;;  %v8874_v55 = vpop.f32.mrf.mxu1 }
 0xd73   :  { %v3358_v60 = vpop.f32.mrf.mxu2 }
 0xd76   :  { %3849 = vmatmul.bf16.gmra.mxu1 %v8799_v26  ;;  %v8877_v26 = vpop.f32.mrf.mxu1 }
 0xd7b   :  { %v3360_v19 = vpop.f32.mrf.mxu2 }
 0xd7e   :  { %v8879_v27 = vpop.f32.mrf.mxu1 }
 0xd83   :  { %v3363_v42 = vpop.f32.mrf.mxu2 }
 0xd86   :  { %3854 = vmatmul.bf16.gmra.mxu1 %v8802_v28  ;;  %v8882_v63 = vpop.f32.mrf.mxu1 }
 0xd8b   :  { %v3365_v49 = vpop.f32.mrf.mxu2 }
 0xd93   :  { %v3368_v40 = vpop.f32.mrf.mxu2 }
 0xd96   :  { %3859 = vmatmul.bf16.gmra.mxu1 %v8805_v6  ;;  %v8884_v6 = vpop.f32.mrf.mxu1 }
 0xd9b   :  { %v3370_v47 = vpop.f32.mrf.mxu2 }
 0xda3   :  { %v3373_v18 = vpop.f32.mrf.mxu2 }
 0xda6   :  { %3864 = vmatmul.bf16.gmra.mxu1 %v8808_v58  ;;  %v6844_v58 = vld [vmem:[%s9318_s27] ss:$0 sm:$0xff] }
 0xda7   :  { %v3374_v20 = vadd.f32 %v6844_v58, %v3373_v18  ;;  %v3371_v37 = vadd.f32 %v6844_v58, %v3370_v47  ;;  %v3369_v52 = vadd.f32 %v6844_v58, %v3368_v40  ;;  %v3366_v12 = vadd.f32 %v6844_v58, %v3365_v49  ;;  %v9386_v47 = vld [vmem:[#allocation103_spill] sm:$0xff]  ;;  %v9388_v18 = vld [vmem:[#allocation109_spill] sm:$0xff] }
 0xda8   :  { %v3364_v43 = vadd.f32 %v6844_v58, %v3363_v42  ;;  %v3361_v3 = vadd.f32 %v6844_v58, %v3360_v19  ;;  %v3359_v22 = vadd.f32 %v6844_v58, %v3358_v60  ;;  %v3356_v33 = vadd.f32 %v6844_v58, %v3355_v10  ;;  %v9380_v10 = vld [vmem:[#allocation91_spill] sm:$0xff]  ;;  %v6852_v19 = vld [vmem:[#allocation22] sm:$0xff] }
 0xda9   :  { %v3396_v54 = vpack.c.bf16 %v3371_v37, %v3369_v52  ;;  %v3354_v51 = vadd.f32 %v6844_v58, %v3353_v62  ;;  %vm9381_vm12 = vnez %v9380_v10  ;;  %v6850_v62 = vld [vmem:[#allocation22 + $0x10] sm:$0xff]  ;;  %v6851_v60 = vld [vmem:[#allocation22 + $0x8] sm:$0xff]  ;;  %v9382_v42 = vld [vmem:[#allocation94_spill] sm:$0xff]  ;;  %vm9387_vm15 = vnez %v9386_v47 }
 0xdaa   :  { %v3395_v15 = vpack.c.bf16 %v3366_v12, %v3364_v43  ;;  %v3394_v23 = vpack.c.bf16 %v3361_v3, %v3359_v22  ;;  %vm9383_vm0 = vnez %v9382_v42  ;;  %vm9389_vm4 = vnez %v9388_v18  ;;  %v9017_v18 = vld [vmem:[%s9394_s5] ss:$0 sm:$0xff] }
 0xdab   :  { %v3375_v25 = vpop.f32.mrf.mxu2  ;;  %v3393_v57 = vpack.c.bf16 %v3356_v33, %v3354_v51 }
 0xdac   :  { %v3376_v0 = vadd.f32 %v6844_v58, %v3375_v25  ;;  %v9396_v25 = vld [vmem:[#allocation87_spill] sm:$0xff] }
 0xdb3   :  { %v3378_v28 = vpop.f32.mrf.mxu2 }
 0xdb4   :  { %v3379_v56 = vadd.f32 %v6844_v58, %v3378_v28 }
 0xdb6   :  { %3869 = vmatmul.bf16.gmra.mxu1 %v8811_v48 }
 0xdbb   :  { %v3380_v45 = vpop.f32.mrf.mxu2 }
 0xdbc   :  { %v3381_v34 = vadd.f32 %v6844_v58, %v3380_v45 }
 0xdbe   :  { %v3398_v36 = vpack.c.bf16 %v3381_v34, %v3379_v56 }
 0xdc3   :  { %v3383_v53 = vpop.f32.mrf.mxu2 }
 0xdc4   :  { %v3384_v44 = vadd.f32 %v6844_v58, %v3383_v53 }
 0xdc6   :  { %3874 = vmatmul.bf16.gmra.mxu1 %v8814_v35  ;;  %v3397_v35 = vpack.c.bf16 %v3376_v0, %v3374_v20 }
 0xdcb   :  { %v3385_v39 = vpop.f32.mrf.mxu2 }
 0xdcc   :  { %v3386_v14 = vadd.f32 %v6844_v58, %v3385_v39 }
 0xdce   :  { %v3399_v48 = vpack.c.bf16 %v3386_v14, %v3384_v44 }
 0xdd3   :  { %v3388_v32 = vpop.f32.mrf.mxu2 }
 0xdd4   :  { %v3389_v30 = vadd.f32 %v6844_v58, %v3388_v32 }
 0xddb   :  { %v3390_v4 = vpop.f32.mrf.mxu2 }
 0xddc   :  { %v3391_v13 = vadd.f32 %v6844_v58, %v3390_v4 }
 0xdde   :  { %v3400_v5 = vpack.c.bf16 %v3391_v13, %v3389_v30 }
 0xde0   :  { %3401 = vmatpush.bf16.msrb.mxu3 %v3400_v5 }
 0xde4   :  { %3402 = vmatpush.bf16.msrb.mxu3 %v3399_v48 }
 0xde8   :  { %3403 = vmatpush.bf16.msrb.mxu3 %v3398_v36 }
 0xdec   :  { %3404 = vmatpush.bf16.msrb.mxu3 %v3397_v35 }
 0xdf0   :  { %3405 = vmatpush.bf16.msrb.mxu3 %v3396_v54 }
 0xdf4   :  { %3406 = vmatpush.bf16.msrb.mxu3 %v3395_v15 }
 0xdf8   :  { %3407 = vmatpush.bf16.msrb.mxu3 %v3394_v23  ;;  %v8915_v23 = vld [vmem:[%s9366_s28] ss:$0 sm:$0xff] }
 0xdfc   :  { %3408 = vmatpush.bf16.msrb.mxu3 %v3393_v57 }
 0xdff   :  { %5994 = vmatmul.msk.bf16.vlgmr.msrb.gmra.mxu3 %vm9379_vm13, %v9326_v7 }
 0xe00   :  { %3637 = vmatpush.bf16.msra.mxu3 %v6845_v29 }
 0xe04   :  { %3638 = vmatpush.bf16.msra.mxu3 %v6846_v21 }
 0xe08   :  { %3639 = vmatpush.bf16.msra.mxu3 %v6847_v59 }
 0xe0c   :  { %3640 = vmatpush.bf16.msra.mxu3 %v6848_v41 }
 0xe0f   :  { %5996 = vmatmul.msk.bf16.gmra.mxu3 %vm9381_vm12, %v9326_v7 }
 0xe10   :  { %3641 = vmatpush.bf16.msra.mxu3 %v6849_v50 }
 0xe14   :  { %3642 = vmatpush.bf16.msra.mxu3 %v6850_v62 }
 0xe18   :  { %3643 = vmatpush.bf16.msra.mxu3 %v6851_v60 }
 0xe1c   :  { %3644 = vmatpush.bf16.msra.mxu3 %v6852_v19 }
 0xe1f   :  { %5998 = vmatmul.msk.bf16.gmra.mxu3 %vm9383_vm0, %v9326_v7 }
 0xe2f   :  { %6000 = vmatmul.msk.bf16.gmra.mxu3 %vm8466_vm10, %v9326_v7 }
 0xe3f   :  { %6002 = vmatmul.msk.bf16.gmra.mxu3 %vm8483_vm6, %v9326_v7 }
 0xe4f   :  { %6004 = vmatmul.msk.bf16.gmra.mxu3 %vm9387_vm15, %v9326_v7 }
 0xe5f   :  { %6006 = vmatmul.msk.bf16.gmra.mxu3 %vm9389_vm4, %v9326_v7 }
 0xe6f   :  { %6008 = vmatmul.msk.bf16.gmra.mxu3 %vm8583_vm8, %v9326_v7 }
 0xe82   :  { %v3410_v28 = vpop.f32.mrf.mxu3 }
 0xe8a   :  { %v3412_v45 = vpop.f32.mrf.mxu3 }
 0xe8b   :  { %v3450_v53 = vpack.c.bf16 %v3412_v45, %v3410_v28 }
 0xe8d   :  { %3466 = vmatmul.bf16.vlgmr.msrb.gmra.mxu0 %v3450_v53 }
 0xe92   :  { %v3415_v39 = vpop.f32.mrf.mxu3 }
 0xe9a   :  { %v3417_v32 = vpop.f32.mrf.mxu3 }
 0xe9b   :  { %v3451_v4 = vpack.c.bf16 %v3417_v32, %v3415_v39 }
 0xe9d   :  { %3471 = vmatmul.bf16.gmra.mxu0 %v3451_v4 }
 0xea2   :  { %v3420_v58 = vpop.f32.mrf.mxu3 }
 0xeaa   :  { %v3422_v30 = vpop.f32.mrf.mxu3 }
 0xeab   :  { %v3452_v13 = vpack.c.bf16 %v3422_v30, %v3420_v58 }
 0xead   :  { %3476 = vmatmul.bf16.gmra.mxu0 %v3452_v13 }
 0xeb2   :  { %v3425_v14 = vpop.f32.mrf.mxu3 }
 0xeba   :  { %v3427_v5 = vpop.f32.mrf.mxu3 }
 0xebb   :  { %v3453_v44 = vpack.c.bf16 %v3427_v5, %v3425_v14 }
 0xebd   :  { %3481 = vmatmul.bf16.gmra.mxu0 %v3453_v44 }
 0xec2   :  { %v3430_v34 = vpop.f32.mrf.mxu3 }
 0xeca   :  { %v3432_v48 = vpop.f32.mrf.mxu3 }
 0xecb   :  { %v3454_v56 = vpack.c.bf16 %v3432_v48, %v3430_v34 }
 0xecd   :  { %3486 = vmatmul.bf16.gmra.mxu0 %v3454_v56 }
 0xed2   :  { %v3435_v0 = vpop.f32.mrf.mxu3 }
 0xeda   :  { %v3437_v36 = vpop.f32.mrf.mxu3 }
 0xedb   :  { %v3455_v20 = vpack.c.bf16 %v3437_v36, %v3435_v0 }
 0xedd   :  { %3491 = vmatmul.bf16.gmra.mxu0 %v3455_v20 }
 0xee2   :  { %v3440_v37 = vpop.f32.mrf.mxu3 }
 0xeea   :  { %v3442_v35 = vpop.f32.mrf.mxu3 }
 0xeeb   :  { %v3456_v52 = vpack.c.bf16 %v3442_v35, %v3440_v37 }
 0xeed   :  { %3496 = vmatmul.bf16.gmra.mxu0 %v3456_v52 }
 0xef2   :  { %v3445_v12 = vpop.f32.mrf.mxu3 }
 0xefa   :  { %v3447_v54 = vpop.f32.mrf.mxu3 }
 0xefb   :  { %v3457_v43 = vpack.c.bf16 %v3447_v54, %v3445_v12 }
 0xefd   :  { %3501 = vmatmul.bf16.gmra.mxu0 %v3457_v43 }
 0xf0a   :  { %v3467_v3 = vpop.f32.mrf.mxu0 }
 0xf0b   :  { %v3517_v15 = vadd.f32 %v8866_v9, %v3467_v3 }
 0xf0d   :  { %v3556_v51 = vadd.f32 %v8915_v23, %v3517_v15 }
 0xf12   :  { %v3469_v22 = vpop.f32.mrf.mxu0 }
 0xf13   :  { %v3519_v33 = vadd.f32 %v8869_v38, %v3469_v22 }
 0xf15   :  { %v3557_v57 = vadd.f32 %v8915_v23, %v3519_v33 }
 0xf17   :  { %v3572_v29 = vpack.c.bf16 %v3557_v57, %v3556_v51 }
 0xf19   :  { %3588 = vmatmul.bf16.vlgmr.msrb.gmra.mxu2 %v3572_v29 }
 0xf1a   :  { %v3472_v21 = vpop.f32.mrf.mxu0 }
 0xf1b   :  { %v3522_v59 = vadd.f32 %v8871_v16, %v3472_v21 }
 0xf1d   :  { %v3558_v62 = vadd.f32 %v8915_v23, %v3522_v59 }
 0xf22   :  { %v3474_v41 = vpop.f32.mrf.mxu0 }
 0xf23   :  { %v3524_v50 = vadd.f32 %v8874_v55, %v3474_v41  ;;  %v3536_v55 = vpop.f32.mrf.mxu1 }
 0xf25   :  { %v3559_v9 = vadd.f32 %v8915_v23, %v3524_v50 }
 0xf27   :  { %v3573_v60 = vpack.c.bf16 %v3559_v9, %v3558_v62 }
 0xf29   :  { %3593 = vmatmul.bf16.gmra.mxu2 %v3573_v60 }
 0xf2a   :  { %v3477_v38 = vpop.f32.mrf.mxu0 }
 0xf2b   :  { %v3527_v19 = vadd.f32 %v8877_v26, %v3477_v38  ;;  %v3538_v14 = vpop.f32.mrf.mxu1 }
 0xf2d   :  { %v3560_v53 = vadd.f32 %v8915_v23, %v3527_v19 }
 0xf32   :  { %v3479_v28 = vpop.f32.mrf.mxu0 }
 0xf33   :  { %v3529_v45 = vadd.f32 %v8879_v27, %v3479_v28  ;;  %v3541_v44 = vpop.f32.mrf.mxu1 }
 0xf35   :  { %v3561_v39 = vadd.f32 %v8915_v23, %v3529_v45 }
 0xf37   :  { %v3574_v16 = vpack.c.bf16 %v3561_v39, %v3560_v53 }
 0xf39   :  { %3598 = vmatmul.bf16.gmra.mxu2 %v3574_v16  ;;  %v6854_v16 = vld [vmem:[%s9367_s23] ss:$0 sm:$0xff] }
 0xf3a   :  { %v3482_v32 = vpop.f32.mrf.mxu0 }
 0xf3b   :  { %v3532_v4 = vadd.f32 %v8882_v63, %v3482_v32  ;;  %v3543_v20 = vpop.f32.mrf.mxu1 }
 0xf3d   :  { %v3562_v13 = vadd.f32 %v8915_v23, %v3532_v4 }
 0xf42   :  { %v3484_v58 = vpop.f32.mrf.mxu0 }
 0xf43   :  { %v3534_v30 = vadd.f32 %v8884_v6, %v3484_v58  ;;  %v3546_v12 = vpop.f32.mrf.mxu1 }
 0xf45   :  { %v3563_v26 = vadd.f32 %v8915_v23, %v3534_v30 }
 0xf47   :  { %v3575_v5 = vpack.c.bf16 %v3563_v26, %v3562_v13 }
 0xf49   :  { %3603 = vmatmul.bf16.gmra.mxu2 %v3575_v5 }
 0xf4a   :  { %v3487_v27 = vpop.f32.mrf.mxu0 }
 0xf4b   :  { %v3537_v34 = vadd.f32 %v3536_v55, %v3487_v27  ;;  %v3548_v22 = vpop.f32.mrf.mxu1 }
 0xf4d   :  { %v3564_v0 = vadd.f32 %v8915_v23, %v3537_v34 }
 0xf52   :  { %v3489_v48 = vpop.f32.mrf.mxu0 }
 0xf53   :  { %v3539_v56 = vadd.f32 %v3538_v14, %v3489_v48  ;;  %v3551_v41 = vpop.f32.mrf.mxu1 }
 0xf55   :  { %v3565_v36 = vadd.f32 %v8915_v23, %v3539_v56 }
 0xf57   :  { %v3576_v63 = vpack.c.bf16 %v3565_v36, %v3564_v0 }
 0xf59   :  { %3608 = vmatmul.bf16.gmra.mxu2 %v3576_v63 }
 0xf5a   :  { %v3492_v6 = vpop.f32.mrf.mxu0 }
 0xf5b   :  { %v3542_v37 = vadd.f32 %v3541_v44, %v3492_v6  ;;  %v3553_v9 = vpop.f32.mrf.mxu1 }
 0xf5d   :  { %v3566_v54 = vadd.f32 %v8915_v23, %v3542_v37 }
 0xf62   :  { %v3494_v35 = vpop.f32.mrf.mxu0 }
 0xf63   :  { %v3544_v52 = vadd.f32 %v3543_v20, %v3494_v35 }
 0xf65   :  { %v3567_v43 = vadd.f32 %v8915_v23, %v3544_v52 }
 0xf67   :  { %v3577_v3 = vpack.c.bf16 %v3567_v43, %v3566_v54 }
 0xf69   :  { %3613 = vmatmul.bf16.gmra.mxu2 %v3577_v3 }
 0xf6a   :  { %v3497_v15 = vpop.f32.mrf.mxu0 }
 0xf6b   :  { %v3547_v33 = vadd.f32 %v3546_v12, %v3497_v15 }
 0xf6d   :  { %v3568_v29 = vadd.f32 %v8915_v23, %v3547_v33 }
 0xf72   :  { %v3499_v51 = vpop.f32.mrf.mxu0 }
 0xf73   :  { %v3549_v57 = vadd.f32 %v3548_v22, %v3499_v51 }
 0xf75   :  { %v3569_v21 = vadd.f32 %v8915_v23, %v3549_v57 }
 0xf77   :  { %v3578_v59 = vpack.c.bf16 %v3569_v21, %v3568_v29 }
 0xf79   :  { %3618 = vmatmul.bf16.gmra.mxu2 %v3578_v59 }
 0xf7a   :  { %v3502_v50 = vpop.f32.mrf.mxu0 }
 0xf7b   :  { %v3552_v62 = vadd.f32 %v3551_v41, %v3502_v50 }
 0xf7d   :  { %v3570_v19 = vadd.f32 %v8915_v23, %v3552_v62 }
 0xf82   :  { %v3504_v60 = vpop.f32.mrf.mxu0 }
 0xf83   :  { %v3554_v38 = vadd.f32 %v3553_v9, %v3504_v60 }
 0xf85   :  { %v3571_v28 = vadd.f32 %v8915_v23, %v3554_v38 }
 0xf87   :  { %v3579_v45 = vpack.c.bf16 %v3571_v28, %v3570_v19 }
 0xf89   :  { %3623 = vmatmul.bf16.gmra.mxu2 %v3579_v45 }
 0xf9c   :  { %v3589_v53 = vpop.f32.mrf.mxu2 }
 0xf9d   :  { %v3590_v32 = vadd.f32 %v6854_v16, %v3589_v53 }
 0xfa4   :  { %v3591_v39 = vpop.f32.mrf.mxu2 }
 0xfa5   :  { %v3592_v55 = vadd.f32 %v6854_v16, %v3591_v39 }
 0xfa7   :  { %v3629_v4 = vpack.c.bf16 %v3592_v55, %v3590_v32  ;;  %v6552_v32 = vld [vmem:[#allocation23 + $0x38] sm:$0xff] }
 0xfa8   :  { %3928 = vmatpush.bf16.msra.mxu2 %v6552_v32 }
 0xfa9   :  { %3645 = vmatmul.bf16.vlgmr.msra.gmra.mxu3 %v3629_v4  ;;  %v6551_v4 = vld [vmem:[#allocation23 + $0x30] sm:$0xff] }
 0xfac   :  { %v3594_v58 = vpop.f32.mrf.mxu2  ;;  %3929 = vmatpush.bf16.msra.mxu2 %v6551_v4 }
 0xfad   :  { %v3595_v13 = vadd.f32 %v6854_v16, %v3594_v58  ;;  %v6550_v58 = vld [vmem:[#allocation23 + $0x28] sm:$0xff] }
 0xfb0   :  { %3930 = vmatpush.bf16.msra.mxu2 %v6550_v58 }
 0xfb4   :  { %v3596_v30 = vpop.f32.mrf.mxu2 }
 0xfb5   :  { %v3597_v26 = vadd.f32 %v6854_v16, %v3596_v30 }
 0xfb7   :  { %v3630_v14 = vpack.c.bf16 %v3597_v26, %v3595_v13  ;;  %v6548_v13 = vld [vmem:[#allocation23 + $0x18] sm:$0xff] }
 0xfb9   :  { %3650 = vmatmul.bf16.gmra.mxu3 %v3630_v14  ;;  %v6547_v14 = vld [vmem:[#allocation23 + $0x10] sm:$0xff] }
 0xfbc   :  { %v3599_v5 = vpop.f32.mrf.mxu2 }
 0xfbd   :  { %v3600_v44 = vadd.f32 %v6854_v16, %v3599_v5  ;;  %v6546_v5 = vld [vmem:[#allocation23 + $0x8] sm:$0xff] }
 0xfc4   :  { %v3601_v27 = vpop.f32.mrf.mxu2 }
 0xfc5   :  { %v3602_v34 = vadd.f32 %v6854_v16, %v3601_v27 }
 0xfc7   :  { %v3631_v23 = vpack.c.bf16 %v3602_v34, %v3600_v44  ;;  %v6545_v44 = vld [vmem:[#allocation23] sm:$0xff] }
 0xfc9   :  { %3655 = vmatmul.bf16.gmra.mxu3 %v3631_v23 }
 0xfcc   :  { %v3604_v48 = vpop.f32.mrf.mxu2 }
 0xfcd   :  { %v3605_v0 = vadd.f32 %v6854_v16, %v3604_v48 }
 0xfd4   :  { %v3606_v56 = vpop.f32.mrf.mxu2 }
 0xfd5   :  { %v3607_v36 = vadd.f32 %v6854_v16, %v3606_v56 }
 0xfd7   :  { %v3632_v63 = vpack.c.bf16 %v3607_v36, %v3605_v0  ;;  %v6855_v0 = vld [vmem:[%s9368_s13] ss:$0 sm:$0xff] }
 0xfd9   :  { %3660 = vmatmul.bf16.gmra.mxu3 %v3632_v63 }
 0xfdc   :  { %v3609_v20 = vpop.f32.mrf.mxu2 }
 0xfdd   :  { %v3610_v37 = vadd.f32 %v6854_v16, %v3609_v20 }
 0xfe4   :  { %v3611_v6 = vpop.f32.mrf.mxu2 }
 0xfe5   :  { %v3612_v35 = vadd.f32 %v6854_v16, %v3611_v6 }
 0xfe7   :  { %v3633_v52 = vpack.c.bf16 %v3612_v35, %v3610_v37 }
 0xfe9   :  { %3665 = vmatmul.bf16.gmra.mxu3 %v3633_v52 }
 0xfec   :  { %v3614_v12 = vpop.f32.mrf.mxu2 }
 0xfed   :  { %v3615_v43 = vadd.f32 %v6854_v16, %v3614_v12 }
 0xff4   :  { %v3616_v54 = vpop.f32.mrf.mxu2 }
 0xff5   :  { %v3617_v3 = vadd.f32 %v6854_v16, %v3616_v54 }
 0xff7   :  { %v3634_v15 = vpack.c.bf16 %v3617_v3, %v3615_v43 }
 0xff9   :  { %3670 = vmatmul.bf16.gmra.mxu3 %v3634_v15 }
 0xffc   :  { %v3619_v22 = vpop.f32.mrf.mxu2 }
 0xffd   :  { %v3620_v51 = vadd.f32 %v6854_v16, %v3619_v22 }
0x1004   :  { %v3621_v33 = vpop.f32.mrf.mxu2 }
0x1005   :  { %v3622_v57 = vadd.f32 %v6854_v16, %v3621_v33 }
0x1007   :  { %v3635_v29 = vpack.c.bf16 %v3622_v57, %v3620_v51 }
0x1009   :  { %3675 = vmatmul.bf16.gmra.mxu3 %v3635_v29 }
0x100c   :  { %v3624_v21 = vpop.f32.mrf.mxu2 }
0x100d   :  { %v3625_v41 = vadd.f32 %v6854_v16, %v3624_v21 }
0x1014   :  { %v3626_v59 = vpop.f32.mrf.mxu2 }
0x1015   :  { %v3627_v50 = vadd.f32 %v6854_v16, %v3626_v59  ;;  %v6549_v16 = vld [vmem:[#allocation23 + $0x20] sm:$0xff] }
0x1016   :  { %3931 = vmatpush.bf16.msra.mxu2 %v6549_v16  ;;  %v6567_v16 = vld [vmem:[#allocation26 + $0x30] sm:$0xff] }
0x1017   :  { %v3636_v62 = vpack.c.bf16 %v3627_v50, %v3625_v41 }
0x1019   :  { %3680 = vmatmul.bf16.gmra.mxu3 %v3636_v62 }
0x101a   :  { %3932 = vmatpush.bf16.msra.mxu2 %v6548_v13 }
0x101e   :  { %3933 = vmatpush.bf16.msra.mxu2 %v6547_v14  ;;  %v6565_v14 = vld [vmem:[#allocation26 + $0x20] sm:$0xff] }
0x1022   :  { %3934 = vmatpush.bf16.msra.mxu2 %v6546_v5 }
0x1026   :  { %3935 = vmatpush.bf16.msra.mxu2 %v6545_v44  ;;  %v6564_v44 = vld [vmem:[#allocation26 + $0x18] sm:$0xff] }
0x102c   :  { %v8940_v9 = vpop.f32.mrf.mxu3 }
0x102d   :  { %v3647_v32 = vadd.f32 %v6855_v0, %v8940_v9 }
0x1034   :  { %v8942_v60 = vpop.f32.mrf.mxu3 }
0x1035   :  { %v3649_v50 = vadd.f32 %v6855_v0, %v8942_v60 }
0x103c   :  { %v3651_v38 = vpop.f32.mrf.mxu3 }
0x103d   :  { %v3652_v41 = vadd.f32 %v6855_v0, %v3651_v38 }
0x1044   :  { %v3653_v19 = vpop.f32.mrf.mxu3 }
0x1045   :  { %v3654_v21 = vadd.f32 %v6855_v0, %v3653_v19 }
0x1047   :  { %v3687_v62 = vpack.c.bf16 %v3654_v21, %v3652_v41 }
0x104c   :  { %v3656_v28 = vpop.f32.mrf.mxu3 }
0x104d   :  { %v3657_v29 = vadd.f32 %v6855_v0, %v3656_v28 }
0x1054   :  { %v3658_v45 = vpop.f32.mrf.mxu3 }
0x1055   :  { %v3659_v51 = vadd.f32 %v6855_v0, %v3658_v45 }
0x1057   :  { %v3688_v59 = vpack.c.bf16 %v3659_v51, %v3657_v29 }
0x105c   :  { %v3661_v53 = vpop.f32.mrf.mxu3 }
0x105d   :  { %v3662_v33 = vadd.f32 %v6855_v0, %v3661_v53  ;;  %v3686_v53 = vpack.c.bf16 %v3649_v50, %v3647_v32 }
0x1064   :  { %v3663_v39 = vpop.f32.mrf.mxu3 }
0x1065   :  { %v3664_v15 = vadd.f32 %v6855_v0, %v3663_v39 }
0x1067   :  { %v3689_v57 = vpack.c.bf16 %v3664_v15, %v3662_v33 }
0x106c   :  { %v3666_v55 = vpop.f32.mrf.mxu3 }
0x106d   :  { %v3667_v3 = vadd.f32 %v6855_v0, %v3666_v55 }
0x1074   :  { %v3668_v30 = vpop.f32.mrf.mxu3 }
0x1075   :  { %v3669_v54 = vadd.f32 %v6855_v0, %v3668_v30  ;;  %v6568_v30 = vld [vmem:[#allocation26 + $0x38] sm:$0xff] }
0x1076   :  { %4073 = vmatpush.bf16.msrb.mxu3 %v6568_v30 }
0x1077   :  { %v3690_v22 = vpack.c.bf16 %v3669_v54, %v3667_v3 }
0x107a   :  { %4074 = vmatpush.bf16.msrb.mxu3 %v6567_v16 }
0x107c   :  { %v3671_v26 = vpop.f32.mrf.mxu3 }
0x107d   :  { %v3672_v12 = vadd.f32 %v6855_v0, %v3671_v26  ;;  %v6566_v26 = vld [vmem:[#allocation26 + $0x28] sm:$0xff] }
0x107e   :  { %4075 = vmatpush.bf16.msrb.mxu3 %v6566_v26 }
0x1082   :  { %4076 = vmatpush.bf16.msrb.mxu3 %v6565_v14 }
0x1084   :  { %v3673_v27 = vpop.f32.mrf.mxu3 }
0x1085   :  { %v3674_v35 = vadd.f32 %v6855_v0, %v3673_v27 }
0x1086   :  { %4077 = vmatpush.bf16.msrb.mxu3 %v6564_v44 }
0x1087   :  { %v3691_v43 = vpack.c.bf16 %v3674_v35, %v3672_v12  ;;  %v8972_v12 = vld [vmem:[%s9391_s1] ss:$0 sm:$0xff] }
0x108c   :  { %v3676_v34 = vpop.f32.mrf.mxu3 }
0x108d   :  { %v3677_v37 = vadd.f32 %v6855_v0, %v3676_v34  ;;  %v3840_v34 = vpop.f32.mrf.mxu1 }
0x1094   :  { %v3678_v23 = vpop.f32.mrf.mxu3 }
0x1095   :  { %v3679_v20 = vadd.f32 %v6855_v0, %v3678_v23 }
0x1097   :  { %v3692_v52 = vpack.c.bf16 %v3679_v20, %v3677_v37  ;;  %v3842_v20 = vpop.f32.mrf.mxu1 }
0x109c   :  { %v3681_v48 = vpop.f32.mrf.mxu3 }
0x109d   :  { %v3682_v36 = vadd.f32 %v6855_v0, %v3681_v48  ;;  %v6563_v48 = vld [vmem:[#allocation26 + $0x10] sm:$0xff] }
0x109e   :  { %4078 = vmatpush.bf16.msrb.mxu3 %v6563_v48 }
0x10a4   :  { %v3683_v56 = vpop.f32.mrf.mxu3 }
0x10a5   :  { %v3684_v63 = vadd.f32 %v6855_v0, %v3683_v56  ;;  %v6562_v56 = vld [vmem:[#allocation26 + $0x8] sm:$0xff] }
0x10a6   :  { %4079 = vmatpush.bf16.msrb.mxu3 %v6562_v56 }
0x10a7   :  { %v3693_v6 = vpack.c.bf16 %v3684_v63, %v3682_v36  ;;  %v6561_v63 = vld [vmem:[#allocation26] sm:$0xff] }
0x10a9   :  { %3694 = vmatpush.bf16.msra.mxu0 %v3693_v6  ;;  %4361 = vmatpush.bf16.msrb.mxu2 %v3693_v6  ;;  %v3845_v6 = vpop.f32.mrf.mxu1 }
0x10aa   :  { %4080 = vmatpush.bf16.msrb.mxu3 %v6561_v63 }
0x10ad   :  { %3695 = vmatpush.bf16.msra.mxu0 %v3692_v52  ;;  %4362 = vmatpush.bf16.msrb.mxu2 %v3692_v52 }
0x10b1   :  { %3696 = vmatpush.bf16.msra.mxu0 %v3691_v43  ;;  %4363 = vmatpush.bf16.msrb.mxu2 %v3691_v43  ;;  %v3847_v37 = vpop.f32.mrf.mxu1 }
0x10b5   :  { %3697 = vmatpush.bf16.msra.mxu0 %v3690_v22  ;;  %4364 = vmatpush.bf16.msrb.mxu2 %v3690_v22 }
0x10b9   :  { %3698 = vmatpush.bf16.msra.mxu0 %v3689_v57  ;;  %4365 = vmatpush.bf16.msrb.mxu2 %v3689_v57  ;;  %v3850_v3 = vpop.f32.mrf.mxu1 }
0x10bd   :  { %3699 = vmatpush.bf16.msra.mxu0 %v3688_v59  ;;  %4366 = vmatpush.bf16.msrb.mxu2 %v3688_v59 }
0x10c1   :  { %3700 = vmatpush.bf16.msra.mxu0 %v3687_v62  ;;  %4367 = vmatpush.bf16.msrb.mxu2 %v3687_v62  ;;  %v3852_v57 = vpop.f32.mrf.mxu1 }
0x10c5   :  { %3701 = vmatpush.bf16.msra.mxu0 %v3686_v53  ;;  %4368 = vmatpush.bf16.msrb.mxu2 %v3686_v53 }
0x10c8   :  { %6010 = vmatmul.msk.bf16.vlgmr.msra.gmra.mxu0 %vm8146_vm2, %v9326_v7 }
0x10c9   :  { %v3855_v32 = vpop.f32.mrf.mxu1 }
0x10d8   :  { %6012 = vmatmul.msk.bf16.gmra.mxu0 %vm8157_vm7, %v9326_v7  ;;  %vm4306_vm7 = vcmp.eq.s32.totalorder %v9017_v18, %v9396_v25 }
0x10e8   :  { %6014 = vmatmul.msk.bf16.gmra.mxu0 %vm8167_vm11, %v9326_v7 }
0x10f8   :  { %6016 = vmatmul.msk.bf16.gmra.mxu0 %vm8189_vm3, %v9326_v7 }
0x1108   :  { %6018 = vmatmul.msk.bf16.gmra.mxu0 %vm8217_vm1, %v9326_v7 }
0x1118   :  { %6020 = vmatmul.msk.bf16.gmra.mxu0 %vm9369_vm9, %v9326_v7 }
0x1128   :  { %6022 = vmatmul.msk.bf16.gmra.mxu0 %vm9371_vm5, %v9326_v7 }
0x1138   :  { %6024 = vmatmul.msk.bf16.gmra.mxu0 %vm8274_vm14, %v9326_v7 }
0x1145   :  { %v3703_v1 = vpop.f32.mrf.mxu0 }
0x114d   :  { %v3705_v8 = vpop.f32.mrf.mxu0 }
0x114e   :  { %v3743_v11 = vpack.c.bf16 %v3705_v8, %v3703_v1  ;;  %v3857_v8 = vpop.f32.mrf.mxu1 }
0x1150   :  { %3936 = vmatmul.bf16.vlgmr.msra.gmra.mxu2 %v3743_v11 }
0x1155   :  { %v3708_v17 = vpop.f32.mrf.mxu0 }
0x115d   :  { %v3710_v9 = vpop.f32.mrf.mxu0 }
0x115e   :  { %v3744_v24 = vpack.c.bf16 %v3710_v9, %v3708_v17 }
0x1160   :  { %3941 = vmatmul.bf16.gmra.mxu2 %v3744_v24 }
0x1165   :  { %v3713_v60 = vpop.f32.mrf.mxu0 }
0x116d   :  { %v3715_v38 = vpop.f32.mrf.mxu0 }
0x116e   :  { %v3745_v31 = vpack.c.bf16 %v3715_v38, %v3713_v60 }
0x1170   :  { %3946 = vmatmul.bf16.gmra.mxu2 %v3745_v31  ;;  %v3860_v31 = vpop.f32.mrf.mxu1 }
0x1175   :  { %v3718_v19 = vpop.f32.mrf.mxu0 }
0x117d   :  { %v3720_v28 = vpop.f32.mrf.mxu0 }
0x117e   :  { %v3746_v46 = vpack.c.bf16 %v3720_v28, %v3718_v19 }
0x1180   :  { %3951 = vmatmul.bf16.gmra.mxu2 %v3746_v46 }
0x1185   :  { %v3723_v45 = vpop.f32.mrf.mxu0 }
0x118d   :  { %v3725_v39 = vpop.f32.mrf.mxu0 }
0x118e   :  { %v3747_v61 = vpack.c.bf16 %v3725_v39, %v3723_v45 }
0x1190   :  { %3956 = vmatmul.bf16.gmra.mxu2 %v3747_v61  ;;  %v3862_v61 = vpop.f32.mrf.mxu1 }
0x1195   :  { %v3728_v55 = vpop.f32.mrf.mxu0 }
0x119d   :  { %v3730_v4 = vpop.f32.mrf.mxu0 }
0x119e   :  { %v3748_v58 = vpack.c.bf16 %v3730_v4, %v3728_v55 }
0x11a0   :  { %3961 = vmatmul.bf16.gmra.mxu2 %v3748_v58  ;;  %v3865_v58 = vpop.f32.mrf.mxu1 }
0x11a5   :  { %v3733_v13 = vpop.f32.mrf.mxu0 }
0x11ad   :  { %v3735_v5 = vpop.f32.mrf.mxu0 }
0x11ae   :  { %v3749_v27 = vpack.c.bf16 %v3735_v5, %v3733_v13 }
0x11b0   :  { %3966 = vmatmul.bf16.gmra.mxu2 %v3749_v27  ;;  %v3867_v27 = vpop.f32.mrf.mxu1 }
0x11b5   :  { %v3738_v23 = vpop.f32.mrf.mxu0 }
0x11b8   :  { %v3870_v56 = vpop.f32.mrf.mxu1 }
0x11bd   :  { %v3740_v0 = vpop.f32.mrf.mxu0 }
0x11be   :  { %v3750_v36 = vpack.c.bf16 %v3740_v0, %v3738_v23 }
0x11c0   :  { %3971 = vmatmul.bf16.gmra.mxu2 %v3750_v36 }
0x11d3   :  { %v3937_v35 = vpop.f32.mrf.mxu2 }
0x11d4   :  { %v3938_v52 = vadd.f32 %v3937_v35, %v3840_v34  ;;  %v3872_v35 = vpop.f32.mrf.mxu1 }
0x11d6   :  { %v3981_v15 = vadd.f32 %v8972_v12, %v3938_v52  ;;  %v6574_v52 = vld [vmem:[#allocation28 + $0x28] sm:$0xff] }
0x11db   :  { %v3939_v54 = vpop.f32.mrf.mxu2 }
0x11dc   :  { %v3940_v43 = vadd.f32 %v3939_v54, %v3842_v20  ;;  %v6576_v20 = vld [vmem:[#allocation28 + $0x38] sm:$0xff] }
0x11dd   :  { %4198 = vmatpush.bf16.msrb.mxu0 %v6576_v20 }
0x11de   :  { %v3982_v22 = vadd.f32 %v8972_v12, %v3940_v43 }
0x11e0   :  { %v3997_v33 = vpack.c.bf16 %v3982_v22, %v3981_v15  ;;  %v6573_v15 = vld [vmem:[#allocation28 + $0x20] sm:$0xff] }
0x11e2   :  { %4081 = vmatmul.bf16.vlgmr.msrb.gmra.mxu3 %v3997_v33 }
0x11e3   :  { %v3942_v51 = vpop.f32.mrf.mxu2 }
0x11e4   :  { %v3943_v29 = vadd.f32 %v3942_v51, %v3845_v6 }
0x11e6   :  { %v3983_v41 = vadd.f32 %v8972_v12, %v3943_v29  ;;  %v3875_v29 = vpop.f32.mrf.mxu1 }
0x11eb   :  { %v3944_v21 = vpop.f32.mrf.mxu2 }
0x11ec   :  { %v3945_v59 = vadd.f32 %v3944_v21, %v3847_v37  ;;  %v6575_v37 = vld [vmem:[#allocation28 + $0x30] sm:$0xff] }
0x11ed   :  { %4199 = vmatpush.bf16.msrb.mxu0 %v6575_v37 }
0x11ee   :  { %v3984_v50 = vadd.f32 %v8972_v12, %v3945_v59  ;;  %v6571_v59 = vld [vmem:[#allocation28 + $0x10] sm:$0xff] }
0x11f0   :  { %v3998_v62 = vpack.c.bf16 %v3984_v50, %v3983_v41  ;;  %v6570_v41 = vld [vmem:[#allocation28 + $0x8] sm:$0xff] }
0x11f1   :  { %4200 = vmatpush.bf16.msrb.mxu0 %v6574_v52 }
0x11f2   :  { %4086 = vmatmul.bf16.gmra.mxu3 %v3998_v62  ;;  %v3877_v62 = vpop.f32.mrf.mxu1 }
0x11f3   :  { %v3947_v53 = vpop.f32.mrf.mxu2 }
0x11f4   :  { %v3948_v1 = vadd.f32 %v3947_v53, %v3850_v3 }
0x11f5   :  { %4201 = vmatpush.bf16.msrb.mxu0 %v6573_v15 }
0x11f6   :  { %v3985_v9 = vadd.f32 %v8972_v12, %v3948_v1 }
0x11fb   :  { %v3949_v11 = vpop.f32.mrf.mxu2 }
0x11fc   :  { %v3950_v17 = vadd.f32 %v3949_v11, %v3852_v57  ;;  %v6572_v57 = vld [vmem:[#allocation28 + $0x18] sm:$0xff]  ;;  %v6569_v11 = vld [vmem:[#allocation28] sm:$0xff] }
0x11fd   :  { %4202 = vmatpush.bf16.msrb.mxu0 %v6572_v57 }
0x11fe   :  { %v3986_v24 = vadd.f32 %v8972_v12, %v3950_v17 }
0x1200   :  { %v3999_v60 = vpack.c.bf16 %v3986_v24, %v3985_v9  ;;  %v6750_v24 = vld [vmem:[%s9392_s30] ss:$0 sm:$0xff] }
0x1201   :  { %4203 = vmatpush.bf16.msrb.mxu0 %v6571_v59 }
0x1202   :  { %4091 = vmatmul.bf16.gmra.mxu3 %v3999_v60 }
0x1203   :  { %v3952_v38 = vpop.f32.mrf.mxu2 }
0x1204   :  { %v3953_v19 = vadd.f32 %v3952_v38, %v3855_v32 }
0x1205   :  { %4204 = vmatpush.bf16.msrb.mxu0 %v6570_v41 }
0x1206   :  { %v3987_v45 = vadd.f32 %v8972_v12, %v3953_v19 }
0x1209   :  { %4205 = vmatpush.bf16.msrb.mxu0 %v6569_v11 }
0x120b   :  { %v3954_v28 = vpop.f32.mrf.mxu2 }
0x120c   :  { %v3955_v46 = vadd.f32 %v3954_v28, %v3857_v8 }
0x120e   :  { %v3988_v39 = vadd.f32 %v8972_v12, %v3955_v46 }
0x1210   :  { %v4000_v55 = vpack.c.bf16 %v3988_v39, %v3987_v45 }
0x1212   :  { %4096 = vmatmul.bf16.gmra.mxu3 %v4000_v55 }
0x1213   :  { %v3957_v4 = vpop.f32.mrf.mxu2 }
0x1214   :  { %v3958_v30 = vadd.f32 %v3957_v4, %v3860_v31 }
0x1216   :  { %v3989_v26 = vadd.f32 %v8972_v12, %v3958_v30 }
0x121b   :  { %v3959_v16 = vpop.f32.mrf.mxu2 }
0x121c   :  { %v3960_v13 = vadd.f32 %v3959_v16, %v3862_v61 }
0x121e   :  { %v3990_v14 = vadd.f32 %v8972_v12, %v3960_v13 }
0x1220   :  { %v4001_v5 = vpack.c.bf16 %v3990_v14, %v3989_v26 }
0x1222   :  { %4101 = vmatmul.bf16.gmra.mxu3 %v4001_v5 }
0x1223   :  { %v3962_v44 = vpop.f32.mrf.mxu2 }
0x1224   :  { %v3963_v34 = vadd.f32 %v3962_v44, %v3865_v58 }
0x1226   :  { %v3991_v0 = vadd.f32 %v8972_v12, %v3963_v34 }
0x122b   :  { %v3964_v23 = vpop.f32.mrf.mxu2 }
0x122c   :  { %v3965_v48 = vadd.f32 %v3964_v23, %v3867_v27 }
0x122e   :  { %v3992_v36 = vadd.f32 %v8972_v12, %v3965_v48 }
0x1230   :  { %v4002_v63 = vpack.c.bf16 %v3992_v36, %v3991_v0 }
0x1232   :  { %4106 = vmatmul.bf16.gmra.mxu3 %v4002_v63 }
0x1233   :  { %v3967_v6 = vpop.f32.mrf.mxu2 }
0x1234   :  { %v3968_v54 = vadd.f32 %v3967_v6, %v3870_v56 }
0x1236   :  { %v3993_v22 = vadd.f32 %v8972_v12, %v3968_v54 }
0x123b   :  { %v3969_v43 = vpop.f32.mrf.mxu2 }
0x123c   :  { %v3970_v3 = vadd.f32 %v3969_v43, %v3872_v35 }
0x123e   :  { %v3994_v33 = vadd.f32 %v8972_v12, %v3970_v3 }
0x1240   :  { %v4003_v51 = vpack.c.bf16 %v3994_v33, %v3993_v22 }
0x1242   :  { %4111 = vmatmul.bf16.gmra.mxu3 %v4003_v51 }
0x1243   :  { %v3972_v21 = vpop.f32.mrf.mxu2 }
0x1244   :  { %v3973_v50 = vadd.f32 %v3972_v21, %v3875_v29 }
0x1246   :  { %v3995_v1 = vadd.f32 %v8972_v12, %v3973_v50 }
0x124b   :  { %v3974_v32 = vpop.f32.mrf.mxu2 }
0x124c   :  { %v3975_v53 = vadd.f32 %v3974_v32, %v3877_v62 }
0x124e   :  { %v3996_v8 = vadd.f32 %v8972_v12, %v3975_v53 }
0x1250   :  { %v4004_v17 = vpack.c.bf16 %v3996_v8, %v3995_v1 }
0x1252   :  { %4116 = vmatmul.bf16.gmra.mxu3 %v4004_v17 }
0x1265   :  { %v4082_v9 = vpop.f32.mrf.mxu3 }
0x1266   :  { %v4083_v38 = vadd.f32 %v6750_v24, %v4082_v9 }
0x126d   :  { %v4084_v60 = vpop.f32.mrf.mxu3 }
0x126e   :  { %v4085_v31 = vadd.f32 %v6750_v24, %v4084_v60  ;;  %v6751_v60 = vld [vmem:[%s9393_s4] ss:$0 sm:$0xff] }
0x1270   :  { %v4122_v19 = vpack.c.bf16 %v4085_v31, %v4083_v38 }
0x1272   :  { %4206 = vmatmul.bf16.vlgmr.msrb.gmra.mxu0 %v4122_v19 }
0x1275   :  { %v4087_v28 = vpop.f32.mrf.mxu3 }
0x1276   :  { %v4088_v45 = vadd.f32 %v6750_v24, %v4087_v28 }
0x127d   :  { %v4089_v46 = vpop.f32.mrf.mxu3 }
0x127e   :  { %v4090_v39 = vadd.f32 %v6750_v24, %v4089_v46 }
0x1280   :  { %v4123_v61 = vpack.c.bf16 %v4090_v39, %v4088_v45 }
0x1282   :  { %4211 = vmatmul.bf16.gmra.mxu0 %v4123_v61 }
0x1285   :  { %v4092_v55 = vpop.f32.mrf.mxu3 }
0x1286   :  { %v4093_v12 = vadd.f32 %v6750_v24, %v4092_v55 }
0x128d   :  { %v4094_v4 = vpop.f32.mrf.mxu3 }
0x128e   :  { %v4095_v58 = vadd.f32 %v6750_v24, %v4094_v4 }
0x1290   :  { %v4124_v30 = vpack.c.bf16 %v4095_v58, %v4093_v12 }
0x1292   :  { %4216 = vmatmul.bf16.gmra.mxu0 %v4124_v30 }
0x1295   :  { %v4097_v16 = vpop.f32.mrf.mxu3 }
0x1296   :  { %v4098_v26 = vadd.f32 %v6750_v24, %v4097_v16 }
0x129d   :  { %v4099_v13 = vpop.f32.mrf.mxu3 }
0x129e   :  { %v4100_v14 = vadd.f32 %v6750_v24, %v4099_v13 }
0x12a0   :  { %v4125_v5 = vpack.c.bf16 %v4100_v14, %v4098_v26 }
0x12a2   :  { %4221 = vmatmul.bf16.gmra.mxu0 %v4125_v5 }
0x12a5   :  { %v4102_v27 = vpop.f32.mrf.mxu3 }
0x12a6   :  { %v4103_v34 = vadd.f32 %v6750_v24, %v4102_v27 }
0x12ad   :  { %v4104_v44 = vpop.f32.mrf.mxu3 }
0x12ae   :  { %v4105_v23 = vadd.f32 %v6750_v24, %v4104_v44 }
0x12b0   :  { %v4126_v48 = vpack.c.bf16 %v4105_v23, %v4103_v34 }
0x12b2   :  { %4226 = vmatmul.bf16.gmra.mxu0 %v4126_v48 }
0x12b5   :  { %v4107_v56 = vpop.f32.mrf.mxu3 }
0x12b6   :  { %v4108_v36 = vadd.f32 %v6750_v24, %v4107_v56 }
0x12bd   :  { %v4109_v0 = vpop.f32.mrf.mxu3 }
0x12be   :  { %v4110_v63 = vadd.f32 %v6750_v24, %v4109_v0 }
0x12c0   :  { %v4127_v20 = vpack.c.bf16 %v4110_v63, %v4108_v36 }
0x12c2   :  { %4231 = vmatmul.bf16.gmra.mxu0 %v4127_v20 }
0x12c5   :  { %v4112_v6 = vpop.f32.mrf.mxu3 }
0x12c6   :  { %v4113_v35 = vadd.f32 %v6750_v24, %v4112_v6 }
0x12cd   :  { %v4114_v37 = vpop.f32.mrf.mxu3 }
0x12ce   :  { %v4115_v52 = vadd.f32 %v6750_v24, %v4114_v37 }
0x12d0   :  { %v4128_v54 = vpack.c.bf16 %v4115_v52, %v4113_v35 }
0x12d2   :  { %4236 = vmatmul.bf16.gmra.mxu0 %v4128_v54  ;;  %v9395_v54 = vld [vmem:[#allocation86_spill] sm:$0xff] }
0x12d3   :  { %vm4305_vm2 = vcmp.eq.s32.totalorder %v9017_v18, %v9395_v54 }
0x12d4   :  { %vm9023_vm11 = vmpackc.low %vm4306_vm7, %vm4305_vm2 }
0x12d5   :  { %v4117_v43 = vpop.f32.mrf.mxu3  ;;  %6186 = vmatmul.msk.bf16.vlgmr.msrb.gmra.mxu2 %vm9023_vm11, %v9326_v7 }
0x12d6   :  { %v4118_v15 = vadd.f32 %v6750_v24, %v4117_v43 }
0x12dd   :  { %v4119_v3 = vpop.f32.mrf.mxu3 }
0x12de   :  { %v4120_v22 = vadd.f32 %v6750_v24, %v4119_v3 }
0x12e0   :  { %v4129_v33 = vpack.c.bf16 %v4120_v22, %v4118_v15 }
0x12e2   :  { %4241 = vmatmul.bf16.gmra.mxu0 %v4129_v33  ;;  %v9399_v33 = vld [vmem:[#allocation89_spill] sm:$0xff] }
0x12e3   :  { %vm4307_vm3 = vcmp.eq.s32.totalorder %v9017_v18, %v9399_v33 }
0x12ef   :  { %v4207_v51 = vpop.f32.mrf.mxu0 }
0x12f0   :  { %v4208_v48 = vadd.f32 %v6751_v60, %v4207_v51  ;;  %v9400_v51 = vld [vmem:[#allocation90_spill] sm:$0xff] }
0x12f1   :  { %vm4308_vm1 = vcmp.eq.s32.totalorder %v9017_v18, %v9400_v51 }
0x12f2   :  { %vm9034_vm14 = vmpackc.low %vm4308_vm1, %vm4307_vm3 }
0x12f3   :  { %6188 = vmatmul.msk.bf16.gmra.mxu2 %vm9034_vm14, %v9326_v7 }
0x12f7   :  { %v4209_v57 = vpop.f32.mrf.mxu0 }
0x12f8   :  { %v4210_v34 = vadd.f32 %v6751_v60, %v4209_v57 }
0x12fa   :  { %v4247_v56 = vpack.c.bf16 %v4210_v34, %v4208_v48  ;;  %v6579_v34 = vld [vmem:[#allocation29 + $0x10] sm:$0xff]  ;;  %v6578_v48 = vld [vmem:[#allocation29 + $0x8] sm:$0xff] }
0x12ff   :  { %v4212_v29 = vpop.f32.mrf.mxu0 }
0x1300   :  { %v4213_v44 = vadd.f32 %v6751_v60, %v4212_v29 }
0x1307   :  { %v4214_v21 = vpop.f32.mrf.mxu0 }
0x1308   :  { %v4215_v5 = vadd.f32 %v6751_v60, %v4214_v21 }
0x130a   :  { %v4248_v23 = vpack.c.bf16 %v4215_v5, %v4213_v44  ;;  %v6580_v5 = vld [vmem:[#allocation29 + $0x18] sm:$0xff] }
0x130b   :  { %v6588_v44 = vld [vmem:[#allocation31 + $0x18] sm:$0xff] }
0x130f   :  { %v4217_v59 = vpop.f32.mrf.mxu0 }
0x1310   :  { %v4218_v14 = vadd.f32 %v6751_v60, %v4217_v59 }
0x1317   :  { %v4219_v41 = vpop.f32.mrf.mxu0 }
0x1318   :  { %v4220_v13 = vadd.f32 %v6751_v60, %v4219_v41 }
0x131a   :  { %v4249_v27 = vpack.c.bf16 %v4220_v13, %v4218_v14  ;;  %v6582_v13 = vld [vmem:[#allocation29 + $0x28] sm:$0xff]  ;;  %v6581_v14 = vld [vmem:[#allocation29 + $0x20] sm:$0xff] }
0x131f   :  { %v4222_v50 = vpop.f32.mrf.mxu0 }
0x1320   :  { %v4223_v16 = vadd.f32 %v6751_v60, %v4222_v50  ;;  %v9403_v50 = vld [vmem:[#allocation92_spill] sm:$0xff] }
0x1327   :  { %v4224_v62 = vpop.f32.mrf.mxu0 }
0x1328   :  { %v4225_v58 = vadd.f32 %v6751_v60, %v4224_v62  ;;  %v9404_v62 = vld [vmem:[#allocation93_spill] sm:$0xff] }
0x132a   :  { %v4250_v26 = vpack.c.bf16 %v4225_v58, %v4223_v16  ;;  %v9423_v58 = vld [vmem:[#allocation111_spill] sm:$0xff] }
0x132b   :  { %v6590_v16 = vld [vmem:[#allocation31 + $0x28] sm:$0xff] }
0x132f   :  { %v4227_v32 = vpop.f32.mrf.mxu0 }
0x1330   :  { %v4228_v12 = vadd.f32 %v6751_v60, %v4227_v32 }
0x1337   :  { %v4229_v53 = vpop.f32.mrf.mxu0 }
0x1338   :  { %v4230_v55 = vadd.f32 %v6751_v60, %v4229_v53 }
0x133a   :  { %v4251_v30 = vpack.c.bf16 %v4230_v55, %v4228_v12  ;;  %v6591_v55 = vld [vmem:[#allocation31 + $0x30] sm:$0xff] }
0x133f   :  { %v4232_v1 = vpop.f32.mrf.mxu0 }
0x1340   :  { %v4233_v61 = vadd.f32 %v6751_v60, %v4232_v1 }
0x1347   :  { %v4234_v8 = vpop.f32.mrf.mxu0 }
0x1348   :  { %v4235_v45 = vadd.f32 %v6751_v60, %v4234_v8 }
0x134a   :  { %v4252_v4 = vpack.c.bf16 %v4235_v45, %v4233_v61  ;;  %v9420_v61 = vld [vmem:[#allocation106_spill] sm:$0xff] }
0x134b   :  { %vm4318_vm3 = vcmp.eq.s32.totalorder %v9017_v18, %v9420_v61  ;;  %v6597_v61 = vld [vmem:[#allocation32 + $0x20] sm:$0xff] }
0x134f   :  { %v4237_v11 = vpop.f32.mrf.mxu0 }
0x1350   :  { %v4238_v46 = vadd.f32 %v6751_v60, %v4237_v11  ;;  %v9407_v11 = vld [vmem:[#allocation95_spill] sm:$0xff] }
0x1351   :  { %vm4311_vm9 = vcmp.eq.s32.totalorder %v9017_v18, %v9407_v11 }
0x1357   :  { %v4239_v17 = vpop.f32.mrf.mxu0 }
0x1358   :  { %v4240_v19 = vadd.f32 %v6751_v60, %v4239_v17  ;;  %v9408_v17 = vld [vmem:[#allocation96_spill] sm:$0xff] }
0x1359   :  { %vm4312_vm5 = vcmp.eq.s32.totalorder %v9017_v18, %v9408_v17  ;;  %v6599_v17 = vld [vmem:[#allocation32 + $0x30] sm:$0xff] }
0x135a   :  { %v4253_v39 = vpack.c.bf16 %v4240_v19, %v4238_v46  ;;  %v9416_v19 = vld [vmem:[#allocation102_spill] sm:$0xff]  ;;  %v6584_v46 = vld [vmem:[#allocation29 + $0x38] sm:$0xff] }
0x135b   :  { %vm4316_vm2 = vcmp.eq.s32.totalorder %v9017_v18, %v9416_v19 }
0x135f   :  { %v4242_v9 = vpop.f32.mrf.mxu0 }
0x1360   :  { %v4243_v38 = vadd.f32 %v6751_v60, %v4242_v9 }
0x1367   :  { %v4244_v24 = vpop.f32.mrf.mxu0 }
0x1368   :  { %v4245_v31 = vadd.f32 %v6751_v60, %v4244_v24  ;;  %v9411_v60 = vld [vmem:[#allocation98_spill] sm:$0xff]  ;;  %v9412_v24 = vld [vmem:[#allocation99_spill] sm:$0xff] }
0x136a   :  { %v4254_v28 = vpack.c.bf16 %v4245_v31, %v4243_v38  ;;  %v9415_v31 = vld [vmem:[#allocation101_spill] sm:$0xff] }
0x136c   :  { %4255 = vmatpush.bf16.msrb.mxu1 %v4254_v28  ;;  %v6592_v28 = vld [vmem:[#allocation31 + $0x38] sm:$0xff] }
0x136d   :  { %4563 = vmatpush.bf16.msra.mxu0 %v6592_v28  ;;  %v6598_v28 = vld [vmem:[#allocation32 + $0x28] sm:$0xff] }
0x1370   :  { %4256 = vmatpush.bf16.msrb.mxu1 %v4253_v39  ;;  %v9419_v39 = vld [vmem:[#allocation105_spill] sm:$0xff] }
0x1371   :  { %4564 = vmatpush.bf16.msra.mxu0 %v6591_v55 }
0x1374   :  { %4257 = vmatpush.bf16.msrb.mxu1 %v4252_v4  ;;  %v6583_v4 = vld [vmem:[#allocation29 + $0x30] sm:$0xff] }
0x1375   :  { %4565 = vmatpush.bf16.msra.mxu0 %v6590_v16  ;;  %v6595_v16 = vld [vmem:[#allocation32 + $0x10] sm:$0xff] }
0x1378   :  { %4258 = vmatpush.bf16.msrb.mxu1 %v4251_v30  ;;  %v9424_v30 = vld [vmem:[#allocation112_spill] sm:$0xff] }
0x137c   :  { %4259 = vmatpush.bf16.msrb.mxu1 %v4250_v26 }
0x1380   :  { %4260 = vmatpush.bf16.msrb.mxu1 %v4249_v27  ;;  %v6589_v27 = vld [vmem:[#allocation31 + $0x20] sm:$0xff] }
0x1381   :  { %4566 = vmatpush.bf16.msra.mxu0 %v6589_v27 }
0x1384   :  { %4261 = vmatpush.bf16.msrb.mxu1 %v4248_v23  ;;  %v4370_v23 = vpop.f32.mrf.mxu2 }
0x1385   :  { %4567 = vmatpush.bf16.msra.mxu0 %v6588_v44 }
0x1388   :  { %4262 = vmatpush.bf16.msrb.mxu1 %v4247_v56  ;;  %v6577_v56 = vld [vmem:[#allocation29] sm:$0xff] }
0x138b   :  { %6154 = vmatmul.msk.bf16.vlgmr.msrb.gmra.mxu1 %vm9379_vm13, %v9326_v7  ;;  %vm9059_vm13 = vmpackc.low %vm4312_vm5, %vm4311_vm9 }
0x138c   :  { %4660 = vmatpush.bf16.msra.mxu1 %v6584_v46 }
0x1390   :  { %4661 = vmatpush.bf16.msra.mxu1 %v6583_v4  ;;  %v6596_v4 = vld [vmem:[#allocation32 + $0x18] sm:$0xff] }
0x1394   :  { %4662 = vmatpush.bf16.msra.mxu1 %v6582_v13  ;;  %v6594_v13 = vld [vmem:[#allocation32 + $0x8] sm:$0xff] }
0x1398   :  { %4663 = vmatpush.bf16.msra.mxu1 %v6581_v14  ;;  %v6593_v14 = vld [vmem:[#allocation32] sm:$0xff] }
0x139b   :  { %6156 = vmatmul.msk.bf16.gmra.mxu1 %vm9381_vm12, %v9326_v7  ;;  %vm4313_vm12 = vcmp.eq.s32.totalorder %v9017_v18, %v9411_v60 }
0x139c   :  { %4664 = vmatpush.bf16.msra.mxu1 %v6580_v5 }
0x13a0   :  { %4665 = vmatpush.bf16.msra.mxu1 %v6579_v34 }
0x13a4   :  { %4666 = vmatpush.bf16.msra.mxu1 %v6578_v48 }
0x13a8   :  { %4667 = vmatpush.bf16.msra.mxu1 %v6577_v56 }
0x13ab   :  { %6158 = vmatmul.msk.bf16.gmra.mxu1 %vm9383_vm0, %v9326_v7  ;;  %vm4314_vm0 = vcmp.eq.s32.totalorder %v9017_v18, %v9412_v24 }
0x13bb   :  { %6160 = vmatmul.msk.bf16.gmra.mxu1 %vm8466_vm10, %v9326_v7  ;;  %vm4309_vm10 = vcmp.eq.s32.totalorder %v9017_v18, %v9403_v50  ;;  %v6600_v50 = vld [vmem:[#allocation32 + $0x38] sm:$0xff] }
0x13bc   :  { %4805 = vmatpush.bf16.msra.mxu2 %v6600_v50 }
0x13c0   :  { %4806 = vmatpush.bf16.msra.mxu2 %v6599_v17 }
0x13c4   :  { %4807 = vmatpush.bf16.msra.mxu2 %v6598_v28 }
0x13c8   :  { %4808 = vmatpush.bf16.msra.mxu2 %v6597_v61 }
0x13cb   :  { %6162 = vmatmul.msk.bf16.gmra.mxu1 %vm8483_vm6, %v9326_v7  ;;  %vm4310_vm6 = vcmp.eq.s32.totalorder %v9017_v18, %v9404_v62 }
0x13cc   :  { %4809 = vmatpush.bf16.msra.mxu2 %v6596_v4 }
0x13d0   :  { %4810 = vmatpush.bf16.msra.mxu2 %v6595_v16  ;;  %v6605_v16 = vld [vmem:[#allocation34 + $0x20] sm:$0xff] }
0x13d4   :  { %4811 = vmatpush.bf16.msra.mxu2 %v6594_v13 }
0x13d8   :  { %4812 = vmatpush.bf16.msra.mxu2 %v6593_v14 }
0x13db   :  { %6164 = vmatmul.msk.bf16.gmra.mxu1 %vm9387_vm15, %v9326_v7  ;;  %vm9073_vm15 = vmpackc.low %vm4314_vm0, %vm4313_vm12 }
0x13eb   :  { %6166 = vmatmul.msk.bf16.gmra.mxu1 %vm9389_vm4, %v9326_v7  ;;  %vm4315_vm4 = vcmp.eq.s32.totalorder %v9017_v18, %v9415_v31 }
0x13ec   :  { %vm9087_vm7 = vmpackc.low %vm4316_vm2, %vm4315_vm4 }
0x13fb   :  { %6168 = vmatmul.msk.bf16.gmra.mxu1 %vm8583_vm8, %v9326_v7  ;;  %vm9045_vm8 = vmpackc.low %vm4310_vm6, %vm4309_vm10  ;;  %vm4320_vm10 = vcmp.eq.s32.totalorder %v9017_v18, %v9424_v30 }
0x13fc   :  { %6190 = vmatmul.msk.bf16.gmra.mxu2 %vm9045_vm8, %v9326_v7 }
0x1408   :  { %v4264_v2 = vpop.f32.mrf.mxu1 }
0x140c   :  { %6192 = vmatmul.msk.bf16.gmra.mxu2 %vm9059_vm13, %v9326_v7 }
0x1410   :  { %v4266_v10 = vpop.f32.mrf.mxu1 }
0x1411   :  { %v4410_v8 = vpack.c.bf16 %v4266_v10, %v4264_v2  ;;  %v4372_v2 = vpop.f32.mrf.mxu2 }
0x1412   :  { %v4467_v10 = vpack.c.bf16 %v4372_v2, %v4370_v23  ;;  %v9132_v2 = vld [vmem:[%s9427_s7] ss:$0 sm:$0xff] }
0x1414   :  { %4668 = vmatmul.bf16.vlgmr.msra.gmra.mxu1 %v4467_v10 }
0x1418   :  { %v4269_v42 = vpop.f32.mrf.mxu1 }
0x141c   :  { %6194 = vmatmul.msk.bf16.gmra.mxu2 %vm9073_vm15, %v9326_v7 }
0x1420   :  { %v4271_v49 = vpop.f32.mrf.mxu1 }
0x1421   :  { %v4411_v1 = vpack.c.bf16 %v4271_v49, %v4269_v42  ;;  %v6587_v42 = vld [vmem:[#allocation31 + $0x10] sm:$0xff]  ;;  %v6586_v49 = vld [vmem:[#allocation31 + $0x8] sm:$0xff] }
0x1422   :  { %4568 = vmatpush.bf16.msra.mxu0 %v6587_v42 }
0x1426   :  { %4569 = vmatpush.bf16.msra.mxu0 %v6586_v49 }
0x1428   :  { %v4274_v0 = vpop.f32.mrf.mxu1 }
0x142c   :  { %6196 = vmatmul.msk.bf16.gmra.mxu2 %vm9087_vm7, %v9326_v7 }
0x1430   :  { %v4276_v40 = vpop.f32.mrf.mxu1 }
0x1431   :  { %v4412_v53 = vpack.c.bf16 %v4276_v40, %v4274_v0  ;;  %v4375_v0 = vpop.f32.mrf.mxu2  ;;  %v6585_v40 = vld [vmem:[#allocation31] sm:$0xff] }
0x1432   :  { %4570 = vmatpush.bf16.msra.mxu0 %v6585_v40 }
0x1438   :  { %v4279_v36 = vpop.f32.mrf.mxu1 }
0x1440   :  { %v4281_v63 = vpop.f32.mrf.mxu1 }
0x1441   :  { %v4413_v41 = vpack.c.bf16 %v4281_v63, %v4279_v36  ;;  %v4377_v36 = vpop.f32.mrf.mxu2 }
0x1442   :  { %v4468_v63 = vpack.c.bf16 %v4377_v36, %v4375_v0 }
0x1444   :  { %4673 = vmatmul.bf16.gmra.mxu1 %v4468_v63 }
0x1448   :  { %v4284_v20 = vpop.f32.mrf.mxu1 }
0x1450   :  { %v4286_v47 = vpop.f32.mrf.mxu1 }
0x1451   :  { %v4414_v59 = vpack.c.bf16 %v4286_v47, %v4284_v20 }
0x1458   :  { %v4289_v6 = vpop.f32.mrf.mxu1 }
0x1460   :  { %v4291_v37 = vpop.f32.mrf.mxu1 }
0x1461   :  { %v4415_v21 = vpack.c.bf16 %v4291_v37, %v4289_v6 }
0x1468   :  { %v4294_v35 = vpop.f32.mrf.mxu1 }
0x1470   :  { %v4296_v52 = vpop.f32.mrf.mxu1 }
0x1471   :  { %v4416_v29 = vpack.c.bf16 %v4296_v52, %v4294_v35 }
0x1478   :  { %v4299_v3 = vpop.f32.mrf.mxu1 }
0x147f   :  { %v4380_v20 = vpop.f32.mrf.mxu2 }
0x1480   :  { %v4301_v15 = vpop.f32.mrf.mxu1 }
0x1481   :  { %v4417_v22 = vpack.c.bf16 %v4301_v15, %v4299_v3 }
0x1483   :  { %4418 = vmatpush.bf16.msra.mxu3 %v4417_v22 }
0x1487   :  { %4419 = vmatpush.bf16.msra.mxu3 %v4416_v29  ;;  %v4382_v47 = vpop.f32.mrf.mxu2 }
0x1488   :  { %v4469_v6 = vpack.c.bf16 %v4382_v47, %v4380_v20 }
0x148a   :  { %4678 = vmatmul.bf16.gmra.mxu1 %v4469_v6 }
0x148b   :  { %4420 = vmatpush.bf16.msra.mxu3 %v4415_v21 }
0x148f   :  { %4421 = vmatpush.bf16.msra.mxu3 %v4414_v59  ;;  %v4385_v35 = vpop.f32.mrf.mxu2 }
0x1491   :  { %v4669_v30 = vpop.f32.mrf.mxu1 }
0x1493   :  { %4422 = vmatpush.bf16.msra.mxu3 %v4413_v41 }
0x1497   :  { %4423 = vmatpush.bf16.msra.mxu3 %v4412_v53  ;;  %v4387_v54 = vpop.f32.mrf.mxu2 }
0x1498   :  { %v4470_v25 = vpack.c.bf16 %v4387_v54, %v4385_v35 }
0x1499   :  { %v4671_v5 = vpop.f32.mrf.mxu1 }
0x149a   :  { %4683 = vmatmul.bf16.gmra.mxu1 %v4470_v25 }
0x149b   :  { %4424 = vmatpush.bf16.msra.mxu3 %v4411_v1 }
0x149f   :  { %4425 = vmatpush.bf16.msra.mxu3 %v4410_v8  ;;  %v4390_v3 = vpop.f32.mrf.mxu2 }
0x14a2   :  { %6202 = vmatmul.msk.bf16.vlgmr.msra.gmra.mxu3 %vm9023_vm11, %v9326_v7  ;;  %vm4317_vm11 = vcmp.eq.s32.totalorder %v9017_v18, %v9419_v39 }
0x14a3   :  { %vm9101_vm1 = vmpackc.low %vm4318_vm3, %vm4317_vm11 }
0x14a4   :  { %6198 = vmatmul.msk.bf16.gmra.mxu2 %vm9101_vm1, %v9326_v7 }
0x14a7   :  { %v4392_v33 = vpop.f32.mrf.mxu2 }
0x14a8   :  { %v4471_v51 = vpack.c.bf16 %v4392_v33, %v4390_v3 }
0x14aa   :  { %4688 = vmatmul.bf16.gmra.mxu1 %v4471_v51 }
0x14af   :  { %v4395_v57 = vpop.f32.mrf.mxu2 }
0x14b2   :  { %6204 = vmatmul.msk.bf16.gmra.mxu3 %vm9034_vm14, %v9326_v7  ;;  %vm4319_vm14 = vcmp.eq.s32.totalorder %v9017_v18, %v9423_v58 }
0x14b3   :  { %vm9115_vm6 = vmpackc.low %vm4320_vm10, %vm4319_vm14 }
0x14b4   :  { %6200 = vmatmul.msk.bf16.gmra.mxu2 %vm9115_vm6, %v9326_v7 }
0x14b7   :  { %v4397_v59 = vpop.f32.mrf.mxu2 }
0x14b8   :  { %v4472_v41 = vpack.c.bf16 %v4397_v59, %v4395_v57 }
0x14ba   :  { %4693 = vmatmul.bf16.gmra.mxu1 %v4472_v41 }
0x14c1   :  { %v4674_v34 = vpop.f32.mrf.mxu1 }
0x14c2   :  { %6206 = vmatmul.msk.bf16.gmra.mxu3 %vm9045_vm8, %v9326_v7 }
0x14c9   :  { %v4676_v48 = vpop.f32.mrf.mxu1 }
0x14d2   :  { %6208 = vmatmul.msk.bf16.gmra.mxu3 %vm9059_vm13, %v9326_v7 }
0x14e2   :  { %6210 = vmatmul.msk.bf16.gmra.mxu3 %vm9073_vm15, %v9326_v7 }
0x14f2   :  { %6212 = vmatmul.msk.bf16.gmra.mxu3 %vm9087_vm7, %v9326_v7 }
0x1502   :  { %6214 = vmatmul.msk.bf16.gmra.mxu3 %vm9101_vm1, %v9326_v7 }
0x1507   :  { %v4679_v49 = vpop.f32.mrf.mxu1 }
0x150f   :  { %v4681_v20 = vpop.f32.mrf.mxu1 }
0x1512   :  { %6216 = vmatmul.msk.bf16.gmra.mxu3 %vm9115_vm6, %v9326_v7 }
0x1517   :  { %v4684_v54 = vpop.f32.mrf.mxu1 }
0x1525   :  { %v4427_v37 = vpop.f32.mrf.mxu3 }
0x1527   :  { %v4400_v32 = vpop.f32.mrf.mxu2 }
0x152d   :  { %v4429_v18 = vpop.f32.mrf.mxu3 }
0x152e   :  { %v4491_v52 = vpack.c.bf16 %v4429_v18, %v4427_v37 }
0x152f   :  { %v4402_v8 = vpop.f32.mrf.mxu2 }
0x1530   :  { %4571 = vmatmul.bf16.vlgmr.msra.gmra.mxu0 %v4491_v52  ;;  %v4473_v11 = vpack.c.bf16 %v4402_v8, %v4400_v32 }
0x1532   :  { %4698 = vmatmul.bf16.gmra.mxu1 %v4473_v11  ;;  %v6607_v11 = vld [vmem:[#allocation34 + $0x30] sm:$0xff] }
0x1535   :  { %v4432_v43 = vpop.f32.mrf.mxu3 }
0x1537   :  { %v4405_v60 = vpop.f32.mrf.mxu2 }
0x153d   :  { %v4434_v15 = vpop.f32.mrf.mxu3 }
0x153e   :  { %v4492_v22 = vpack.c.bf16 %v4434_v15, %v4432_v43  ;;  %v4686_v15 = vpop.f32.mrf.mxu1 }
0x153f   :  { %v4407_v31 = vpop.f32.mrf.mxu2 }
0x1540   :  { %4576 = vmatmul.bf16.gmra.mxu0 %v4492_v22  ;;  %v4474_v19 = vpack.c.bf16 %v4407_v31, %v4405_v60 }
0x1542   :  { %4703 = vmatmul.bf16.gmra.mxu1 %v4474_v19 }
0x1545   :  { %v4437_v7 = vpop.f32.mrf.mxu3 }
0x154d   :  { %v4439_v29 = vpop.f32.mrf.mxu3 }
0x154e   :  { %v4493_v21 = vpack.c.bf16 %v4439_v29, %v4437_v7  ;;  %v4689_v29 = vpop.f32.mrf.mxu1 }
0x1550   :  { %4581 = vmatmul.bf16.gmra.mxu0 %v4493_v21  ;;  %v6608_v21 = vld [vmem:[#allocation34 + $0x38] sm:$0xff] }
0x1551   :  { %4930 = vmatpush.bf16.msrb.mxu3 %v6608_v21 }
0x1555   :  { %v4442_v62 = vpop.f32.mrf.mxu3  ;;  %4931 = vmatpush.bf16.msrb.mxu3 %v6607_v11 }
0x155d   :  { %v4444_v53 = vpop.f32.mrf.mxu3 }
0x155e   :  { %v4494_v1 = vpack.c.bf16 %v4444_v53, %v4442_v62  ;;  %v4691_v53 = vpop.f32.mrf.mxu1 }
0x1560   :  { %4586 = vmatmul.bf16.gmra.mxu0 %v4494_v1 }
0x1565   :  { %v4447_v9 = vpop.f32.mrf.mxu3 }
0x1566   :  { %v4694_v17 = vpop.f32.mrf.mxu1 }
0x156d   :  { %v4449_v24 = vpop.f32.mrf.mxu3 }
0x156e   :  { %v4495_v38 = vpack.c.bf16 %v4449_v24, %v4447_v9 }
0x1570   :  { %4591 = vmatmul.bf16.gmra.mxu0 %v4495_v38 }
0x1575   :  { %v4452_v46 = vpop.f32.mrf.mxu3 }
0x157d   :  { %v4454_v45 = vpop.f32.mrf.mxu3 }
0x157e   :  { %v4496_v39 = vpack.c.bf16 %v4454_v45, %v4452_v46  ;;  %v4696_v46 = vpop.f32.mrf.mxu1  ;;  %v6606_v45 = vld [vmem:[#allocation34 + $0x28] sm:$0xff] }
0x157f   :  { %4932 = vmatpush.bf16.msrb.mxu3 %v6606_v45  ;;  %v6613_v45 = vld [vmem:[#allocation35 + $0x20] sm:$0xff] }
0x1580   :  { %4596 = vmatmul.bf16.gmra.mxu0 %v4496_v39 }
0x1583   :  { %4933 = vmatpush.bf16.msrb.mxu3 %v6605_v16  ;;  %v6611_v16 = vld [vmem:[#allocation35 + $0x10] sm:$0xff] }
0x1585   :  { %v4457_v55 = vpop.f32.mrf.mxu3 }
0x158d   :  { %v4459_v12 = vpop.f32.mrf.mxu3 }
0x158e   :  { %v4497_v58 = vpack.c.bf16 %v4459_v12, %v4457_v55 }
0x1590   :  { %4601 = vmatmul.bf16.gmra.mxu0 %v4497_v58 }
0x1595   :  { %v4462_v26 = vpop.f32.mrf.mxu3 }
0x159d   :  { %v4464_v27 = vpop.f32.mrf.mxu3 }
0x159e   :  { %v4498_v44 = vpack.c.bf16 %v4464_v27, %v4462_v26  ;;  %v6604_v26 = vld [vmem:[#allocation34 + $0x18] sm:$0xff] }
0x159f   :  { %4934 = vmatpush.bf16.msrb.mxu3 %v6604_v26 }
0x15a0   :  { %4606 = vmatmul.bf16.gmra.mxu0 %v4498_v44 }
0x15ad   :  { %v4572_v23 = vpop.f32.mrf.mxu0 }
0x15ae   :  { %v4670_v56 = vadd.f32 %v4669_v30, %v4572_v23 }
0x15af   :  { %v4699_v4 = vpop.f32.mrf.mxu1 }
0x15b0   :  { %v4713_v0 = vadd.f32 %v9132_v2, %v4670_v56 }
0x15b5   :  { %v4574_v10 = vpop.f32.mrf.mxu0 }
0x15b6   :  { %v4672_v42 = vadd.f32 %v4671_v5, %v4574_v10 }
0x15b7   :  { %v4701_v14 = vpop.f32.mrf.mxu1 }
0x15b8   :  { %v4714_v40 = vadd.f32 %v9132_v2, %v4672_v42  ;;  %v6603_v42 = vld [vmem:[#allocation34 + $0x10] sm:$0xff] }
0x15b9   :  { %4935 = vmatpush.bf16.msrb.mxu3 %v6603_v42 }
0x15ba   :  { %v4729_v36 = vpack.c.bf16 %v4714_v40, %v4713_v0 }
0x15bc   :  { %4813 = vmatmul.bf16.vlgmr.msra.gmra.mxu2 %v4729_v36 }
0x15bd   :  { %v4577_v63 = vpop.f32.mrf.mxu0 }
0x15be   :  { %v4675_v47 = vadd.f32 %v4674_v34, %v4577_v63 }
0x15bf   :  { %v4704_v56 = vpop.f32.mrf.mxu1 }
0x15c0   :  { %v4715_v35 = vadd.f32 %v9132_v2, %v4675_v47 }
0x15c5   :  { %v4579_v6 = vpop.f32.mrf.mxu0 }
0x15c6   :  { %v4677_v37 = vadd.f32 %v4676_v48, %v4579_v6  ;;  %v6601_v6 = vld [vmem:[#allocation34] sm:$0xff] }
0x15c7   :  { %v4706_v36 = vpop.f32.mrf.mxu1 }
0x15c8   :  { %v4716_v18 = vadd.f32 %v9132_v2, %v4677_v37 }
0x15ca   :  { %v4730_v52 = vpack.c.bf16 %v4716_v18, %v4715_v35  ;;  %v6754_v18 = vld [vmem:[%s9428_s10] ss:$0 sm:$0xff] }
0x15cc   :  { %4818 = vmatmul.bf16.gmra.mxu2 %v4730_v52 }
0x15cd   :  { %v4582_v25 = vpop.f32.mrf.mxu0 }
0x15ce   :  { %v4680_v43 = vadd.f32 %v4679_v49, %v4582_v25  ;;  %v6602_v49 = vld [vmem:[#allocation34 + $0x8] sm:$0xff] }
0x15cf   :  { %4936 = vmatpush.bf16.msrb.mxu3 %v6602_v49 }
0x15d0   :  { %v4717_v33 = vadd.f32 %v9132_v2, %v4680_v43 }
0x15d3   :  { %4937 = vmatpush.bf16.msrb.mxu3 %v6601_v6 }
0x15d5   :  { %v4584_v3 = vpop.f32.mrf.mxu0 }
0x15d6   :  { %v4682_v22 = vadd.f32 %v4681_v20, %v4584_v3 }
0x15d8   :  { %v4718_v51 = vadd.f32 %v9132_v2, %v4682_v22 }
0x15da   :  { %v4731_v7 = vpack.c.bf16 %v4718_v51, %v4717_v33 }
0x15dc   :  { %4823 = vmatmul.bf16.gmra.mxu2 %v4731_v7 }
0x15dd   :  { %v4587_v57 = vpop.f32.mrf.mxu0 }
0x15de   :  { %v4685_v59 = vadd.f32 %v4684_v54, %v4587_v57 }
0x15e0   :  { %v4719_v62 = vadd.f32 %v9132_v2, %v4685_v59 }
0x15e5   :  { %v4589_v41 = vpop.f32.mrf.mxu0 }
0x15e6   :  { %v4687_v50 = vadd.f32 %v4686_v15, %v4589_v41  ;;  %v6616_v41 = vld [vmem:[#allocation35 + $0x38] sm:$0xff] }
0x15e7   :  { %5055 = vmatpush.bf16.msrb.mxu0 %v6616_v41 }
0x15e8   :  { %v4720_v32 = vadd.f32 %v9132_v2, %v4687_v50 }
0x15ea   :  { %v4732_v1 = vpack.c.bf16 %v4720_v32, %v4719_v62 }
0x15ec   :  { %4828 = vmatmul.bf16.gmra.mxu2 %v4732_v1 }
0x15ed   :  { %v4592_v8 = vpop.f32.mrf.mxu0 }
0x15ee   :  { %v4690_v9 = vadd.f32 %v4689_v29, %v4592_v8  ;;  %v6615_v8 = vld [vmem:[#allocation35 + $0x30] sm:$0xff] }
0x15ef   :  { %5056 = vmatpush.bf16.msrb.mxu0 %v6615_v8 }
0x15f0   :  { %v4721_v38 = vadd.f32 %v9132_v2, %v4690_v9 }
0x15f5   :  { %v4594_v60 = vpop.f32.mrf.mxu0 }
0x15f6   :  { %v4692_v24 = vadd.f32 %v4691_v53, %v4594_v60 }
0x15f8   :  { %v4722_v31 = vadd.f32 %v9132_v2, %v4692_v24 }
0x15fa   :  { %v4733_v19 = vpack.c.bf16 %v4722_v31, %v4721_v38  ;;  %v6614_v38 = vld [vmem:[#allocation35 + $0x28] sm:$0xff] }
0x15fb   :  { %5057 = vmatpush.bf16.msrb.mxu0 %v6614_v38  ;;  %v6617_v38 = vld [vmem:[#allocation37] sm:$0xff] }
0x15fc   :  { %4833 = vmatmul.bf16.gmra.mxu2 %v4733_v19 }
0x15fd   :  { %v4597_v28 = vpop.f32.mrf.mxu0 }
0x15fe   :  { %v4695_v39 = vadd.f32 %v4694_v17, %v4597_v28 }
0x15ff   :  { %5058 = vmatpush.bf16.msrb.mxu0 %v6613_v45 }
0x1600   :  { %v4723_v12 = vadd.f32 %v9132_v2, %v4695_v39  ;;  %v6612_v39 = vld [vmem:[#allocation35 + $0x18] sm:$0xff] }
0x1603   :  { %5059 = vmatpush.bf16.msrb.mxu0 %v6612_v39  ;;  %v6756_v39 = vld [vmem:[%s9430_s0] ss:$0 sm:$0xff] }
0x1605   :  { %v4599_v61 = vpop.f32.mrf.mxu0 }
0x1606   :  { %v4697_v55 = vadd.f32 %v4696_v46, %v4599_v61 }
0x1607   :  { %5060 = vmatpush.bf16.msrb.mxu0 %v6611_v16 }
0x1608   :  { %v4724_v58 = vadd.f32 %v9132_v2, %v4697_v55 }
0x160a   :  { %v4734_v30 = vpack.c.bf16 %v4724_v58, %v4723_v12 }
0x160c   :  { %4838 = vmatmul.bf16.gmra.mxu2 %v4734_v30 }
0x160d   :  { %v4602_v13 = vpop.f32.mrf.mxu0 }
0x160e   :  { %v4700_v5 = vadd.f32 %v4699_v4, %v4602_v13  ;;  %v6610_v13 = vld [vmem:[#allocation35 + $0x8] sm:$0xff] }
0x160f   :  { %5061 = vmatpush.bf16.msrb.mxu0 %v6610_v13 }
0x1610   :  { %v4725_v34 = vadd.f32 %v9132_v2, %v4700_v5 }
0x1615   :  { %v4604_v27 = vpop.f32.mrf.mxu0 }
0x1616   :  { %v4702_v44 = vadd.f32 %v4701_v14, %v4604_v27  ;;  %v6609_v27 = vld [vmem:[#allocation35] sm:$0xff] }
0x1617   :  { %5062 = vmatpush.bf16.msrb.mxu0 %v6609_v27 }
0x1618   :  { %v4726_v23 = vadd.f32 %v9132_v2, %v4702_v44 }
0x161a   :  { %v4735_v48 = vpack.c.bf16 %v4726_v23, %v4725_v34  ;;  %v6755_v23 = vld [vmem:[%s9429_s21] ss:$0 sm:$0xff] }
0x161c   :  { %4843 = vmatmul.bf16.gmra.mxu2 %v4735_v48 }
0x161d   :  { %v4607_v10 = vpop.f32.mrf.mxu0 }
0x161e   :  { %v4705_v0 = vadd.f32 %v4704_v56, %v4607_v10 }
0x1620   :  { %v4727_v20 = vadd.f32 %v9132_v2, %v4705_v0 }
0x1625   :  { %v4609_v40 = vpop.f32.mrf.mxu0 }
0x1626   :  { %v4707_v63 = vadd.f32 %v4706_v36, %v4609_v40 }
0x1628   :  { %v4728_v47 = vadd.f32 %v9132_v2, %v4707_v63 }
0x162a   :  { %v4736_v37 = vpack.c.bf16 %v4728_v47, %v4727_v20 }
0x162c   :  { %4848 = vmatmul.bf16.gmra.mxu2 %v4736_v37 }
0x163f   :  { %v4814_v35 = vpop.f32.mrf.mxu2 }
0x1640   :  { %v4815_v54 = vadd.f32 %v6754_v18, %v4814_v35 }
0x1647   :  { %v4816_v52 = vpop.f32.mrf.mxu2 }
0x1648   :  { %v4817_v25 = vadd.f32 %v6754_v18, %v4816_v52 }
0x164a   :  { %v4854_v43 = vpack.c.bf16 %v4817_v25, %v4815_v54 }
0x164c   :  { %4938 = vmatmul.bf16.vlgmr.msrb.gmra.mxu3 %v4854_v43 }
0x164f   :  { %v4819_v3 = vpop.f32.mrf.mxu2 }
0x1650   :  { %v4820_v22 = vadd.f32 %v6754_v18, %v4819_v3 }
0x1657   :  { %v4821_v15 = vpop.f32.mrf.mxu2 }
0x1658   :  { %v4822_v33 = vadd.f32 %v6754_v18, %v4821_v15  ;;  %v6623_v15 = vld [vmem:[#allocation37 + $0x30] sm:$0xff] }
0x165a   :  { %v4855_v51 = vpack.c.bf16 %v4822_v33, %v4820_v22 }
0x165c   :  { %4943 = vmatmul.bf16.gmra.mxu3 %v4855_v51 }
0x165f   :  { %v4824_v7 = vpop.f32.mrf.mxu2 }
0x1660   :  { %v4825_v2 = vadd.f32 %v6754_v18, %v4824_v7 }
0x1667   :  { %v4826_v57 = vpop.f32.mrf.mxu2 }
0x1668   :  { %v4827_v29 = vadd.f32 %v6754_v18, %v4826_v57 }
0x166a   :  { %v4856_v21 = vpack.c.bf16 %v4827_v29, %v4825_v2  ;;  %v6622_v2 = vld [vmem:[#allocation37 + $0x28] sm:$0xff] }
0x166c   :  { %4948 = vmatmul.bf16.gmra.mxu3 %v4856_v21 }
0x166f   :  { %v4829_v59 = vpop.f32.mrf.mxu2 }
0x1670   :  { %v4830_v62 = vadd.f32 %v6754_v18, %v4829_v59 }
0x1677   :  { %v4831_v50 = vpop.f32.mrf.mxu2 }
0x1678   :  { %v4832_v32 = vadd.f32 %v6754_v18, %v4831_v50 }
0x167a   :  { %v4857_v53 = vpack.c.bf16 %v4832_v32, %v4830_v62  ;;  %v6621_v62 = vld [vmem:[#allocation37 + $0x20] sm:$0xff]  ;;  %v6620_v32 = vld [vmem:[#allocation37 + $0x18] sm:$0xff] }
0x167c   :  { %4953 = vmatmul.bf16.gmra.mxu3 %v4857_v53 }
0x167f   :  { %v4834_v1 = vpop.f32.mrf.mxu2 }
0x1680   :  { %v4835_v17 = vadd.f32 %v6754_v18, %v4834_v1 }
0x1687   :  { %v4836_v11 = vpop.f32.mrf.mxu2 }
0x1688   :  { %v4837_v9 = vadd.f32 %v6754_v18, %v4836_v11 }
0x168a   :  { %v4858_v60 = vpack.c.bf16 %v4837_v9, %v4835_v17  ;;  %v6619_v9 = vld [vmem:[#allocation37 + $0x10] sm:$0xff] }
0x168c   :  { %4958 = vmatmul.bf16.gmra.mxu3 %v4858_v60  ;;  %v6618_v60 = vld [vmem:[#allocation37 + $0x8] sm:$0xff] }
0x168f   :  { %v4839_v24 = vpop.f32.mrf.mxu2 }
0x1690   :  { %v4840_v19 = vadd.f32 %v6754_v18, %v4839_v24 }
0x1697   :  { %v4841_v31 = vpop.f32.mrf.mxu2 }
0x1698   :  { %v4842_v28 = vadd.f32 %v6754_v18, %v4841_v31 }
0x169a   :  { %v4859_v46 = vpack.c.bf16 %v4842_v28, %v4840_v19 }
0x169c   :  { %4963 = vmatmul.bf16.gmra.mxu3 %v4859_v46 }
0x169f   :  { %v4844_v61 = vpop.f32.mrf.mxu2 }
0x16a0   :  { %v4845_v4 = vadd.f32 %v6754_v18, %v4844_v61 }
0x16a7   :  { %v4846_v55 = vpop.f32.mrf.mxu2 }
0x16a8   :  { %v4847_v12 = vadd.f32 %v6754_v18, %v4846_v55 }
0x16aa   :  { %v4860_v58 = vpack.c.bf16 %v4847_v12, %v4845_v4 }
0x16ac   :  { %4968 = vmatmul.bf16.gmra.mxu3 %v4860_v58 }
0x16af   :  { %v4849_v30 = vpop.f32.mrf.mxu2 }
0x16b0   :  { %v4850_v14 = vadd.f32 %v6754_v18, %v4849_v30 }
0x16b7   :  { %v4851_v26 = vpop.f32.mrf.mxu2 }
0x16b8   :  { %v4852_v5 = vadd.f32 %v6754_v18, %v4851_v26  ;;  %v6624_v18 = vld [vmem:[#allocation37 + $0x38] sm:$0xff] }
0x16b9   :  { %5180 = vmatpush.bf16.msrb.mxu1 %v6624_v18 }
0x16ba   :  { %v4861_v44 = vpack.c.bf16 %v4852_v5, %v4850_v14 }
0x16bc   :  { %4973 = vmatmul.bf16.gmra.mxu3 %v4861_v44 }
0x16bd   :  { %5181 = vmatpush.bf16.msrb.mxu1 %v6623_v15 }
0x16c1   :  { %5182 = vmatpush.bf16.msrb.mxu1 %v6622_v2 }
0x16c5   :  { %5183 = vmatpush.bf16.msrb.mxu1 %v6621_v62 }
0x16c9   :  { %5184 = vmatpush.bf16.msrb.mxu1 %v6620_v32  ;;  %v6757_v32 = vld [vmem:[%s7796_s14] ss:$0 sm:$0xff] }
0x16cd   :  { %5185 = vmatpush.bf16.msrb.mxu1 %v6619_v9 }
0x16cf   :  { %v4939_v34 = vpop.f32.mrf.mxu3 }
0x16d0   :  { %v4940_v56 = vadd.f32 %v6755_v23, %v4939_v34 }
0x16d1   :  { %5186 = vmatpush.bf16.msrb.mxu1 %v6618_v60 }
0x16d5   :  { %5187 = vmatpush.bf16.msrb.mxu1 %v6617_v38 }
0x16d7   :  { %v4941_v48 = vpop.f32.mrf.mxu3 }
0x16d8   :  { %v4942_v10 = vadd.f32 %v6755_v23, %v4941_v48 }
0x16da   :  { %v4979_v42 = vpack.c.bf16 %v4942_v10, %v4940_v56 }
0x16dc   :  { %5063 = vmatmul.bf16.vlgmr.msrb.gmra.mxu0 %v4979_v42 }
0x16df   :  { %v4944_v49 = vpop.f32.mrf.mxu3 }
0x16e0   :  { %v4945_v40 = vadd.f32 %v6755_v23, %v4944_v49 }
0x16e7   :  { %v4946_v0 = vpop.f32.mrf.mxu3 }
0x16e8   :  { %v4947_v36 = vadd.f32 %v6755_v23, %v4946_v0  ;;  %v6631_v0 = vld [vmem:[#allocation38 + $0x30] sm:$0xff] }
0x16ea   :  { %v4980_v63 = vpack.c.bf16 %v4947_v36, %v4945_v40 }
0x16ec   :  { %5068 = vmatmul.bf16.gmra.mxu0 %v4980_v63 }
0x16ef   :  { %v4949_v20 = vpop.f32.mrf.mxu3 }
0x16f0   :  { %v4950_v6 = vadd.f32 %v6755_v23, %v4949_v20 }
0x16f7   :  { %v4951_v47 = vpop.f32.mrf.mxu3 }
0x16f8   :  { %v4952_v37 = vadd.f32 %v6755_v23, %v4951_v47 }
0x16fa   :  { %v4981_v35 = vpack.c.bf16 %v4952_v37, %v4950_v6  ;;  %v6630_v6 = vld [vmem:[#allocation38 + $0x28] sm:$0xff] }
0x16fc   :  { %5073 = vmatmul.bf16.gmra.mxu0 %v4981_v35 }
0x16ff   :  { %v4954_v52 = vpop.f32.mrf.mxu3 }
0x1700   :  { %v4955_v25 = vadd.f32 %v6755_v23, %v4954_v52 }
0x1707   :  { %v4956_v54 = vpop.f32.mrf.mxu3 }
0x1708   :  { %v4957_v43 = vadd.f32 %v6755_v23, %v4956_v54 }
0x170a   :  { %v4982_v3 = vpack.c.bf16 %v4957_v43, %v4955_v25  ;;  %v6629_v25 = vld [vmem:[#allocation38 + $0x20] sm:$0xff]  ;;  %v6628_v43 = vld [vmem:[#allocation38 + $0x18] sm:$0xff] }
0x170c   :  { %5078 = vmatmul.bf16.gmra.mxu0 %v4982_v3 }
0x170f   :  { %v4959_v22 = vpop.f32.mrf.mxu3 }
0x1710   :  { %v4960_v51 = vadd.f32 %v6755_v23, %v4959_v22 }
0x1717   :  { %v4961_v33 = vpop.f32.mrf.mxu3 }
0x1718   :  { %v4962_v7 = vadd.f32 %v6755_v23, %v4961_v33 }
0x171a   :  { %v4983_v57 = vpack.c.bf16 %v4962_v7, %v4960_v51  ;;  %v6627_v7 = vld [vmem:[#allocation38 + $0x10] sm:$0xff] }
0x171c   :  { %5083 = vmatmul.bf16.gmra.mxu0 %v4983_v57  ;;  %v6626_v57 = vld [vmem:[#allocation38 + $0x8] sm:$0xff] }
0x171f   :  { %v4964_v29 = vpop.f32.mrf.mxu3 }
0x1720   :  { %v4965_v59 = vadd.f32 %v6755_v23, %v4964_v29  ;;  %v6625_v29 = vld [vmem:[#allocation38] sm:$0xff] }
0x1727   :  { %v4966_v21 = vpop.f32.mrf.mxu3 }
0x1728   :  { %v4967_v41 = vadd.f32 %v6755_v23, %v4966_v21 }
0x172a   :  { %v4984_v50 = vpack.c.bf16 %v4967_v41, %v4965_v59 }
0x172c   :  { %5088 = vmatmul.bf16.gmra.mxu0 %v4984_v50 }
0x172f   :  { %v4969_v53 = vpop.f32.mrf.mxu3 }
0x1730   :  { %v4970_v8 = vadd.f32 %v6755_v23, %v4969_v53 }
0x1737   :  { %v4971_v1 = vpop.f32.mrf.mxu3 }
0x1738   :  { %v4972_v11 = vadd.f32 %v6755_v23, %v4971_v1 }
0x173a   :  { %v4985_v17 = vpack.c.bf16 %v4972_v11, %v4970_v8 }
0x173c   :  { %5093 = vmatmul.bf16.gmra.mxu0 %v4985_v17 }
0x173f   :  { %v4974_v24 = vpop.f32.mrf.mxu3 }
0x1740   :  { %v4975_v19 = vadd.f32 %v6755_v23, %v4974_v24 }
0x1747   :  { %v4976_v31 = vpop.f32.mrf.mxu3 }
0x1748   :  { %v4977_v28 = vadd.f32 %v6755_v23, %v4976_v31  ;;  %v6632_v23 = vld [vmem:[#allocation38 + $0x38] sm:$0xff] }
0x1749   :  { %5305 = vmatpush.bf16.msrb.mxu2 %v6632_v23 }
0x174a   :  { %v4986_v46 = vpack.c.bf16 %v4977_v28, %v4975_v19 }
0x174c   :  { %5098 = vmatmul.bf16.gmra.mxu0 %v4986_v46 }
0x174d   :  { %5306 = vmatpush.bf16.msrb.mxu2 %v6631_v0 }
0x1751   :  { %5307 = vmatpush.bf16.msrb.mxu2 %v6630_v6 }
0x1755   :  { %5308 = vmatpush.bf16.msrb.mxu2 %v6629_v25 }
0x1759   :  { %v5064_v45 = vpop.f32.mrf.mxu0  ;;  %5309 = vmatpush.bf16.msrb.mxu2 %v6628_v43 }
0x175a   :  { %v5065_v55 = vadd.f32 %v6756_v39, %v5064_v45 }
0x175d   :  { %5310 = vmatpush.bf16.msrb.mxu2 %v6627_v7 }
0x1761   :  { %v5066_v61 = vpop.f32.mrf.mxu0  ;;  %5311 = vmatpush.bf16.msrb.mxu2 %v6626_v57 }
0x1762   :  { %v5067_v4 = vadd.f32 %v6756_v39, %v5066_v61 }
0x1764   :  { %v5104_v12 = vpack.c.bf16 %v5067_v4, %v5065_v55 }
0x1765   :  { %5312 = vmatpush.bf16.msrb.mxu2 %v6625_v29 }
0x1766   :  { %5188 = vmatmul.bf16.vlgmr.msrb.gmra.mxu1 %v5104_v12 }
0x1769   :  { %v5069_v58 = vpop.f32.mrf.mxu0 }
0x176a   :  { %v5070_v16 = vadd.f32 %v6756_v39, %v5069_v58 }
0x1771   :  { %v5071_v30 = vpop.f32.mrf.mxu0 }
0x1772   :  { %v5072_v13 = vadd.f32 %v6756_v39, %v5071_v30 }
0x1774   :  { %v5105_v26 = vpack.c.bf16 %v5072_v13, %v5070_v16 }
0x1776   :  { %5193 = vmatmul.bf16.gmra.mxu1 %v5105_v26 }
0x1779   :  { %v5074_v14 = vpop.f32.mrf.mxu0 }
0x177a   :  { %v5075_v27 = vadd.f32 %v6756_v39, %v5074_v14 }
0x1781   :  { %v5076_v5 = vpop.f32.mrf.mxu0 }
0x1782   :  { %v5077_v44 = vadd.f32 %v6756_v39, %v5076_v5 }
0x1784   :  { %v5106_v34 = vpack.c.bf16 %v5077_v44, %v5075_v27 }
0x1786   :  { %5198 = vmatmul.bf16.gmra.mxu1 %v5106_v34 }
0x1789   :  { %v5079_v48 = vpop.f32.mrf.mxu0 }
0x178a   :  { %v5080_v10 = vadd.f32 %v6756_v39, %v5079_v48 }
0x1791   :  { %v5081_v56 = vpop.f32.mrf.mxu0 }
0x1792   :  { %v5082_v42 = vadd.f32 %v6756_v39, %v5081_v56 }
0x1794   :  { %v5107_v49 = vpack.c.bf16 %v5082_v42, %v5080_v10 }
0x1796   :  { %5203 = vmatmul.bf16.gmra.mxu1 %v5107_v49 }
0x1799   :  { %v5084_v40 = vpop.f32.mrf.mxu0 }
0x179a   :  { %v5085_v63 = vadd.f32 %v6756_v39, %v5084_v40 }
0x17a1   :  { %v5086_v36 = vpop.f32.mrf.mxu0 }
0x17a2   :  { %v5087_v20 = vadd.f32 %v6756_v39, %v5086_v36 }
0x17a4   :  { %v5108_v47 = vpack.c.bf16 %v5087_v20, %v5085_v63  ;;  %v6758_v20 = vld [vmem:[%s7806_s25] ss:$0 sm:$0xff]  ;;  %s7560_s25 = smov [#allocation40]  }
0x17a5   :  { %s5374_s14 = sshll.u32 %s7560_s25, 4  ;;  %s5375_s14 = int_to_ptr.vmem [resolvable:$true] %s5374_s14 }
0x17a6   :  { %5208 = vmatmul.bf16.gmra.mxu1 %v5108_v47 }
0x17a9   :  { %v5089_v37 = vpop.f32.mrf.mxu0 }
0x17aa   :  { %v5090_v18 = vadd.f32 %v6756_v39, %v5089_v37 }
0x17b1   :  { %v5091_v35 = vpop.f32.mrf.mxu0 }
0x17b2   :  { %v5092_v52 = vadd.f32 %v6756_v39, %v5091_v35 }
0x17b4   :  { %v5109_v54 = vpack.c.bf16 %v5092_v52, %v5090_v18 }
0x17b6   :  { %5213 = vmatmul.bf16.gmra.mxu1 %v5109_v54 }
0x17b9   :  { %v5094_v3 = vpop.f32.mrf.mxu0 }
0x17ba   :  { %v5095_v22 = vadd.f32 %v6756_v39, %v5094_v3 }
0x17c1   :  { %v5096_v15 = vpop.f32.mrf.mxu0 }
0x17c2   :  { %v5097_v33 = vadd.f32 %v6756_v39, %v5096_v15 }
0x17c4   :  { %v5110_v51 = vpack.c.bf16 %v5097_v33, %v5095_v22 }
0x17c6   :  { %5218 = vmatmul.bf16.gmra.mxu1 %v5110_v51 }
0x17c9   :  { %v5099_v2 = vpop.f32.mrf.mxu0 }
0x17ca   :  { %v5100_v59 = vadd.f32 %v6756_v39, %v5099_v2 }
0x17d1   :  { %v5101_v21 = vpop.f32.mrf.mxu0 }
0x17d2   :  { %v5102_v41 = vadd.f32 %v6756_v39, %v5101_v21 }
0x17d4   :  { %v5111_v50 = vpack.c.bf16 %v5102_v41, %v5100_v59 }
0x17d6   :  { %5223 = vmatmul.bf16.gmra.mxu1 %v5111_v50 }
0x17e3   :  { %v5189_v62 = vpop.f32.mrf.mxu1 }
0x17e4   :  { %v5190_v1 = vadd.f32 %v6757_v32, %v5189_v62 }
0x17eb   :  { %v5191_v53 = vpop.f32.mrf.mxu1 }
0x17ec   :  { %v5192_v8 = vadd.f32 %v6757_v32, %v5191_v53 }
0x17ee   :  { %v5229_v11 = vpack.c.bf16 %v5192_v8, %v5190_v1 }
0x17f0   :  { %5313 = vmatmul.bf16.vlgmr.msrb.gmra.mxu2 %v5229_v11 }
0x17f3   :  { %v5194_v17 = vpop.f32.mrf.mxu1 }
0x17f4   :  { %v5195_v60 = vadd.f32 %v6757_v32, %v5194_v17 }
0x17fb   :  { %v5196_v9 = vpop.f32.mrf.mxu1 }
0x17fc   :  { %v5197_v24 = vadd.f32 %v6757_v32, %v5196_v9 }
0x17fe   :  { %v5230_v38 = vpack.c.bf16 %v5197_v24, %v5195_v60 }
0x1800   :  { %5318 = vmatmul.bf16.gmra.mxu2 %v5230_v38 }
0x1803   :  { %v5199_v31 = vpop.f32.mrf.mxu1 }
0x1804   :  { %v5200_v28 = vadd.f32 %v6757_v32, %v5199_v31 }
0x180b   :  { %v5201_v19 = vpop.f32.mrf.mxu1 }
0x180c   :  { %v5202_v46 = vadd.f32 %v6757_v32, %v5201_v19 }
0x180e   :  { %v5231_v45 = vpack.c.bf16 %v5202_v46, %v5200_v28 }
0x1810   :  { %5323 = vmatmul.bf16.gmra.mxu2 %v5231_v45 }
0x1813   :  { %v5204_v39 = vpop.f32.mrf.mxu1 }
0x1814   :  { %v5205_v55 = vadd.f32 %v6757_v32, %v5204_v39 }
0x181b   :  { %v5206_v61 = vpop.f32.mrf.mxu1 }
0x181c   :  { %v5207_v4 = vadd.f32 %v6757_v32, %v5206_v61 }
0x181e   :  { %v5232_v12 = vpack.c.bf16 %v5207_v4, %v5205_v55 }
0x1820   :  { %5328 = vmatmul.bf16.gmra.mxu2 %v5232_v12 }
0x1823   :  { %v5209_v58 = vpop.f32.mrf.mxu1 }
0x1824   :  { %v5210_v16 = vadd.f32 %v6757_v32, %v5209_v58 }
0x182b   :  { %v5211_v30 = vpop.f32.mrf.mxu1 }
0x182c   :  { %v5212_v13 = vadd.f32 %v6757_v32, %v5211_v30 }
0x182e   :  { %v5233_v26 = vpack.c.bf16 %v5212_v13, %v5210_v16 }
0x1830   :  { %5333 = vmatmul.bf16.gmra.mxu2 %v5233_v26 }
0x1833   :  { %v5214_v14 = vpop.f32.mrf.mxu1 }
0x1834   :  { %v5215_v27 = vadd.f32 %v6757_v32, %v5214_v14 }
0x183b   :  { %v5216_v5 = vpop.f32.mrf.mxu1 }
0x183c   :  { %v5217_v44 = vadd.f32 %v6757_v32, %v5216_v5 }
0x183e   :  { %v5234_v34 = vpack.c.bf16 %v5217_v44, %v5215_v27 }
0x1840   :  { %5338 = vmatmul.bf16.gmra.mxu2 %v5234_v34 }
0x1843   :  { %v5219_v23 = vpop.f32.mrf.mxu1 }
0x1844   :  { %v5220_v56 = vadd.f32 %v6757_v32, %v5219_v23 }
0x184b   :  { %v5221_v48 = vpop.f32.mrf.mxu1 }
0x184c   :  { %v5222_v10 = vadd.f32 %v6757_v32, %v5221_v48 }
0x184e   :  { %v5235_v42 = vpack.c.bf16 %v5222_v10, %v5220_v56 }
0x1850   :  { %5343 = vmatmul.bf16.gmra.mxu2 %v5235_v42 }
0x1853   :  { %v5224_v49 = vpop.f32.mrf.mxu1 }
0x1854   :  { %v5225_v40 = vadd.f32 %v6757_v32, %v5224_v49 }
0x185b   :  { %v5226_v0 = vpop.f32.mrf.mxu1 }
0x185c   :  { %v5227_v36 = vadd.f32 %v6757_v32, %v5226_v0 }
0x185e   :  { %v5236_v63 = vpack.c.bf16 %v5227_v36, %v5225_v40 }
0x1860   :  { %5348 = vmatmul.bf16.gmra.mxu2 %v5236_v63 }
0x1873   :  { %v5314_v47 = vpop.f32.mrf.mxu2 }
0x1874   :  { %v5315_v6 = vadd.f32 %v6758_v20, %v5314_v47 }
0x1876   :  { %5354 = vst [vmem:[#allocation40] sm:$0xff] %v5315_v6 }
0x187b   :  { %v5316_v37 = vpop.f32.mrf.mxu2 }
0x187c   :  { %v5317_v35 = vadd.f32 %v6758_v20, %v5316_v37 }
0x187e   :  { %5355 = vst [vmem:[#allocation40 + $0x8] sm:$0xff] %v5317_v35 }
0x1883   :  { %v5319_v18 = vpop.f32.mrf.mxu2 }
0x1884   :  { %v5320_v52 = vadd.f32 %v6758_v20, %v5319_v18 }
0x1886   :  { %5356 = vst [vmem:[#allocation40 + $0x10] sm:$0xff] %v5320_v52 }
0x188b   :  { %v5321_v54 = vpop.f32.mrf.mxu2 }
0x188c   :  { %v5322_v25 = vadd.f32 %v6758_v20, %v5321_v54 }
0x188e   :  { %5357 = vst [vmem:[#allocation40 + $0x18] sm:$0xff] %v5322_v25 }
0x1893   :  { %v5324_v43 = vpop.f32.mrf.mxu2 }
0x1894   :  { %v5325_v3 = vadd.f32 %v6758_v20, %v5324_v43 }
0x1896   :  { %5358 = vst [vmem:[#allocation40 + $0x20] sm:$0xff] %v5325_v3 }
0x189b   :  { %v5326_v15 = vpop.f32.mrf.mxu2 }
0x189c   :  { %v5327_v22 = vadd.f32 %v6758_v20, %v5326_v15 }
0x189e   :  { %5359 = vst [vmem:[#allocation40 + $0x28] sm:$0xff] %v5327_v22 }
0x18a3   :  { %v5329_v33 = vpop.f32.mrf.mxu2 }
0x18a4   :  { %v5330_v51 = vadd.f32 %v6758_v20, %v5329_v33 }
0x18a6   :  { %5360 = vst [vmem:[#allocation40 + $0x30] sm:$0xff] %v5330_v51 }
0x18ab   :  { %v5331_v7 = vpop.f32.mrf.mxu2 }
0x18ac   :  { %v5332_v57 = vadd.f32 %v6758_v20, %v5331_v7 }
0x18ae   :  { %5361 = vst [vmem:[#allocation40 + $0x38] sm:$0xff] %v5332_v57 }
0x18b3   :  { %v5334_v2 = vpop.f32.mrf.mxu2 }
0x18b4   :  { %v5335_v29 = vadd.f32 %v6758_v20, %v5334_v2 }
0x18b6   :  { %5362 = vst [vmem:[#allocation40 + $0x40] sm:$0xff] %v5335_v29 }
0x18bb   :  { %v5336_v21 = vpop.f32.mrf.mxu2 }
0x18bc   :  { %v5337_v59 = vadd.f32 %v6758_v20, %v5336_v21 }
0x18be   :  { %5363 = vst [vmem:[#allocation40 + $0x48] sm:$0xff] %v5337_v59 }
0x18c3   :  { %v5339_v41 = vpop.f32.mrf.mxu2 }
0x18c4   :  { %v5340_v50 = vadd.f32 %v6758_v20, %v5339_v41 }
0x18c6   :  { %5364 = vst [vmem:[#allocation40 + $0x50] sm:$0xff] %v5340_v50 }
0x18cb   :  { %v5341_v62 = vpop.f32.mrf.mxu2 }
0x18cc   :  { %v5342_v32 = vadd.f32 %v6758_v20, %v5341_v62 }
0x18ce   :  { %5365 = vst [vmem:[#allocation40 + $0x58] sm:$0xff] %v5342_v32 }
0x18d3   :  { %v5344_v53 = vpop.f32.mrf.mxu2 }
0x18d4   :  { %v5345_v1 = vadd.f32 %v6758_v20, %v5344_v53 }
0x18d6   :  { %5366 = vst [vmem:[#allocation40 + $0x60] sm:$0xff] %v5345_v1 }
0x18db   :  { %v5346_v8 = vpop.f32.mrf.mxu2 }
0x18dc   :  { %v5347_v11 = vadd.f32 %v6758_v20, %v5346_v8 }
0x18de   :  { %5367 = vst [vmem:[#allocation40 + $0x68] sm:$0xff] %v5347_v11 }
0x18e3   :  { %v5349_v17 = vpop.f32.mrf.mxu2 }
0x18e4   :  { %v5350_v9 = vadd.f32 %v6758_v20, %v5349_v17 }
0x18e6   :  { %5368 = vst [vmem:[#allocation40 + $0x70] sm:$0xff] %v5350_v9 }
0x18eb   :  { %v5351_v60 = vpop.f32.mrf.mxu2 }
0x18ec   :  { %v5352_v24 = vadd.f32 %v6758_v20, %v5351_v60 }
0x18ee   :  { %5369 = vst [vmem:[#allocation40 + $0x78] sm:$0xff] %v5352_v24 }
0x18ef   :  { %7455 = shalt.err (!%p7452_p12)
}
0x18f0   :  { %s7561_s29 = smov 128   ;;  %s7562_s2 = smov 8  }
0x18f1   :  { %5382 = dma.vmem_to_hbm [thread:$0]  %s5375_s14, 2048, %s5377_s19, [#allocation4], %s7561_s29, %s7561_s29, %s7562_s2  }
0x18f2   :  { %7482 = dma.done.wait [#allocation4], 2048  }
0x18f3   :  { %7483 = vsyncadd [#allocation4], 4294965248 }
0x18f4   :  { %5387 = vsyncpa [#allocation3], 1 }
0x18f5   :  { %5388 = vsyncpa [#allocation6], 1 }
0x18f6   :  { %5389 = vsyncpa [#allocation9], 1 }
0x18f7   :  { %5390 = vsyncpa [#allocation12], 1 }
0x18f8   :  { %5391 = vsyncpa [#allocation15], 1 }
0x18f9   :  { %5392 = vsyncpa [#allocation18], 1 }
0x18fa   :  { %5393 = vsyncpa [#allocation21], 1 }
0x18fb   :  { %5394 = vsyncpa [#allocation24], 1 }
0x18fc   :  { %5395 = vsyncpa [#allocation27], 1 }
0x18fd   :  { %5396 = vsyncpa [#allocation30], 1 }
0x18fe   :  { %5397 = vsyncpa [#allocation33], 1 }
0x18ff   :  { %5398 = vsyncpa [#allocation36], 1 }
0x1900   :  { %5399 = vsyncpa [#allocation39], 1 }
0x1901   :  { %5400 = vsyncpa [#allocation4], 1 }

</bundles_post_ra>
